<compile_context>
chip_gen: v6e
topology: v6e:2x2x1
jax: 0.10.0
libtpu: 0.0.40
codegen_flags: <defaults>
</compile_context>

<pallas_src>
import math
from functools import partial

import jax
import jax.numpy as jnp
from jax.experimental import pallas as pl
from jax.experimental.pallas import tpu as pltpu

TOKEN_LEN = 288                         # d_model
NUM_HEADS = 8
HEAD_DIM = TOKEN_LEN // NUM_HEADS       # 36
FFN_DIM = TOKEN_LEN * 2                 # 576
NUM_LAYERS = 6
LN_EPS = 1e-5
ATTN_SCALE = 1.0 / math.sqrt(HEAD_DIM)
NEG_INF = -1e30                         # additive mask value (exp underflows to 0)

# Per-layer (1, 288) vectors packed row-wise into one (L, n_rows, 288) slab.
ENC_VEC_FIELDS = ("q_b", "k_b", "v_b", "wo_b", "ff2_b",
                  "n1_g", "n1_b", "n2_g", "n2_b")
DEC_VEC_FIELDS = ("sa_b", "ca_q_b", "ca_k_b", "ca_v_b", "ca_wo_b", "ff2_b",
                  "n1_g", "n1_b", "n2_g", "n2_b", "n3_g", "n3_b")


# ------------------------------ kernel helpers -------------------------------

def _split_rows(vec, fields):
    """vec: (len(fields), 288) -> dict of (1, 288) rows (static sublane slices)."""
    return {name: vec[k:k + 1, :] for k, name in enumerate(fields)}


def _layernorm(y, g, b):
    # one-pass LN: mean + mean-of-squares (halves XLU reduction traffic)
    mu = jnp.mean(y, axis=-1, keepdims=True)
    ms = jnp.mean(y * y, axis=-1, keepdims=True)
    inv = jax.lax.rsqrt(ms - mu * mu + LN_EPS)
    return (y - mu) * inv * g + b


def _softmax_rows(s):
    mx = jnp.max(s, axis=-1, keepdims=True)
    ex = jnp.exp(s - mx)
    return ex * pl.reciprocal(jnp.sum(ex, axis=-1, keepdims=True), approx=True)


def _mm(x, w_bf16, b_f32=None):
    # bf16 x bf16 MXU matmul, f32 accumulation, f32 bias add.
    y = jnp.dot(x.astype(jnp.bfloat16), w_bf16, preferred_element_type=jnp.float32)
    return y if b_f32 is None else y + b_f32


# ------------------------------ fused kernel ---------------------------------

def _custom_net_kernel(*refs, enc_tree, n_enc, dec_tree, n_dec, fin_tree, n_fin,
                       seq, batch):
    E, H = TOKEN_LEN, NUM_HEADS
    T = seq * batch
    bf16 = jnp.bfloat16

    x_ref = refs[0]
    pos = 1
    enc = jax.tree_util.tree_unflatten(enc_tree, refs[pos:pos + n_enc]); pos += n_enc
    dec = jax.tree_util.tree_unflatten(dec_tree, refs[pos:pos + n_dec]); pos += n_dec
    fin = jax.tree_util.tree_unflatten(fin_tree, refs[pos:pos + n_fin]); pos += n_fin
    out_ref = refs[pos]
    mem_ref, tgt_ref = refs[pos + 1], refs[pos + 2]

    i = pl.program_id(0)
    head_masks = fin["head_masks"][...]        # (H, E) f32, 0/1 per-head lane mask

    def mha_core(q, k, v, attn_mask, m_rows):
        """Multi-head attention on lane-dense (., 288) operands.

        q: (m_rows, E) queries (scale pre-folded); k, v: (T_k, E).
        Per-head scores via masked-Q stacking: one (H*m_rows, E)@(E, T_k) matmul,
        additive batch mask, one softmax over the whole slab, then per-head
        P_h @ (V * mask_h) accumulated lane-dense in f32.
        """
        kb = k.astype(bf16)
        qs = jnp.concatenate([q * head_masks[h:h + 1, :] for h in range(H)],
                             axis=0).astype(bf16)                       # (H*m, E)
        s = jax.lax.dot_general(qs, kb, (((1,), (1,)), ((), ())),
                                preferred_element_type=jnp.float32)     # (H*m, T_k)
        p = _softmax_rows(s + attn_mask)
        ctx = jnp.zeros((m_rows, E), jnp.float32)
        for h in range(H):
            ph = p[h * m_rows:(h + 1) * m_rows, :].astype(bf16)
            vh = (v * head_masks[h:h + 1, :]).astype(bf16)
            ctx = ctx + jnp.dot(ph, vh, preferred_element_type=jnp.float32)
        return ctx                                                       # (m, E) f32

    # ---------------- encoder layers: grid steps 0 .. NUM_LAYERS-1 -------------
    @pl.when(i == 0)
    def _init():
        mem_ref[...] = x_ref[...]

    @pl.when(i < NUM_LAYERS)
    def _encoder_step():
        vec = _split_rows(enc["vecs"][0], ENC_VEC_FIELDS)
        x = mem_ref[...]                                                # (T, E) f32
        xb = x.astype(bf16)
        q = jnp.dot(xb, enc["q_w"][0], preferred_element_type=jnp.float32) + vec["q_b"]
        k = jnp.dot(xb, enc["k_w"][0], preferred_element_type=jnp.float32) + vec["k_b"]
        v = jnp.dot(xb, enc["v_w"][0], preferred_element_type=jnp.float32) + vec["v_b"]
        ctx = mha_core(q, k, v, fin["enc_mask"][...], T)
        attn = _mm(ctx, enc["wo_w"][0], vec["wo_b"])
        h1 = _layernorm(x + attn, vec["n1_g"], vec["n1_b"])
        ff = jnp.maximum(_mm(h1, enc["ff1_w"][0], enc["ff1_b"][0]), 0.0)
        ff = _mm(ff, enc["ff2_w"][0], vec["ff2_b"])
        mem_ref[...] = _layernorm(h1 + ff, vec["n2_g"], vec["n2_b"])

    # -------- encoder final norm + decoder init: first decoder step ------------
    @pl.when(i == NUM_LAYERS)
    def _mid():
        mem_ref[...] = _layernorm(mem_ref[...], fin["enc_norm_g"][...],
                                  fin["enc_norm_b"][...])
        tgt_ref[...] = jnp.ones((batch, E), jnp.float32)   # decoder_input = ones

    # ---------------- decoder layers: grid steps NUM_LAYERS .. 2*NUM_LAYERS-1 --
    @pl.when(i >= NUM_LAYERS)
    def _decoder_step():
        vec = _split_rows(dec["vecs"][0], DEC_VEC_FIELDS)
        tgt = tgt_ref[...]                                             # (batch, E)
        mem = mem_ref[...]                                             # (T, E)

        # Self-attention with tgt_len == 1: softmax over one key is exactly 1,
        # so the whole block collapses to the pre-folded (Wv @ Wo) matmul (exact).
        sa = _mm(tgt, dec["sa_w"][0], vec["sa_b"])
        h1 = _layernorm(tgt + sa, vec["n1_g"], vec["n1_b"])

        # Cross-attention: 1 query per batch element, keys/values from memory.
        qc = _mm(h1, dec["ca_q_w"][0], vec["ca_q_b"])                  # (batch, E)
        memb = mem.astype(bf16)
        kc = jnp.dot(memb, dec["ca_k_w"][0],
                     preferred_element_type=jnp.float32) + vec["ca_k_b"]
        vc = jnp.dot(memb, dec["ca_v_w"][0],
                     preferred_element_type=jnp.float32) + vec["ca_v_b"]
        ctx = mha_core(qc, kc, vc, fin["dec_mask"][...], batch)
        ca = _mm(ctx, dec["ca_wo_w"][0], vec["ca_wo_b"])
        h2 = _layernorm(h1 + ca, vec["n2_g"], vec["n2_b"])

        ff = jnp.maximum(_mm(h2, dec["ff1_w"][0], dec["ff1_b"][0]), 0.0)
        ff = _mm(ff, dec["ff2_w"][0], vec["ff2_b"])
        tgt_ref[...] = _layernorm(h2 + ff, vec["n3_g"], vec["n3_b"])

    # ---------------- final decoder norm + output head: last step --------------
    @pl.when(i == 2 * NUM_LAYERS - 1)
    def _head():
        t = _layernorm(tgt_ref[...], fin["dec_norm_g"][...], fin["dec_norm_b"][...])
        y = jnp.maximum(_mm(t, fin["head1_w"][...], fin["head1_b"][...]), 0.0)
        out_ref[...] = _mm(y, fin["head2_w"][...], fin["head2_b"][...])


# --------------------------------- wrapper -----------------------------------

def positional_encoding(S, d_model):
    # identical math to the PyTorch PositionalEncoding buffer
    position = jnp.arange(S, dtype=jnp.float32)[:, None]
    div_term = jnp.exp(jnp.arange(0, d_model, 2, dtype=jnp.float32)
                       * (-math.log(10000.0) / d_model))
    pe = jnp.zeros((S, d_model), jnp.float32)
    pe = pe.at[:, 0::2].set(jnp.sin(position * div_term))
    pe = pe.at[:, 1::2].set(jnp.cos(position * div_term))
    return pe


def custom_net_forward(state, packed):
    """state: (S, N, 288) -> (1, N, 144).  Dropouts are identity (eval)."""
    S, N, E = state.shape
    assert E == TOKEN_LEN
    T = N * S

    x = state + positional_encoding(S, E)[:, None, :]       # pos_encoder (dropout=id)
    x = jnp.transpose(x, (1, 0, 2)).reshape(T, E)           # batch-major token slab

    # Constant masks (static shapes S, N).
    tok_batch = jnp.arange(T, dtype=jnp.int32) // S                     # token -> batch id
    base = jnp.where(tok_batch[:, None] == tok_batch[None, :], 0.0, NEG_INF)
    enc_mask = jnp.tile(base.astype(jnp.float32), (NUM_HEADS, 1))       # (H*T, T)
    q_batch = jnp.arange(NUM_HEADS * N, dtype=jnp.int32) % N            # stacked-query -> batch id
    dec_mask = jnp.where(q_batch[:, None] == tok_batch[None, :],
                         0.0, NEG_INF).astype(jnp.float32)              # (H*N, T)
    head_masks = (jnp.arange(E)[None, :] // HEAD_DIM
                  == jnp.arange(NUM_HEADS)[:, None]).astype(jnp.float32)  # (H, E)

    fin = dict(packed["final"], head_masks=head_masks,
               enc_mask=enc_mask, dec_mask=dec_mask)

    enc_leaves, enc_tree = jax.tree_util.tree_flatten(packed["enc"])
    dec_leaves, dec_tree = jax.tree_util.tree_flatten(packed["dec"])
    fin_leaves, fin_tree = jax.tree_util.tree_flatten(fin)

    def enc_spec(a):
        # encoder steps 0..5 stream layer i; during decoder steps the index is
        # clamped at 5 -> Pallas elides the re-fetch (weights stay resident).
        return pl.BlockSpec((1,) + a.shape[1:],
                            lambda i: (jnp.minimum(i, NUM_LAYERS - 1), 0, 0))

    def dec_spec(a):
        # decoder steps 6..11 stream layer i-6; clamped at 0 during encoder steps.
        return pl.BlockSpec((1,) + a.shape[1:],
                            lambda i: (jnp.maximum(i - NUM_LAYERS, 0), 0, 0))

    def const_spec(a):
        return pl.BlockSpec(a.shape, lambda i: (0,) * a.ndim)

    in_specs = ([const_spec(x)]
                + [enc_spec(a) for a in enc_leaves]
                + [dec_spec(a) for a in dec_leaves]
                + [const_spec(a) for a in fin_leaves])

    kernel = partial(_custom_net_kernel,
                     enc_tree=enc_tree, n_enc=len(enc_leaves),
                     dec_tree=dec_tree, n_dec=len(dec_leaves),
                     fin_tree=fin_tree, n_fin=len(fin_leaves),
                     seq=S, batch=N)

    out = pl.pallas_call(
        kernel,
        out_shape=jax.ShapeDtypeStruct((N, TOKEN_LEN // 2), jnp.float32),
        grid_spec=pltpu.PrefetchScalarGridSpec(
            num_scalar_prefetch=0,
            grid=(2 * NUM_LAYERS,),
            in_specs=in_specs,
            out_specs=pl.BlockSpec((N, TOKEN_LEN // 2), lambda i: (0, 0)),
            scratch_shapes=[pltpu.VMEM((T, E), jnp.float32),   # encoder memory
                            pltpu.VMEM((N, E), jnp.float32)],  # decoder carry
        ),
        compiler_params=pltpu.CompilerParams(
            dimension_semantics=("arbitrary",),
            vmem_limit_bytes=32 * 1024 * 1024),
    )(x, *enc_leaves, *dec_leaves, *fin_leaves)
    return out.reshape(1, N, TOKEN_LEN // 2)


# -------------------------------- parameters ---------------------------------

def init_params(key):
    keys = iter(jax.random.split(key, 512))

    def lin(i, o):
        w = jax.random.normal(next(keys), (i, o), jnp.float32) * 0.02
        b = jax.random.normal(next(keys), (1, o), jnp.float32) * 0.02
        return w, b

    def ln():
        return (jnp.ones((1, TOKEN_LEN), jnp.float32),
                jnp.zeros((1, TOKEN_LEN), jnp.float32))

    def mha():
        wq, bq = lin(TOKEN_LEN, TOKEN_LEN); wk, bk = lin(TOKEN_LEN, TOKEN_LEN)
        wv, bv = lin(TOKEN_LEN, TOKEN_LEN); wo, bo = lin(TOKEN_LEN, TOKEN_LEN)
        return dict(wq=wq, bq=bq, wk=wk, bk=bk, wv=wv, bv=bv, wo=wo, bo=bo)

    def enc_layer():
        l1w, l1b = lin(TOKEN_LEN, FFN_DIM); l2w, l2b = lin(FFN_DIM, TOKEN_LEN)
        (n1g, n1b), (n2g, n2b) = ln(), ln()
        return dict(self_attn=mha(), l1_w=l1w, l1_b=l1b, l2_w=l2w, l2_b=l2b,
                    n1_g=n1g, n1_b=n1b, n2_g=n2g, n2_b=n2b)

    def dec_layer():
        l1w, l1b = lin(TOKEN_LEN, FFN_DIM); l2w, l2b = lin(FFN_DIM, TOKEN_LEN)
        (n1g, n1b), (n2g, n2b), (n3g, n3b) = ln(), ln(), ln()
        return dict(self_attn=mha(), cross_attn=mha(),
                    l1_w=l1w, l1_b=l1b, l2_w=l2w, l2_b=l2b,
                    n1_g=n1g, n1_b=n1b, n2_g=n2g, n2_b=n2b, n3_g=n3g, n3_b=n3b)

    s1w, s1b = lin(TOKEN_LEN, TOKEN_LEN)
    s2w, s2b = lin(TOKEN_LEN, TOKEN_LEN // 2)
    eg, eb = ln(); dg, db = ln()
    return dict(encoder_layers=[enc_layer() for _ in range(NUM_LAYERS)],
                decoder_layers=[dec_layer() for _ in range(NUM_LAYERS)],
                enc_norm_g=eg, enc_norm_b=eb, dec_norm_g=dg, dec_norm_b=db,
                seq_l1_w=s1w, seq_l1_b=s1b, seq_l2_w=s2w, seq_l2_b=s2b)


def pack_params(p):
    """Stack per-layer params with a leading layer dim (streamed via the grid).

    Matmul weights -> bf16; ATTN_SCALE folded into Q weights/biases; the decoder
    self-attention (tgt_len==1) pre-folded into W_sa = Wv @ Wo (f32 then bf16);
    all per-layer (1,288) vectors packed into one (L, n, 288) f32 slab.
    """
    bf16 = jnp.bfloat16
    enc_l, dec_l = p["encoder_layers"], p["decoder_layers"]

    def stack(layers, fn, dtype=None):
        a = jnp.stack([fn(l) for l in layers], axis=0)
        return a.astype(dtype) if dtype is not None else a

    def stack_vecs(layers, per_layer_fn, fields):
        def one(l):
            d = per_layer_fn(l)
            return jnp.concatenate([d[name] for name in fields], axis=0)
        return jnp.stack([one(l) for l in layers], axis=0)

    def enc_vec_dict(l):
        a = l["self_attn"]
        return dict(q_b=a["bq"] * ATTN_SCALE, k_b=a["bk"], v_b=a["bv"], wo_b=a["bo"],
                    ff2_b=l["l2_b"], n1_g=l["n1_g"], n1_b=l["n1_b"],
                    n2_g=l["n2_g"], n2_b=l["n2_b"])

    packed_enc = dict(
        q_w=stack(enc_l, lambda l: l["self_attn"]["wq"] * ATTN_SCALE, bf16),
        k_w=stack(enc_l, lambda l: l["self_attn"]["wk"], bf16),
        v_w=stack(enc_l, lambda l: l["self_attn"]["wv"], bf16),
        wo_w=stack(enc_l, lambda l: l["self_attn"]["wo"], bf16),
        ff1_w=stack(enc_l, lambda l: l["l1_w"], bf16),
        ff1_b=stack(enc_l, lambda l: l["l1_b"]),
        ff2_w=stack(enc_l, lambda l: l["l2_w"], bf16),
        vecs=stack_vecs(enc_l, enc_vec_dict, ENC_VEC_FIELDS),
    )

    def dec_vec_dict(l):
        sa, ca = l["self_attn"], l["cross_attn"]
        return dict(sa_b=sa["bv"] @ sa["wo"] + sa["bo"],
                    ca_q_b=ca["bq"] * ATTN_SCALE, ca_k_b=ca["bk"], ca_v_b=ca["bv"],
                    ca_wo_b=ca["bo"], ff2_b=l["l2_b"],
                    n1_g=l["n1_g"], n1_b=l["n1_b"], n2_g=l["n2_g"], n2_b=l["n2_b"],
                    n3_g=l["n3_g"], n3_b=l["n3_b"])

    packed_dec = dict(
        sa_w=stack(dec_l, lambda l: l["self_attn"]["wv"] @ l["self_attn"]["wo"], bf16),
        ca_q_w=stack(dec_l, lambda l: l["cross_attn"]["wq"] * ATTN_SCALE, bf16),
        ca_k_w=stack(dec_l, lambda l: l["cross_attn"]["wk"], bf16),
        ca_v_w=stack(dec_l, lambda l: l["cross_attn"]["wv"], bf16),
        ca_wo_w=stack(dec_l, lambda l: l["cross_attn"]["wo"], bf16),
        ff1_w=stack(dec_l, lambda l: l["l1_w"], bf16),
        ff1_b=stack(dec_l, lambda l: l["l1_b"]),
        ff2_w=stack(dec_l, lambda l: l["l2_w"], bf16),
        vecs=stack_vecs(dec_l, dec_vec_dict, DEC_VEC_FIELDS),
    )

    final = dict(
        enc_norm_g=p["enc_norm_g"], enc_norm_b=p["enc_norm_b"],
        dec_norm_g=p["dec_norm_g"], dec_norm_b=p["dec_norm_b"],
        head1_w=p["seq_l1_w"].astype(bf16), head1_b=p["seq_l1_b"],
        head2_w=p["seq_l2_w"].astype(bf16), head2_b=p["seq_l2_b"],
    )
    return dict(enc=packed_enc, dec=packed_dec, final=final)


# ----------------------------------- main -------------------------------------

if __name__ == "__main__":
    key = jax.random.PRNGKey(0)
    pkey, xkey = jax.random.split(key)
    params = init_params(pkey)
    packed = pack_params(params)

    S, N = 8, 2                                  # seq=8, batch=2, d_model=288
    state = jax.random.normal(xkey, (S, N, TOKEN_LEN), jnp.float32)

    fwd = jax.jit(custom_net_forward)
    out = jax.block_until_ready(fwd(state, packed))
    assert out.shape == (1, N, TOKEN_LEN // 2), out.shape
    assert bool(jnp.all(jnp.isfinite(out)))
    print("KERNEL_OK")
</pallas_src>

<mosaic_0001>
module attributes {stable_mosaic.version = 11 : i64} {
  func.func @_custom_net_kernel(%arg0: i32, %arg1: memref<16x288xf32, #tpu.memory_space<vmem>>, %arg2: memref<1x1x576xf32, #tpu.memory_space<vmem>>, %arg3: memref<1x288x576xbf16, #tpu.memory_space<vmem>>, %arg4: memref<1x576x288xbf16, #tpu.memory_space<vmem>>, %arg5: memref<1x288x288xbf16, #tpu.memory_space<vmem>>, %arg6: memref<1x288x288xbf16, #tpu.memory_space<vmem>>, %arg7: memref<1x288x288xbf16, #tpu.memory_space<vmem>>, %arg8: memref<1x9x288xf32, #tpu.memory_space<vmem>>, %arg9: memref<1x288x288xbf16, #tpu.memory_space<vmem>>, %arg10: memref<1x288x288xbf16, #tpu.memory_space<vmem>>, %arg11: memref<1x288x288xbf16, #tpu.memory_space<vmem>>, %arg12: memref<1x288x288xbf16, #tpu.memory_space<vmem>>, %arg13: memref<1x288x288xbf16, #tpu.memory_space<vmem>>, %arg14: memref<1x1x576xf32, #tpu.memory_space<vmem>>, %arg15: memref<1x288x576xbf16, #tpu.memory_space<vmem>>, %arg16: memref<1x576x288xbf16, #tpu.memory_space<vmem>>, %arg17: memref<1x288x288xbf16, #tpu.memory_space<vmem>>, %arg18: memref<1x12x288xf32, #tpu.memory_space<vmem>>, %arg19: memref<16x16xf32, #tpu.memory_space<vmem>>, %arg20: memref<1x288xf32, #tpu.memory_space<vmem>>, %arg21: memref<1x288xf32, #tpu.memory_space<vmem>>, %arg22: memref<128x16xf32, #tpu.memory_space<vmem>>, %arg23: memref<1x288xf32, #tpu.memory_space<vmem>>, %arg24: memref<1x288xf32, #tpu.memory_space<vmem>>, %arg25: memref<1x288xf32, #tpu.memory_space<vmem>>, %arg26: memref<288x288xbf16, #tpu.memory_space<vmem>>, %arg27: memref<1x144xf32, #tpu.memory_space<vmem>>, %arg28: memref<288x144xbf16, #tpu.memory_space<vmem>>, %arg29: memref<8x288xf32, #tpu.memory_space<vmem>>, %arg30: memref<2x144xf32, #tpu.memory_space<vmem>>, %arg31: memref<16x288xf32, #tpu.memory_space<vmem>>, %arg32: memref<2x288xf32, #tpu.memory_space<vmem>>) attributes {dimension_semantics = [#tpu.dimension_semantics<arbitrary>], iteration_bounds = array<i64: 12>, scalar_prefetch = 0 : i64, scratch_operands = 2 : i64, tpu.core_type = #tpu.core_type<tc>, window_params = [{pipeline_mode = #tpu.pipeline_mode<synchronous>, transform_indices = @transform_0, window_bounds = array<i64: 16, 288>}, {transform_indices = @transform_1, window_bounds = array<i64: 1, 1, 576>}, {transform_indices = @transform_2, window_bounds = array<i64: 1, 288, 576>}, {transform_indices = @transform_3, window_bounds = array<i64: 1, 576, 288>}, {transform_indices = @transform_4, window_bounds = array<i64: 1, 288, 288>}, {transform_indices = @transform_5, window_bounds = array<i64: 1, 288, 288>}, {transform_indices = @transform_6, window_bounds = array<i64: 1, 288, 288>}, {transform_indices = @transform_7, window_bounds = array<i64: 1, 9, 288>}, {transform_indices = @transform_8, window_bounds = array<i64: 1, 288, 288>}, {transform_indices = @transform_9, window_bounds = array<i64: 1, 288, 288>}, {transform_indices = @transform_10, window_bounds = array<i64: 1, 288, 288>}, {transform_indices = @transform_11, window_bounds = array<i64: 1, 288, 288>}, {transform_indices = @transform_12, window_bounds = array<i64: 1, 288, 288>}, {transform_indices = @transform_13, window_bounds = array<i64: 1, 1, 576>}, {transform_indices = @transform_14, window_bounds = array<i64: 1, 288, 576>}, {transform_indices = @transform_15, window_bounds = array<i64: 1, 576, 288>}, {transform_indices = @transform_16, window_bounds = array<i64: 1, 288, 288>}, {transform_indices = @transform_17, window_bounds = array<i64: 1, 12, 288>}, {pipeline_mode = #tpu.pipeline_mode<synchronous>, transform_indices = @transform_18, window_bounds = array<i64: 16, 16>}, {pipeline_mode = #tpu.pipeline_mode<synchronous>, transform_indices = @transform_19, window_bounds = array<i64: 1, 288>}, {pipeline_mode = #tpu.pipeline_mode<synchronous>, transform_indices = @transform_20, window_bounds = array<i64: 1, 288>}, {pipeline_mode = #tpu.pipeline_mode<synchronous>, transform_indices = @transform_21, window_bounds = array<i64: 128, 16>}, {pipeline_mode = #tpu.pipeline_mode<synchronous>, transform_indices = @transform_22, window_bounds = array<i64: 1, 288>}, {pipeline_mode = #tpu.pipeline_mode<synchronous>, transform_indices = @transform_23, window_bounds = array<i64: 1, 288>}, {pipeline_mode = #tpu.pipeline_mode<synchronous>, transform_indices = @transform_24, window_bounds = array<i64: 1, 288>}, {pipeline_mode = #tpu.pipeline_mode<synchronous>, transform_indices = @transform_25, window_bounds = array<i64: 288, 288>}, {pipeline_mode = #tpu.pipeline_mode<synchronous>, transform_indices = @transform_26, window_bounds = array<i64: 1, 144>}, {pipeline_mode = #tpu.pipeline_mode<synchronous>, transform_indices = @transform_27, window_bounds = array<i64: 288, 144>}, {pipeline_mode = #tpu.pipeline_mode<synchronous>, transform_indices = @transform_28, window_bounds = array<i64: 8, 288>}, {pipeline_mode = #tpu.pipeline_mode<synchronous>, transform_indices = @transform_29, window_bounds = array<i64: 2, 144>}]} {
    %c0 = arith.constant 0 : index
    %c0_0 = arith.constant 0 : index
    %0 = vector.load %arg29[%c0, %c0_0] : memref<8x288xf32, #tpu.memory_space<vmem>>, vector<8x288xf32>
    %c0_i32 = arith.constant 0 : i32
    %1 = arith.cmpi eq, %arg0, %c0_i32 : i32
    %2 = arith.extui %1 : i1 to i32
    %c0_i32_1 = arith.constant 0 : i32
    %3 = arith.cmpi ne, %2, %c0_i32_1 : i32
    scf.if %3 {
      %c0_8 = arith.constant 0 : index
      %c0_9 = arith.constant 0 : index
      %16 = vector.load %arg1[%c0_8, %c0_9] : memref<16x288xf32, #tpu.memory_space<vmem>>, vector<16x288xf32>
      %c0_10 = arith.constant 0 : index
      %c0_11 = arith.constant 0 : index
      %17 = vector.load %arg31[%c0_10, %c0_11] : memref<16x288xf32, #tpu.memory_space<vmem>>, vector<16x288xf32>
      tpu.vector_store %arg31[%c0_10, %c0_11], %16 {strides = array<i32>} : memref<16x288xf32, #tpu.memory_space<vmem>>, vector<16x288xf32>,
    } else {
    }
    %c6_i32 = arith.constant 6 : i32
    %4 = arith.cmpi slt, %arg0, %c6_i32 : i32
    %5 = arith.extui %4 : i1 to i32
    %c0_i32_2 = arith.constant 0 : i32
    %6 = arith.cmpi ne, %5, %c0_i32_2 : i32
    scf.if %6 {
      %c0_8 = arith.constant 0 : index
      %c0_9 = arith.constant 0 : index
      %c0_10 = arith.constant 0 : index
      %16 = vector.load %arg8[%c0_8, %c0_9, %c0_10] : memref<1x9x288xf32, #tpu.memory_space<vmem>>, vector<1x9x288xf32>
      %17 = vector.shape_cast %16 : vector<1x9x288xf32> to vector<9x288xf32>
      %18 = vector.extract_strided_slice %17 {offsets = [0, 0], sizes = [1, 288], strides = [1, 1]} : vector<9x288xf32> to vector<1x288xf32>
      %19 = vector.extract_strided_slice %17 {offsets = [1, 0], sizes = [1, 288], strides = [1, 1]} : vector<9x288xf32> to vector<1x288xf32>
      %20 = vector.extract_strided_slice %17 {offsets = [2, 0], sizes = [1, 288], strides = [1, 1]} : vector<9x288xf32> to vector<1x288xf32>
      %21 = vector.extract_strided_slice %17 {offsets = [3, 0], sizes = [1, 288], strides = [1, 1]} : vector<9x288xf32> to vector<1x288xf32>
      %22 = vector.extract_strided_slice %17 {offsets = [4, 0], sizes = [1, 288], strides = [1, 1]} : vector<9x288xf32> to vector<1x288xf32>
      %23 = vector.extract_strided_slice %17 {offsets = [5, 0], sizes = [1, 288], strides = [1, 1]} : vector<9x288xf32> to vector<1x288xf32>
      %24 = vector.extract_strided_slice %17 {offsets = [6, 0], sizes = [1, 288], strides = [1, 1]} : vector<9x288xf32> to vector<1x288xf32>
      %25 = vector.extract_strided_slice %17 {offsets = [7, 0], sizes = [1, 288], strides = [1, 1]} : vector<9x288xf32> to vector<1x288xf32>
      %26 = vector.extract_strided_slice %17 {offsets = [8, 0], sizes = [1, 288], strides = [1, 1]} : vector<9x288xf32> to vector<1x288xf32>
      %c0_11 = arith.constant 0 : index
      %c0_12 = arith.constant 0 : index
      %27 = vector.load %arg31[%c0_11, %c0_12] : memref<16x288xf32, #tpu.memory_space<vmem>>, vector<16x288xf32>
      %28 = arith.truncf %27 : vector<16x288xf32> to vector<16x288xbf16>
      %c0_13 = arith.constant 0 : index
      %c0_14 = arith.constant 0 : index
      %c0_15 = arith.constant 0 : index
      %29 = vector.load %arg6[%c0_13, %c0_14, %c0_15] : memref<1x288x288xbf16, #tpu.memory_space<vmem>>, vector<1x288x288xbf16>
      %30 = vector.shape_cast %29 : vector<1x288x288xbf16> to vector<288x288xbf16>
      %cst = arith.constant dense<0.000000e+00> : vector<16x288xf32>
      %31 = tpu.matmul %28, %30, %cst {dimension_numbers = #tpu.dot_dimension_numbers<[1], [0], [0], [1], [0, 0, 1, 1], [], []>} : vector<16x288xbf16>, vector<288x288xbf16>, vector<16x288xf32> -> vector<16x288xf32>
      %32 = vector.broadcast %18 : vector<1x288xf32> to vector<16x288xf32>
      %33 = arith.addf %31, %32 : vector<16x288xf32>
      %c0_16 = arith.constant 0 : index
      %c0_17 = arith.constant 0 : index
      %c0_18 = arith.constant 0 : index
      %34 = vector.load %arg5[%c0_16, %c0_17, %c0_18] : memref<1x288x288xbf16, #tpu.memory_space<vmem>>, vector<1x288x288xbf16>
      %35 = vector.shape_cast %34 : vector<1x288x288xbf16> to vector<288x288xbf16>
      %cst_19 = arith.constant dense<0.000000e+00> : vector<16x288xf32>
      %36 = tpu.matmul %28, %35, %cst_19 {dimension_numbers = #tpu.dot_dimension_numbers<[1], [0], [0], [1], [0, 0, 1, 1], [], []>} : vector<16x288xbf16>, vector<288x288xbf16>, vector<16x288xf32> -> vector<16x288xf32>
      %37 = vector.broadcast %19 : vector<1x288xf32> to vector<16x288xf32>
      %38 = arith.addf %36, %37 : vector<16x288xf32>
      %c0_20 = arith.constant 0 : index
      %c0_21 = arith.constant 0 : index
      %c0_22 = arith.constant 0 : index
      %39 = vector.load %arg7[%c0_20, %c0_21, %c0_22] : memref<1x288x288xbf16, #tpu.memory_space<vmem>>, vector<1x288x288xbf16>
      %40 = vector.shape_cast %39 : vector<1x288x288xbf16> to vector<288x288xbf16>
      %cst_23 = arith.constant dense<0.000000e+00> : vector<16x288xf32>
      %41 = tpu.matmul %28, %40, %cst_23 {dimension_numbers = #tpu.dot_dimension_numbers<[1], [0], [0], [1], [0, 0, 1, 1], [], []>} : vector<16x288xbf16>, vector<288x288xbf16>, vector<16x288xf32> -> vector<16x288xf32>
      %42 = vector.broadcast %20 : vector<1x288xf32> to vector<16x288xf32>
      %43 = arith.addf %41, %42 : vector<16x288xf32>
      %c0_24 = arith.constant 0 : index
      %c0_25 = arith.constant 0 : index
      %44 = vector.load %arg22[%c0_24, %c0_25] : memref<128x16xf32, #tpu.memory_space<vmem>>, vector<128x16xf32>
      %45 = arith.truncf %38 : vector<16x288xf32> to vector<16x288xbf16>
      %46 = vector.extract_strided_slice %0 {offsets = [0, 0], sizes = [1, 288], strides = [1, 1]} : vector<8x288xf32> to vector<1x288xf32>
      %47 = vector.broadcast %46 : vector<1x288xf32> to vector<16x288xf32>
      %48 = arith.mulf %33, %47 : vector<16x288xf32>
      %49 = vector.extract_strided_slice %0 {offsets = [1, 0], sizes = [1, 288], strides = [1, 1]} : vector<8x288xf32> to vector<1x288xf32>
      %50 = vector.broadcast %49 : vector<1x288xf32> to vector<16x288xf32>
      %51 = arith.mulf %33, %50 : vector<16x288xf32>
      %52 = vector.extract_strided_slice %0 {offsets = [2, 0], sizes = [1, 288], strides = [1, 1]} : vector<8x288xf32> to vector<1x288xf32>
      %53 = vector.broadcast %52 : vector<1x288xf32> to vector<16x288xf32>
      %54 = arith.mulf %33, %53 : vector<16x288xf32>
      %55 = vector.extract_strided_slice %0 {offsets = [3, 0], sizes = [1, 288], strides = [1, 1]} : vector<8x288xf32> to vector<1x288xf32>
      %56 = vector.broadcast %55 : vector<1x288xf32> to vector<16x288xf32>
      %57 = arith.mulf %33, %56 : vector<16x288xf32>
      %58 = vector.extract_strided_slice %0 {offsets = [4, 0], sizes = [1, 288], strides = [1, 1]} : vector<8x288xf32> to vector<1x288xf32>
      %59 = vector.broadcast %58 : vector<1x288xf32> to vector<16x288xf32>
      %60 = arith.mulf %33, %59 : vector<16x288xf32>
      %61 = vector.extract_strided_slice %0 {offsets = [5, 0], sizes = [1, 288], strides = [1, 1]} : vector<8x288xf32> to vector<1x288xf32>
      %62 = vector.broadcast %61 : vector<1x288xf32> to vector<16x288xf32>
      %63 = arith.mulf %33, %62 : vector<16x288xf32>
      %64 = vector.extract_strided_slice %0 {offsets = [6, 0], sizes = [1, 288], strides = [1, 1]} : vector<8x288xf32> to vector<1x288xf32>
      %65 = vector.broadcast %64 : vector<1x288xf32> to vector<16x288xf32>
      %66 = arith.mulf %33, %65 : vector<16x288xf32>
      %67 = vector.extract_strided_slice %0 {offsets = [7, 0], sizes = [1, 288], strides = [1, 1]} : vector<8x288xf32> to vector<1x288xf32>
      %68 = vector.broadcast %67 : vector<1x288xf32> to vector<16x288xf32>
      %69 = arith.mulf %33, %68 : vector<16x288xf32>
      %70 = tpu.concatenate %48, %51, %54, %57, %60, %63, %66, %69 in 0 : vector<16x288xf32>, vector<16x288xf32>, vector<16x288xf32>, vector<16x288xf32>, vector<16x288xf32>, vector<16x288xf32>, vector<16x288xf32>, vector<16x288xf32> -> vector<128x288xf32>
      %71 = arith.truncf %70 : vector<128x288xf32> to vector<128x288xbf16>
      %cst_26 = arith.constant dense<0.000000e+00> : vector<128x16xf32>
      %72 = tpu.matmul %71, %45, %cst_26 {dimension_numbers = #tpu.dot_dimension_numbers<[1], [1], [0], [0], [0, 0, 1, 0], [], []>} : vector<128x288xbf16>, vector<16x288xbf16>, vector<128x16xf32> -> vector<128x16xf32>
      %73 = arith.addf %72, %44 : vector<128x16xf32>
      %cst_27 = arith.constant dense<0xFF800000> : vector<128xf32>
      %74 = vector.multi_reduction <maximumf>, %73, %cst_27 [1] : vector<128x16xf32> to vector<128xf32>
      %75 = vector.shape_cast %74 : vector<128xf32> to vector<128x1xf32>
      %76 = vector.broadcast %75 : vector<128x1xf32> to vector<128x16xf32>
      %77 = arith.subf %73, %76 : vector<128x16xf32>
      %78 = math.exp %77 : vector<128x16xf32>
      %cst_28 = arith.constant dense<0.000000e+00> : vector<128xf32>
      %79 = vector.multi_reduction <add>, %78, %cst_28 [1] : vector<128x16xf32> to vector<128xf32>
      %80 = vector.shape_cast %79 : vector<128xf32> to vector<128x1xf32>
      %81 = tpu.reciprocal %80 {approx = true} : vector<128x1xf32> -> vector<128x1xf32>
      %82 = vector.broadcast %81 : vector<128x1xf32> to vector<128x16xf32>
      %83 = arith.mulf %78, %82 : vector<128x16xf32>
      %cst_29 = arith.constant 0.000000e+00 : f32
      %84 = vector.broadcast %cst_29 : f32 to vector<16x288xf32>
      %85 = vector.extract_strided_slice %83 {offsets = [0, 0], sizes = [16, 16], strides = [1, 1]} : vector<128x16xf32> to vector<16x16xf32>
      %86 = arith.truncf %85 : vector<16x16xf32> to vector<16x16xbf16>
      %87 = vector.extract_strided_slice %0 {offsets = [0, 0], sizes = [1, 288], strides = [1, 1]} : vector<8x288xf32> to vector<1x288xf32>
      %88 = vector.broadcast %87 : vector<1x288xf32> to vector<16x288xf32>
      %89 = arith.mulf %43, %88 : vector<16x288xf32>
      %90 = arith.truncf %89 : vector<16x288xf32> to vector<16x288xbf16>
      %cst_30 = arith.constant dense<0.000000e+00> : vector<16x288xf32>
      %91 = tpu.matmul %86, %90, %cst_30 {dimension_numbers = #tpu.dot_dimension_numbers<[1], [0], [0], [1], [0, 0, 1, 1], [], []>} : vector<16x16xbf16>, vector<16x288xbf16>, vector<16x288xf32> -> vector<16x288xf32>
      %92 = arith.addf %84, %91 : vector<16x288xf32>
      %93 = vector.extract_strided_slice %83 {offsets = [16, 0], sizes = [16, 16], strides = [1, 1]} : vector<128x16xf32> to vector<16x16xf32>
      %94 = arith.truncf %93 : vector<16x16xf32> to vector<16x16xbf16>
      %95 = vector.extract_strided_slice %0 {offsets = [1, 0], sizes = [1, 288], strides = [1, 1]} : vector<8x288xf32> to vector<1x288xf32>
      %96 = vector.broadcast %95 : vector<1x288xf32> to vector<16x288xf32>
      %97 = arith.mulf %43, %96 : vector<16x288xf32>
      %98 = arith.truncf %97 : vector<16x288xf32> to vector<16x288xbf16>
      %cst_31 = arith.constant dense<0.000000e+00> : vector<16x288xf32>
      %99 = tpu.matmul %94, %98, %cst_31 {dimension_numbers = #tpu.dot_dimension_numbers<[1], [0], [0], [1], [0, 0, 1, 1], [], []>} : vector<16x16xbf16>, vector<16x288xbf16>, vector<16x288xf32> -> vector<16x288xf32>
      %100 = arith.addf %92, %99 : vector<16x288xf32>
      %101 = vector.extract_strided_slice %83 {offsets = [32, 0], sizes = [16, 16], strides = [1, 1]} : vector<128x16xf32> to vector<16x16xf32>
      %102 = arith.truncf %101 : vector<16x16xf32> to vector<16x16xbf16>
      %103 = vector.extract_strided_slice %0 {offsets = [2, 0], sizes = [1, 288], strides = [1, 1]} : vector<8x288xf32> to vector<1x288xf32>
      %104 = vector.broadcast %103 : vector<1x288xf32> to vector<16x288xf32>
      %105 = arith.mulf %43, %104 : vector<16x288xf32>
      %106 = arith.truncf %105 : vector<16x288xf32> to vector<16x288xbf16>
      %cst_32 = arith.constant dense<0.000000e+00> : vector<16x288xf32>
      %107 = tpu.matmul %102, %106, %cst_32 {dimension_numbers = #tpu.dot_dimension_numbers<[1], [0], [0], [1], [0, 0, 1, 1], [], []>} : vector<16x16xbf16>, vector<16x288xbf16>, vector<16x288xf32> -> vector<16x288xf32>
      %108 = arith.addf %100, %107 : vector<16x288xf32>
      %109 = vector.extract_strided_slice %83 {offsets = [48, 0], sizes = [16, 16], strides = [1, 1]} : vector<128x16xf32> to vector<16x16xf32>
      %110 = arith.truncf %109 : vector<16x16xf32> to vector<16x16xbf16>
      %111 = vector.extract_strided_slice %0 {offsets = [3, 0], sizes = [1, 288], strides = [1, 1]} : vector<8x288xf32> to vector<1x288xf32>
      %112 = vector.broadcast %111 : vector<1x288xf32> to vector<16x288xf32>
      %113 = arith.mulf %43, %112 : vector<16x288xf32>
      %114 = arith.truncf %113 : vector<16x288xf32> to vector<16x288xbf16>
      %cst_33 = arith.constant dense<0.000000e+00> : vector<16x288xf32>
      %115 = tpu.matmul %110, %114, %cst_33 {dimension_numbers = #tpu.dot_dimension_numbers<[1], [0], [0], [1], [0, 0, 1, 1], [], []>} : vector<16x16xbf16>, vector<16x288xbf16>, vector<16x288xf32> -> vector<16x288xf32>
      %116 = arith.addf %108, %115 : vector<16x288xf32>
      %117 = vector.extract_strided_slice %83 {offsets = [64, 0], sizes = [16, 16], strides = [1, 1]} : vector<128x16xf32> to vector<16x16xf32>
      %118 = arith.truncf %117 : vector<16x16xf32> to vector<16x16xbf16>
      %119 = vector.extract_strided_slice %0 {offsets = [4, 0], sizes = [1, 288], strides = [1, 1]} : vector<8x288xf32> to vector<1x288xf32>
      %120 = vector.broadcast %119 : vector<1x288xf32> to vector<16x288xf32>
      %121 = arith.mulf %43, %120 : vector<16x288xf32>
      %122 = arith.truncf %121 : vector<16x288xf32> to vector<16x288xbf16>
      %cst_34 = arith.constant dense<0.000000e+00> : vector<16x288xf32>
      %123 = tpu.matmul %118, %122, %cst_34 {dimension_numbers = #tpu.dot_dimension_numbers<[1], [0], [0], [1], [0, 0, 1, 1], [], []>} : vector<16x16xbf16>, vector<16x288xbf16>, vector<16x288xf32> -> vector<16x288xf32>
      %124 = arith.addf %116, %123 : vector<16x288xf32>
      %125 = vector.extract_strided_slice %83 {offsets = [80, 0], sizes = [16, 16], strides = [1, 1]} : vector<128x16xf32> to vector<16x16xf32>
      %126 = arith.truncf %125 : vector<16x16xf32> to vector<16x16xbf16>
      %127 = vector.extract_strided_slice %0 {offsets = [5, 0], sizes = [1, 288], strides = [1, 1]} : vector<8x288xf32> to vector<1x288xf32>
      %128 = vector.broadcast %127 : vector<1x288xf32> to vector<16x288xf32>
      %129 = arith.mulf %43, %128 : vector<16x288xf32>
      %130 = arith.truncf %129 : vector<16x288xf32> to vector<16x288xbf16>
      %cst_35 = arith.constant dense<0.000000e+00> : vector<16x288xf32>
      %131 = tpu.matmul %126, %130, %cst_35 {dimension_numbers = #tpu.dot_dimension_numbers<[1], [0], [0], [1], [0, 0, 1, 1], [], []>} : vector<16x16xbf16>, vector<16x288xbf16>, vector<16x288xf32> -> vector<16x288xf32>
      %132 = arith.addf %124, %131 : vector<16x288xf32>
      %133 = vector.extract_strided_slice %83 {offsets = [96, 0], sizes = [16, 16], strides = [1, 1]} : vector<128x16xf32> to vector<16x16xf32>
      %134 = arith.truncf %133 : vector<16x16xf32> to vector<16x16xbf16>
      %135 = vector.extract_strided_slice %0 {offsets = [6, 0], sizes = [1, 288], strides = [1, 1]} : vector<8x288xf32> to vector<1x288xf32>
      %136 = vector.broadcast %135 : vector<1x288xf32> to vector<16x288xf32>
      %137 = arith.mulf %43, %136 : vector<16x288xf32>
      %138 = arith.truncf %137 : vector<16x288xf32> to vector<16x288xbf16>
      %cst_36 = arith.constant dense<0.000000e+00> : vector<16x288xf32>
      %139 = tpu.matmul %134, %138, %cst_36 {dimension_numbers = #tpu.dot_dimension_numbers<[1], [0], [0], [1], [0, 0, 1, 1], [], []>} : vector<16x16xbf16>, vector<16x288xbf16>, vector<16x288xf32> -> vector<16x288xf32>
      %140 = arith.addf %132, %139 : vector<16x288xf32>
      %141 = vector.extract_strided_slice %83 {offsets = [112, 0], sizes = [16, 16], strides = [1, 1]} : vector<128x16xf32> to vector<16x16xf32>
      %142 = arith.truncf %141 : vector<16x16xf32> to vector<16x16xbf16>
      %143 = vector.extract_strided_slice %0 {offsets = [7, 0], sizes = [1, 288], strides = [1, 1]} : vector<8x288xf32> to vector<1x288xf32>
      %144 = vector.broadcast %143 : vector<1x288xf32> to vector<16x288xf32>
      %145 = arith.mulf %43, %144 : vector<16x288xf32>
      %146 = arith.truncf %145 : vector<16x288xf32> to vector<16x288xbf16>
      %cst_37 = arith.constant dense<0.000000e+00> : vector<16x288xf32>
      %147 = tpu.matmul %142, %146, %cst_37 {dimension_numbers = #tpu.dot_dimension_numbers<[1], [0], [0], [1], [0, 0, 1, 1], [], []>} : vector<16x16xbf16>, vector<16x288xbf16>, vector<16x288xf32> -> vector<16x288xf32>
      %148 = arith.addf %140, %147 : vector<16x288xf32>
      %c0_38 = arith.constant 0 : index
      %c0_39 = arith.constant 0 : index
      %c0_40 = arith.constant 0 : index
      %149 = vector.load %arg9[%c0_38, %c0_39, %c0_40] : memref<1x288x288xbf16, #tpu.memory_space<vmem>>, vector<1x288x288xbf16>
      %150 = vector.shape_cast %149 : vector<1x288x288xbf16> to vector<288x288xbf16>
      %151 = arith.truncf %148 : vector<16x288xf32> to vector<16x288xbf16>
      %cst_41 = arith.constant dense<0.000000e+00> : vector<16x288xf32>
      %152 = tpu.matmul %151, %150, %cst_41 {dimension_numbers = #tpu.dot_dimension_numbers<[1], [0], [0], [1], [0, 0, 1, 1], [], []>} : vector<16x288xbf16>, vector<288x288xbf16>, vector<16x288xf32> -> vector<16x288xf32>
      %153 = vector.broadcast %21 : vector<1x288xf32> to vector<16x288xf32>
      %154 = arith.addf %152, %153 : vector<16x288xf32>
      %155 = arith.addf %27, %154 : vector<16x288xf32>
      %cst_42 = arith.constant dense<0.000000e+00> : vector<16xf32>
      %156 = vector.multi_reduction <add>, %155, %cst_42 [1] : vector<16x288xf32> to vector<16xf32>
      %157 = vector.shape_cast %156 : vector<16xf32> to vector<16x1xf32>
      %cst_43 = arith.constant 2.880000e+02 : f32
      %158 = vector.broadcast %cst_43 : f32 to vector<16x1xf32>
      %159 = arith.divf %157, %158 : vector<16x1xf32>
      %160 = arith.mulf %155, %155 : vector<16x288xf32>
      %cst_44 = arith.constant dense<0.000000e+00> : vector<16xf32>
      %161 = vector.multi_reduction <add>, %160, %cst_44 [1] : vector<16x288xf32> to vector<16xf32>
      %162 = vector.shape_cast %161 : vector<16xf32> to vector<16x1xf32>
      %cst_45 = arith.constant 2.880000e+02 : f32
      %163 = vector.broadcast %cst_45 : f32 to vector<16x1xf32>
      %164 = arith.divf %162, %163 : vector<16x1xf32>
      %165 = arith.mulf %159, %159 : vector<16x1xf32>
      %166 = arith.subf %164, %165 : vector<16x1xf32>
      %cst_46 = arith.constant 9.99999974E-6 : f32
      %167 = vector.broadcast %cst_46 : f32 to vector<16x1xf32>
      %168 = arith.addf %166, %167 : vector<16x1xf32>
      %169 = math.rsqrt %168 : vector<16x1xf32>
      %170 = vector.broadcast %159 : vector<16x1xf32> to vector<16x288xf32>
      %171 = arith.subf %155, %170 : vector<16x288xf32>
      %172 = vector.broadcast %169 : vector<16x1xf32> to vector<16x288xf32>
      %173 = arith.mulf %171, %172 : vector<16x288xf32>
      %174 = vector.broadcast %23 : vector<1x288xf32> to vector<16x288xf32>
      %175 = arith.mulf %173, %174 : vector<16x288xf32>
      %176 = vector.broadcast %24 : vector<1x288xf32> to vector<16x288xf32>
      %177 = arith.addf %175, %176 : vector<16x288xf32>
      %c0_47 = arith.constant 0 : index
      %c0_48 = arith.constant 0 : index
      %c0_49 = arith.constant 0 : index
      %178 = vector.load %arg3[%c0_47, %c0_48, %c0_49] : memref<1x288x576xbf16, #tpu.memory_space<vmem>>, vector<1x288x576xbf16>
      %179 = vector.shape_cast %178 : vector<1x288x576xbf16> to vector<288x576xbf16>
      %c0_50 = arith.constant 0 : index
      %c0_51 = arith.constant 0 : index
      %c0_52 = arith.constant 0 : index
      %180 = vector.load %arg2[%c0_50, %c0_51, %c0_52] : memref<1x1x576xf32, #tpu.memory_space<vmem>>, vector<1x1x576xf32>
      %181 = vector.shape_cast %180 : vector<1x1x576xf32> to vector<1x576xf32>
      %182 = arith.truncf %177 : vector<16x288xf32> to vector<16x288xbf16>
      %cst_53 = arith.constant dense<0.000000e+00> : vector<16x576xf32>
      %183 = tpu.matmul %182, %179, %cst_53 {dimension_numbers = #tpu.dot_dimension_numbers<[1], [0], [0], [1], [0, 0, 1, 1], [], []>} : vector<16x288xbf16>, vector<288x576xbf16>, vector<16x576xf32> -> vector<16x576xf32>
      %184 = vector.broadcast %181 : vector<1x576xf32> to vector<16x576xf32>
      %185 = arith.addf %183, %184 : vector<16x576xf32>
      %cst_54 = arith.constant 0.000000e+00 : f32
      %186 = vector.broadcast %cst_54 : f32 to vector<16x576xf32>
      %187 = arith.maximumf %185, %186 : vector<16x576xf32>
      %c0_55 = arith.constant 0 : index
      %c0_56 = arith.constant 0 : index
      %c0_57 = arith.constant 0 : index
      %188 = vector.load %arg4[%c0_55, %c0_56, %c0_57] : memref<1x576x288xbf16, #tpu.memory_space<vmem>>, vector<1x576x288xbf16>
      %189 = vector.shape_cast %188 : vector<1x576x288xbf16> to vector<576x288xbf16>
      %190 = arith.truncf %187 : vector<16x576xf32> to vector<16x576xbf16>
      %cst_58 = arith.constant dense<0.000000e+00> : vector<16x288xf32>
      %191 = tpu.matmul %190, %189, %cst_58 {dimension_numbers = #tpu.dot_dimension_numbers<[1], [0], [0], [1], [0, 0, 1, 1], [], []>} : vector<16x576xbf16>, vector<576x288xbf16>, vector<16x288xf32> -> vector<16x288xf32>
      %192 = vector.broadcast %22 : vector<1x288xf32> to vector<16x288xf32>
      %193 = arith.addf %191, %192 : vector<16x288xf32>
      %194 = arith.addf %177, %193 : vector<16x288xf32>
      %cst_59 = arith.constant dense<0.000000e+00> : vector<16xf32>
      %195 = vector.multi_reduction <add>, %194, %cst_59 [1] : vector<16x288xf32> to vector<16xf32>
      %196 = vector.shape_cast %195 : vector<16xf32> to vector<16x1xf32>
      %cst_60 = arith.constant 2.880000e+02 : f32
      %197 = vector.broadcast %cst_60 : f32 to vector<16x1xf32>
      %198 = arith.divf %196, %197 : vector<16x1xf32>
      %199 = arith.mulf %194, %194 : vector<16x288xf32>
      %cst_61 = arith.constant dense<0.000000e+00> : vector<16xf32>
      %200 = vector.multi_reduction <add>, %199, %cst_61 [1] : vector<16x288xf32> to vector<16xf32>
      %201 = vector.shape_cast %200 : vector<16xf32> to vector<16x1xf32>
      %cst_62 = arith.constant 2.880000e+02 : f32
      %202 = vector.broadcast %cst_62 : f32 to vector<16x1xf32>
      %203 = arith.divf %201, %202 : vector<16x1xf32>
      %204 = arith.mulf %198, %198 : vector<16x1xf32>
      %205 = arith.subf %203, %204 : vector<16x1xf32>
      %cst_63 = arith.constant 9.99999974E-6 : f32
      %206 = vector.broadcast %cst_63 : f32 to vector<16x1xf32>
      %207 = arith.addf %205, %206 : vector<16x1xf32>
      %208 = math.rsqrt %207 : vector<16x1xf32>
      %209 = vector.broadcast %198 : vector<16x1xf32> to vector<16x288xf32>
      %210 = arith.subf %194, %209 : vector<16x288xf32>
      %211 = vector.broadcast %208 : vector<16x1xf32> to vector<16x288xf32>
      %212 = arith.mulf %210, %211 : vector<16x288xf32>
      %213 = vector.broadcast %25 : vector<1x288xf32> to vector<16x288xf32>
      %214 = arith.mulf %212, %213 : vector<16x288xf32>
      %215 = vector.broadcast %26 : vector<1x288xf32> to vector<16x288xf32>
      %216 = arith.addf %214, %215 : vector<16x288xf32>
      %c0_64 = arith.constant 0 : index
      %c0_65 = arith.constant 0 : index
      %217 = vector.load %arg31[%c0_64, %c0_65] : memref<16x288xf32, #tpu.memory_space<vmem>>, vector<16x288xf32>
      tpu.vector_store %arg31[%c0_64, %c0_65], %216 {strides = array<i32>} : memref<16x288xf32, #tpu.memory_space<vmem>>, vector<16x288xf32>,
    } else {
    }
    %c6_i32_3 = arith.constant 6 : i32
    %7 = arith.cmpi eq, %arg0, %c6_i32_3 : i32
    %8 = arith.extui %7 : i1 to i32
    %c0_i32_4 = arith.constant 0 : i32
    %9 = arith.cmpi ne, %8, %c0_i32_4 : i32
    scf.if %9 {
      %c0_8 = arith.constant 0 : index
      %c0_9 = arith.constant 0 : index
      %16 = vector.load %arg31[%c0_8, %c0_9] : memref<16x288xf32, #tpu.memory_space<vmem>>, vector<16x288xf32>
      %c0_10 = arith.constant 0 : index
      %c0_11 = arith.constant 0 : index
      %17 = vector.load %arg24[%c0_10, %c0_11] : memref<1x288xf32, #tpu.memory_space<vmem>>, vector<1x288xf32>
      %c0_12 = arith.constant 0 : index
      %c0_13 = arith.constant 0 : index
      %18 = vector.load %arg23[%c0_12, %c0_13] : memref<1x288xf32, #tpu.memory_space<vmem>>, vector<1x288xf32>
      %cst = arith.constant dense<0.000000e+00> : vector<16xf32>
      %19 = vector.multi_reduction <add>, %16, %cst [1] : vector<16x288xf32> to vector<16xf32>
      %20 = vector.shape_cast %19 : vector<16xf32> to vector<16x1xf32>
      %cst_14 = arith.constant 2.880000e+02 : f32
      %21 = vector.broadcast %cst_14 : f32 to vector<16x1xf32>
      %22 = arith.divf %20, %21 : vector<16x1xf32>
      %23 = arith.mulf %16, %16 : vector<16x288xf32>
      %cst_15 = arith.constant dense<0.000000e+00> : vector<16xf32>
      %24 = vector.multi_reduction <add>, %23, %cst_15 [1] : vector<16x288xf32> to vector<16xf32>
      %25 = vector.shape_cast %24 : vector<16xf32> to vector<16x1xf32>
      %cst_16 = arith.constant 2.880000e+02 : f32
      %26 = vector.broadcast %cst_16 : f32 to vector<16x1xf32>
      %27 = arith.divf %25, %26 : vector<16x1xf32>
      %28 = arith.mulf %22, %22 : vector<16x1xf32>
      %29 = arith.subf %27, %28 : vector<16x1xf32>
      %cst_17 = arith.constant 9.99999974E-6 : f32
      %30 = vector.broadcast %cst_17 : f32 to vector<16x1xf32>
      %31 = arith.addf %29, %30 : vector<16x1xf32>
      %32 = math.rsqrt %31 : vector<16x1xf32>
      %33 = vector.broadcast %22 : vector<16x1xf32> to vector<16x288xf32>
      %34 = arith.subf %16, %33 : vector<16x288xf32>
      %35 = vector.broadcast %32 : vector<16x1xf32> to vector<16x288xf32>
      %36 = arith.mulf %34, %35 : vector<16x288xf32>
      %37 = vector.broadcast %17 : vector<1x288xf32> to vector<16x288xf32>
      %38 = arith.mulf %36, %37 : vector<16x288xf32>
      %39 = vector.broadcast %18 : vector<1x288xf32> to vector<16x288xf32>
      %40 = arith.addf %38, %39 : vector<16x288xf32>
      %c0_18 = arith.constant 0 : index
      %c0_19 = arith.constant 0 : index
      %41 = vector.load %arg31[%c0_18, %c0_19] : memref<16x288xf32, #tpu.memory_space<vmem>>, vector<16x288xf32>
      tpu.vector_store %arg31[%c0_18, %c0_19], %40 {strides = array<i32>} : memref<16x288xf32, #tpu.memory_space<vmem>>, vector<16x288xf32>,
      %cst_20 = arith.constant 1.000000e+00 : f32
      %42 = vector.broadcast %cst_20 : f32 to vector<2x288xf32>
      %c0_21 = arith.constant 0 : index
      %c0_22 = arith.constant 0 : index
      %43 = vector.load %arg32[%c0_21, %c0_22] : memref<2x288xf32, #tpu.memory_space<vmem>>, vector<2x288xf32>
      tpu.vector_store %arg32[%c0_21, %c0_22], %42 {strides = array<i32>} : memref<2x288xf32, #tpu.memory_space<vmem>>, vector<2x288xf32>,
    } else {
    }
    %c6_i32_5 = arith.constant 6 : i32
    %10 = arith.cmpi sge, %arg0, %c6_i32_5 : i32
    %11 = arith.extui %10 : i1 to i32
    %c0_i32_6 = arith.constant 0 : i32
    %12 = arith.cmpi ne, %11, %c0_i32_6 : i32
    scf.if %12 {
      %c0_8 = arith.constant 0 : index
      %c0_9 = arith.constant 0 : index
      %c0_10 = arith.constant 0 : index
      %16 = vector.load %arg18[%c0_8, %c0_9, %c0_10] : memref<1x12x288xf32, #tpu.memory_space<vmem>>, vector<1x12x288xf32>
      %17 = vector.shape_cast %16 : vector<1x12x288xf32> to vector<12x288xf32>
      %18 = vector.extract_strided_slice %17 {offsets = [0, 0], sizes = [1, 288], strides = [1, 1]} : vector<12x288xf32> to vector<1x288xf32>
      %19 = vector.extract_strided_slice %17 {offsets = [1, 0], sizes = [1, 288], strides = [1, 1]} : vector<12x288xf32> to vector<1x288xf32>
      %20 = vector.extract_strided_slice %17 {offsets = [2, 0], sizes = [1, 288], strides = [1, 1]} : vector<12x288xf32> to vector<1x288xf32>
      %21 = vector.extract_strided_slice %17 {offsets = [3, 0], sizes = [1, 288], strides = [1, 1]} : vector<12x288xf32> to vector<1x288xf32>
      %22 = vector.extract_strided_slice %17 {offsets = [4, 0], sizes = [1, 288], strides = [1, 1]} : vector<12x288xf32> to vector<1x288xf32>
      %23 = vector.extract_strided_slice %17 {offsets = [5, 0], sizes = [1, 288], strides = [1, 1]} : vector<12x288xf32> to vector<1x288xf32>
      %24 = vector.extract_strided_slice %17 {offsets = [6, 0], sizes = [1, 288], strides = [1, 1]} : vector<12x288xf32> to vector<1x288xf32>
      %25 = vector.extract_strided_slice %17 {offsets = [7, 0], sizes = [1, 288], strides = [1, 1]} : vector<12x288xf32> to vector<1x288xf32>
      %26 = vector.extract_strided_slice %17 {offsets = [8, 0], sizes = [1, 288], strides = [1, 1]} : vector<12x288xf32> to vector<1x288xf32>
      %27 = vector.extract_strided_slice %17 {offsets = [9, 0], sizes = [1, 288], strides = [1, 1]} : vector<12x288xf32> to vector<1x288xf32>
      %28 = vector.extract_strided_slice %17 {offsets = [10, 0], sizes = [1, 288], strides = [1, 1]} : vector<12x288xf32> to vector<1x288xf32>
      %29 = vector.extract_strided_slice %17 {offsets = [11, 0], sizes = [1, 288], strides = [1, 1]} : vector<12x288xf32> to vector<1x288xf32>
      %c0_11 = arith.constant 0 : index
      %c0_12 = arith.constant 0 : index
      %30 = vector.load %arg32[%c0_11, %c0_12] : memref<2x288xf32, #tpu.memory_space<vmem>>, vector<2x288xf32>
      %c0_13 = arith.constant 0 : index
      %c0_14 = arith.constant 0 : index
      %31 = vector.load %arg31[%c0_13, %c0_14] : memref<16x288xf32, #tpu.memory_space<vmem>>, vector<16x288xf32>
      %c0_15 = arith.constant 0 : index
      %c0_16 = arith.constant 0 : index
      %c0_17 = arith.constant 0 : index
      %32 = vector.load %arg17[%c0_15, %c0_16, %c0_17] : memref<1x288x288xbf16, #tpu.memory_space<vmem>>, vector<1x288x288xbf16>
      %33 = vector.shape_cast %32 : vector<1x288x288xbf16> to vector<288x288xbf16>
      %34 = arith.truncf %30 : vector<2x288xf32> to vector<2x288xbf16>
      %cst = arith.constant dense<0.000000e+00> : vector<2x288xf32>
      %35 = tpu.matmul %34, %33, %cst {dimension_numbers = #tpu.dot_dimension_numbers<[1], [0], [0], [1], [0, 0, 1, 1], [], []>} : vector<2x288xbf16>, vector<288x288xbf16>, vector<2x288xf32> -> vector<2x288xf32>
      %36 = vector.broadcast %18 : vector<1x288xf32> to vector<2x288xf32>
      %37 = arith.addf %35, %36 : vector<2x288xf32>
      %38 = arith.addf %30, %37 : vector<2x288xf32>
      %cst_18 = arith.constant dense<0.000000e+00> : vector<2xf32>
      %39 = vector.multi_reduction <add>, %38, %cst_18 [1] : vector<2x288xf32> to vector<2xf32>
      %40 = vector.shape_cast %39 : vector<2xf32> to vector<2x1xf32>
      %cst_19 = arith.constant 2.880000e+02 : f32
      %41 = vector.broadcast %cst_19 : f32 to vector<2x1xf32>
      %42 = arith.divf %40, %41 : vector<2x1xf32>
      %43 = arith.mulf %38, %38 : vector<2x288xf32>
      %cst_20 = arith.constant dense<0.000000e+00> : vector<2xf32>
      %44 = vector.multi_reduction <add>, %43, %cst_20 [1] : vector<2x288xf32> to vector<2xf32>
      %45 = vector.shape_cast %44 : vector<2xf32> to vector<2x1xf32>
      %cst_21 = arith.constant 2.880000e+02 : f32
      %46 = vector.broadcast %cst_21 : f32 to vector<2x1xf32>
      %47 = arith.divf %45, %46 : vector<2x1xf32>
      %48 = arith.mulf %42, %42 : vector<2x1xf32>
      %49 = arith.subf %47, %48 : vector<2x1xf32>
      %cst_22 = arith.constant 9.99999974E-6 : f32
      %50 = vector.broadcast %cst_22 : f32 to vector<2x1xf32>
      %51 = arith.addf %49, %50 : vector<2x1xf32>
      %52 = math.rsqrt %51 : vector<2x1xf32>
      %53 = vector.broadcast %42 : vector<2x1xf32> to vector<2x288xf32>
      %54 = arith.subf %38, %53 : vector<2x288xf32>
      %55 = vector.broadcast %52 : vector<2x1xf32> to vector<2x288xf32>
      %56 = arith.mulf %54, %55 : vector<2x288xf32>
      %57 = vector.broadcast %24 : vector<1x288xf32> to vector<2x288xf32>
      %58 = arith.mulf %56, %57 : vector<2x288xf32>
      %59 = vector.broadcast %25 : vector<1x288xf32> to vector<2x288xf32>
      %60 = arith.addf %58, %59 : vector<2x288xf32>
      %c0_23 = arith.constant 0 : index
      %c0_24 = arith.constant 0 : index
      %c0_25 = arith.constant 0 : index
      %61 = vector.load %arg11[%c0_23, %c0_24, %c0_25] : memref<1x288x288xbf16, #tpu.memory_space<vmem>>, vector<1x288x288xbf16>
      %62 = vector.shape_cast %61 : vector<1x288x288xbf16> to vector<288x288xbf16>
      %63 = arith.truncf %60 : vector<2x288xf32> to vector<2x288xbf16>
      %cst_26 = arith.constant dense<0.000000e+00> : vector<2x288xf32>
      %64 = tpu.matmul %63, %62, %cst_26 {dimension_numbers = #tpu.dot_dimension_numbers<[1], [0], [0], [1], [0, 0, 1, 1], [], []>} : vector<2x288xbf16>, vector<288x288xbf16>, vector<2x288xf32> -> vector<2x288xf32>
      %65 = vector.broadcast %19 : vector<1x288xf32> to vector<2x288xf32>
      %66 = arith.addf %64, %65 : vector<2x288xf32>
      %67 = arith.truncf %31 : vector<16x288xf32> to vector<16x288xbf16>
      %c0_27 = arith.constant 0 : index
      %c0_28 = arith.constant 0 : index
      %c0_29 = arith.constant 0 : index
      %68 = vector.load %arg10[%c0_27, %c0_28, %c0_29] : memref<1x288x288xbf16, #tpu.memory_space<vmem>>, vector<1x288x288xbf16>
      %69 = vector.shape_cast %68 : vector<1x288x288xbf16> to vector<288x288xbf16>
      %cst_30 = arith.constant dense<0.000000e+00> : vector<16x288xf32>
      %70 = tpu.matmul %67, %69, %cst_30 {dimension_numbers = #tpu.dot_dimension_numbers<[1], [0], [0], [1], [0, 0, 1, 1], [], []>} : vector<16x288xbf16>, vector<288x288xbf16>, vector<16x288xf32> -> vector<16x288xf32>
      %71 = vector.broadcast %20 : vector<1x288xf32> to vector<16x288xf32>
      %72 = arith.addf %70, %71 : vector<16x288xf32>
      %c0_31 = arith.constant 0 : index
      %c0_32 = arith.constant 0 : index
      %c0_33 = arith.constant 0 : index
      %73 = vector.load %arg12[%c0_31, %c0_32, %c0_33] : memref<1x288x288xbf16, #tpu.memory_space<vmem>>, vector<1x288x288xbf16>
      %74 = vector.shape_cast %73 : vector<1x288x288xbf16> to vector<288x288xbf16>
      %cst_34 = arith.constant dense<0.000000e+00> : vector<16x288xf32>
      %75 = tpu.matmul %67, %74, %cst_34 {dimension_numbers = #tpu.dot_dimension_numbers<[1], [0], [0], [1], [0, 0, 1, 1], [], []>} : vector<16x288xbf16>, vector<288x288xbf16>, vector<16x288xf32> -> vector<16x288xf32>
      %76 = vector.broadcast %21 : vector<1x288xf32> to vector<16x288xf32>
      %77 = arith.addf %75, %76 : vector<16x288xf32>
      %c0_35 = arith.constant 0 : index
      %c0_36 = arith.constant 0 : index
      %78 = vector.load %arg19[%c0_35, %c0_36] : memref<16x16xf32, #tpu.memory_space<vmem>>, vector<16x16xf32>
      %79 = arith.truncf %72 : vector<16x288xf32> to vector<16x288xbf16>
      %80 = vector.extract_strided_slice %0 {offsets = [0, 0], sizes = [1, 288], strides = [1, 1]} : vector<8x288xf32> to vector<1x288xf32>
      %81 = vector.broadcast %80 : vector<1x288xf32> to vector<2x288xf32>
      %82 = arith.mulf %66, %81 : vector<2x288xf32>
      %83 = vector.extract_strided_slice %0 {offsets = [1, 0], sizes = [1, 288], strides = [1, 1]} : vector<8x288xf32> to vector<1x288xf32>
      %84 = vector.broadcast %83 : vector<1x288xf32> to vector<2x288xf32>
      %85 = arith.mulf %66, %84 : vector<2x288xf32>
      %86 = vector.extract_strided_slice %0 {offsets = [2, 0], sizes = [1, 288], strides = [1, 1]} : vector<8x288xf32> to vector<1x288xf32>
      %87 = vector.broadcast %86 : vector<1x288xf32> to vector<2x288xf32>
      %88 = arith.mulf %66, %87 : vector<2x288xf32>
      %89 = vector.extract_strided_slice %0 {offsets = [3, 0], sizes = [1, 288], strides = [1, 1]} : vector<8x288xf32> to vector<1x288xf32>
      %90 = vector.broadcast %89 : vector<1x288xf32> to vector<2x288xf32>
      %91 = arith.mulf %66, %90 : vector<2x288xf32>
      %92 = vector.extract_strided_slice %0 {offsets = [4, 0], sizes = [1, 288], strides = [1, 1]} : vector<8x288xf32> to vector<1x288xf32>
      %93 = vector.broadcast %92 : vector<1x288xf32> to vector<2x288xf32>
      %94 = arith.mulf %66, %93 : vector<2x288xf32>
      %95 = vector.extract_strided_slice %0 {offsets = [5, 0], sizes = [1, 288], strides = [1, 1]} : vector<8x288xf32> to vector<1x288xf32>
      %96 = vector.broadcast %95 : vector<1x288xf32> to vector<2x288xf32>
      %97 = arith.mulf %66, %96 : vector<2x288xf32>
      %98 = vector.extract_strided_slice %0 {offsets = [6, 0], sizes = [1, 288], strides = [1, 1]} : vector<8x288xf32> to vector<1x288xf32>
      %99 = vector.broadcast %98 : vector<1x288xf32> to vector<2x288xf32>
      %100 = arith.mulf %66, %99 : vector<2x288xf32>
      %101 = vector.extract_strided_slice %0 {offsets = [7, 0], sizes = [1, 288], strides = [1, 1]} : vector<8x288xf32> to vector<1x288xf32>
      %102 = vector.broadcast %101 : vector<1x288xf32> to vector<2x288xf32>
      %103 = arith.mulf %66, %102 : vector<2x288xf32>
      %104 = tpu.concatenate %82, %85, %88, %91, %94, %97, %100, %103 in 0 : vector<2x288xf32>, vector<2x288xf32>, vector<2x288xf32>, vector<2x288xf32>, vector<2x288xf32>, vector<2x288xf32>, vector<2x288xf32>, vector<2x288xf32> -> vector<16x288xf32>
      %105 = arith.truncf %104 : vector<16x288xf32> to vector<16x288xbf16>
      %cst_37 = arith.constant dense<0.000000e+00> : vector<16x16xf32>
      %106 = tpu.matmul %105, %79, %cst_37 {dimension_numbers = #tpu.dot_dimension_numbers<[1], [1], [0], [0], [0, 0, 1, 0], [], []>} : vector<16x288xbf16>, vector<16x288xbf16>, vector<16x16xf32> -> vector<16x16xf32>
      %107 = arith.addf %106, %78 : vector<16x16xf32>
      %cst_38 = arith.constant dense<0xFF800000> : vector<16xf32>
      %108 = vector.multi_reduction <maximumf>, %107, %cst_38 [1] : vector<16x16xf32> to vector<16xf32>
      %109 = vector.shape_cast %108 : vector<16xf32> to vector<16x1xf32>
      %110 = vector.broadcast %109 : vector<16x1xf32> to vector<16x16xf32>
      %111 = arith.subf %107, %110 : vector<16x16xf32>
      %112 = math.exp %111 : vector<16x16xf32>
      %cst_39 = arith.constant dense<0.000000e+00> : vector<16xf32>
      %113 = vector.multi_reduction <add>, %112, %cst_39 [1] : vector<16x16xf32> to vector<16xf32>
      %114 = vector.shape_cast %113 : vector<16xf32> to vector<16x1xf32>
      %115 = tpu.reciprocal %114 {approx = true} : vector<16x1xf32> -> vector<16x1xf32>
      %116 = vector.broadcast %115 : vector<16x1xf32> to vector<16x16xf32>
      %117 = arith.mulf %112, %116 : vector<16x16xf32>
      %cst_40 = arith.constant 0.000000e+00 : f32
      %118 = vector.broadcast %cst_40 : f32 to vector<2x288xf32>
      %119 = vector.extract_strided_slice %117 {offsets = [0, 0], sizes = [2, 16], strides = [1, 1]} : vector<16x16xf32> to vector<2x16xf32>
      %120 = arith.truncf %119 : vector<2x16xf32> to vector<2x16xbf16>
      %121 = vector.extract_strided_slice %0 {offsets = [0, 0], sizes = [1, 288], strides = [1, 1]} : vector<8x288xf32> to vector<1x288xf32>
      %122 = vector.broadcast %121 : vector<1x288xf32> to vector<16x288xf32>
      %123 = arith.mulf %77, %122 : vector<16x288xf32>
      %124 = arith.truncf %123 : vector<16x288xf32> to vector<16x288xbf16>
      %cst_41 = arith.constant dense<0.000000e+00> : vector<2x288xf32>
      %125 = tpu.matmul %120, %124, %cst_41 {dimension_numbers = #tpu.dot_dimension_numbers<[1], [0], [0], [1], [0, 0, 1, 1], [], []>} : vector<2x16xbf16>, vector<16x288xbf16>, vector<2x288xf32> -> vector<2x288xf32>
      %126 = arith.addf %118, %125 : vector<2x288xf32>
      %127 = vector.extract_strided_slice %117 {offsets = [2, 0], sizes = [2, 16], strides = [1, 1]} : vector<16x16xf32> to vector<2x16xf32>
      %128 = arith.truncf %127 : vector<2x16xf32> to vector<2x16xbf16>
      %129 = vector.extract_strided_slice %0 {offsets = [1, 0], sizes = [1, 288], strides = [1, 1]} : vector<8x288xf32> to vector<1x288xf32>
      %130 = vector.broadcast %129 : vector<1x288xf32> to vector<16x288xf32>
      %131 = arith.mulf %77, %130 : vector<16x288xf32>
      %132 = arith.truncf %131 : vector<16x288xf32> to vector<16x288xbf16>
      %cst_42 = arith.constant dense<0.000000e+00> : vector<2x288xf32>
      %133 = tpu.matmul %128, %132, %cst_42 {dimension_numbers = #tpu.dot_dimension_numbers<[1], [0], [0], [1], [0, 0, 1, 1], [], []>} : vector<2x16xbf16>, vector<16x288xbf16>, vector<2x288xf32> -> vector<2x288xf32>
      %134 = arith.addf %126, %133 : vector<2x288xf32>
      %135 = vector.extract_strided_slice %117 {offsets = [4, 0], sizes = [2, 16], strides = [1, 1]} : vector<16x16xf32> to vector<2x16xf32>
      %136 = arith.truncf %135 : vector<2x16xf32> to vector<2x16xbf16>
      %137 = vector.extract_strided_slice %0 {offsets = [2, 0], sizes = [1, 288], strides = [1, 1]} : vector<8x288xf32> to vector<1x288xf32>
      %138 = vector.broadcast %137 : vector<1x288xf32> to vector<16x288xf32>
      %139 = arith.mulf %77, %138 : vector<16x288xf32>
      %140 = arith.truncf %139 : vector<16x288xf32> to vector<16x288xbf16>
      %cst_43 = arith.constant dense<0.000000e+00> : vector<2x288xf32>
      %141 = tpu.matmul %136, %140, %cst_43 {dimension_numbers = #tpu.dot_dimension_numbers<[1], [0], [0], [1], [0, 0, 1, 1], [], []>} : vector<2x16xbf16>, vector<16x288xbf16>, vector<2x288xf32> -> vector<2x288xf32>
      %142 = arith.addf %134, %141 : vector<2x288xf32>
      %143 = vector.extract_strided_slice %117 {offsets = [6, 0], sizes = [2, 16], strides = [1, 1]} : vector<16x16xf32> to vector<2x16xf32>
      %144 = arith.truncf %143 : vector<2x16xf32> to vector<2x16xbf16>
      %145 = vector.extract_strided_slice %0 {offsets = [3, 0], sizes = [1, 288], strides = [1, 1]} : vector<8x288xf32> to vector<1x288xf32>
      %146 = vector.broadcast %145 : vector<1x288xf32> to vector<16x288xf32>
      %147 = arith.mulf %77, %146 : vector<16x288xf32>
      %148 = arith.truncf %147 : vector<16x288xf32> to vector<16x288xbf16>
      %cst_44 = arith.constant dense<0.000000e+00> : vector<2x288xf32>
      %149 = tpu.matmul %144, %148, %cst_44 {dimension_numbers = #tpu.dot_dimension_numbers<[1], [0], [0], [1], [0, 0, 1, 1], [], []>} : vector<2x16xbf16>, vector<16x288xbf16>, vector<2x288xf32> -> vector<2x288xf32>
      %150 = arith.addf %142, %149 : vector<2x288xf32>
      %151 = vector.extract_strided_slice %117 {offsets = [8, 0], sizes = [2, 16], strides = [1, 1]} : vector<16x16xf32> to vector<2x16xf32>
      %152 = arith.truncf %151 : vector<2x16xf32> to vector<2x16xbf16>
      %153 = vector.extract_strided_slice %0 {offsets = [4, 0], sizes = [1, 288], strides = [1, 1]} : vector<8x288xf32> to vector<1x288xf32>
      %154 = vector.broadcast %153 : vector<1x288xf32> to vector<16x288xf32>
      %155 = arith.mulf %77, %154 : vector<16x288xf32>
      %156 = arith.truncf %155 : vector<16x288xf32> to vector<16x288xbf16>
      %cst_45 = arith.constant dense<0.000000e+00> : vector<2x288xf32>
      %157 = tpu.matmul %152, %156, %cst_45 {dimension_numbers = #tpu.dot_dimension_numbers<[1], [0], [0], [1], [0, 0, 1, 1], [], []>} : vector<2x16xbf16>, vector<16x288xbf16>, vector<2x288xf32> -> vector<2x288xf32>
      %158 = arith.addf %150, %157 : vector<2x288xf32>
      %159 = vector.extract_strided_slice %117 {offsets = [10, 0], sizes = [2, 16], strides = [1, 1]} : vector<16x16xf32> to vector<2x16xf32>
      %160 = arith.truncf %159 : vector<2x16xf32> to vector<2x16xbf16>
      %161 = vector.extract_strided_slice %0 {offsets = [5, 0], sizes = [1, 288], strides = [1, 1]} : vector<8x288xf32> to vector<1x288xf32>
      %162 = vector.broadcast %161 : vector<1x288xf32> to vector<16x288xf32>
      %163 = arith.mulf %77, %162 : vector<16x288xf32>
      %164 = arith.truncf %163 : vector<16x288xf32> to vector<16x288xbf16>
      %cst_46 = arith.constant dense<0.000000e+00> : vector<2x288xf32>
      %165 = tpu.matmul %160, %164, %cst_46 {dimension_numbers = #tpu.dot_dimension_numbers<[1], [0], [0], [1], [0, 0, 1, 1], [], []>} : vector<2x16xbf16>, vector<16x288xbf16>, vector<2x288xf32> -> vector<2x288xf32>
      %166 = arith.addf %158, %165 : vector<2x288xf32>
      %167 = vector.extract_strided_slice %117 {offsets = [12, 0], sizes = [2, 16], strides = [1, 1]} : vector<16x16xf32> to vector<2x16xf32>
      %168 = arith.truncf %167 : vector<2x16xf32> to vector<2x16xbf16>
      %169 = vector.extract_strided_slice %0 {offsets = [6, 0], sizes = [1, 288], strides = [1, 1]} : vector<8x288xf32> to vector<1x288xf32>
      %170 = vector.broadcast %169 : vector<1x288xf32> to vector<16x288xf32>
      %171 = arith.mulf %77, %170 : vector<16x288xf32>
      %172 = arith.truncf %171 : vector<16x288xf32> to vector<16x288xbf16>
      %cst_47 = arith.constant dense<0.000000e+00> : vector<2x288xf32>
      %173 = tpu.matmul %168, %172, %cst_47 {dimension_numbers = #tpu.dot_dimension_numbers<[1], [0], [0], [1], [0, 0, 1, 1], [], []>} : vector<2x16xbf16>, vector<16x288xbf16>, vector<2x288xf32> -> vector<2x288xf32>
      %174 = arith.addf %166, %173 : vector<2x288xf32>
      %175 = vector.extract_strided_slice %117 {offsets = [14, 0], sizes = [2, 16], strides = [1, 1]} : vector<16x16xf32> to vector<2x16xf32>
      %176 = arith.truncf %175 : vector<2x16xf32> to vector<2x16xbf16>
      %177 = vector.extract_strided_slice %0 {offsets = [7, 0], sizes = [1, 288], strides = [1, 1]} : vector<8x288xf32> to vector<1x288xf32>
      %178 = vector.broadcast %177 : vector<1x288xf32> to vector<16x288xf32>
      %179 = arith.mulf %77, %178 : vector<16x288xf32>
      %180 = arith.truncf %179 : vector<16x288xf32> to vector<16x288xbf16>
      %cst_48 = arith.constant dense<0.000000e+00> : vector<2x288xf32>
      %181 = tpu.matmul %176, %180, %cst_48 {dimension_numbers = #tpu.dot_dimension_numbers<[1], [0], [0], [1], [0, 0, 1, 1], [], []>} : vector<2x16xbf16>, vector<16x288xbf16>, vector<2x288xf32> -> vector<2x288xf32>
      %182 = arith.addf %174, %181 : vector<2x288xf32>
      %c0_49 = arith.constant 0 : index
      %c0_50 = arith.constant 0 : index
      %c0_51 = arith.constant 0 : index
      %183 = vector.load %arg13[%c0_49, %c0_50, %c0_51] : memref<1x288x288xbf16, #tpu.memory_space<vmem>>, vector<1x288x288xbf16>
      %184 = vector.shape_cast %183 : vector<1x288x288xbf16> to vector<288x288xbf16>
      %185 = arith.truncf %182 : vector<2x288xf32> to vector<2x288xbf16>
      %cst_52 = arith.constant dense<0.000000e+00> : vector<2x288xf32>
      %186 = tpu.matmul %185, %184, %cst_52 {dimension_numbers = #tpu.dot_dimension_numbers<[1], [0], [0], [1], [0, 0, 1, 1], [], []>} : vector<2x288xbf16>, vector<288x288xbf16>, vector<2x288xf32> -> vector<2x288xf32>
      %187 = vector.broadcast %22 : vector<1x288xf32> to vector<2x288xf32>
      %188 = arith.addf %186, %187 : vector<2x288xf32>
      %189 = arith.addf %60, %188 : vector<2x288xf32>
      %cst_53 = arith.constant dense<0.000000e+00> : vector<2xf32>
      %190 = vector.multi_reduction <add>, %189, %cst_53 [1] : vector<2x288xf32> to vector<2xf32>
      %191 = vector.shape_cast %190 : vector<2xf32> to vector<2x1xf32>
      %cst_54 = arith.constant 2.880000e+02 : f32
      %192 = vector.broadcast %cst_54 : f32 to vector<2x1xf32>
      %193 = arith.divf %191, %192 : vector<2x1xf32>
      %194 = arith.mulf %189, %189 : vector<2x288xf32>
      %cst_55 = arith.constant dense<0.000000e+00> : vector<2xf32>
      %195 = vector.multi_reduction <add>, %194, %cst_55 [1] : vector<2x288xf32> to vector<2xf32>
      %196 = vector.shape_cast %195 : vector<2xf32> to vector<2x1xf32>
      %cst_56 = arith.constant 2.880000e+02 : f32
      %197 = vector.broadcast %cst_56 : f32 to vector<2x1xf32>
      %198 = arith.divf %196, %197 : vector<2x1xf32>
      %199 = arith.mulf %193, %193 : vector<2x1xf32>
      %200 = arith.subf %198, %199 : vector<2x1xf32>
      %cst_57 = arith.constant 9.99999974E-6 : f32
      %201 = vector.broadcast %cst_57 : f32 to vector<2x1xf32>
      %202 = arith.addf %200, %201 : vector<2x1xf32>
      %203 = math.rsqrt %202 : vector<2x1xf32>
      %204 = vector.broadcast %193 : vector<2x1xf32> to vector<2x288xf32>
      %205 = arith.subf %189, %204 : vector<2x288xf32>
      %206 = vector.broadcast %203 : vector<2x1xf32> to vector<2x288xf32>
      %207 = arith.mulf %205, %206 : vector<2x288xf32>
      %208 = vector.broadcast %26 : vector<1x288xf32> to vector<2x288xf32>
      %209 = arith.mulf %207, %208 : vector<2x288xf32>
      %210 = vector.broadcast %27 : vector<1x288xf32> to vector<2x288xf32>
      %211 = arith.addf %209, %210 : vector<2x288xf32>
      %c0_58 = arith.constant 0 : index
      %c0_59 = arith.constant 0 : index
      %c0_60 = arith.constant 0 : index
      %212 = vector.load %arg15[%c0_58, %c0_59, %c0_60] : memref<1x288x576xbf16, #tpu.memory_space<vmem>>, vector<1x288x576xbf16>
      %213 = vector.shape_cast %212 : vector<1x288x576xbf16> to vector<288x576xbf16>
      %c0_61 = arith.constant 0 : index
      %c0_62 = arith.constant 0 : index
      %c0_63 = arith.constant 0 : index
      %214 = vector.load %arg14[%c0_61, %c0_62, %c0_63] : memref<1x1x576xf32, #tpu.memory_space<vmem>>, vector<1x1x576xf32>
      %215 = vector.shape_cast %214 : vector<1x1x576xf32> to vector<1x576xf32>
      %216 = arith.truncf %211 : vector<2x288xf32> to vector<2x288xbf16>
      %cst_64 = arith.constant dense<0.000000e+00> : vector<2x576xf32>
      %217 = tpu.matmul %216, %213, %cst_64 {dimension_numbers = #tpu.dot_dimension_numbers<[1], [0], [0], [1], [0, 0, 1, 1], [], []>} : vector<2x288xbf16>, vector<288x576xbf16>, vector<2x576xf32> -> vector<2x576xf32>
      %218 = vector.broadcast %215 : vector<1x576xf32> to vector<2x576xf32>
      %219 = arith.addf %217, %218 : vector<2x576xf32>
      %cst_65 = arith.constant 0.000000e+00 : f32
      %220 = vector.broadcast %cst_65 : f32 to vector<2x576xf32>
      %221 = arith.maximumf %219, %220 : vector<2x576xf32>
      %c0_66 = arith.constant 0 : index
      %c0_67 = arith.constant 0 : index
      %c0_68 = arith.constant 0 : index
      %222 = vector.load %arg16[%c0_66, %c0_67, %c0_68] : memref<1x576x288xbf16, #tpu.memory_space<vmem>>, vector<1x576x288xbf16>
      %223 = vector.shape_cast %222 : vector<1x576x288xbf16> to vector<576x288xbf16>
      %224 = arith.truncf %221 : vector<2x576xf32> to vector<2x576xbf16>
      %cst_69 = arith.constant dense<0.000000e+00> : vector<2x288xf32>
      %225 = tpu.matmul %224, %223, %cst_69 {dimension_numbers = #tpu.dot_dimension_numbers<[1], [0], [0], [1], [0, 0, 1, 1], [], []>} : vector<2x576xbf16>, vector<576x288xbf16>, vector<2x288xf32> -> vector<2x288xf32>
      %226 = vector.broadcast %23 : vector<1x288xf32> to vector<2x288xf32>
      %227 = arith.addf %225, %226 : vector<2x288xf32>
      %228 = arith.addf %211, %227 : vector<2x288xf32>
      %cst_70 = arith.constant dense<0.000000e+00> : vector<2xf32>
      %229 = vector.multi_reduction <add>, %228, %cst_70 [1] : vector<2x288xf32> to vector<2xf32>
      %230 = vector.shape_cast %229 : vector<2xf32> to vector<2x1xf32>
      %cst_71 = arith.constant 2.880000e+02 : f32
      %231 = vector.broadcast %cst_71 : f32 to vector<2x1xf32>
      %232 = arith.divf %230, %231 : vector<2x1xf32>
      %233 = arith.mulf %228, %228 : vector<2x288xf32>
      %cst_72 = arith.constant dense<0.000000e+00> : vector<2xf32>
      %234 = vector.multi_reduction <add>, %233, %cst_72 [1] : vector<2x288xf32> to vector<2xf32>
      %235 = vector.shape_cast %234 : vector<2xf32> to vector<2x1xf32>
      %cst_73 = arith.constant 2.880000e+02 : f32
      %236 = vector.broadcast %cst_73 : f32 to vector<2x1xf32>
      %237 = arith.divf %235, %236 : vector<2x1xf32>
      %238 = arith.mulf %232, %232 : vector<2x1xf32>
      %239 = arith.subf %237, %238 : vector<2x1xf32>
      %cst_74 = arith.constant 9.99999974E-6 : f32
      %240 = vector.broadcast %cst_74 : f32 to vector<2x1xf32>
      %241 = arith.addf %239, %240 : vector<2x1xf32>
      %242 = math.rsqrt %241 : vector<2x1xf32>
      %243 = vector.broadcast %232 : vector<2x1xf32> to vector<2x288xf32>
      %244 = arith.subf %228, %243 : vector<2x288xf32>
      %245 = vector.broadcast %242 : vector<2x1xf32> to vector<2x288xf32>
      %246 = arith.mulf %244, %245 : vector<2x288xf32>
      %247 = vector.broadcast %28 : vector<1x288xf32> to vector<2x288xf32>
      %248 = arith.mulf %246, %247 : vector<2x288xf32>
      %249 = vector.broadcast %29 : vector<1x288xf32> to vector<2x288xf32>
      %250 = arith.addf %248, %249 : vector<2x288xf32>
      %c0_75 = arith.constant 0 : index
      %c0_76 = arith.constant 0 : index
      %251 = vector.load %arg32[%c0_75, %c0_76] : memref<2x288xf32, #tpu.memory_space<vmem>>, vector<2x288xf32>
      tpu.vector_store %arg32[%c0_75, %c0_76], %250 {strides = array<i32>} : memref<2x288xf32, #tpu.memory_space<vmem>>, vector<2x288xf32>,
    } else {
    }
    %c11_i32 = arith.constant 11 : i32
    %13 = arith.cmpi eq, %arg0, %c11_i32 : i32
    %14 = arith.extui %13 : i1 to i32
    %c0_i32_7 = arith.constant 0 : i32
    %15 = arith.cmpi ne, %14, %c0_i32_7 : i32
    scf.if %15 {
      %c0_8 = arith.constant 0 : index
      %c0_9 = arith.constant 0 : index
      %16 = vector.load %arg32[%c0_8, %c0_9] : memref<2x288xf32, #tpu.memory_space<vmem>>, vector<2x288xf32>
      %c0_10 = arith.constant 0 : index
      %c0_11 = arith.constant 0 : index
      %17 = vector.load %arg21[%c0_10, %c0_11] : memref<1x288xf32, #tpu.memory_space<vmem>>, vector<1x288xf32>
      %c0_12 = arith.constant 0 : index
      %c0_13 = arith.constant 0 : index
      %18 = vector.load %arg20[%c0_12, %c0_13] : memref<1x288xf32, #tpu.memory_space<vmem>>, vector<1x288xf32>
      %cst = arith.constant dense<0.000000e+00> : vector<2xf32>
      %19 = vector.multi_reduction <add>, %16, %cst [1] : vector<2x288xf32> to vector<2xf32>
      %20 = vector.shape_cast %19 : vector<2xf32> to vector<2x1xf32>
      %cst_14 = arith.constant 2.880000e+02 : f32
      %21 = vector.broadcast %cst_14 : f32 to vector<2x1xf32>
      %22 = arith.divf %20, %21 : vector<2x1xf32>
      %23 = arith.mulf %16, %16 : vector<2x288xf32>
      %cst_15 = arith.constant dense<0.000000e+00> : vector<2xf32>
      %24 = vector.multi_reduction <add>, %23, %cst_15 [1] : vector<2x288xf32> to vector<2xf32>
      %25 = vector.shape_cast %24 : vector<2xf32> to vector<2x1xf32>
      %cst_16 = arith.constant 2.880000e+02 : f32
      %26 = vector.broadcast %cst_16 : f32 to vector<2x1xf32>
      %27 = arith.divf %25, %26 : vector<2x1xf32>
      %28 = arith.mulf %22, %22 : vector<2x1xf32>
      %29 = arith.subf %27, %28 : vector<2x1xf32>
      %cst_17 = arith.constant 9.99999974E-6 : f32
      %30 = vector.broadcast %cst_17 : f32 to vector<2x1xf32>
      %31 = arith.addf %29, %30 : vector<2x1xf32>
      %32 = math.rsqrt %31 : vector<2x1xf32>
      %33 = vector.broadcast %22 : vector<2x1xf32> to vector<2x288xf32>
      %34 = arith.subf %16, %33 : vector<2x288xf32>
      %35 = vector.broadcast %32 : vector<2x1xf32> to vector<2x288xf32>
      %36 = arith.mulf %34, %35 : vector<2x288xf32>
      %37 = vector.broadcast %17 : vector<1x288xf32> to vector<2x288xf32>
      %38 = arith.mulf %36, %37 : vector<2x288xf32>
      %39 = vector.broadcast %18 : vector<1x288xf32> to vector<2x288xf32>
      %40 = arith.addf %38, %39 : vector<2x288xf32>
      %c0_18 = arith.constant 0 : index
      %c0_19 = arith.constant 0 : index
      %41 = vector.load %arg26[%c0_18, %c0_19] : memref<288x288xbf16, #tpu.memory_space<vmem>>, vector<288x288xbf16>
      %c0_20 = arith.constant 0 : index
      %c0_21 = arith.constant 0 : index
      %42 = vector.load %arg25[%c0_20, %c0_21] : memref<1x288xf32, #tpu.memory_space<vmem>>, vector<1x288xf32>
      %43 = arith.truncf %40 : vector<2x288xf32> to vector<2x288xbf16>
      %cst_22 = arith.constant dense<0.000000e+00> : vector<2x288xf32>
      %44 = tpu.matmul %43, %41, %cst_22 {dimension_numbers = #tpu.dot_dimension_numbers<[1], [0], [0], [1], [0, 0, 1, 1], [], []>} : vector<2x288xbf16>, vector<288x288xbf16>, vector<2x288xf32> -> vector<2x288xf32>
      %45 = vector.broadcast %42 : vector<1x288xf32> to vector<2x288xf32>
      %46 = arith.addf %44, %45 : vector<2x288xf32>
      %cst_23 = arith.constant 0.000000e+00 : f32
      %47 = vector.broadcast %cst_23 : f32 to vector<2x288xf32>
      %48 = arith.maximumf %46, %47 : vector<2x288xf32>
      %c0_24 = arith.constant 0 : index
      %c0_25 = arith.constant 0 : index
      %49 = vector.load %arg28[%c0_24, %c0_25] : memref<288x144xbf16, #tpu.memory_space<vmem>>, vector<288x144xbf16>
      %c0_26 = arith.constant 0 : index
      %c0_27 = arith.constant 0 : index
      %50 = vector.load %arg27[%c0_26, %c0_27] : memref<1x144xf32, #tpu.memory_space<vmem>>, vector<1x144xf32>
      %51 = arith.truncf %48 : vector<2x288xf32> to vector<2x288xbf16>
      %cst_28 = arith.constant dense<0.000000e+00> : vector<2x144xf32>
      %52 = tpu.matmul %51, %49, %cst_28 {dimension_numbers = #tpu.dot_dimension_numbers<[1], [0], [0], [1], [0, 0, 1, 1], [], []>} : vector<2x288xbf16>, vector<288x144xbf16>, vector<2x144xf32> -> vector<2x144xf32>
      %53 = vector.broadcast %50 : vector<1x144xf32> to vector<2x144xf32>
      %54 = arith.addf %52, %53 : vector<2x144xf32>
      %c0_29 = arith.constant 0 : index
      %c0_30 = arith.constant 0 : index
      %55 = vector.load %arg30[%c0_29, %c0_30] : memref<2x144xf32, #tpu.memory_space<vmem>>, vector<2x144xf32>
      tpu.vector_store %arg30[%c0_29, %c0_30], %54 {strides = array<i32>} : memref<2x144xf32, #tpu.memory_space<vmem>>, vector<2x144xf32>,
    } else {
    }
    return
  }
  func.func @transform_0(%arg0: i32) -> (i32, i32) {
    %c0_i32 = arith.constant 0 : i32
    %c0_i32_0 = arith.constant 0 : i32
    %c0_i32_1 = arith.constant 0 : i32
    return %c0_i32, %c0_i32_0 : i32, i32
  }
  func.func @transform_1(%arg0: i32) -> (i32, i32, i32) {
    %c5_i32 = arith.constant 5 : i32
    %0 = arith.minsi %arg0, %c5_i32 : i32
    %c0_i32 = arith.constant 0 : i32
    %c0_i32_0 = arith.constant 0 : i32
    %c0_i32_1 = arith.constant 0 : i32
    return %0, %c0_i32, %c0_i32_0 : i32, i32, i32
  }
  func.func @transform_2(%arg0: i32) -> (i32, i32, i32) {
    %c5_i32 = arith.constant 5 : i32
    %0 = arith.minsi %arg0, %c5_i32 : i32
    %c0_i32 = arith.constant 0 : i32
    %c0_i32_0 = arith.constant 0 : i32
    %c0_i32_1 = arith.constant 0 : i32
    return %0, %c0_i32, %c0_i32_0 : i32, i32, i32
  }
  func.func @transform_3(%arg0: i32) -> (i32, i32, i32) {
    %c5_i32 = arith.constant 5 : i32
    %0 = arith.minsi %arg0, %c5_i32 : i32
    %c0_i32 = arith.constant 0 : i32
    %c0_i32_0 = arith.constant 0 : i32
    %c0_i32_1 = arith.constant 0 : i32
    return %0, %c0_i32, %c0_i32_0 : i32, i32, i32
  }
  func.func @transform_4(%arg0: i32) -> (i32, i32, i32) {
    %c5_i32 = arith.constant 5 : i32
    %0 = arith.minsi %arg0, %c5_i32 : i32
    %c0_i32 = arith.constant 0 : i32
    %c0_i32_0 = arith.constant 0 : i32
    %c0_i32_1 = arith.constant 0 : i32
    return %0, %c0_i32, %c0_i32_0 : i32, i32, i32
  }
  func.func @transform_5(%arg0: i32) -> (i32, i32, i32) {
    %c5_i32 = arith.constant 5 : i32
    %0 = arith.minsi %arg0, %c5_i32 : i32
    %c0_i32 = arith.constant 0 : i32
    %c0_i32_0 = arith.constant 0 : i32
    %c0_i32_1 = arith.constant 0 : i32
    return %0, %c0_i32, %c0_i32_0 : i32, i32, i32
  }
  func.func @transform_6(%arg0: i32) -> (i32, i32, i32) {
    %c5_i32 = arith.constant 5 : i32
    %0 = arith.minsi %arg0, %c5_i32 : i32
    %c0_i32 = arith.constant 0 : i32
    %c0_i32_0 = arith.constant 0 : i32
    %c0_i32_1 = arith.constant 0 : i32
    return %0, %c0_i32, %c0_i32_0 : i32, i32, i32
  }
  func.func @transform_7(%arg0: i32) -> (i32, i32, i32) {
    %c5_i32 = arith.constant 5 : i32
    %0 = arith.minsi %arg0, %c5_i32 : i32
    %c0_i32 = arith.constant 0 : i32
    %c0_i32_0 = arith.constant 0 : i32
    %c0_i32_1 = arith.constant 0 : i32
    return %0, %c0_i32, %c0_i32_0 : i32, i32, i32
  }
  func.func @transform_8(%arg0: i32) -> (i32, i32, i32) {
    %c5_i32 = arith.constant 5 : i32
    %0 = arith.minsi %arg0, %c5_i32 : i32
    %c0_i32 = arith.constant 0 : i32
    %c0_i32_0 = arith.constant 0 : i32
    %c0_i32_1 = arith.constant 0 : i32
    return %0, %c0_i32, %c0_i32_0 : i32, i32, i32
  }
  func.func @transform_9(%arg0: i32) -> (i32, i32, i32) {
    %c6_i32 = arith.constant 6 : i32
    %0 = arith.subi %arg0, %c6_i32 : i32
    %c0_i32 = arith.constant 0 : i32
    %1 = arith.maxsi %0, %c0_i32 : i32
    %c0_i32_0 = arith.constant 0 : i32
    %c0_i32_1 = arith.constant 0 : i32
    %c0_i32_2 = arith.constant 0 : i32
    return %1, %c0_i32_0, %c0_i32_1 : i32, i32, i32
  }
  func.func @transform_10(%arg0: i32) -> (i32, i32, i32) {
    %c6_i32 = arith.constant 6 : i32
    %0 = arith.subi %arg0, %c6_i32 : i32
    %c0_i32 = arith.constant 0 : i32
    %1 = arith.maxsi %0, %c0_i32 : i32
    %c0_i32_0 = arith.constant 0 : i32
    %c0_i32_1 = arith.constant 0 : i32
    %c0_i32_2 = arith.constant 0 : i32
    return %1, %c0_i32_0, %c0_i32_1 : i32, i32, i32
  }
  func.func @transform_11(%arg0: i32) -> (i32, i32, i32) {
    %c6_i32 = arith.constant 6 : i32
    %0 = arith.subi %arg0, %c6_i32 : i32
    %c0_i32 = arith.constant 0 : i32
    %1 = arith.maxsi %0, %c0_i32 : i32
    %c0_i32_0 = arith.constant 0 : i32
    %c0_i32_1 = arith.constant 0 : i32
    %c0_i32_2 = arith.constant 0 : i32
    return %1, %c0_i32_0, %c0_i32_1 : i32, i32, i32
  }
  func.func @transform_12(%arg0: i32) -> (i32, i32, i32) {
    %c6_i32 = arith.constant 6 : i32
    %0 = arith.subi %arg0, %c6_i32 : i32
    %c0_i32 = arith.constant 0 : i32
    %1 = arith.maxsi %0, %c0_i32 : i32
    %c0_i32_0 = arith.constant 0 : i32
    %c0_i32_1 = arith.constant 0 : i32
    %c0_i32_2 = arith.constant 0 : i32
    return %1, %c0_i32_0, %c0_i32_1 : i32, i32, i32
  }
  func.func @transform_13(%arg0: i32) -> (i32, i32, i32) {
    %c6_i32 = arith.constant 6 : i32
    %0 = arith.subi %arg0, %c6_i32 : i32
    %c0_i32 = arith.constant 0 : i32
    %1 = arith.maxsi %0, %c0_i32 : i32
    %c0_i32_0 = arith.constant 0 : i32
    %c0_i32_1 = arith.constant 0 : i32
    %c0_i32_2 = arith.constant 0 : i32
    return %1, %c0_i32_0, %c0_i32_1 : i32, i32, i32
  }
  func.func @transform_14(%arg0: i32) -> (i32, i32, i32) {
    %c6_i32 = arith.constant 6 : i32
    %0 = arith.subi %arg0, %c6_i32 : i32
    %c0_i32 = arith.constant 0 : i32
    %1 = arith.maxsi %0, %c0_i32 : i32
    %c0_i32_0 = arith.constant 0 : i32
    %c0_i32_1 = arith.constant 0 : i32
    %c0_i32_2 = arith.constant 0 : i32
    return %1, %c0_i32_0, %c0_i32_1 : i32, i32, i32
  }
  func.func @transform_15(%arg0: i32) -> (i32, i32, i32) {
    %c6_i32 = arith.constant 6 : i32
    %0 = arith.subi %arg0, %c6_i32 : i32
    %c0_i32 = arith.constant 0 : i32
    %1 = arith.maxsi %0, %c0_i32 : i32
    %c0_i32_0 = arith.constant 0 : i32
    %c0_i32_1 = arith.constant 0 : i32
    %c0_i32_2 = arith.constant 0 : i32
    return %1, %c0_i32_0, %c0_i32_1 : i32, i32, i32
  }
  func.func @transform_16(%arg0: i32) -> (i32, i32, i32) {
    %c6_i32 = arith.constant 6 : i32
    %0 = arith.subi %arg0, %c6_i32 : i32
    %c0_i32 = arith.constant 0 : i32
    %1 = arith.maxsi %0, %c0_i32 : i32
    %c0_i32_0 = arith.constant 0 : i32
    %c0_i32_1 = arith.constant 0 : i32
    %c0_i32_2 = arith.constant 0 : i32
    return %1, %c0_i32_0, %c0_i32_1 : i32, i32, i32
  }
  func.func @transform_17(%arg0: i32) -> (i32, i32, i32) {
    %c6_i32 = arith.constant 6 : i32
    %0 = arith.subi %arg0, %c6_i32 : i32
    %c0_i32 = arith.constant 0 : i32
    %1 = arith.maxsi %0, %c0_i32 : i32
    %c0_i32_0 = arith.constant 0 : i32
    %c0_i32_1 = arith.constant 0 : i32
    %c0_i32_2 = arith.constant 0 : i32
    return %1, %c0_i32_0, %c0_i32_1 : i32, i32, i32
  }
  func.func @transform_18(%arg0: i32) -> (i32, i32) {
    %c0_i32 = arith.constant 0 : i32
    %c0_i32_0 = arith.constant 0 : i32
    %c0_i32_1 = arith.constant 0 : i32
    return %c0_i32, %c0_i32_0 : i32, i32
  }
  func.func @transform_19(%arg0: i32) -> (i32, i32) {
    %c0_i32 = arith.constant 0 : i32
    %c0_i32_0 = arith.constant 0 : i32
    %c0_i32_1 = arith.constant 0 : i32
    return %c0_i32, %c0_i32_0 : i32, i32
  }
  func.func @transform_20(%arg0: i32) -> (i32, i32) {
    %c0_i32 = arith.constant 0 : i32
    %c0_i32_0 = arith.constant 0 : i32
    %c0_i32_1 = arith.constant 0 : i32
    return %c0_i32, %c0_i32_0 : i32, i32
  }
  func.func @transform_21(%arg0: i32) -> (i32, i32) {
    %c0_i32 = arith.constant 0 : i32
    %c0_i32_0 = arith.constant 0 : i32
    %c0_i32_1 = arith.constant 0 : i32
    return %c0_i32, %c0_i32_0 : i32, i32
  }
  func.func @transform_22(%arg0: i32) -> (i32, i32) {
    %c0_i32 = arith.constant 0 : i32
    %c0_i32_0 = arith.constant 0 : i32
    %c0_i32_1 = arith.constant 0 : i32
    return %c0_i32, %c0_i32_0 : i32, i32
  }
  func.func @transform_23(%arg0: i32) -> (i32, i32) {
    %c0_i32 = arith.constant 0 : i32
    %c0_i32_0 = arith.constant 0 : i32
    %c0_i32_1 = arith.constant 0 : i32
    return %c0_i32, %c0_i32_0 : i32, i32
  }
  func.func @transform_24(%arg0: i32) -> (i32, i32) {
    %c0_i32 = arith.constant 0 : i32
    %c0_i32_0 = arith.constant 0 : i32
    %c0_i32_1 = arith.constant 0 : i32
    return %c0_i32, %c0_i32_0 : i32, i32
  }
  func.func @transform_25(%arg0: i32) -> (i32, i32) {
    %c0_i32 = arith.constant 0 : i32
    %c0_i32_0 = arith.constant 0 : i32
    %c0_i32_1 = arith.constant 0 : i32
    return %c0_i32, %c0_i32_0 : i32, i32
  }
  func.func @transform_26(%arg0: i32) -> (i32, i32) {
    %c0_i32 = arith.constant 0 : i32
    %c0_i32_0 = arith.constant 0 : i32
    %c0_i32_1 = arith.constant 0 : i32
    return %c0_i32, %c0_i32_0 : i32, i32
  }
  func.func @transform_27(%arg0: i32) -> (i32, i32) {
    %c0_i32 = arith.constant 0 : i32
    %c0_i32_0 = arith.constant 0 : i32
    %c0_i32_1 = arith.constant 0 : i32
    return %c0_i32, %c0_i32_0 : i32, i32
  }
  func.func @transform_28(%arg0: i32) -> (i32, i32) {
    %c0_i32 = arith.constant 0 : i32
    %c0_i32_0 = arith.constant 0 : i32
    %c0_i32_1 = arith.constant 0 : i32
    return %c0_i32, %c0_i32_0 : i32, i32
  }
  func.func @transform_29(%arg0: i32) -> (i32, i32) {
    %c0_i32 = arith.constant 0 : i32
    %c0_i32_0 = arith.constant 0 : i32
    %c0_i32_1 = arith.constant 0 : i32
    return %c0_i32, %c0_i32_0 : i32, i32
  }
}

</mosaic_0001>

<bundles_post_ra>
// kernel: custom_net_forward.1
= control target key start
LH: loop header
LB: loop body
LE: loop exit
PB: predicated region body
PF: predicated region fallthrough
CT: control target
= control target key end

     0   :  { %s18691_s6 = smov 1   ;;  %s18692_s10 = smov 2   ;;  %s22395_s0 = inlined_call_operand.smem [shape: u32[30], index: -1, kind: input, shape index: {}] }
   0x1   :  { %s18754_s5 = sld [smem:[%s22395_s0]]   ;;  %s18693_s14 = smov 3  }
   0x2   :  { %s18759_s9 = sld [smem:[%s22395_s0 + %s18691_s6]]   ;;  %s18694_s18 = smov 4  }
   0x3   :  { %s18764_s13 = sld [smem:[%s22395_s0 + %s18692_s10]]   ;;  %s18695_s22 = smov 5  }
   0x4   :  { %s18769_s17 = sld [smem:[%s22395_s0 + %s18693_s14]]   ;;  %s18696_s26 = smov 6  }
   0x5   :  { %s18774_s21 = sld [smem:[%s22395_s0 + %s18694_s18]]   ;;  %s18697_s30 = smov 7  }
   0x6   :  { %s18779_s25 = sld [smem:[%s22395_s0 + %s18695_s22]]   ;;  %s18698_s4 = smov 8  }
   0x7   :  { %22538 = sst [smem:[#allocation22_spill]] %s18754_s5  ;;  %s18699_s10 = smov 9  }
   0x8   :  { %22539 = sst [smem:[#allocation23_spill]] %s18759_s9  ;;  %s18700_s15 = smov 10  }
   0x9   :  { %22540 = sst [smem:[#allocation24_spill]] %s18764_s13  ;;  %s18701_s20 = smov 11  }
   0xa   :  { %22541 = sst [smem:[#allocation25_spill]] %s18769_s17  ;;  %s18703_s1 = smov 13  }
   0xb   :  { %22542 = sst [smem:[#allocation26_spill]] %s18774_s21  ;;  %s18704_s7 = smov 14  }
   0xc   :  { %22543 = sst [smem:[#allocation27_spill]] %s18779_s25  ;;  %s18706_s22 = smov 16  }
   0xd   :  { %s18784_s29 = sld [smem:[%s22395_s0 + %s18696_s26]]   ;;  %s18702_s26 = smov 12  }
   0xe   :  { %s18789_s3 = sld [smem:[%s22395_s0 + %s18697_s30]]   ;;  %s18707_s28 = smov 17  }
   0xf   :  { %s18794_s8 = sld [smem:[%s22395_s0 + %s18698_s4]]  }
  0x10   :  { %s18799_s14 = sld [smem:[%s22395_s0 + %s18699_s10]]  }
  0x11   :  { %s18804_s19 = sld [smem:[%s22395_s0 + %s18700_s15]]   ;;  %s18705_s15 = smov 15  }
  0x12   :  { %s18809_s24 = sld [smem:[%s22395_s0 + %s18701_s20]]  }
  0x13   :  { %22544 = sst [smem:[#allocation28_spill]] %s18784_s29 }
  0x14   :  { %22545 = sst [smem:[#allocation29_spill]] %s18789_s3 }
  0x15   :  { %22546 = sst [smem:[#allocation30_spill]] %s18794_s8 }
  0x16   :  { %22547 = sst [smem:[#allocation31_spill]] %s18799_s14 }
  0x17   :  { %22548 = sst [smem:[#allocation32_spill]] %s18804_s19 }
  0x18   :  { %22549 = sst [smem:[#allocation33_spill]] %s18809_s24 }
  0x19   :  { %s18814_s30 = sld [smem:[%s22395_s0 + %s18702_s26]]  }
  0x1a   :  { %s18819_s6 = sld [smem:[%s22395_s0 + %s18703_s1]]  }
  0x1b   :  { %s18824_s12 = sld [smem:[%s22395_s0 + %s18704_s7]]   ;;  %s18708_s7 = smov 18  }
  0x1c   :  { %s18829_s20 = sld [smem:[%s22395_s0 + %s18705_s15]]   ;;  %s18709_s15 = smov 19  }
  0x1d   :  { %s18834_s27 = sld [smem:[%s22395_s0 + %s18706_s22]]   ;;  %s18710_s22 = smov 20  }
  0x1e   :  { %s18839_s4 = sld [smem:[%s22395_s0 + %s18707_s28]]   ;;  %s18711_s28 = smov 21  }
  0x1f   :  { %22550 = sst [smem:[#allocation34_spill]] %s18814_s30 }
  0x20   :  { %22551 = sst [smem:[#allocation35_spill]] %s18819_s6 }
  0x21   :  { %22552 = sst [smem:[#allocation36_spill]] %s18824_s12 }
  0x22   :  { %22553 = sst [smem:[#allocation37_spill]] %s18829_s20 }
  0x23   :  { %22554 = sst [smem:[#allocation38_spill]] %s18834_s27 }
  0x24   :  { %22555 = sst [smem:[#allocation39_spill]] %s18839_s4 }
  0x25   :  { %s18844_s5 = sld [smem:[%s22395_s0 + %s18708_s7]]   ;;  %s18712_s7 = smov 22  }
  0x26   :  { %s18849_s20 = sld [smem:[%s22395_s0 + %s18709_s15]]   ;;  %s18713_s15 = smov 23  }
  0x27   :  { %s18854_s12 = sld [smem:[%s22395_s0 + %s18710_s22]]   ;;  %s18714_s22 = smov 24  }
  0x28   :  { %s18859_s6 = sld [smem:[%s22395_s0 + %s18711_s28]]   ;;  %s18715_s28 = smov 25  }
  0x2b   :  { %22556 = sst [smem:[#allocation40_spill]] %s18844_s5 }
  0x2c   :  { %22557 = sst [smem:[#allocation41_spill]] %s18849_s20 }
  0x2d   :  { %22558 = sst [smem:[#allocation42_spill]] %s18854_s12 }
  0x2e   :  { %22559 = sst [smem:[#allocation43_spill]] %s18859_s6 }
  0x2f   :  { %s18864_s5 = sld [smem:[%s22395_s0 + %s18712_s7]]   ;;  %s18716_s7 = smov 26  }
  0x30   :  { %s18869_s20 = sld [smem:[%s22395_s0 + %s18713_s15]]   ;;  %s18717_s15 = smov 27  }
  0x31   :  { %s18874_s12 = sld [smem:[%s22395_s0 + %s18714_s22]]   ;;  %s18718_s22 = smov 28  }
  0x32   :  { %s18879_s6 = sld [smem:[%s22395_s0 + %s18715_s28]]   ;;  %s18719_s28 = smov 29  }
  0x35   :  { %22560 = sst [smem:[#allocation44_spill]] %s18864_s5 }
  0x36   :  { %22561 = sst [smem:[#allocation45_spill]] %s18869_s20 }
  0x37   :  { %22562 = sst [smem:[#allocation46_spill]] %s18874_s12 }
  0x38   :  { %22563 = sst [smem:[#allocation47_spill]] %s18879_s6 }
  0x39   :  { %s18884_s5 = sld [smem:[%s22395_s0 + %s18716_s7]]  }
  0x3a   :  { %s18889_s20 = sld [smem:[%s22395_s0 + %s18717_s15]]  }
  0x3b   :  { %s18894_s12 = sld [smem:[%s22395_s0 + %s18718_s22]]  }
  0x3c   :  { %s18899_s6 = sld [smem:[%s22395_s0 + %s18719_s28]]  }
  0x3f   :  { %22564 = sst [smem:[#allocation48_spill]] %s18884_s5 }
  0x40   :  { %22565 = sst [smem:[#allocation49_spill]] %s18889_s20 }
  0x41   :  { %22566 = sst [smem:[#allocation50_spill]] %s18894_s12 }
  0x42   :  { %22567 = sst [smem:[#allocation51_spill]] %s18899_s6 }
  0x43   :  { %64 = vsyncpa [#allocation5], 0 }
  0x44   :  { %66 = vsyncpa [#allocation5 + $0x1], 0 }
  0x45   :  { %67 = vsyncpa [#allocation8], 0 }
  0x46   :  { %69 = vsyncpa [#allocation8 + $0x1], 0 }
  0x47   :  { %70 = vsyncpa [#allocation11], 0 }
  0x48   :  { %72 = vsyncpa [#allocation11 + $0x1], 0 }
  0x49   :  { %73 = vsyncpa [#allocation14], 0 }
  0x4a   :  { %75 = vsyncpa [#allocation14 + $0x1], 0 }
  0x4b   :  { %76 = vsyncpa [#allocation6], 0  ;;  %s18901_s7 = smov 0   ;;  %s18903_s10 = smov 0  }
  0x4c   :  { %s18905_s11 = smov 0   ;;  %s18907_s15 = smov 0  }
  0x4d   :  { %s18909_s16 = smov 0   ;;  %s18911_s0 = smov 0  }
  0x4e   :  { %s18913_s18 = smov 0  }
  0x4f LB: > { %s22568_s30 = sld [smem:[#allocation34_spill]]  ;;  %p22403_p0 = scmp.eq.s32.totalorder %s18689_s18, 0  ;;  %s18689_s18 = sphi %s18913_s18, %s22824_s18   ;;  %s18685_s0 = sphi %s18911_s0, %s22830_s0   ;;  %s18681_s16 = sphi %s18909_s16, %s22829_s16   ;;  %s18677_s15 = sphi %s18907_s15, %s22828_s15   ;;  %s18673_s11 = sphi %s18905_s11, %s22827_s11   ;;  %s18669_s10 = sphi %s18903_s10, %s22826_s10   ;;  %s18665_s7 = sphi %s18901_s7, %s22825_s7  }
  0x50   : > { %s22569_s19 = sld [smem:[#allocation32_spill]]  ;;  %s14970_s22 = sadd.s32 4294967290, %s18689_s18 }
  0x51   : > { %s22570_s8 = sld [smem:[#allocation30_spill]]  ;;  %p348_p1 = scmp.gt.s32.totalorder %s14970_s22, 0 }
  0x52   : > { %s22571_s4 = sld [smem:[#allocation39_spill]]  ;;  %p363_p2 = scmp.ne.s32.totalorder %s18673_s11, %s18669_s10 }
  0x53   : > { %s22572_s27 = sld [smem:[#allocation38_spill]]  ;;  %p22402_p3 = scmp.lt.s32.totalorder %s18689_s18, 12 }
  0x54   : > { %s22573_s24 = sld [smem:[#allocation33_spill]]  ;;  %s22832_s22 = smov (!%p348_p1, %s14970_s22), 0 }
  0x55   : > { %s22574_s14 = sld [smem:[#allocation31_spill]]  ;;  %p365_p4 = por %p363_p2, %p22403_p0 }
  0x56   : > { %22575 = sst [smem:[#allocation52_spill]] %s18669_s10  ;;  %s18946_s23 = sand.u32 1, %s18689_s18  }
  0x57   : > { %22576 = sst [smem:[#allocation53_spill]] %s18673_s11  ;;  %s22400_s26 = sand.u32 1, %s18673_s11  }
  0x58   : > { %22577 = sst [smem:[#allocation54_spill]] %s18681_s16  ;;  %s18951_s28 = smul.u32 432, %s22400_s26 }
  0x59   : > { %22578 = sst [smem:[#allocation55_spill]] %s18685_s0  ;;  %p18955_p5 = pnand %p22402_p3, %p365_p4 }
  0x5a   : > { %s18960_s2 = smul.u32 6912, %s22832_s22  ;;  %s1047_s5 = scalar_lea.vmem [#allocation7], %s18951_s28 }
  0x5b   : > { %s22579_s1 = scalar_select %p18955_p5, 1, 0 }
  0x5c   : > { %s18965_s6 = scalar_lea.hbm %s22574_s14, %s18960_s2  ;;  %s1057_s26 = sshll.u32 %s1047_s5, 4  ;;  %s18968_s26 = int_to_ptr.vmem [resolvable:$true] %s1057_s26 }
  0x5d   : > { %s18395_s3 = scalar_lea.hbm %s18965_s6, 6912  ;;  %p18976_p9 = pneg %p18955_p5 }
  0x5e   : > { %p18396_p8 = scmp.ne.s32.totalorder %s18965_s6, %s18395_s3  ;;  %s18400_s25 = scalar_lea.hbm %s22574_s14, 41472 }
  0x5f   : > { %s22580_s29 = scalar_select %p18976_p9, 1, 0 }
  0x60   : > { %p18398_p10 = pnand %p18976_p9, %p18396_p8  ;;  %p18401_p12 = scmp.lt.s32.totalorder %s18965_s6, %s22574_s14 }
  0x61   : > { %p18402_p13 = scmp.lt.s32.totalorder %s18400_s25, %s18395_s3 }
  0x62   : > { %p18399_p11 = pneg %p18398_p10 }
  0x63   : > { %p18403_p1 = por %p18402_p13, %p18401_p12 }
  0x65   : > { %p18404_p2 = pnand %p18403_p1, %p18399_p11 }
  0x67   : > { %18407 = shalt.err (!%p18404_p2)
}
  0x68   : > { %s18408_s5 = scalar_lea.vmem %s18968_s26, 6912  ;;  %s18720_s20 = smov [#allocation7]  }
  0x69   : > { %p18409_p4 = scmp.ne.s32.totalorder %s18968_s26, %s18408_s5  ;;  %s18413_s21 = sshll.u32 %s18720_s20, 4  ;;  %s18414_s21 = int_to_ptr.vmem [resolvable:$false] %s18413_s21 }
  0x6a   : > { %s18415_s17 = scalar_lea.vmem %s18414_s21, 13824  ;;  %p18416_p8 = scmp.lt.s32.totalorder %s18968_s26, %s18414_s21 }
  0x6b   : > { %p18411_p3 = pnand %p18409_p4, %p18976_p9  ;;  %p18417_p10 = scmp.lt.s32.totalorder %s18415_s17, %s18408_s5 }
  0x6d   : > { %p18412_p0 = pneg %p18411_p3  ;;  %p18418_p6 = por %p18417_p10, %p18416_p8 }
  0x6f   : > { %p18419_p7 = pnand %p18418_p6, %p18412_p0 }
  0x71   : > { %18422 = shalt.err (!%p18419_p7)
}
  0x72   : > { %s22407_s25 = smov 192   ;;  %s22409_s3 = smov 12  }
  0x73   : > { %s22581_s17 = scalar_lea.sflag [#allocation8], %s18946_s23  ;;  %p22582_p0 = scmp.lt.s32.totalorder %s18689_s18, 13 }
  0x74   : > { %16844 = dma.hbm_to_vmem [thread:$0]  (!%p18955_p5), %s18965_s6, 6912, %s18968_s26, %s22581_s17, %s22407_s25, %s22407_s25, %s22409_s3  }
  0x75   : > { %p22583_p3 = scmp.ge.s32.totalorder %s18689_s18, 1  ;;  %s19009_s20 = scalar_lea.hbm %s22573_s24, %s18960_s2 }
  0x76   : > { %s1095_s5 = scalar_lea.vmem [#allocation10], %s18951_s28  ;;  %s18423_s9 = scalar_lea.hbm %s19009_s20, 6912 }
  0x77   : > { %p19003_p6 = pnand %p22583_p3, %p22582_p0  ;;  %s1105_s14 = sshll.u32 %s1095_s5, 4  ;;  %s19012_s14 = int_to_ptr.vmem [resolvable:$true] %s1105_s14 }
  0x78   : > { %p18424_p7 = scmp.ne.s32.totalorder %s19009_s20, %s18423_s9  ;;  %s18428_s6 = scalar_lea.hbm %s22573_s24, 41472 }
  0x79   : > { %s22584_s21 = scalar_select %p19003_p6, 1, 0 }
  0x7a   : > { %p18426_p11 = pnand %p18424_p7, %p18976_p9  ;;  %p18429_p13 = scmp.lt.s32.totalorder %s19009_s20, %s22573_s24 }
  0x7b   : > { %p18430_p1 = scmp.lt.s32.totalorder %s18428_s6, %s18423_s9 }
  0x7c   : > { %p18427_p12 = pneg %p18426_p11 }
  0x7d   : > { %p18431_p2 = por %p18430_p1, %p18429_p13 }
  0x7f   : > { %p18432_p4 = pnand %p18431_p2, %p18427_p12 }
  0x81   : > { %18435 = shalt.err (!%p18432_p4)
}
  0x82   : > { %s18436_s26 = scalar_lea.vmem %s19012_s14, 6912  ;;  %s18723_s17 = smov [#allocation10]  }
  0x83   : > { %p18437_p8 = scmp.ne.s32.totalorder %s19012_s14, %s18436_s26  ;;  %s18441_s5 = sshll.u32 %s18723_s17, 4  ;;  %s18442_s5 = int_to_ptr.vmem [resolvable:$false] %s18441_s5 }
  0x84   : > { %s18443_s13 = scalar_lea.vmem %s18442_s5, 13824  ;;  %p18444_p3 = scmp.lt.s32.totalorder %s19012_s14, %s18442_s5 }
  0x85   : > { %p18439_p10 = pnand %p18437_p8, %p18976_p9  ;;  %p18445_p7 = scmp.lt.s32.totalorder %s18443_s13, %s18436_s26 }
  0x87   : > { %p18440_p0 = pneg %p18439_p10  ;;  %p18446_p11 = por %p18445_p7, %p18444_p3 }
  0x89   : > { %p18447_p6 = pnand %p18446_p11, %p18440_p0 }
  0x8b   : > { %18450 = shalt.err (!%p18447_p6)
}
  0x8c   : > { %s22585_s9 = scalar_lea.sflag [#allocation11], %s18946_s23  ;;  %s19038_s13 = scalar_lea.hbm %s22572_s27, %s18960_s2 }
  0x8d   : > { %16850 = dma.hbm_to_vmem [thread:$0]  (!%p18955_p5), %s19009_s20, 6912, %s19012_s14, %s22585_s9, %s22407_s25, %s22407_s25, %s22409_s3  }
  0x8e   : > { %s1184_s6 = scalar_lea.vmem [#allocation13], %s18951_s28  ;;  %s22406_s17 = scalar_lea.sflag [#allocation14], %s18946_s23 }
  0x8f   : > { %s1194_s26 = sshll.u32 %s1184_s6, 4  ;;  %s18451_s5 = scalar_lea.hbm %s19038_s13, 6912  ;;  %s19041_s26 = int_to_ptr.vmem [resolvable:$true] %s1194_s26 }
  0x90   : > { %p18452_p6 = scmp.ne.s32.totalorder %s19038_s13, %s18451_s5  ;;  %s18456_s24 = scalar_lea.hbm %s22572_s27, 41472 }
  0x91   : > { %p18457_p1 = scmp.lt.s32.totalorder %s19038_s13, %s22572_s27  ;;  %p18458_p2 = scmp.lt.s32.totalorder %s18456_s24, %s18451_s5 }
  0x92   : > { %p18454_p12 = pnand %p18452_p6, %p18976_p9 }
  0x93   : > { %p18459_p4 = por %p18458_p2, %p18457_p1 }
  0x94   : > { %p18455_p13 = pneg %p18454_p12 }
  0x96   : > { %p18460_p8 = pnand %p18459_p4, %p18455_p13 }
  0x98   : > { %18463 = shalt.err (!%p18460_p8)
}
  0x99   : > { %s18464_s14 = scalar_lea.vmem %s19041_s26, 6912  ;;  %s18724_s20 = smov [#allocation13]  }
  0x9a   : > { %p18465_p10 = scmp.ne.s32.totalorder %s19041_s26, %s18464_s14  ;;  %s18469_s9 = sshll.u32 %s18724_s20, 4  ;;  %s18470_s9 = int_to_ptr.vmem [resolvable:$false] %s18469_s9 }
  0x9b   : > { %s18471_s6 = scalar_lea.vmem %s18470_s9, 13824  ;;  %p18472_p7 = scmp.lt.s32.totalorder %s19041_s26, %s18470_s9 }
  0x9c   : > { %p18467_p0 = pnand %p18465_p10, %p18976_p9  ;;  %p18473_p11 = scmp.lt.s32.totalorder %s18471_s6, %s18464_s14 }
  0x9e   : > { %p18468_p3 = pneg %p18467_p0  ;;  %p18474_p6 = por %p18473_p11, %p18472_p7 }
  0xa0   : > { %p18475_p12 = pnand %p18474_p6, %p18468_p3 }
  0xa2   : > { %18478 = shalt.err (!%p18475_p12)
}
  0xa3   : > { %16856 = dma.hbm_to_vmem [thread:$0]  (!%p18955_p5), %s19038_s13, 6912, %s19041_s26, %s22406_s17, %s22407_s25, %s22407_s25, %s22409_s3  }
  0xa4   : > { %s19066_s24 = sadd.s32 4294967295, %s18689_s18   ;;  %s19069_s5 = sadd.s32 1, %s18689_s18  }
  0xa5   : > { %22586 = sst [smem:[#allocation56_spill]] %s19069_s5  ;;  %p317_p13 = scmp.lt.s32.totalorder %s18689_s18, 5 }
  0xa6   : > { %p319_p1 = scmp.lt.s32.totalorder %s19069_s5, 5  ;;  %s324_s14 = sadd.s32 1, %s18685_s0 }
  0xa7   : > { %s318_s20 = scalar_select %p317_p13, %s18689_s18, 5 }
  0xa8   : > { %s320_s9 = scalar_select %p319_p1, %s19069_s5, 5 }
  0xa9   : > { %p331_p2 = scmp.ne.s32.totalorder %s18685_s0, %s18681_s16  ;;  %p337_p4 = scmp.ne.s32.totalorder %s18681_s16, %s18677_s15 }
  0xaa   : > { %s321_s13 = ssub.s32 %s318_s20, %s320_s9  ;;  %p338_p8 = scmp.eq.s32.totalorder %s19066_s24, 0 }
  0xab   : > { %p322_p10 = scmp.eq.s32.totalorder %s321_s13, 0  ;;  %p22587_p0 = scmp.eq.s32.totalorder %s18689_s18, 0 }
  0xac   : > { %p19087_p7 = por %p338_p8, %p337_p4  ;;  %s14971_s17 = sadd.s32 4294967290, %s19069_s5 }
  0xad   : > { %p19083_p3 = por %p22587_p0, %p331_p2  ;;  %p351_p11 = scmp.gt.s32.totalorder %s14971_s17, 0 }
  0xae   : > { %s22589_s6 = scalar_select %p19087_p7, 1, 0 }
  0xaf   : > { %s19093_s25 = scalar_select %p322_p10, %s18685_s0, %s324_s14  }
  0xb0   : > { %s356_s15 = sadd.s32 1, %s18673_s11  ;;  %p369_p6 = scmp.ne.s32.totalorder %s18669_s10, %s18665_s7 }
  0xb1   : > { %22590 = sst [smem:[#allocation57_spill]] %s19093_s25  ;;  %s1020_s9 = sand.u32 1, %s18685_s0  }
  0xb2   : > { %s22834_s17 = smov (!%p351_p11, %s14971_s17), 0  ;;  %p19099_p12 = por %p369_p6, %p338_p8 }
  0xb3   : > { %s353_s3 = ssub.s32 %s22832_s22, %s22834_s17  ;;  %s16795_s27 = smul.u32 432, %s1020_s9 }
  0xb4   : > { %s22591_s13 = scalar_select %p19099_p12, 1, 0 }
  0xb5   : > { %p354_p13 = scmp.eq.s32.totalorder %s353_s3, 0  ;;  %s16796_s12 = smul.u32 6912, %s318_s20 }
  0xb6   : > { %p22592_p1 = scmp.lt.s32.totalorder %s18689_s18, 12  ;;  %s1024_s17 = scalar_lea.vmem [#allocation4], %s16795_s27 }
  0xb7   : > { %s19113_s7 = scalar_select %p354_p13, %s18673_s11, %s356_s15  }
  0xb8   : > { %p19108_p2 = pnand %p22592_p1, %p19083_p3  ;;  %s19116_s25 = scalar_lea.hbm %s22570_s8, %s16796_s12 }
  0xb9   : > { %22594 = sst [smem:[#allocation58_spill]] %s19113_s7  ;;  %s1033_s0 = sshll.u32 %s1024_s17, 4  ;;  %s19118_s0 = int_to_ptr.vmem [resolvable:$true] %s1033_s0 }
  0xba   : > { %s19120_s3 = scalar_lea.sflag [#allocation5], %s1020_s9  ;;  %s18479_s20 = scalar_lea.hbm %s19116_s25, 6912 }
  0xbb   : > { %p18480_p4 = scmp.ne.s32.totalorder %s19116_s25, %s18479_s20  ;;  %p18481_p8 = pneg %p19108_p2 }
  0xbc   : > { %s18484_s18 = scalar_lea.hbm %s22570_s8, 41472  ;;  %p18485_p3 = scmp.lt.s32.totalorder %s19116_s25, %s22570_s8 }
  0xbd   : > { %p18482_p10 = pnand %p18481_p8, %p18480_p4  ;;  %p18486_p11 = scmp.lt.s32.totalorder %s18484_s18, %s18479_s20 }
  0xbf   : > { %p18483_p0 = pneg %p18482_p10  ;;  %p18487_p6 = por %p18486_p11, %p18485_p3 }
  0xc1   : > { %p18488_p13 = pnand %p18487_p6, %p18483_p0 }
  0xc3   : > { %18491 = shalt.err (!%p18488_p13)
}
  0xc4   : > { %s18492_s12 = scalar_lea.vmem %s19118_s0, 6912  ;;  %s18725_s27 = smov [#allocation4]  }
  0xc5   : > { %p18493_p1 = scmp.ne.s32.totalorder %s19118_s0, %s18492_s12  ;;  %s18497_s26 = sshll.u32 %s18725_s27, 4  ;;  %s18498_s26 = int_to_ptr.vmem [resolvable:$false] %s18497_s26 }
  0xc6   : > { %s18499_s15 = scalar_lea.vmem %s18498_s26, 13824  ;;  %p18500_p5 = scmp.lt.s32.totalorder %s19118_s0, %s18498_s26 }
  0xc7   : > { %p18495_p12 = pnand %p18493_p1, %p18481_p8  ;;  %p18501_p4 = scmp.lt.s32.totalorder %s18499_s15, %s18492_s12 }
  0xc9   : > { %p18496_p7 = pneg %p18495_p12  ;;  %p18502_p10 = por %p18501_p4, %p18500_p5 }
  0xcb   : > { %p18503_p9 = pnand %p18502_p10, %p18496_p7 }
  0xcd   : > { %18506 = shalt.err (!%p18503_p9)
}
  0xce   : > { %s22595_s9 = smov 12   ;;  %s22596_s17 = smov 192  }
  0xcf   : > { %16841 = dma.hbm_to_vmem [thread:$0]  (!%p19108_p2), %s19116_s25, 6912, %s19118_s0, %s19120_s3, %s22596_s17, %s22596_s17, %s22595_s9  }
  0xd0   : > { %s19142_s20 = scalar_lea.hbm %s22569_s19, %s18960_s2  ;;  %s1071_s14 = scalar_lea.vmem [#allocation9], %s18951_s28 }
  0xd1   : > { %s1081_s18 = sshll.u32 %s1071_s14, 4  ;;  %s19149_s12 = scalar_lea.hbm %s22568_s30, %s18960_s2  ;;  %s19145_s18 = int_to_ptr.vmem [resolvable:$true] %s1081_s18 }
  0xd2   : > { %s18507_s27 = scalar_lea.hbm %s19142_s20, 6912  ;;  %p22597_p9 = scmp.ne.s32.totalorder %s22580_s29, 0 }
  0xd3   : > { %p18508_p5 = scmp.ne.s32.totalorder %s19142_s20, %s18507_s27  ;;  %s18512_s26 = scalar_lea.hbm %s22569_s19, 41472 }
  0xd4   : > { %p18513_p8 = scmp.lt.s32.totalorder %s19142_s20, %s22569_s19  ;;  %p18514_p0 = scmp.lt.s32.totalorder %s18512_s26, %s18507_s27 }
  0xd5   : > { %p18510_p7 = pnand %p18508_p5, %p22597_p9 }
  0xd6   : > { %p18515_p2 = por %p18514_p0, %p18513_p8 }
  0xd7   : > { %p18511_p12 = pneg %p18510_p7 }
  0xd9   : > { %p18516_p3 = pnand %p18515_p2, %p18511_p12 }
  0xdb   : > { %18519 = shalt.err (!%p18516_p3)
}
  0xdc   : > { %s18520_s0 = scalar_lea.vmem %s19145_s18, 6912  ;;  %s18726_s2 = smov [#allocation9]  }
  0xdd   : > { %p18521_p11 = scmp.ne.s32.totalorder %s19145_s18, %s18520_s0  ;;  %s18525_s25 = sshll.u32 %s18726_s2, 4  ;;  %s18526_s25 = int_to_ptr.vmem [resolvable:$false] %s18525_s25 }
  0xde   : > { %s18527_s3 = scalar_lea.vmem %s18526_s25, 13824  ;;  %p18528_p1 = scmp.lt.s32.totalorder %s19145_s18, %s18526_s25 }
  0xdf   : > { %p18523_p6 = pnand %p18521_p11, %p22597_p9  ;;  %p18529_p4 = scmp.lt.s32.totalorder %s18527_s3, %s18520_s0 }
  0xe1   : > { %p18524_p13 = pneg %p18523_p6  ;;  %p18530_p10 = por %p18529_p4, %p18528_p1 }
  0xe3   : > { %p18531_p5 = pnand %p18530_p10, %p18524_p13 }
  0xe5   : > { %18534 = shalt.err (!%p18531_p5)
}
  0xe6   : > { %p22598_p7 = scmp.ne.s32.totalorder %s22579_s1, 0  ;;  %s22599_s15 = scalar_lea.sflag [#allocation8], %s18946_s23 }
  0xe7   : > { %s1119_s14 = scalar_lea.vmem [#allocation12], %s18951_s28  ;;  %s22600_s26 = sand.u32 1, %s18673_s11  }
  0xe8   : > { %16847 = dma.hbm_to_vmem [thread:$0]  (!%p22598_p7), %s19142_s20, 6912, %s19145_s18, %s22599_s15, %s22596_s17, %s22596_s17, %s22595_s9  }
  0xe9   : > { %s1129_s27 = sshll.u32 %s1119_s14, 4  ;;  %s19175_s0 = smul.u32 48, %s22600_s26  ;;  %s19177_s27 = int_to_ptr.vmem [resolvable:$true] %s1129_s27 }
  0xea   : > { %s16808_s2 = smul.u32 768, %s22832_s22  ;;  %s18535_s25 = scalar_lea.hbm %s19149_s12, 6912 }
  0xeb   : > { %p18536_p12 = scmp.ne.s32.totalorder %s19149_s12, %s18535_s25  ;;  %s18540_s3 = scalar_lea.hbm %s22568_s30, 41472 }
  0xec   : > { %p18541_p2 = scmp.lt.s32.totalorder %s19149_s12, %s22568_s30  ;;  %p18542_p3 = scmp.lt.s32.totalorder %s18540_s3, %s18535_s25 }
  0xed   : > { %p18538_p8 = pnand %p18536_p12, %p22597_p9 }
  0xee   : > { %p18543_p11 = por %p18542_p3, %p18541_p2 }
  0xef   : > { %p18539_p0 = pneg %p18538_p8 }
  0xf1   : > { %p18544_p6 = pnand %p18543_p11, %p18539_p0 }
  0xf3   : > { %18547 = shalt.err (!%p18544_p6)
}
  0xf4   : > { %s18548_s28 = scalar_lea.vmem %s19177_s27, 6912  ;;  %s18727_s20 = smov [#allocation12]  }
  0xf5   : > { %p18549_p13 = scmp.ne.s32.totalorder %s19177_s27, %s18548_s28  ;;  %s18553_s18 = sshll.u32 %s18727_s20, 4  ;;  %s18554_s18 = int_to_ptr.vmem [resolvable:$false] %s18553_s18 }
  0xf6   : > { %s18555_s15 = scalar_lea.vmem %s18554_s18, 13824  ;;  %p18556_p10 = scmp.lt.s32.totalorder %s19177_s27, %s18554_s18 }
  0xf7   : > { %p18551_p1 = pnand %p18549_p13, %p22597_p9  ;;  %p18557_p5 = scmp.lt.s32.totalorder %s18555_s15, %s18548_s28 }
  0xf9   : > { %p18552_p4 = pneg %p18551_p1  ;;  %p18558_p12 = por %p18557_p5, %p18556_p10 }
  0xfb   : > { %p18559_p8 = pnand %p18558_p12, %p18552_p4 }
  0xfd   : > { %18562 = shalt.err (!%p18559_p8)
}
  0xfe   : > { %s22601_s14 = scalar_lea.sflag [#allocation11], %s18946_s23  ;;  %s19204_s26 = scalar_lea.hbm %s22571_s4, %s16808_s2 }
  0xff   : > { %16853 = dma.hbm_to_vmem [thread:$0]  (!%p22598_p7), %s19149_s12, 6912, %s19177_s27, %s22601_s14, %s22596_s17, %s22596_s17, %s22595_s9  }
 0x100   : > { %s1208_s25 = scalar_lea.vmem [#allocation15], %s19175_s0  ;;  %s18563_s28 = scalar_lea.hbm %s19204_s26, 768 }
 0x101   : > { %s1218_s3 = sshll.u32 %s1208_s25, 4  ;;  %p18564_p0 = scmp.ne.s32.totalorder %s19204_s26, %s18563_s28  ;;  %s19207_s3 = int_to_ptr.vmem [resolvable:$true] %s1218_s3 }
 0x102   : > { %s18568_s20 = scalar_lea.hbm %s22571_s4, 4608  ;;  %p18569_p11 = scmp.lt.s32.totalorder %s19204_s26, %s22571_s4 }
 0x103   : > { %p18566_p2 = pnand %p18564_p0, %p22597_p9  ;;  %p18570_p6 = scmp.lt.s32.totalorder %s18568_s20, %s18563_s28 }
 0x105   : > { %p18567_p3 = pneg %p18566_p2  ;;  %p18571_p13 = por %p18570_p6, %p18569_p11 }
 0x107   : > { %p18572_p1 = pnand %p18571_p13, %p18567_p3 }
 0x109   : > { %18575 = shalt.err (!%p18572_p1)
}
 0x10a   : > { %s18576_s22 = scalar_lea.vmem %s19207_s3, 768  ;;  %s18728_s9 = smov [#allocation15]  }
 0x10b   : > { %p18577_p4 = scmp.ne.s32.totalorder %s19207_s3, %s18576_s22  ;;  %s18581_s17 = sshll.u32 %s18728_s9, 4  ;;  %s18582_s17 = int_to_ptr.vmem [resolvable:$false] %s18581_s17 }
 0x10c   : > { %s18583_s12 = scalar_lea.vmem %s18582_s17, 1536  ;;  %p18584_p12 = scmp.lt.s32.totalorder %s19207_s3, %s18582_s17 }
 0x10d   : > { %p18579_p10 = pnand %p18577_p4, %p22597_p9  ;;  %p18585_p8 = scmp.lt.s32.totalorder %s18583_s12, %s18576_s22 }
 0x10f   : > { %p18580_p5 = pneg %p18579_p10  ;;  %p18586_p0 = por %p18585_p8, %p18584_p12 }
 0x111   : > { %p18587_p2 = pnand %p18586_p0, %p18580_p5 }
 0x113   : > { %18590 = shalt.err (!%p18587_p2)
}
 0x114   : > { %s18729_s27 = smov 384   ;;  %s18730_s0 = smov 24  }
 0x115   : > { %s22602_s2 = scalar_lea.sflag [#allocation14], %s18946_s23  ;;  %p22603_p9 = scmp.ne.s32.totalorder %s22584_s21, 0 }
 0x116   : > { %16859 = dma.hbm_to_vmem [thread:$0]  (!%p22598_p7), %s19204_s26, 768, %s19207_s3, %s22602_s2, %s18729_s27, %s18729_s27, %s18730_s0  }
 0x117   : > { %1230 = sbr.rel (%p22603_p9) target bundleno = 6034 (0x1792), region = 136 }
 0x11c   : > { %s1232_s29 = sand.u32 1, %s18681_s16   ;;  %p22604_p3 = scmp.ne.s32.totalorder %s22589_s6, 0 }
 0x11d   : > { %s16809_s18 = smul.u32 432, %s1232_s29  ;;  %s1233_s15 = scalar_lea.sflag [#allocation5], %s1232_s29 }
 0x11f   : > { %s19230_s14 = scalar_lea.vmem [#allocation4], %s16809_s18 }
 0x120   : > { %18644 = dma.done.wait (%p22604_p3), %s1233_s15, 6912  }
 0x121   : > { %18646 = vsyncadd (%p22604_p3), %s1233_s15, 4294960384  ;;  %s1241_s23 = sand.u32 1, %s19066_s24   ;;  %s1243_s1 = sand.u32 1, %s18669_s10  }
 0x122   : > { %s16810_s26 = smul.u32 432, %s1243_s1  ;;  %s1242_s21 = scalar_lea.sflag [#allocation8], %s1241_s23 }
 0x123   : > { %p22606_p7 = scmp.ne.s32.totalorder %s22591_s13, 0 }
 0x124   : > { %s19238_s25 = scalar_lea.vmem [#allocation7], %s16810_s26 }
 0x125   : > { %22605 = sst [smem:[#allocation59_spill]] %s19238_s25 }
 0x126   : > { %18648 = dma.done.wait (%p22606_p7), %s1242_s21, 13824  }
 0x127   : > { %18650 = vsyncadd (%p22606_p7), %s1242_s21, 4294953472  ;;  %s19244_s3 = scalar_lea.vmem [#allocation9], %s16810_s26  ;;  %s1260_s28 = scalar_lea.sflag [#allocation11], %s1241_s23 }
 0x128   : > { %s19246_s6 = scalar_lea.vmem [#allocation10], %s16810_s26 }
 0x129   : > { %22607 = sst [smem:[#allocation60_spill]] %s19246_s6 }
 0x12a   : > { %18652 = dma.done.wait (%p22606_p7), %s1260_s28, 13824  }
 0x12b   : > { %18654 = vsyncadd (%p22606_p7), %s1260_s28, 4294953472  ;;  %s19252_s20 = scalar_lea.vmem [#allocation12], %s16810_s26  ;;  %s1278_s22 = scalar_lea.sflag [#allocation14], %s1241_s23 }
 0x12c   : > { %22608 = sst [smem:[#allocation61_spill]] %s19252_s20  ;;  %s19254_s9 = scalar_lea.vmem [#allocation13], %s16810_s26 }
 0x12d   : > { %18656 = dma.done.wait (%p22606_p7), %s1278_s22, 7680  }
 0x12e   : > { %18658 = vsyncadd (%p22606_p7), %s1278_s22, 4294959616  ;;  %s22609_s17 = sld [smem:[#allocation50_spill]]  ;;  %s19260_s0 = smul.u32 48, %s1243_s1 }
 0x12f   : > { %s22610_s12 = sld [smem:[#allocation23_spill]]  ;;  %p1461_p11 = scmp.lt.s32.totalorder %s19066_s24, 5 }
 0x130   : > { %s22611_s27 = sld [smem:[#allocation24_spill]]  ;;  %s15031_s29 = sadd.s32 4294967290, %s19066_s24 }
 0x131   : > { %s22612_s2 = sld [smem:[#allocation25_spill]]  ;;  %p1538_p6 = scmp.gt.s32.totalorder %s15031_s29, 0 }
 0x132   : > { %s22613_s18 = sld [smem:[#allocation26_spill]]  ;;  %p15032_p13 = scmp.lt.s32.totalorder %s15031_s29, 5 }
 0x133   : > { %s1462_s15 = scalar_select %p1461_p11, %s19066_s24, 5 }
 0x134   : > { %s22614_s23 = sld [smem:[#allocation27_spill]]  ;;  %v19266_v0 = vld [vmem:[%s22609_s17] sm:$0xff]  ;;  %v19269_v1 = vld [vmem:[%s22609_s17 + $0x8] sm:$0xff]  ;;  %v19272_v2 = vld [vmem:[%s22609_s17 + $0x10] sm:$0xff]  ;;  %p15051_p1 = scmp.ne.s32.totalorder %s19066_s24, 0 }
 0x135   : > { %s22836_s15 = smov (!%p1461_p11, %s1462_s15), 5  ;;  %s22615_s13 = sld [smem:[#allocation28_spill]]  ;;  %22617 = vst [vmem:[#allocation62_spill] sm:$0xff] %v19266_v0  ;;  %22618 = vst [vmem:[#allocation63_spill] sm:$0xff] %v19269_v1 }
 0x136   : > { %s1539_s26 = scalar_select %p1538_p6, %s15031_s29, 0  ;;  %22619 = vst [vmem:[#allocation64_spill] sm:$0xff] %v19272_v2 }
 0x137   : > { %s22616_s21 = sld [smem:[#allocation29_spill]]  ;;  %s16812_s28 = smul.u32 5, %s22836_s15 }
 0x138   : > { %s22620_s1 = sld [smem:[#allocation35_spill]]  ;;  %s16813_s22 = smul.u32 720, %s22836_s15 }
 0x139   : > { %s22621_s4 = sld [smem:[#allocation36_spill]]  ;;  %s19275_s8 = scalar_lea.vmem %s22610_s12, %s16812_s28 }
 0x13a   : > { %s22622_s19 = sld [smem:[#allocation37_spill]]  ;;  %s16814_s30 = smul.u32 864, %s22836_s15 }
 0x13b   : > { %s19278_s16 = scalar_lea.vmem %s22611_s27, %s16813_s22  ;;  %s16815_s7 = smul.u32 432, %s22836_s15 }
 0x13c   : > { %s19281_s11 = scalar_lea.vmem %s22612_s2, %s16814_s30  ;;  %s16816_s10 = smul.u32 48, %s22836_s15 }
 0x13d   : > { %s19284_s5 = scalar_lea.vmem %s22613_s18, %s16815_s7  ;;  %s19287_s17 = scalar_lea.vmem %s22614_s23, %s16815_s7 }
 0x13e   : > { %s19290_s20 = scalar_lea.vmem %s22615_s13, %s16815_s7  ;;  %s19293_s6 = scalar_lea.vmem %s22616_s21, %s16816_s10 }
 0x13f   : > { %s22838_s26 = smov (!%p15032_p13, %s1539_s26), 5  ;;  %s19305_s30 = scalar_lea.vmem [#allocation15], %s19260_s0 }
 0x140   : > { %s16817_s12 = smul.u32 5, %s22838_s26  ;;  %s22623_s2 = sld [smem:[#allocation22_spill]] (!%p15051_p1) }
 0x141   : > { %s16818_s29 = smul.u32 720, %s22838_s26 }
 0x142   : > { %s19296_s28 = scalar_lea.vmem %s22620_s1, %s16817_s12  ;;  %s16819_s25 = smul.u32 864, %s22838_s26 }
 0x143   : > { %s19299_s27 = scalar_lea.vmem %s22621_s4, %s16818_s29  ;;  %1582 = sbr.rel (%p15051_p1) target bundleno = 332 (0x14c), region = 168 }
 0x144   : > { %s19302_s22 = scalar_lea.vmem %s22622_s19, %s16819_s25 }
 0x148   : > { %v1583_v3 = vld [vmem:[%s22623_s2] sm:$0xff]  ;;  %v1584_v4 = vld [vmem:[%s22623_s2 + $0x8] sm:$0xff]  ;;  %v1585_v5 = vld [vmem:[%s22623_s2 + $0x10] sm:$0xff]  ;;  %vm1591_vm0 = vcmask 261120  }
 0x149   : > { %1589 = vst [vmem:[#allocation2] sm:$0xff] %v1583_v3  ;;  %1590 = vst [vmem:[#allocation2 + $0x8] sm:$0xff] %v1584_v4  ;;  %v1586_v6 = vld [vmem:[%s22623_s2 + $0x18] sm:$0xff]  ;;  %v1587_v7 = vld [vmem:[%s22623_s2 + $0x20] sm:$0xff] }
 0x14a   : > { %1592 = vst.msk [vmem:[#allocation2 + $0x10] sm:$0xff] %vm1591_vm0, %v1585_v5  ;;  %v1588_v8 = vld [vmem:[%s22623_s2 + $0x28] sm:$0xff]  ;;  %1593 = vst [vmem:[#allocation2 + $0x18] sm:$0xff] %v1586_v6 }
 0x14b   : > { %1594 = vst [vmem:[#allocation2 + $0x20] sm:$0xff] %v1587_v7  ;;  %1595 = vst.msk [vmem:[#allocation2 + $0x28] sm:$0xff] %vm1591_vm0, %v1588_v8 }
 0x14c PF: > { %p15052_p4 = scmp.ge.s32.totalorder %s19066_s24, 6 }
 0x14e   : > { %1599 = sbr.rel (%p15052_p4) target bundleno = 2546 (0x9f2), region = 172 }
 0x153   : > { %v16967_v9 = vld [vmem:[%s19287_s17 + $0xac] ss:$12 sps:$4 sm:$0xff]   ;;  %v16969_v10 = vld [vmem:[%s19287_s17 + $0x19c] ss:$12 sps:$4 sm:$0xff]   ;;  %v22433_v11 = vmov 0   ;;  %v1608_v19 = vld [vmem:[#allocation2 + $0x10] sm:$0xff] }
 0x154   : > { %2066 = vmatprep.mubr.bf16.mxu1 %v22433_v11  ;;  %1991 = vmatprep.subr.bf16.mxu0 %v16967_v9  ;;  %v16971_v12 = vld [vmem:[%s19287_s17 + $0xa8] ss:$12 sps:$4 sm:$0xff]   ;;  %v16972_v13 = vld [vmem:[%s19287_s17 + $0x198] ss:$12 sps:$4 sm:$0xff]   ;;  %v16977_v16 = vld [vmem:[%s19287_s17 + $0x90] ss:$12 sps:$4 sm:$0xff]  }
 0x155   : > { %2046 = vmatprep.subr.bf16.mxu1 %v16969_v10  ;;  %v16973_v14 = vld [vmem:[%s19287_s17 + $0x94] ss:$12 sps:$4 sm:$0xff]   ;;  %1992 = vmatpush1.bf16.msra.mxu0 %v16971_v12  ;;  %v16975_v15 = vld [vmem:[%s19287_s17 + $0x184] ss:$12 sps:$4 sm:$0xff]   ;;  %v16979_v18 = vld [vmem:[%s19287_s17 + $0x7c] ss:$12 sps:$4 sm:$0xff]  }
 0x156   : > { %2047 = vmatpush1.bf16.msra.mxu1 %v16972_v13  ;;  %1993 = vmatprep.subr.bf16.mxu0 %v16973_v14  ;;  %v16978_v17 = vld [vmem:[%s19287_s17 + $0x180] ss:$12 sps:$4 sm:$0xff]   ;;  %vm1987_vm1 = vcmask 261120   ;;  %v16981_v22 = vld [vmem:[%s19287_s17 + $0x170] ss:$12 sps:$4 sm:$0xff]   ;;  %v22435_v62 = vmov 0.0  }
 0x157   : > { %2048 = vmatprep.subr.bf16.mxu1 %v16975_v15  ;;  %v1611_v20 = vld [vmem:[#allocation2 + $0x28] sm:$0xff]  ;;  %v16982_v23 = vld [vmem:[%s19287_s17 + $0x78] ss:$12 sps:$4 sm:$0xff]   ;;  %v16983_v24 = vld [vmem:[%s19287_s17 + $0xb0] ss:$12 sps:$4 sm:$0xff]   ;;  %vm18733_vm2 = vmmov 0  }
 0x158   : > { %v19325_v21 = vpack.c.bf16 %v1611_v20, %v1608_v19  ;;  %v16984_v25 = vld [vmem:[%s19287_s17 + $0x64] ss:$12 sps:$4 sm:$0xff]   ;;  %v16987_v27 = vld [vmem:[%s19287_s17 + $0x60] ss:$12 sps:$4 sm:$0xff]   ;;  %v16992_v31 = vld [vmem:[%s19287_s17 + $0x48] ss:$12 sps:$4 sm:$0xff]  }
 0x159   : > { %1994 = vmatpush1.bf16.msra.mxu0 %v16977_v16  ;;  %v16986_v26 = vld [vmem:[%s19287_s17 + $0x158] ss:$12 sps:$4 sm:$0xff]   ;;  %v16991_v30 = vld [vmem:[%s19287_s17 + $0x140] ss:$12 sps:$4 sm:$0xff]   ;;  %v16996_v34 = vld [vmem:[%s19287_s17 + $0x128] ss:$12 sps:$4 sm:$0xff]  }
 0x15a   : > { %2049 = vmatpush1.bf16.msra.mxu1 %v16978_v17  ;;  %1995 = vmatprep.subr.bf16.mxu0 %v16979_v18  ;;  %v16988_v28 = vld [vmem:[%s19287_s17 + $0x98] ss:$12 sps:$4 sm:$0xff]   ;;  %v16993_v32 = vld [vmem:[%s19287_s17 + $0x80] ss:$12 sps:$4 sm:$0xff]   ;;  %v16997_v35 = vld [vmem:[%s19287_s17 + $0x30] ss:$12 sps:$4 sm:$0xff]  }
 0x15b   : > { %16113 = vmatprep.subr.bf16.mxu1 %v16981_v22  ;;  %v16989_v29 = vld [vmem:[%s19287_s17 + $0x4c] ss:$12 sps:$4 sm:$0xff]   ;;  %v16994_v33 = vld [vmem:[%s19287_s17 + $0x34] ss:$12 sps:$4 sm:$0xff]   ;;  %v16999_v37 = vld [vmem:[%s19287_s17 + $0x1c] ss:$12 sps:$4 sm:$0xff]  }
 0x15c   : > { %v16998_v36 = vld [vmem:[%s19287_s17 + $0x68] ss:$12 sps:$4 sm:$0xff]   ;;  %v17001_v38 = vld [vmem:[%s19287_s17 + $0x110] ss:$12 sps:$4 sm:$0xff]   ;;  %v17002_v39 = vld [vmem:[%s19287_s17 + $0x18] ss:$12 sps:$4 sm:$0xff]  }
 0x15d   : > { %15107 = vmatmul.mubr.msk.bf16.vlgmr.msra.gmra.mxu1 %vm1987_vm1, %v19325_v21  ;;  %1996 = vmatpush1.bf16.msra.mxu0 %v16982_v23  ;;  %v17003_v40 = vld [vmem:[%s19287_s17 + $0x50] ss:$12 sps:$4 sm:$0xff]   ;;  %v17006_v42 = vld [vmem:[%s19287_s17 + $0xf8] ss:$12 sps:$4 sm:$0xff]   ;;  %v17007_v43 = vld [vmem:[%s19287_s17] ss:$12 sps:$4 sm:$0xff]  }
 0x15e   : > { %16114 = vmatpush3.bf16.msra.mxu1 %v16983_v24  ;;  %1997 = vmatprep.subr.bf16.mxu0 %v16984_v25  ;;  %v17004_v41 = vld [vmem:[%s19287_s17 + $0x4] ss:$12 sps:$4 sm:$0xff]   ;;  %v17009_v45 = vld [vmem:[%s19287_s17 + $0x16c] ss:$12 sps:$4 sm:$0xff]   ;;  %v17012_v47 = vld [vmem:[%s19287_s17 + $0x168] ss:$12 sps:$4 sm:$0xff]  }
 0x15f   : > { %16115 = vmatprep.subr.bf16.mxu1 %v16986_v26  ;;  %v17008_v44 = vld [vmem:[%s19287_s17 + $0x38] ss:$12 sps:$4 sm:$0xff]   ;;  %v17011_v46 = vld [vmem:[%s19287_s17 + $0xe0] ss:$12 sps:$4 sm:$0xff]   ;;  %v17016_v50 = vld [vmem:[%s19287_s17 + $0xc8] ss:$12 sps:$4 sm:$0xff]  }
 0x160   : > { %v17013_v48 = vld [vmem:[%s19287_s17 + $0x20] ss:$12 sps:$4 sm:$0xff]   ;;  %v17017_v53 = vld [vmem:[%s19287_s17 + $0x150] ss:$12 sps:$4 sm:$0xff]   ;;  %v17018_v54 = vld [vmem:[%s19287_s17 + $0x8] ss:$12 sps:$4 sm:$0xff]  }
 0x161   : > { %1998 = vmatpush1.bf16.msra.mxu0 %v16987_v27  ;;  %v17014_v49 = vld [vmem:[%s19287_s17 + $0x154] ss:$12 sps:$4 sm:$0xff]   ;;  %v1607_v51 = vld [vmem:[#allocation2 + $0x8] sm:$0xff]  ;;  %v1609_v57 = vld [vmem:[#allocation2 + $0x18] sm:$0xff]  ;;  %s22736_s19 = sld [smem:[#allocation43_spill]]  ;;  %vm3647_vm3 = vcmask 130048  }
 0x162   : > { %16116 = vmatpush3.bf16.msra.mxu1 %v16988_v28  ;;  %1999 = vmatprep.subr.bf16.mxu0 %v16989_v29  ;;  %v1610_v52 = vld [vmem:[#allocation2 + $0x20] sm:$0xff]  ;;  %v17019_v58 = vld [vmem:[%s19287_s17 + $0x13c] ss:$12 sps:$4 sm:$0xff]   ;;  %v17027_v5 = vld [vmem:[%s19287_s17 + $0x10c] ss:$12 sps:$4 sm:$0xff]   ;;  %vm6885_vm4 = vcmask 523264  }
 0x163   : > { %16117 = vmatprep.subr.bf16.mxu1 %v16991_v30  ;;  %v19360_v55 = vpack.c.bf16 %v1610_v52, %v1607_v51  ;;  %v1606_v56 = vld [vmem:[#allocation2] sm:$0xff]  ;;  %v17026_v4 = vld [vmem:[%s19287_s17 + $0x188] ss:$12 sps:$4 sm:$0xff]   ;;  %v17031_v6 = vld [vmem:[%s19284_s5 + $0xac] ss:$12 sps:$4 sm:$0xff]  }
 0x164   : > { %v19365_v59 = vpack.c.bf16 %v1609_v57, %v1606_v56  ;;  %v17021_v60 = vld [vmem:[%s19287_s17 + $0x138] ss:$12 sps:$4 sm:$0xff]   ;;  %v17022_v61 = vld [vmem:[%s19287_s17 + $0x1a0] ss:$12 sps:$4 sm:$0xff]   ;;  %v17029_v7 = vld [vmem:[%s19284_s5 + $0xa8] ss:$12 sps:$4 sm:$0xff]  }
 0x165   : > { %2000 = vmatpush1.bf16.msra.mxu0 %v16992_v31  ;;  %2109 = vmatprep.mubr.bf16.mxu1 %v19360_v55  ;;  %v17023_v63 = vld [vmem:[%s19287_s17 + $0x124] ss:$12 sps:$4 sm:$0xff]   ;;  %v17025_v3 = vld [vmem:[%s19287_s17 + $0x120] ss:$12 sps:$4 sm:$0xff]   ;;  %v17032_v8 = vld [vmem:[%s19287_s17 + $0x108] ss:$12 sps:$4 sm:$0xff]  }
 0x166   : > { %16118 = vmatpush3.bf16.msra.mxu1 %v16993_v32  ;;  %2001 = vmatprep.subr.bf16.mxu0 %v16994_v33  ;;  %v17033_v9 = vld [vmem:[%s19287_s17 + $0xf4] ss:$12 sps:$4 sm:$0xff]   ;;  %v17035_v12 = vld [vmem:[%s19284_s5 + $0x90] ss:$12 sps:$4 sm:$0xff]   ;;  %v17041_v16 = vld [vmem:[%s19284_s5 + $0x78] ss:$12 sps:$4 sm:$0xff]  }
 0x167   : > { %16119 = vmatprep.subr.bf16.mxu1 %v16996_v34  ;;  %2023 = vmatprep.mubr.bf16.mxu0 %v19360_v55  ;;  %v17037_v10 = vld [vmem:[%s19284_s5 + $0x94] ss:$12 sps:$4 sm:$0xff]   ;;  %v17038_v13 = vld [vmem:[%s19287_s17 + $0xf0] ss:$12 sps:$4 sm:$0xff]   ;;  %v17044_v17 = vld [vmem:[%s19287_s17 + $0xd8] ss:$12 sps:$4 sm:$0xff]  }
 0x168   : > { %v17039_v14 = vld [vmem:[%s19287_s17 + $0xdc] ss:$12 sps:$4 sm:$0xff]   ;;  %v17045_v18 = vld [vmem:[%s19287_s17 + $0xc4] ss:$12 sps:$4 sm:$0xff]   ;;  %v17047_v20 = vld [vmem:[%s19284_s5 + $0x60] ss:$12 sps:$4 sm:$0xff]  }
 0x169   : > { %2002 = vmatpush1.bf16.msra.mxu0 %v16997_v35  ;;  %v17043_v15 = vld [vmem:[%s19284_s5 + $0x7c] ss:$12 sps:$4 sm:$0xff]   ;;  %v17049_v19 = vld [vmem:[%s19284_s5 + $0x64] ss:$12 sps:$4 sm:$0xff]   ;;  %v17050_v22 = vld [vmem:[%s19287_s17 + $0xc0] ss:$12 sps:$4 sm:$0xff]  }
 0x16a   : > { %16120 = vmatpush3.bf16.msra.mxu1 %v16998_v36  ;;  %2003 = vmatprep.subr.bf16.mxu0 %v16999_v37  ;;  %v17053_v23 = vld [vmem:[%s19284_s5 + $0x4c] ss:$12 sps:$4 sm:$0xff]   ;;  %v17056_v24 = vld [vmem:[%s19284_s5 + $0x19c] ss:$12 sps:$4 sm:$0xff]   ;;  %v17059_v27 = vld [vmem:[%s19284_s5 + $0x34] ss:$12 sps:$4 sm:$0xff]  }
 0x16b   : > { %16121 = vmatprep.subr.bf16.mxu1 %v17001_v38  ;;  %v17051_v25 = vld [vmem:[%s19284_s5 + $0x48] ss:$12 sps:$4 sm:$0xff]   ;;  %v17054_v26 = vld [vmem:[%s19284_s5 + $0x198] ss:$12 sps:$4 sm:$0xff]   ;;  %v17057_v29 = vld [vmem:[%s19284_s5 + $0x30] ss:$12 sps:$4 sm:$0xff]  }
 0x16c   : > { %v17062_v28 = vld [vmem:[%s19284_s5 + $0x184] ss:$12 sps:$4 sm:$0xff]   ;;  %v17060_v30 = vld [vmem:[%s19284_s5 + $0x180] ss:$12 sps:$4 sm:$0xff]   ;;  %v17065_v31 = vld [vmem:[%s19284_s5 + $0x1c] ss:$12 sps:$4 sm:$0xff]  }
 0x16d   : > { %2004 = vmatpush1.bf16.msra.mxu0 %v17002_v39  ;;  %v17066_v32 = vld [vmem:[%s19284_s5 + $0x170] ss:$12 sps:$4 sm:$0xff]   ;;  %v17063_v33 = vld [vmem:[%s19284_s5 + $0x18] ss:$12 sps:$4 sm:$0xff]   ;;  %v17068_v37 = vld [vmem:[%s19284_s5] ss:$12 sps:$4 sm:$0xff]  }
 0x16e   : > { %16122 = vmatpush3.bf16.msra.mxu1 %v17003_v40  ;;  %2005 = vmatprep.subr.bf16.mxu0 %v17004_v41  ;;  %v17067_v34 = vld [vmem:[%s19284_s5 + $0xb0] ss:$12 sps:$4 sm:$0xff]   ;;  %v17071_v36 = vld [vmem:[%s19284_s5 + $0x158] ss:$12 sps:$4 sm:$0xff]   ;;  %v17076_v40 = vld [vmem:[%s19284_s5 + $0x140] ss:$12 sps:$4 sm:$0xff]  }
 0x16f   : > { %16123 = vmatprep.subr.bf16.mxu1 %v17006_v42  ;;  %v17070_v35 = vld [vmem:[%s19284_s5 + $0x4] ss:$12 sps:$4 sm:$0xff]   ;;  %v17075_v39 = vld [vmem:[%s19284_s5 + $0x16c] ss:$12 sps:$4 sm:$0xff]   ;;  %v17073_v41 = vld [vmem:[%s19284_s5 + $0x168] ss:$12 sps:$4 sm:$0xff]  }
 0x170   : > { %v17072_v38 = vld [vmem:[%s19284_s5 + $0x98] ss:$12 sps:$4 sm:$0xff]   ;;  %v17077_v42 = vld [vmem:[%s19284_s5 + $0x80] ss:$12 sps:$4 sm:$0xff]  }
 0x171   : > { %2006 = vmatpush1.bf16.msra.mxu0 %v17007_v43  ;;  %v17080_v43 = vld [vmem:[%s19284_s5 + $0x154] ss:$12 sps:$4 sm:$0xff]   ;;  %v17090_v51 = vld [vmem:[%s19284_s5 + $0x124] ss:$12 sps:$4 sm:$0xff]   ;;  %v17095_v56 = vld [vmem:[%s19284_s5 + $0x10c] ss:$12 sps:$4 sm:$0xff]  }
 0x172   : > { %16124 = vmatpush3.bf16.msra.mxu1 %v17008_v44  ;;  %2007 = vmatprep.subr.bf16.mxu0 %v17009_v45  ;;  %v17081_v44 = vld [vmem:[%s19284_s5 + $0x128] ss:$12 sps:$4 sm:$0xff]   ;;  %v17078_v45 = vld [vmem:[%s19284_s5 + $0x150] ss:$12 sps:$4 sm:$0xff]   ;;  %v17091_v52 = vld [vmem:[%s19284_s5 + $0xf8] ss:$12 sps:$4 sm:$0xff]  }
 0x173   : > { %16125 = vmatprep.subr.bf16.mxu1 %v17011_v46  ;;  %v17082_v46 = vld [vmem:[%s19284_s5 + $0x68] ss:$12 sps:$4 sm:$0xff]   ;;  %v17096_v57 = vld [vmem:[%s19284_s5 + $0xe0] ss:$12 sps:$4 sm:$0xff]  }
 0x175   : > { %2008 = vmatpush2.bf16.msra.mxu0 %v17012_v47  ;;  %v17085_v47 = vld [vmem:[%s19284_s5 + $0x13c] ss:$12 sps:$4 sm:$0xff]  }
 0x176   : > { %16126 = vmatpush3.bf16.msra.mxu1 %v17013_v48  ;;  %2009 = vmatprep.subr.bf16.mxu0 %v17014_v49  ;;  %v17086_v48 = vld [vmem:[%s19284_s5 + $0x110] ss:$12 sps:$4 sm:$0xff]   ;;  %v17083_v49 = vld [vmem:[%s19284_s5 + $0x138] ss:$12 sps:$4 sm:$0xff]  }
 0x177   : > { %16127 = vmatprep.subr.bf16.mxu1 %v17016_v50  ;;  %v17087_v50 = vld [vmem:[%s19284_s5 + $0x50] ss:$12 sps:$4 sm:$0xff]  }
 0x179   : > { %2010 = vmatpush2.bf16.msra.mxu0 %v17017_v53  ;;  %v17088_v53 = vld [vmem:[%s19284_s5 + $0x120] ss:$12 sps:$4 sm:$0xff]  }
 0x17a   : > { %16128 = vmatpush3.bf16.msra.mxu1 %v17018_v54  ;;  %2011 = vmatprep.subr.bf16.mxu0 %v17019_v58  ;;  %v17092_v54 = vld [vmem:[%s19284_s5 + $0x38] ss:$12 sps:$4 sm:$0xff]   ;;  %v17093_v58 = vld [vmem:[%s19284_s5 + $0x108] ss:$12 sps:$4 sm:$0xff]  }
 0x17b   : > { %16554 = vmatprep.subr.bf16.mxu1 %v22435_v62 }
 0x17d   : > { %2110 = vmatmul.mubr.bf16.vlgmr.msra.gmra.mxu1 %v19365_v59  ;;  %2012 = vmatpush2.bf16.msra.mxu0 %v17021_v60  ;;  %v17097_v60 = vld [vmem:[%s19284_s5 + $0x20] ss:$12 sps:$4 sm:$0xff]  }
 0x17e   : > { %16555 = vmatpush3.bf16.msra.mxu1 %v17022_v61  ;;  %2013 = vmatprep.subr.bf16.mxu0 %v17023_v63  ;;  %v17100_v61 = vld [vmem:[%s19284_s5 + $0xf4] ss:$12 sps:$4 sm:$0xff]  }
 0x17f   : > { %16556 = vmatprep.subr.bf16.mxu1 %v22435_v62  ;;  %16558 = vmatprep.mubr.msk.bf16.mxu1 %vm18733_vm2, %v22435_v62  ;;  %v17101_v63 = vld [vmem:[%s19284_s5 + $0xc8] ss:$12 sps:$4 sm:$0xff]  }
 0x181   : > { %2014 = vmatpush2.bf16.msra.mxu0 %v17025_v3  ;;  %v17098_v3 = vld [vmem:[%s19284_s5 + $0xf0] ss:$12 sps:$4 sm:$0xff]  }
 0x182   : > { %16557 = vmatpush3.bf16.msra.mxu1 %v17026_v4  ;;  %2015 = vmatprep.subr.bf16.mxu0 %v17027_v5  ;;  %v17102_v4 = vld [vmem:[%s19284_s5 + $0x8] ss:$12 sps:$4 sm:$0xff]  }
 0x183   : > { %2531 = vmatprep.subr.bf16.mxu1 %v17031_v6  ;;  %v17105_v5 = vld [vmem:[%s19284_s5 + $0xdc] ss:$12 sps:$4 sm:$0xff]   ;;  %v17103_v6 = vld [vmem:[%s19284_s5 + $0xd8] ss:$12 sps:$4 sm:$0xff]  }
 0x185   : > { %16559 = vmatmul.mubr.msk.bf16.vlgmr.msra.gmra.mxu1 %vm1987_vm1, %v19325_v21  ;;  %2016 = vmatpush2.bf16.msra.mxu0 %v17032_v8  ;;  %v17109_v8 = vld [vmem:[%s19284_s5 + $0xc4] ss:$12 sps:$4 sm:$0xff]  }
 0x186   : > { %2532 = vmatpush1.bf16.msra.mxu1 %v17029_v7  ;;  %2017 = vmatprep.subr.bf16.mxu0 %v17033_v9  ;;  %v17106_v7 = vld [vmem:[%s19284_s5 + $0x1a0] ss:$12 sps:$4 sm:$0xff]  }
 0x187   : > { %2533 = vmatprep.subr.bf16.mxu1 %v17037_v10  ;;  %2563 = vmatprep.mubr.bf16.mxu1 %v19360_v55  ;;  %v17107_v9 = vld [vmem:[%s19284_s5 + $0xc0] ss:$12 sps:$4 sm:$0xff]   ;;  %v17110_v10 = vld [vmem:[%s19284_s5 + $0x188] ss:$12 sps:$4 sm:$0xff]  }
 0x189   : > { %2018 = vmatpush2.bf16.msra.mxu0 %v17038_v13  ;;  %v17143_v13 = vld [vmem:[%s19290_s20 + $0x19c] ss:$12 sps:$4 sm:$0xff]  }
 0x18a   : > { %2534 = vmatpush1.bf16.msra.mxu1 %v17035_v12  ;;  %2019 = vmatprep.subr.bf16.mxu0 %v17039_v14  ;;  %v17113_v12 = vld [vmem:[%s19290_s20 + $0xac] ss:$12 sps:$4 sm:$0xff]   ;;  %v17111_v14 = vld [vmem:[%s19290_s20 + $0xa8] ss:$12 sps:$4 sm:$0xff]  }
 0x18b   : > { %2535 = vmatprep.subr.bf16.mxu1 %v17043_v15  ;;  %v17141_v15 = vld [vmem:[%s19290_s20 + $0x198] ss:$12 sps:$4 sm:$0xff]  }
 0x18d   : > { %2020 = vmatpush2.bf16.msra.mxu0 %v17044_v17  ;;  %v17149_v17 = vld [vmem:[%s19290_s20 + $0x184] ss:$12 sps:$4 sm:$0xff]  }
 0x18e   : > { %2536 = vmatpush1.bf16.msra.mxu1 %v17041_v16  ;;  %2021 = vmatprep.subr.bf16.mxu0 %v17045_v18  ;;  %v17116_v16 = vld [vmem:[%s19290_s20 + $0x94] ss:$12 sps:$4 sm:$0xff]   ;;  %v17114_v18 = vld [vmem:[%s19290_s20 + $0x90] ss:$12 sps:$4 sm:$0xff]  }
 0x18f   : > { %2537 = vmatprep.subr.bf16.mxu1 %v17049_v19  ;;  %v17119_v19 = vld [vmem:[%s19290_s20 + $0x7c] ss:$12 sps:$4 sm:$0xff]  }
 0x191   : > { %2022 = vmatpush2.bf16.msra.mxu0 %v17050_v22  ;;  %v17153_v22 = vld [vmem:[%s19290_s20 + $0x170] ss:$12 sps:$4 sm:$0xff]  }
 0x192   : > { %2538 = vmatpush1.bf16.msra.mxu1 %v17047_v20  ;;  %2586 = vmatprep.subr.bf16.mxu0 %v17056_v24  ;;  %v17147_v20 = vld [vmem:[%s19290_s20 + $0x180] ss:$12 sps:$4 sm:$0xff]   ;;  %v17122_v24 = vld [vmem:[%s19290_s20 + $0x64] ss:$12 sps:$4 sm:$0xff]  }
 0x193   : > { %2539 = vmatprep.subr.bf16.mxu1 %v17053_v23  ;;  %v17117_v23 = vld [vmem:[%s19290_s20 + $0x78] ss:$12 sps:$4 sm:$0xff]  }
 0x194   : > { %2024 = vmatmul.mubr.bf16.vlgmr.msra.gmra.mxu0 %v19365_v59 }
 0x195   : > { %2587 = vmatpush1.bf16.msra.mxu0 %v17054_v26  ;;  %2606 = vmatprep.mubr.bf16.mxu0 %v22433_v11  ;;  %v17158_v26 = vld [vmem:[%s19290_s20 + $0x158] ss:$12 sps:$4 sm:$0xff]  }
 0x196   : > { %2540 = vmatpush1.bf16.msra.mxu1 %v17051_v25  ;;  %2588 = vmatprep.subr.bf16.mxu0 %v17062_v28  ;;  %v17154_v25 = vld [vmem:[%s19290_s20 + $0xb0] ss:$12 sps:$4 sm:$0xff]   ;;  %v17159_v28 = vld [vmem:[%s19290_s20 + $0x98] ss:$12 sps:$4 sm:$0xff]  }
 0x197   : > { %2541 = vmatprep.subr.bf16.mxu1 %v17059_v27  ;;  %v17120_v27 = vld [vmem:[%s19290_s20 + $0x60] ss:$12 sps:$4 sm:$0xff]  }
 0x199   : > { %2589 = vmatpush1.bf16.msra.mxu0 %v17060_v30  ;;  %v17163_v30 = vld [vmem:[%s19290_s20 + $0x140] ss:$12 sps:$4 sm:$0xff]  }
 0x19a   : > { %2542 = vmatpush1.bf16.msra.mxu1 %v17057_v29  ;;  %16138 = vmatprep.subr.bf16.mxu0 %v17066_v32  ;;  %v17125_v29 = vld [vmem:[%s19290_s20 + $0x4c] ss:$12 sps:$4 sm:$0xff]  }
 0x19b   : > { %2543 = vmatprep.subr.bf16.mxu1 %v17065_v31  ;;  %v17123_v31 = vld [vmem:[%s19290_s20 + $0x48] ss:$12 sps:$4 sm:$0xff]   ;;  %v17164_v32 = vld [vmem:[%s19290_s20 + $0x80] ss:$12 sps:$4 sm:$0xff]  }
 0x19c   : > { %15163 = vmatmul.mubr.msk.bf16.vlgmr.msra.gmra.mxu0 %vm1987_vm1, %v19325_v21 }
 0x19d   : > { %16139 = vmatpush3.bf16.msra.mxu0 %v17067_v34  ;;  %2649 = vmatprep.mubr.bf16.mxu0 %v19360_v55  ;;  %v17168_v34 = vld [vmem:[%s19290_s20 + $0x128] ss:$12 sps:$4 sm:$0xff]  }
 0x19e   : > { %2544 = vmatpush1.bf16.msra.mxu1 %v17063_v33  ;;  %16140 = vmatprep.subr.bf16.mxu0 %v17071_v36  ;;  %v17128_v33 = vld [vmem:[%s19290_s20 + $0x34] ss:$12 sps:$4 sm:$0xff]   ;;  %v17131_v36 = vld [vmem:[%s19290_s20 + $0x1c] ss:$12 sps:$4 sm:$0xff]  }
 0x19f   : > { %2545 = vmatprep.subr.bf16.mxu1 %v17070_v35  ;;  %v17126_v35 = vld [vmem:[%s19290_s20 + $0x30] ss:$12 sps:$4 sm:$0xff]  }
 0x1a1   : > { %16141 = vmatpush3.bf16.msra.mxu0 %v17072_v38  ;;  %v17173_v38 = vld [vmem:[%s19290_s20 + $0x110] ss:$12 sps:$4 sm:$0xff]  }
 0x1a2   : > { %2546 = vmatpush1.bf16.msra.mxu1 %v17068_v37  ;;  %16142 = vmatprep.subr.bf16.mxu0 %v17076_v40  ;;  %v17169_v37 = vld [vmem:[%s19290_s20 + $0x68] ss:$12 sps:$4 sm:$0xff]   ;;  %v17134_v40 = vld [vmem:[%s19290_s20 + $0x4] ss:$12 sps:$4 sm:$0xff]  }
 0x1a3   : > { %2547 = vmatprep.subr.bf16.mxu1 %v17075_v39  ;;  %v17174_v39 = vld [vmem:[%s19290_s20 + $0x50] ss:$12 sps:$4 sm:$0xff]  }
 0x1a5   : > { %16143 = vmatpush3.bf16.msra.mxu0 %v17077_v42  ;;  %v17132_v42 = vld [vmem:[%s19290_s20] ss:$12 sps:$4 sm:$0xff]  }
 0x1a6   : > { %2548 = vmatpush2.bf16.msra.mxu1 %v17073_v41  ;;  %16144 = vmatprep.subr.bf16.mxu0 %v17081_v44  ;;  %v17175_v41 = vld [vmem:[%s19290_s20 + $0xf8] ss:$12 sps:$4 sm:$0xff]  }
 0x1a7   : > { %2549 = vmatprep.subr.bf16.mxu1 %v17080_v43  ;;  %v17176_v43 = vld [vmem:[%s19290_s20 + $0x38] ss:$12 sps:$4 sm:$0xff]  }
 0x1a8   : > { %v17137_v44 = vld [vmem:[%s19290_s20 + $0x16c] ss:$12 sps:$4 sm:$0xff]  }
 0x1a9   : > { %16145 = vmatpush3.bf16.msra.mxu0 %v17082_v46  ;;  %v17135_v46 = vld [vmem:[%s19290_s20 + $0x168] ss:$12 sps:$4 sm:$0xff]  }
 0x1aa   : > { %2550 = vmatpush2.bf16.msra.mxu1 %v17078_v45  ;;  %16146 = vmatprep.subr.bf16.mxu0 %v17086_v48  ;;  %v17177_v45 = vld [vmem:[%s19290_s20 + $0xe0] ss:$12 sps:$4 sm:$0xff]  }
 0x1ab   : > { %2551 = vmatprep.subr.bf16.mxu1 %v17085_v47  ;;  %v17178_v47 = vld [vmem:[%s19290_s20 + $0x20] ss:$12 sps:$4 sm:$0xff]  }
 0x1ac   : > { %v17140_v48 = vld [vmem:[%s19290_s20 + $0x154] ss:$12 sps:$4 sm:$0xff]  }
 0x1ad   : > { %16147 = vmatpush3.bf16.msra.mxu0 %v17087_v50  ;;  %v17138_v50 = vld [vmem:[%s19290_s20 + $0x150] ss:$12 sps:$4 sm:$0xff]  }
 0x1ae   : > { %2552 = vmatpush2.bf16.msra.mxu1 %v17083_v49  ;;  %16148 = vmatprep.subr.bf16.mxu0 %v17091_v52  ;;  %v17179_v49 = vld [vmem:[%s19290_s20 + $0xc8] ss:$12 sps:$4 sm:$0xff]  }
 0x1af   : > { %2553 = vmatprep.subr.bf16.mxu1 %v17090_v51  ;;  %v17180_v51 = vld [vmem:[%s19290_s20 + $0x8] ss:$12 sps:$4 sm:$0xff]  }
 0x1b0   : > { %v17146_v52 = vld [vmem:[%s19290_s20 + $0x13c] ss:$12 sps:$4 sm:$0xff]  }
 0x1b1   : > { %16149 = vmatpush3.bf16.msra.mxu0 %v17092_v54  ;;  %v17181_v54 = vld [vmem:[%s19290_s20 + $0x1a0] ss:$12 sps:$4 sm:$0xff]  }
 0x1b2   : > { %2554 = vmatpush2.bf16.msra.mxu1 %v17088_v53  ;;  %16150 = vmatprep.subr.bf16.mxu0 %v17096_v57  ;;  %v17144_v53 = vld [vmem:[%s19290_s20 + $0x138] ss:$12 sps:$4 sm:$0xff]   ;;  %v17150_v57 = vld [vmem:[%s19290_s20 + $0x120] ss:$12 sps:$4 sm:$0xff]  }
 0x1b3   : > { %2555 = vmatprep.subr.bf16.mxu1 %v17095_v56  ;;  %v17152_v56 = vld [vmem:[%s19290_s20 + $0x124] ss:$12 sps:$4 sm:$0xff]  }
 0x1b5   : > { %16151 = vmatpush3.bf16.msra.mxu0 %v17097_v60  ;;  %v17157_v60 = vld [vmem:[%s19290_s20 + $0x10c] ss:$12 sps:$4 sm:$0xff]  }
 0x1b6   : > { %2556 = vmatpush2.bf16.msra.mxu1 %v17093_v58  ;;  %16152 = vmatprep.subr.bf16.mxu0 %v17101_v63  ;;  %v17182_v58 = vld [vmem:[%s19290_s20 + $0x188] ss:$12 sps:$4 sm:$0xff]  }
 0x1b7   : > { %2557 = vmatprep.subr.bf16.mxu1 %v17100_v61  ;;  %v17155_v61 = vld [vmem:[%s19290_s20 + $0x108] ss:$12 sps:$4 sm:$0xff]  }
 0x1b8   : > { %v17162_v63 = vld [vmem:[%s19290_s20 + $0xf4] ss:$12 sps:$4 sm:$0xff]  }
 0x1b9   : > { %16153 = vmatpush3.bf16.msra.mxu0 %v17102_v4  ;;  %v17167_v4 = vld [vmem:[%s19290_s20 + $0xdc] ss:$12 sps:$4 sm:$0xff]  }
 0x1ba   : > { %2558 = vmatpush2.bf16.msra.mxu1 %v17098_v3  ;;  %16562 = vmatprep.subr.bf16.mxu0 %v22435_v62  ;;  %v17160_v3 = vld [vmem:[%s19290_s20 + $0xf0] ss:$12 sps:$4 sm:$0xff]  }
 0x1bb   : > { %2559 = vmatprep.subr.bf16.mxu1 %v17105_v5  ;;  %v17165_v5 = vld [vmem:[%s19290_s20 + $0xd8] ss:$12 sps:$4 sm:$0xff]  }
 0x1bc   : > { %2650 = vmatmul.mubr.bf16.vlgmr.msra.gmra.mxu0 %v19365_v59 }
 0x1bd   : > { %16563 = vmatpush3.bf16.msra.mxu0 %v17106_v7  ;;  %16566 = vmatprep.mubr.msk.bf16.mxu0 %vm18733_vm2, %v22435_v62  ;;  %v17170_v7 = vld [vmem:[%s19290_s20 + $0xc0] ss:$12 sps:$4 sm:$0xff]  }
 0x1be   : > { %2560 = vmatpush2.bf16.msra.mxu1 %v17103_v6  ;;  %16564 = vmatprep.subr.bf16.mxu0 %v22435_v62  ;;  %v17172_v6 = vld [vmem:[%s19290_s20 + $0xc4] ss:$12 sps:$4 sm:$0xff]  }
 0x1bf   : > { %2561 = vmatprep.subr.bf16.mxu1 %v17109_v8  ;;  %v1687_v8 = vlaneseq }
 0x1c1   : > { %16565 = vmatpush3.bf16.msra.mxu0 %v17110_v10 }
 0x1c2   : > { %2562 = vmatpush2.bf16.msra.mxu1 %v17107_v9  ;;  %3071 = vmatprep.subr.bf16.mxu0 %v17113_v12  ;;  %v1688_v9 = vshrl.u32 %v1687_v8, 7 }
 0x1c3   : > { %3126 = vmatprep.subr.bf16.mxu1 %v17143_v13 }
 0x1c4   : > { %16567 = vmatmul.mubr.msk.bf16.vlgmr.msra.gmra.mxu0 %vm1987_vm1, %v19325_v21  ;;  %v19522_v10 = vsub.s32 0, %v1688_v9 }
 0x1c5   : > { %2564 = vmatmul.mubr.bf16.vlgmr.msra.gmra.mxu1 %v19365_v59  ;;  %3072 = vmatpush1.bf16.msra.mxu0 %v17111_v14 }
 0x1c6   : > { %3127 = vmatpush1.bf16.msra.mxu1 %v17141_v15  ;;  %3073 = vmatprep.subr.bf16.mxu0 %v17116_v16  ;;  %22624 = vst [vmem:[#allocation65_spill] sm:$0xff] %v19522_v10  ;;  %v19533_v15 = vld [vmem:[%s19293_s6 + $0x10] sm:$0xff] }
 0x1c7   : > { %3128 = vmatprep.subr.bf16.mxu1 %v17149_v17  ;;  %3146 = vmatprep.mubr.bf16.mxu1 %v22433_v11 }
 0x1c8   : > { %3103 = vmatprep.mubr.bf16.mxu0 %v19360_v55 }
 0x1c9   : > { %3074 = vmatpush1.bf16.msra.mxu0 %v17114_v18 }
 0x1ca   : > { %3129 = vmatpush1.bf16.msra.mxu1 %v17147_v20  ;;  %3075 = vmatprep.subr.bf16.mxu0 %v17119_v19  ;;  %v19537_v20 = vsub.s32 1, %v1688_v9 }
 0x1cb   : > { %16163 = vmatprep.subr.bf16.mxu1 %v17153_v22  ;;  %v19539_v22 = vsub.s32 2, %v1688_v9 }
 0x1cc   : > { %22625 = vst [vmem:[#allocation66_spill] sm:$0xff] %v19537_v20 }
 0x1cd   : > { %15219 = vmatmul.mubr.msk.bf16.vlgmr.msra.gmra.mxu1 %vm1987_vm1, %v19325_v21  ;;  %3076 = vmatpush1.bf16.msra.mxu0 %v17117_v23  ;;  %22626 = vst [vmem:[#allocation67_spill] sm:$0xff] %v19539_v22  ;;  %v19541_v23 = vsub.s32 3, %v1688_v9 }
 0x1ce   : > { %16164 = vmatpush3.bf16.msra.mxu1 %v17154_v25  ;;  %3077 = vmatprep.subr.bf16.mxu0 %v17122_v24  ;;  %v19543_v25 = vsub.s32 7, %v1688_v9 }
 0x1cf   : > { %16165 = vmatprep.subr.bf16.mxu1 %v17158_v26  ;;  %3189 = vmatprep.mubr.bf16.mxu1 %v19360_v55  ;;  %v17129_v55 = vld [vmem:[%s19290_s20 + $0x18] ss:$12 sps:$4 sm:$0xff]   ;;  %22627 = vst [vmem:[#allocation68_spill] sm:$0xff] %v19541_v23  ;;  %v19545_v26 = vsub.s32 4, %v1688_v9 }
 0x1d0   : > { %22628 = vst [vmem:[#allocation69_spill] sm:$0xff] %v19543_v25  ;;  %v19710_v8 = vrot.slane %v19266_v0, %v19543_v25 }
 0x1d1   : > { %3078 = vmatpush1.bf16.msra.mxu0 %v17120_v27  ;;  %22629 = vst [vmem:[#allocation70_spill] sm:$0xff] %v19545_v26  ;;  %v19547_v27 = vsub.s32 5, %v1688_v9  ;;  %v19687_v11 = vrot.slane %v19269_v1, %v19545_v26 }
 0x1d2   : > { %16166 = vmatpush3.bf16.msra.mxu1 %v17159_v28  ;;  %3079 = vmatprep.subr.bf16.mxu0 %v17125_v29  ;;  %v19549_v28 = vsub.s32 6, %v1688_v9  ;;  %22654 = vst [vmem:[#allocation95_spill] sm:$0xff] %v19710_v8 }
 0x1d3   : > { %16167 = vmatprep.subr.bf16.mxu1 %v17163_v30  ;;  %22630 = vst [vmem:[#allocation71_spill] sm:$0xff] %v19547_v27  ;;  %22649 = vst [vmem:[#allocation90_spill] sm:$0xff] %v19687_v11 }
 0x1d4   : > { %22631 = vst [vmem:[#allocation72_spill] sm:$0xff] %v19549_v28  ;;  %v19706_v9 = vrot.slane %v19269_v1, %v19549_v28 }
 0x1d5   : > { %3080 = vmatpush1.bf16.msra.mxu0 %v17123_v31 }
 0x1d6   : > { %16168 = vmatpush3.bf16.msra.mxu1 %v17164_v32  ;;  %3081 = vmatprep.subr.bf16.mxu0 %v17128_v33  ;;  %v19553_v32 = vrot.slane %v19272_v2, %v19522_v10  ;;  %22653 = vst [vmem:[#allocation94_spill] sm:$0xff] %v19706_v9 }
 0x1d7   : > { %16169 = vmatprep.subr.bf16.mxu1 %v17168_v34  ;;  %v19557_v34 = vrot.slane %v19272_v2, %v19537_v20 }
 0x1d8   : > { %22632 = vst [vmem:[#allocation73_spill] sm:$0xff] %v19553_v32 }
 0x1d9   : > { %3082 = vmatpush1.bf16.msra.mxu0 %v17126_v35  ;;  %22633 = vst [vmem:[#allocation74_spill] sm:$0xff] %v19557_v34  ;;  %v19561_v35 = vrot.slane %v19272_v2, %v19539_v22 }
 0x1da   : > { %16170 = vmatpush3.bf16.msra.mxu1 %v17169_v37  ;;  %3083 = vmatprep.subr.bf16.mxu0 %v17131_v36  ;;  %v19565_v36 = vrot.slane %v19272_v2, %v19541_v23 }
 0x1db   : > { %16171 = vmatprep.subr.bf16.mxu1 %v17173_v38  ;;  %22634 = vst [vmem:[#allocation75_spill] sm:$0xff] %v19561_v35  ;;  %v19569_v38 = vrot.slane %v19272_v2, %v19545_v26 }
 0x1dc   : > { %22635 = vst [vmem:[#allocation76_spill] sm:$0xff] %v19565_v36 }
 0x1dd   : > { %3084 = vmatpush1.bf16.msra.mxu0 %v17129_v55  ;;  %22636 = vst [vmem:[#allocation77_spill] sm:$0xff] %v19569_v38  ;;  %v19573_v55 = vrot.slane %v19272_v2, %v19547_v27 }
 0x1de   : > { %16172 = vmatpush3.bf16.msra.mxu1 %v17174_v39  ;;  %3085 = vmatprep.subr.bf16.mxu0 %v17134_v40  ;;  %v19577_v39 = vrot.slane %v19272_v2, %v19549_v28  ;;  %v19581_v40 = vrot.slane %v19272_v2, %v19543_v25 }
 0x1df   : > { %16173 = vmatprep.subr.bf16.mxu1 %v17175_v41  ;;  %22637 = vst [vmem:[#allocation78_spill] sm:$0xff] %v19573_v55 }
 0x1e0   : > { %22638 = vst [vmem:[#allocation79_spill] sm:$0xff] %v19577_v39  ;;  %22639 = vst [vmem:[#allocation80_spill] sm:$0xff] %v19581_v40 }
 0x1e1   : > { %3086 = vmatpush1.bf16.msra.mxu0 %v17132_v42 }
 0x1e2   : > { %16174 = vmatpush3.bf16.msra.mxu1 %v17176_v43  ;;  %3087 = vmatprep.subr.bf16.mxu0 %v17137_v44 }
 0x1e3   : > { %16175 = vmatprep.subr.bf16.mxu1 %v17177_v45 }
 0x1e5   : > { %3088 = vmatpush2.bf16.msra.mxu0 %v17135_v46 }
 0x1e6   : > { %16176 = vmatpush3.bf16.msra.mxu1 %v17178_v47  ;;  %3089 = vmatprep.subr.bf16.mxu0 %v17140_v48 }
 0x1e7   : > { %16177 = vmatprep.subr.bf16.mxu1 %v17179_v49 }
 0x1e9   : > { %3090 = vmatpush2.bf16.msra.mxu0 %v17138_v50 }
 0x1ea   : > { %16178 = vmatpush3.bf16.msra.mxu1 %v17180_v51  ;;  %3091 = vmatprep.subr.bf16.mxu0 %v17146_v52 }
 0x1eb   : > { %16570 = vmatprep.subr.bf16.mxu1 %v22435_v62 }
 0x1ed   : > { %3190 = vmatmul.mubr.bf16.vlgmr.msra.gmra.mxu1 %v19365_v59  ;;  %3092 = vmatpush2.bf16.msra.mxu0 %v17144_v53 }
 0x1ee   : > { %16571 = vmatpush3.bf16.msra.mxu1 %v17181_v54  ;;  %3093 = vmatprep.subr.bf16.mxu0 %v17152_v56 }
 0x1ef   : > { %16572 = vmatprep.subr.bf16.mxu1 %v22435_v62  ;;  %16574 = vmatprep.mubr.msk.bf16.mxu1 %vm18733_vm2, %v22435_v62 }
 0x1f1   : > { %3094 = vmatpush2.bf16.msra.mxu0 %v17150_v57 }
 0x1f2   : > { %16573 = vmatpush3.bf16.msra.mxu1 %v17182_v58  ;;  %3095 = vmatprep.subr.bf16.mxu0 %v17157_v60 }
 0x1f5   : > { %16575 = vmatmul.mubr.msk.bf16.vlgmr.msra.gmra.mxu1 %vm1987_vm1, %v19325_v21  ;;  %3096 = vmatpush2.bf16.msra.mxu0 %v17155_v61 }
 0x1f6   : > { %3097 = vmatprep.subr.bf16.mxu0 %v17162_v63 }
 0x1f9   : > { %3098 = vmatpush2.bf16.msra.mxu0 %v17160_v3 }
 0x1fa   : > { %3099 = vmatprep.subr.bf16.mxu0 %v17167_v4 }
 0x1fd   : > { %3100 = vmatpush2.bf16.msra.mxu0 %v17165_v5 }
 0x1fe   : > { %3101 = vmatprep.subr.bf16.mxu0 %v17172_v6 }
 0x201   : > { %3102 = vmatpush2.bf16.msra.mxu0 %v17170_v7  ;;  %v19634_v7 = vld [vmem:[%s19293_s6] sm:$0xff] }
 0x204   : > { %3104 = vmatmul.mubr.bf16.vlgmr.msra.gmra.mxu0 %v19365_v59  ;;  %v1698_v59 = vrot.slane %v19533_v15, %v19522_v10 }
 0x21d   : > { %v19524_v12 = vpop.f32.mrf.mxu1 }
 0x21f   : > { %v19526_v21 = vpop.f32.mrf.mxu1 }
 0x221   : > { %v19528_v13 = vpop.f32.mrf.mxu1 }
 0x223   : > { %v19530_v14 = vpop.f32.mrf.mxu1 }
 0x23d   : > { %v16129_v16 = vpop.f32.mrf.mxu1 }
 0x23f   : > { %v16130_v17 = vpop.f32.mrf.mxu1 }
 0x240   : > { %v16131_v18 = vadd.f32 %v16130_v17, %v16129_v16  ;;  %v19691_v17 = vrot.slane %v19269_v1, %v19547_v27 }
 0x241   : > { %v16132_v19 = vpop.f32.mrf.mxu1 }
 0x242   : > { %v2112_v30 = vadd.f32 %v16131_v18, %v1698_v59  ;;  %v19646_v18 = vld [vmem:[%s19293_s6 + $0x8] sm:$0xff]  ;;  %22650 = vst [vmem:[#allocation91_spill] sm:$0xff] %v19691_v17 }
 0x243   : > { %v16133_v24 = vpop.f32.mrf.mxu1  ;;  %22640 = vst [vmem:[#allocation81_spill] sm:$0xff] %v19646_v18 }
 0x244   : > { %v16134_v29 = vadd.f32 %v16133_v24, %v16132_v19  ;;  %v1694_v19 = vrot.slane %v19646_v18, %v19522_v10 }
 0x245   : > { %v2152_v31 = vpop.f32.mrf.mxu1 }
 0x246   : > { %v2153_v33 = vadd.f32 %v2152_v31, %v2112_v30  ;;  %v2115_v41 = vadd.f32 %v16134_v29, %v1698_v59  ;;  %v1690_v59 = vrot.slane %v19634_v7, %v19522_v10  ;;  %v19654_v30 = vrot.slane %v19266_v0, %v19522_v10 }
 0x247   : > { %v16560_v37 = vpop.f32.mrf.mxu1  ;;  %v19658_v31 = vrot.slane %v19266_v0, %v19537_v20 }
 0x248   : > { %v3272_v43 = vmul.f32 %v19553_v32, %v2153_v33  ;;  %v19585_v45 = vmul.f32 %v19557_v34, %v2153_v33  ;;  %v19588_v46 = vmul.f32 %v19561_v35, %v2153_v33  ;;  %v19591_v47 = vmul.f32 %v19565_v36, %v2153_v33  ;;  %22641 = vst [vmem:[#allocation82_spill] sm:$0xff] %v19654_v30 }
 0x249   : > { %v2155_v42 = vpop.f32.mrf.mxu1  ;;  %v19594_v49 = vmul.f32 %v19569_v38, %v2153_v33  ;;  %v19597_v50 = vmul.f32 %v19573_v55, %v2153_v33  ;;  %v19600_v51 = vmul.f32 %v19577_v39, %v2153_v33  ;;  %v19603_v52 = vmul.f32 %v19581_v40, %v2153_v33  ;;  %22642 = vst [vmem:[#allocation83_spill] sm:$0xff] %v19658_v31 }
 0x24a   : > { %v2156_v44 = vadd.f32 %v2155_v42, %v2115_v41  ;;  %v19662_v37 = vrot.slane %v19269_v1, %v19522_v10  ;;  %v19666_v41 = vrot.slane %v19269_v1, %v19539_v22  ;;  %v19670_v42 = vrot.slane %v19266_v0, %v19539_v22 }
 0x24b   : > { %v16561_v48 = vpop.f32.mrf.mxu1 }
 0x24c   : > { %v3275_v53 = vmul.f32 %v19553_v32, %v2156_v44  ;;  %v19607_v54 = vmul.f32 %v19557_v34, %v2156_v44  ;;  %v19610_v56 = vmul.f32 %v19561_v35, %v2156_v44  ;;  %v19613_v57 = vmul.f32 %v19565_v36, %v2156_v44  ;;  %22643 = vst [vmem:[#allocation84_spill] sm:$0xff] %v19662_v37 }
 0x24d   : > { %v19616_v58 = vmul.f32 %v19569_v38, %v2156_v44  ;;  %v19619_v60 = vmul.f32 %v19573_v55, %v2156_v44  ;;  %v19622_v61 = vmul.f32 %v19577_v39, %v2156_v44  ;;  %v19625_v63 = vmul.f32 %v19581_v40, %v2156_v44  ;;  %22644 = vst [vmem:[#allocation85_spill] sm:$0xff] %v19666_v41 }
 0x24e   : > { %v3404_v3 = vpack.c.bf16 %v3275_v53, %v3272_v43  ;;  %22645 = vst [vmem:[#allocation86_spill] sm:$0xff] %v19670_v42  ;;  %v19674_v43 = vrot.slane %v19266_v0, %v19541_v23  ;;  %v19679_v53 = vrot.slane %v19269_v1, %v19541_v23 }
 0x250   : > { %16580 = vmatprep.mubr.msk.bf16.mxu0 %vm1987_vm1, %v3404_v3  ;;  %22646 = vst [vmem:[#allocation87_spill] sm:$0xff] %v19674_v43  ;;  %22647 = vst [vmem:[#allocation88_spill] sm:$0xff] %v19679_v53  ;;  %v19683_v3 = vrot.slane %v19266_v0, %v19545_v26 }
 0x252   : > { %22648 = vst [vmem:[#allocation89_spill] sm:$0xff] %v19683_v3 }
 0x254   : > { %v2025_v24 = vpop.f32.mrf.mxu0 }
 0x255   : > { %v2026_v29 = vadd.f32 %v2025_v24, %v1690_v59 }
 0x256   : > { %v2027_v33 = vpop.f32.mrf.mxu0 }
 0x257   : > { %v2069_v44 = vadd.f32 %v19524_v12, %v2026_v29  ;;  %v2028_v48 = vadd.f32 %v2027_v33, %v1694_v19  ;;  %v19695_v12 = vrot.slane %v19266_v0, %v19547_v27  ;;  %v19699_v29 = vrot.slane %v19266_v0, %v19549_v28 }
 0x258   : > { %v2029_v24 = vpop.f32.mrf.mxu0 }
 0x259   : > { %22651 = vst [vmem:[#allocation92_spill] sm:$0xff] %v19695_v12  ;;  %22652 = vst [vmem:[#allocation93_spill] sm:$0xff] %v19699_v29  ;;  %v19702_v33 = vadd.f32 %v19526_v21, %v2028_v48  ;;  %v2030_v16 = vadd.f32 %v2029_v24, %v1690_v59  ;;  %v19713_v5 = vmul.f32 %v19654_v30, %v2069_v44 }
 0x25a   : > { %v2031_v6 = vpop.f32.mrf.mxu0  ;;  %v19716_v4 = vmul.f32 %v19658_v31, %v2069_v44  ;;  %v19719_v62 = vmul.f32 %v19670_v42, %v2069_v44  ;;  %v19723_v21 = vrot.slane %v19269_v1, %v19543_v25  ;;  %v19727_v24 = vmul.f32 %v19674_v43, %v2069_v44 }
 0x25b   : > { %v2073_v59 = vadd.f32 %v19528_v13, %v2030_v16  ;;  %v2032_v48 = vadd.f32 %v2031_v6, %v1694_v19  ;;  %v19730_v2 = vmul.f32 %v19683_v3, %v2069_v44  ;;  %v3271_v0 = vmul.f32 %v19662_v37, %v19702_v33 }
 0x25c   : > { %22655 = vst [vmem:[#allocation96_spill] sm:$0xff] %v19723_v21  ;;  %v19736_v26 = vmul.f32 %v19666_v41, %v19702_v33  ;;  %v19740_v25 = vmul.f32 %v19679_v53, %v19702_v33  ;;  %v19743_v13 = vmul.f32 %v19695_v12, %v2069_v44  ;;  %v19762_v27 = vmul.f32 %v19687_v11, %v19702_v33 }
 0x25d   : > { %22656 = vst [vmem:[#allocation97_spill] sm:$0xff] %v19730_v2  ;;  %v19746_v6 = vadd.f32 %v19530_v14, %v2032_v48  ;;  %v19749_v16 = vmul.f32 %v19654_v30, %v2073_v59  ;;  %v19752_v19 = vmul.f32 %v19658_v31, %v2073_v59  ;;  %v19755_v10 = vmul.f32 %v19670_v42, %v2073_v59 }
 0x25e   : > { %22657 = vst [vmem:[#allocation98_spill] sm:$0xff] %v19743_v13  ;;  %v19758_v28 = vmul.f32 %v19674_v43, %v2073_v59  ;;  %v19765_v23 = vmul.f32 %v19683_v3, %v2073_v59  ;;  %v19768_v14 = vmul.f32 %v19695_v12, %v2073_v59  ;;  %v19778_v55 = vmul.f32 %v19691_v17, %v19702_v33 }
 0x25f   : > { %v3274_v48 = vmul.f32 %v19662_v37, %v19746_v6  ;;  %v19782_v38 = vmul.f32 %v19666_v41, %v19746_v6  ;;  %v19788_v36 = vmul.f32 %v19679_v53, %v19746_v6  ;;  %v19794_v39 = vmul.f32 %v19687_v11, %v19746_v6 }
 0x260   : > { %22658 = vst [vmem:[#allocation99_spill] sm:$0xff] %v19768_v14  ;;  %22659 = vst [vmem:[#allocation100_spill] sm:$0xff] %v19778_v55  ;;  %v19800_v41 = vmul.f32 %v19706_v9, %v19702_v33  ;;  %v19816_v40 = vmul.f32 %v19706_v9, %v19746_v6  ;;  %v19819_v34 = vmul.f32 %v19699_v29, %v2069_v44 }
 0x261   : > { %v3403_v35 = vpack.c.bf16 %v3274_v48, %v3271_v0  ;;  %v19808_v0 = vmul.f32 %v19691_v17, %v19746_v6  ;;  %v19822_v53 = vmul.f32 %v19699_v29, %v2073_v59  ;;  %v19828_v48 = vmul.f32 %v19723_v21, %v19702_v33 }
 0x262   : > { %22660 = vst [vmem:[#allocation101_spill] sm:$0xff] %v19800_v41  ;;  %22662 = vst [vmem:[#allocation103_spill] sm:$0xff] %v19816_v40  ;;  %v19839_v29 = vmul.f32 %v19710_v8, %v2069_v44  ;;  %v19842_v11 = vmul.f32 %v19710_v8, %v2073_v59  ;;  %v2242_v44 = vrot.slane %v19533_v15, %v19537_v20 }
 0x263   : > { %22661 = vst [vmem:[#allocation102_spill] sm:$0xff] %v19808_v0  ;;  %3485 = vmatprep.mubr.bf16.mxu1 %v3403_v35  ;;  %22663 = vst [vmem:[#allocation104_spill] sm:$0xff] %v19819_v34  ;;  %v19832_v35 = vmul.f32 %v19723_v21, %v19746_v6  ;;  %v2608_v21 = vpop.f32.mrf.mxu0  ;;  %v2238_v17 = vrot.slane %v19646_v18, %v19537_v20 }
 0x264   : > { %22664 = vst [vmem:[#allocation105_spill] sm:$0xff] %v19822_v53  ;;  %22665 = vst [vmem:[#allocation106_spill] sm:$0xff] %v19828_v48 }
 0x265   : > { %22666 = vst [vmem:[#allocation107_spill] sm:$0xff] %v19832_v35  ;;  %22667 = vst [vmem:[#allocation108_spill] sm:$0xff] %v19839_v29  ;;  %v2610_v3 = vpop.f32.mrf.mxu0  ;;  %v2234_v29 = vrot.slane %v19634_v7, %v19537_v20 }
 0x266   : > { %22668 = vst [vmem:[#allocation109_spill] sm:$0xff] %v19842_v11 }
 0x267   : > { %v2612_v43 = vpop.f32.mrf.mxu0 }
 0x269   : > { %v2614_v42 = vpop.f32.mrf.mxu0 }
 0x27c   : > { %v16154_v37 = vpop.f32.mrf.mxu0 }
 0x27e   : > { %v16155_v30 = vpop.f32.mrf.mxu0 }
 0x27f   : > { %v16156_v31 = vadd.f32 %v16155_v30, %v16154_v37 }
 0x280   : > { %v16157_v9 = vpop.f32.mrf.mxu0 }
 0x281   : > { %v2652_v8 = vadd.f32 %v16156_v31, %v2242_v44 }
 0x282   : > { %v16158_v34 = vpop.f32.mrf.mxu0 }
 0x283   : > { %v16159_v59 = vadd.f32 %v16158_v34, %v16157_v9 }
 0x284   : > { %v2692_v41 = vpop.f32.mrf.mxu0 }
 0x285   : > { %v2565_v53 = vpop.f32.mrf.mxu1  ;;  %v2655_v12 = vadd.f32 %v16159_v59, %v2242_v44  ;;  %v2693_v35 = vadd.f32 %v2692_v41, %v2652_v8 }
 0x286   : > { %v16568_v48 = vpop.f32.mrf.mxu0  ;;  %v2566_v55 = vadd.f32 %v2565_v53, %v2234_v29  ;;  %v22669_v53 = vmov 0.0  }
 0x287   : > { %v2567_v11 = vpop.f32.mrf.mxu1  ;;  %v22691_v48 = vld [vmem:[#allocation99_spill] sm:$0xff] }
 0x288   : > { %v2695_v37 = vpop.f32.mrf.mxu0  ;;  %v2568_v40 = vadd.f32 %v2567_v11, %v2238_v17  ;;  %v2609_v59 = vadd.f32 %v2608_v21, %v2566_v55  ;;  %v19858_v11 = vrot.slane %v19269_v1, %v19537_v20  ;;  %v22685_v21 = vld [vmem:[#allocation97_spill] sm:$0xff]  ;;  %v3244_v20 = vld [vmem:[%s22736_s19 + $0x28] sm:$0xff] }
 0x289   : > { %v2569_v30 = vpop.f32.mrf.mxu1  ;;  %v2696_v14 = vadd.f32 %v2695_v37, %v2655_v12  ;;  %v22694_v37 = vld [vmem:[#allocation103_spill] sm:$0xff]  ;;  %v3242_v1 = vld [vmem:[%s22736_s19 + $0x18] sm:$0xff] }
 0x28a   : > { %v2570_v13 = vadd.f32 %v2569_v30, %v2234_v29  ;;  %v16569_v9 = vpop.f32.mrf.mxu0  ;;  %v2611_v2 = vadd.f32 %v2610_v3, %v2568_v40  ;;  %v3292_v40 = vmul.f32 %v19858_v11, %v19746_v6  ;;  %v2774_v30 = vrot.slane %v19634_v7, %v19539_v22  ;;  %v22701_v7 = vld [vmem:[#allocation83_spill] sm:$0xff] }
 0x28b   : > { %v2571_v34 = vpop.f32.mrf.mxu1  ;;  %v3257_v31 = vpack.c.bf16 %v2696_v14, %v2693_v35 }
 0x28c   : > { %v2572_v0 = vadd.f32 %v2571_v34, %v2238_v17  ;;  %v2613_v32 = vadd.f32 %v2612_v43, %v2570_v13  ;;  %v22670_v17 = vpack.c.bf16 %v19607_v54, %v19585_v45  ;;  %v22674_v45 = vpack.c.bf16 %v19616_v58, %v19594_v49  ;;  %v22695_v34 = vld [vmem:[#allocation101_spill] sm:$0xff] }
 0x28d   : > { %16794 = vmatprep.subr.msk.bf16.mxu0 %vm1987_vm1, %v3257_v31  ;;  %v3451_v44 = vsel %vm1987_vm1, %v3257_v31, 0  ;;  %v22675_v54 = vpack.c.bf16 %v19752_v19, %v19716_v4  ;;  %v22678_v49 = vpack.c.bf16 %v19622_v61, %v19600_v51  ;;  %v22679_v58 = vpack.c.bf16 %v19755_v10, %v19719_v62  ;;  %v22697_v31 = vld [vmem:[#allocation81_spill] sm:$0xff] }
 0x28e   : > { %v2615_v18 = vadd.f32 %v2614_v42, %v2572_v0  ;;  %16579 = vmatpush3.bf16.xpose.msra.mxu0 %v3451_v44  ;;  %v3255_v41 = vpack.c.bf16 %v2613_v32, %v2609_v59  ;;  %v3289_v32 = vmul.f32 %v19858_v11, %v19702_v33  ;;  %v22673_v42 = vpack.c.bf16 %v19613_v57, %v19591_v47 }
 0x28f   : > { %v22677_v47 = vpack.c.bf16 %v19619_v60, %v19597_v50  ;;  %v22681_v50 = vpack.c.bf16 %v19625_v63, %v19603_v52  ;;  %v2782_v51 = vrot.slane %v19533_v15, %v19539_v22  ;;  %v22682_v61 = vmov 0  }
 0x290   : > { %v3256_v8 = vpack.c.bf16 %v2615_v18, %v2611_v2  ;;  %v22671_v2 = vpack.c.bf16 %v19610_v56, %v19588_v46  ;;  %v3406_v55 = vpack.c.bf16 %v3292_v40, %v3289_v32  ;;  %v22672_v18 = vpack.c.bf16 %v19749_v16, %v19713_v5  ;;  %v3148_v46 = vpop.f32.mrf.mxu1  ;;  %v22688_v16 = vld [vmem:[#allocation102_spill] sm:$0xff]  ;;  %v22698_v32 = vld [vmem:[#allocation105_spill] sm:$0xff] }
 0x291   : > { %v22676_v56 = vpack.c.bf16 %v19782_v38, %v19736_v26  ;;  %v22680_v26 = vpack.c.bf16 %v19788_v36, %v19740_v25  ;;  %v22683_v10 = vpack.c.bf16 %v19758_v28, %v19727_v24  ;;  %v22684_v36 = vpack.c.bf16 %v19794_v39, %v19762_v27  ;;  %v22687_v28 = vld [vmem:[#allocation73_spill] sm:$0xff]  ;;  %v22689_v27 = vld [vmem:[#allocation100_spill] sm:$0xff] }
 0x292   : > { %3467 = vmatprep.subr.bf16.mxu1 %v3256_v8  ;;  %v3150_v5 = vpop.f32.mrf.mxu1  ;;  %v22686_v13 = vpack.c.bf16 %v19765_v23, %v22685_v21  ;;  %v22690_v39 = vpack.c.bf16 %v22688_v16, %v22689_v27  ;;  %v22692_v23 = vld [vmem:[#allocation98_spill] sm:$0xff]  ;;  %v22696_v9 = vpack.c.bf16 %v22694_v37, %v22695_v34  ;;  %v2778_v44 = vrot.slane %v22697_v31, %v19539_v22 }
 0x293   : > { %3468 = vmatpush1.bf16.xpose.msra.mxu1 %v3255_v41  ;;  %v22693_v35 = vpack.c.bf16 %v22691_v48, %v22692_v23  ;;  %v22717_v23 = vld [vmem:[#allocation94_spill] sm:$0xff] }
 0x294   : > { %16602 = vmatprep.subr.bf16.mxu1 %v22669_v53  ;;  %v3152_v57 = vpop.f32.mrf.mxu1 }
 0x295   : > { %16581 = vmatmul.mubr.msk.bf16.vlgmr.msra.gmra.mxu0 %vm1987_vm1, %v22670_v17 }
 0x296   : > { %16584 = vmatprep.mubr.msk.bf16.mxu0 %vm1987_vm1, %v22671_v2  ;;  %v3154_v38 = vpop.f32.mrf.mxu1 }
 0x29a   : > { %3486 = vmatmul.mubr.bf16.vlgmr.msra.gmra.mxu1 %v22672_v18 }
 0x29b   : > { %3493 = vmatprep.mubr.bf16.mxu1 %v3406_v55  ;;  %v22699_v55 = vld [vmem:[#allocation104_spill] sm:$0xff] }
 0x29c   : > { %v22700_v18 = vpack.c.bf16 %v22698_v32, %v22699_v55 }
 0x29d   : > { %16585 = vmatmul.mubr.msk.bf16.gmra.mxu0 %vm1987_vm1, %v22673_v42 }
 0x29e   : > { %16588 = vmatprep.mubr.msk.bf16.mxu0 %vm1987_vm1, %v22674_v45 }
 0x2a2   : > { %3494 = vmatmul.mubr.bf16.gmra.mxu1 %v22675_v54 }
 0x2a3   : > { %3501 = vmatprep.mubr.bf16.mxu1 %v22676_v56  ;;  %v22702_v56 = vld [vmem:[#allocation82_spill] sm:$0xff] }
 0x2a5   : > { %16589 = vmatmul.mubr.msk.bf16.gmra.mxu0 %vm1987_vm1, %v22677_v47 }
 0x2a6   : > { %16592 = vmatprep.mubr.msk.bf16.mxu0 %vm1987_vm1, %v22678_v49  ;;  %v22703_v49 = vld [vmem:[#allocation107_spill] sm:$0xff] }
 0x2aa   : > { %3502 = vmatmul.mubr.bf16.gmra.mxu1 %v22679_v58  ;;  %v22704_v58 = vld [vmem:[#allocation106_spill] sm:$0xff] }
 0x2ab   : > { %3509 = vmatprep.mubr.bf16.mxu1 %v22680_v26  ;;  %v22705_v26 = vpack.c.bf16 %v22703_v49, %v22704_v58  ;;  %v22723_v58 = vld [vmem:[#allocation93_spill] sm:$0xff] }
 0x2ad   : > { %v16179_v4 = vpop.f32.mrf.mxu1  ;;  %16593 = vmatmul.mubr.msk.bf16.gmra.mxu0 %vm1987_vm1, %v22681_v50  ;;  %v22706_v50 = vld [vmem:[#allocation86_spill] sm:$0xff] }
 0x2ae   : > { %3879 = vmatprep.mubr.bf16.mxu0 %v22682_v61 }
 0x2af   : > { %v16180_v60 = vpop.f32.mrf.mxu1 }
 0x2b0   : > { %v16181_v43 = vadd.f32 %v16180_v60, %v16179_v4 }
 0x2b1   : > { %v16182_v62 = vpop.f32.mrf.mxu1 }
 0x2b2   : > { %3510 = vmatmul.mubr.bf16.gmra.mxu1 %v22683_v10  ;;  %v3192_v25 = vadd.f32 %v16181_v43, %v2782_v51  ;;  %v22708_v43 = vld [vmem:[#allocation89_spill] sm:$0xff] }
 0x2b3   : > { %3517 = vmatprep.mubr.bf16.mxu1 %v22684_v36  ;;  %v16183_v52 = vpop.f32.mrf.mxu1 }
 0x2b4   : > { %v16184_v63 = vadd.f32 %v16183_v52, %v16182_v62 }
 0x2b5   : > { %v3232_v3 = vpop.f32.mrf.mxu1 }
 0x2b6   : > { %v19917_v12 = vadd.f32 %v3232_v3, %v3192_v25  ;;  %v3195_v15 = vadd.f32 %v16184_v63, %v2782_v51  ;;  %v22711_v63 = vld [vmem:[#allocation84_spill] sm:$0xff] }
 0x2b7   : > { %v16576_v29 = vpop.f32.mrf.mxu1 }
 0x2b8   : > { %v3827_v24 = vmul.f32 %v22687_v28, %v19917_v12 }
 0x2b9   : > { %v3235_v33 = vpop.f32.mrf.mxu1 }
 0x2ba   : > { %3518 = vmatmul.mubr.bf16.gmra.mxu1 %v22686_v13  ;;  %v19922_v6 = vadd.f32 %v3235_v33, %v3195_v15  ;;  %v22712_v15 = vld [vmem:[#allocation85_spill] sm:$0xff]  ;;  %v22713_v33 = vld [vmem:[#allocation88_spill] sm:$0xff]  ;;  %v22714_v13 = vld [vmem:[#allocation90_spill] sm:$0xff] }
 0x2bb   : > { %3525 = vmatprep.mubr.bf16.mxu1 %v22690_v39  ;;  %v16577_v19 = vpop.f32.mrf.mxu1 }
 0x2bc   : > { %v3830_v14 = vmul.f32 %v22687_v28, %v19922_v6 }
 0x2be   : > { %v3833_v0 = vpack.c.bf16 %v3830_v14, %v3827_v24  ;;  %v22715_v24 = vld [vmem:[#allocation91_spill] sm:$0xff] }
 0x2c0   : > { %16603 = vmatpush3.bf16.msra.mxu1 %v3833_v0 }
 0x2c1   : > { %16608 = vmatprep.subr.bf16.mxu1 %v22669_v53 }
 0x2c2   : > { %3526 = vmatmul.mubr.bf16.gmra.mxu1 %v22693_v35 }
 0x2c3   : > { %3533 = vmatprep.mubr.bf16.mxu1 %v22696_v9 }
 0x2c4   : > { %v3105_v59 = vpop.f32.mrf.mxu0 }
 0x2c5   : > { %v3106_v8 = vadd.f32 %v3105_v59, %v2774_v30 }
 0x2c6   : > { %v3107_v41 = vpop.f32.mrf.mxu0 }
 0x2c7   : > { %v3108_v40 = vadd.f32 %v3107_v41, %v2778_v44  ;;  %v3149_v17 = vadd.f32 %v3148_v46, %v3106_v8  ;;  %v22707_v46 = vld [vmem:[#allocation87_spill] sm:$0xff]  ;;  %v22720_v8 = vld [vmem:[#allocation108_spill] sm:$0xff] }
 0x2c8   : > { %v3109_v2 = vpop.f32.mrf.mxu0 }
 0x2c9   : > { %v3110_v42 = vadd.f32 %v3109_v2, %v2774_v30  ;;  %v3151_v45 = vadd.f32 %v3150_v5, %v3108_v40  ;;  %v3835_v54 = vmul.f32 %v22701_v7, %v3149_v17  ;;  %v19947_v47 = vmul.f32 %v22702_v56, %v3149_v17  ;;  %v22709_v5 = vld [vmem:[#allocation92_spill] sm:$0xff] }
 0x2ca   : > { %3534 = vmatmul.mubr.bf16.gmra.mxu1 %v22700_v18  ;;  %v3111_v4 = vpop.f32.mrf.mxu0  ;;  %v19953_v51 = vmul.f32 %v22706_v50, %v3149_v17  ;;  %v19956_v60 = vmul.f32 %v22707_v46, %v3149_v17  ;;  %v19959_v62 = vmul.f32 %v22708_v43, %v3149_v17  ;;  %v19962_v10 = vmul.f32 %v22709_v5, %v3149_v17 }
 0x2cb   : > { %3541 = vmatprep.mubr.bf16.mxu1 %v22705_v26  ;;  %v3112_v25 = vadd.f32 %v3111_v4, %v2778_v44  ;;  %v3153_v36 = vadd.f32 %v3152_v57, %v3110_v42  ;;  %v3836_v52 = vmul.f32 %v19858_v11, %v3151_v45  ;;  %v19966_v3 = vmul.f32 %v22711_v63, %v3151_v45  ;;  %v3239_v42 = vld [vmem:[%s22736_s19] sm:$0xff] }
 0x2cc   : > { %22710 = vst [vmem:[#allocation97_spill] sm:$0xff] %v19962_v10  ;;  %v19969_v29 = vmul.f32 %v22712_v15, %v3151_v45  ;;  %v19972_v21 = vmul.f32 %v22713_v33, %v3151_v45  ;;  %v19975_v28 = vmul.f32 %v22714_v13, %v3151_v45  ;;  %v19978_v16 = vmul.f32 %v22715_v24, %v3151_v45 }
 0x2cd   : > { %v3155_v27 = vadd.f32 %v3154_v38, %v3112_v25  ;;  %v3838_v57 = vmul.f32 %v22701_v7, %v3153_v36  ;;  %v19982_v39 = vmul.f32 %v22702_v56, %v3153_v36  ;;  %v19985_v19 = vmul.f32 %v22706_v50, %v3153_v36  ;;  %v22729_v25 = vld [vmem:[#allocation95_spill] sm:$0xff]  ;;  %v3241_v56 = vld [vmem:[%s22736_s19 + $0x10] sm:$0xff] }
 0x2ce   : > { %v19988_v14 = vmul.f32 %v22707_v46, %v3153_v36  ;;  %v19991_v0 = vmul.f32 %v22708_v43, %v3153_v36  ;;  %v19994_v48 = vmul.f32 %v22709_v5, %v3153_v36  ;;  %v19997_v35 = vmul.f32 %v22717_v23, %v3151_v45  ;;  %v22726_v46 = vld [vmem:[#allocation96_spill] sm:$0xff] }
 0x2cf   : > { %v3839_v38 = vmul.f32 %v19858_v11, %v3155_v27  ;;  %v3841_v30 = vpack.c.bf16 %v3838_v57, %v3835_v54  ;;  %v20001_v37 = vmul.f32 %v22711_v63, %v3155_v27  ;;  %v20006_v9 = vmul.f32 %v22712_v15, %v3155_v27  ;;  %v22719_v11 = vld [vmem:[#allocation109_spill] sm:$0xff]  ;;  %v22733_v57 = vld [vmem:[#allocation76_spill] sm:$0xff] }
 0x2d0   : > { %22716 = vst [vmem:[#allocation73_spill] sm:$0xff] %v19994_v48  ;;  %22718 = vst [vmem:[#allocation102_spill] sm:$0xff] %v19997_v35  ;;  %v20011_v44 = vmul.f32 %v22713_v33, %v3155_v27  ;;  %v22721_v41 = vpack.c.bf16 %v22719_v11, %v22720_v8  ;;  %v20021_v32 = vmul.f32 %v22714_v13, %v3155_v27  ;;  %v22735_v8 = vld [vmem:[#allocation77_spill] sm:$0xff]  ;;  %v22738_v13 = vld [vmem:[#allocation79_spill] sm:$0xff] }
 0x2d1   : > { %v3842_v40 = vpack.c.bf16 %v3839_v38, %v3836_v52  ;;  %v20032_v7 = vmul.f32 %v22715_v24, %v3155_v27  ;;  %v20039_v49 = vmul.f32 %v22717_v23, %v3155_v27  ;;  %v20042_v26 = vmul.f32 %v22723_v58, %v3149_v17  ;;  %v22734_v38 = vld [vmem:[#allocation74_spill] sm:$0xff] }
 0x2d2   : > { %3542 = vmatmul.mubr.bf16.gmra.mxu1 %v22721_v41  ;;  %v20045_v4 = vmul.f32 %v22723_v58, %v3153_v36  ;;  %v20050_v43 = vmul.f32 %v22726_v46, %v3151_v45  ;;  %v20053_v5 = vmul.f32 %v22726_v46, %v3155_v27  ;;  %v20056_v52 = vmul.f32 %v22729_v25, %v3149_v17  ;;  %v22732_v17 = vld [vmem:[#allocation75_spill] sm:$0xff] }
 0x2d3   : > { %16604 = vmatprep.mubr.msk.bf16.mxu1 %vm18733_vm2, %v22669_v53  ;;  %3861 = vmatprep.subr.bf16.mxu0 %v3842_v40  ;;  %22722 = vst [vmem:[#allocation100_spill] sm:$0xff] %v20039_v49  ;;  %22724 = vst [vmem:[#allocation99_spill] sm:$0xff] %v20042_v26  ;;  %v20064_v33 = vmul.f32 %v22729_v25, %v3153_v36  ;;  %v20072_v24 = vmul.f32 %v22732_v17, %v19917_v12  ;;  %v22737_v25 = vld [vmem:[#allocation78_spill] sm:$0xff] }
 0x2d4   : > { %22725 = vst [vmem:[#allocation98_spill] sm:$0xff] %v20045_v4  ;;  %3862 = vmatpush1.bf16.msra.mxu0 %v3841_v30  ;;  %22727 = vst [vmem:[#allocation103_spill] sm:$0xff] %v20050_v43  ;;  %v20076_v27 = vmul.f32 %v22732_v17, %v19922_v6  ;;  %v20080_v23 = vmul.f32 %v22733_v57, %v19917_v12  ;;  %v20084_v36 = vmul.f32 %v22733_v57, %v19922_v6 }
 0x2d5   : > { %22728 = vst [vmem:[#allocation101_spill] sm:$0xff] %v20053_v5  ;;  %22730 = vst [vmem:[#allocation81_spill] sm:$0xff] %v20056_v52  ;;  %16596 = vmatprep.subr.bf16.mxu0 %v22669_v53  ;;  %v20088_v30 = vmul.f32 %v22734_v38, %v19917_v12  ;;  %v20092_v11 = vmul.f32 %v22734_v38, %v19922_v6  ;;  %v20096_v41 = vmul.f32 %v22735_v8, %v19917_v12 }
 0x2d6   : > { %22731 = vst [vmem:[#allocation105_spill] sm:$0xff] %v20064_v33  ;;  %v20100_v40 = vmul.f32 %v22735_v8, %v19922_v6  ;;  %v20108_v17 = vmul.f32 %v22737_v25, %v19917_v12  ;;  %v20112_v57 = vmul.f32 %v22737_v25, %v19922_v6  ;;  %v20120_v45 = vmul.f32 %v22738_v13, %v19917_v12  ;;  %v22739_v25 = vld [vmem:[#allocation80_spill] sm:$0xff] }
 0x2d7   : > { %v20124_v15 = vmul.f32 %v22738_v13, %v19922_v6  ;;  %v20130_v54 = vmul.f32 %v22739_v25, %v19917_v12  ;;  %v20134_v50 = vmul.f32 %v22739_v25, %v19922_v6  ;;  %v3240_v12 = vld [vmem:[%s22736_s19 + $0x8] sm:$0xff] }
 0x355   : > { %v16582_v59 = vpop.f32.mrf.mxu0 }
 0x357   : > { %v3584_v13 = vpop.f32.mrf.mxu0 }
 0x359   : > { %v16583_v18 = vpop.f32.mrf.mxu0 }
 0x35a   : > { %v3487_v31 = vpop.f32.mrf.mxu1 }
 0x35b   : > { %v3488_v63 = vadd.f32 %v3487_v31, %v3239_v42  ;;  %v3587_v2 = vpop.f32.mrf.mxu0 }
 0x35c   : > { %v3489_v34 = vpop.f32.mrf.mxu1 }
 0x35d   : > { %v20142_v8 = vadd.f32 %v3584_v13, %v3488_v63  ;;  %v16586_v42 = vpop.f32.mrf.mxu0 }
 0x35e   : > { %v3490_v6 = vpop.f32.mrf.mxu1 }
 0x35f   : > { %v3491_v25 = vadd.f32 %v3490_v6, %v3240_v12  ;;  %v3648_v55 = vsel %vm3647_vm3, %v20142_v8, -inf }
 0x360   : > { %v3492_v38 = vpop.f32.mrf.mxu1  ;;  %3649 = vmax.xlane.f32.xlu0 %v3648_v55  ;;  %v3600_v55 = vpop.f32.mrf.mxu0 }
 0x361   : > { %v20147_v46 = vadd.f32 %v3587_v2, %v3491_v25  ;;  %v3243_v2 = vld [vmem:[%s22736_s19 + $0x20] sm:$0xff] }
 0x362   : > { %v3495_v58 = vpop.f32.mrf.mxu1 }
 0x363   : > { %v3496_v31 = vadd.f32 %v3495_v58, %v3241_v56  ;;  %v3651_v34 = vsel %vm3647_vm3, %v20147_v46, -inf  ;;  %v16587_v58 = vpop.f32.mrf.mxu0 }
 0x364   : > { %v3497_v63 = vpop.f32.mrf.mxu1  ;;  %3652 = vmax.xlane.f32.xlu0 %v3651_v34 }
 0x365   : > { %v20151_v13 = vadd.f32 %v16582_v59, %v3496_v31  ;;  %v3603_v33 = vpop.f32.mrf.mxu0 }
 0x366   : > { %v3498_v12 = vpop.f32.mrf.mxu1 }
 0x367   : > { %v3654_v38 = vsel %vm3647_vm3, %v20151_v13, -inf  ;;  %v3499_v59 = vadd.f32 %v3498_v12, %v3242_v1 }
 0x368   : > { %v3500_v6 = vpop.f32.mrf.mxu1  ;;  %3655 = vmax.xlane.f32.xlu0 %v3654_v38  ;;  %v3245_v38 = vld [vmem:[%s22736_s19 + $0x30] sm:$0xff] }
 0x36a   : > { %v3503_v25 = vpop.f32.mrf.mxu1 }
 0x36b   : > { %v3504_v56 = vadd.f32 %v3503_v25, %v3243_v2 }
 0x36c   : > { %v3505_v22 = vpop.f32.mrf.mxu1 }
 0x36d   : > { %v20158_v52 = vadd.f32 %v3600_v55, %v3504_v56  ;;  %v20167_v55 = vadd.f32 %v16583_v18, %v3499_v59  ;;  %v16590_v56 = vpop.f32.mrf.mxu0  ;;  %v3247_v18 = vld [vmem:[%s22736_s19 + $0x40] sm:$0xff] }
 0x36e   : > { %v3506_v34 = vpop.f32.mrf.mxu1 }
 0x36f   : > { %v3507_v31 = vadd.f32 %v3506_v34, %v3244_v20  ;;  %v3660_v63 = vsel %vm3647_vm3, %v20158_v52, -inf  ;;  %v3246_v20 = vld [vmem:[%s22736_s19 + $0x38] sm:$0xff] }
 0x370   : > { %v3508_v6 = vpop.f32.mrf.mxu1  ;;  %3661 = vmax.xlane.f32.xlu1 %v3660_v63 }
 0x371   : > { %v20163_v43 = vadd.f32 %v3603_v33, %v3507_v31  ;;  %v3657_v33 = vsel %vm3647_vm3, %v20167_v55, -inf  ;;  %v3616_v6 = vpop.f32.mrf.mxu0 }
 0x372   : > { %v3511_v2 = vpop.f32.mrf.mxu1 }
 0x373   : > { %v3512_v25 = vadd.f32 %v3511_v2, %v3245_v38  ;;  %v3663_v22 = vsel %vm3647_vm3, %v20163_v43, -inf }
 0x374   : > { %v3513_v1 = vpop.f32.mrf.mxu1  ;;  %3664 = vmax.xlane.f32.xlu1 %v3663_v22  ;;  %v16591_v22 = vpop.f32.mrf.mxu0 }
 0x375   : > { %v20170_v12 = vadd.f32 %v16586_v42, %v3512_v25 }
 0x376   : > { %v3514_v34 = vpop.f32.mrf.mxu1 }
 0x377   : > { %v3515_v63 = vadd.f32 %v3514_v34, %v3246_v20  ;;  %v3666_v31 = vsel %vm3647_vm3, %v20170_v12, -inf  ;;  %v3248_v20 = vld [vmem:[%s22736_s19 + $0x48] sm:$0xff] }
 0x378   : > { %v3516_v38 = vpop.f32.mrf.mxu1  ;;  %3658 = vmax.xlane.f32.xlu1 %v3657_v33  ;;  %3667 = vmax.xlane.f32.xlu0 %v3666_v31  ;;  %v3619_v31 = vpop.f32.mrf.mxu0 }
 0x379   : > { %v20177_v59 = vadd.f32 %v16587_v58, %v3515_v63  ;;  %v3249_v63 = vld [vmem:[%s22736_s19 + $0x50] sm:$0xff] }
 0x37a   : > { %v3519_v2 = vpop.f32.mrf.mxu1 }
 0x37b   : > { %v3520_v42 = vadd.f32 %v3519_v2, %v3247_v18  ;;  %v3669_v25 = vsel %vm3647_vm3, %v20177_v59, -inf }
 0x37c   : > { %v3521_v1 = vpop.f32.mrf.mxu1  ;;  %3670 = vmax.xlane.f32.xlu1 %v3669_v25 }
 0x37d   : > { %v20182_v34 = vadd.f32 %v3616_v6, %v3520_v42  ;;  %v16594_v1 = vpop.f32.mrf.mxu0  ;;  %v3250_v42 = vld [vmem:[%s22736_s19 + $0x58] sm:$0xff] }
 0x37e   : > { %v3522_v5 = vpop.f32.mrf.mxu1 }
 0x37f   : > { %v3523_v38 = vadd.f32 %v3522_v5, %v3248_v20  ;;  %v3672_v33 = vsel %vm3647_vm3, %v20182_v34, -inf }
 0x380   : > { %v3524_v58 = vpop.f32.mrf.mxu1  ;;  %3673 = vmax.xlane.f32.xlu0 %v3672_v33 }
 0x381   : > { %v20187_v18 = vadd.f32 %v3619_v31, %v3523_v38  ;;  %v3632_v58 = vpop.f32.mrf.mxu0  ;;  %v3251_v31 = vld [vmem:[%s22736_s19 + $0x60] sm:$0xff] }
 0x382   : > { %v3527_v2 = vpop.f32.mrf.mxu1 }
 0x383   : > { %v3528_v26 = vadd.f32 %v3527_v2, %v3249_v63  ;;  %v3675_v25 = vsel %vm3647_vm3, %v20187_v18, -inf }
 0x384   : > { %v3529_v6 = vpop.f32.mrf.mxu1  ;;  %3676 = vmax.xlane.f32.xlu1 %v3675_v25 }
 0x385   : > { %v20192_v5 = vadd.f32 %v16590_v56, %v3528_v26  ;;  %v16595_v6 = vpop.f32.mrf.mxu0  ;;  %v3252_v56 = vld [vmem:[%s22736_s19 + $0x68] sm:$0xff] }
 0x386   : > { %v3530_v20 = vpop.f32.mrf.mxu1 }
 0x387   : > { %v3531_v4 = vadd.f32 %v3530_v20, %v3250_v42  ;;  %v3678_v33 = vsel %vm3647_vm3, %v20192_v5, -inf }
 0x388   : > { %v3532_v38 = vpop.f32.mrf.mxu1  ;;  %3679 = vmax.xlane.f32.xlu0 %v3678_v33 }
 0x389   : > { %v20197_v63 = vadd.f32 %v16591_v22, %v3531_v4  ;;  %v3635_v38 = vpop.f32.mrf.mxu0  ;;  %v3253_v22 = vld [vmem:[%s22736_s19 + $0x70] sm:$0xff] }
 0x38a   : > { %v3535_v2 = vpop.f32.mrf.mxu1 }
 0x38b   : > { %v3536_v35 = vadd.f32 %v3535_v2, %v3251_v31  ;;  %v3681_v25 = vsel %vm3647_vm3, %v20197_v63, -inf }
 0x38c   : > { %v3537_v26 = vpop.f32.mrf.mxu1  ;;  %3682 = vmax.xlane.f32.xlu1 %v3681_v25 }
 0x38d   : > { %v20202_v42 = vadd.f32 %v3632_v58, %v3536_v35  ;;  %v3254_v35 = vld [vmem:[%s22736_s19 + $0x78] sm:$0xff] }
 0x38e   : > { %v3538_v20 = vpop.f32.mrf.mxu1 }
 0x38f   : > { %v3539_v49 = vadd.f32 %v3538_v20, %v3252_v56  ;;  %v3684_v33 = vsel %vm3647_vm3, %v20202_v42, -inf }
 0x390   : > { %v3540_v4 = vpop.f32.mrf.mxu1  ;;  %3685 = vmax.xlane.f32.xlu0 %v3684_v33 }
 0x391   : > { %v20207_v31 = vadd.f32 %v3635_v38, %v3539_v49 }
 0x392   : > { %v3543_v2 = vpop.f32.mrf.mxu1 }
 0x393   : > { %v3544_v10 = vadd.f32 %v3543_v2, %v3253_v22  ;;  %v3687_v25 = vsel %vm3647_vm3, %v20207_v31, -inf }
 0x394   : > { %v3545_v26 = vpop.f32.mrf.mxu1  ;;  %3688 = vmax.xlane.f32.xlu1 %v3687_v25 }
 0x395   : > { %v20212_v58 = vadd.f32 %v16594_v1, %v3544_v10 }
 0x396   : > { %v3546_v56 = vpop.f32.mrf.mxu1 }
 0x397   : > { %v3547_v20 = vadd.f32 %v3546_v56, %v3254_v35  ;;  %v3690_v48 = vsel %vm3647_vm3, %v20212_v58, -inf }
 0x398   : > { %v3548_v4 = vpop.f32.mrf.mxu1  ;;  %3691 = vmax.xlane.f32.xlu0 %v3690_v48 }
 0x399   : > { %v20216_v33 = vadd.f32 %v16595_v6, %v3547_v20 }
 0x39b   : > { %v3693_v49 = vsel %vm3647_vm3, %v20216_v33, -inf }
 0x39c   : > { %3694 = vmax.xlane.f32.xlu1 %v3693_v49 }
 0x3e9   : > { %v3650_v38 = vpop.xlane.xlu0 %3649 }
 0x3ea   : > { %v3696_v22 = vsub.f32 %v20142_v8, %v3650_v38 }
 0x3ec   : > { %v3712_v2 = vmul.f32 1.442695, %v3696_v22 }
 0x3ed   : > { %v3653_v25 = vpop.xlane.xlu0 %3652 }
 0x3ee   : > { %17525 = vpow2.f32 %v3712_v2  ;;  %v3697_v10 = vsub.f32 %v20147_v46, %v3653_v25 }
 0x3f0   : > { %v3714_v1 = vmul.f32 1.442695, %v3697_v10 }
 0x3f1   : > { %v3656_v26 = vpop.xlane.xlu0 %3655 }
 0x3f2   : > { %17527 = vpow2.f32 %v3714_v1  ;;  %v3698_v35 = vsub.f32 %v20151_v13, %v3656_v26 }
 0x3f4   : > { %v3716_v20 = vmul.f32 1.442695, %v3698_v35 }
 0x3f9   : > { %v3662_v48 = vpop.xlane.xlu1 %3661 }
 0x3fa   : > { %v3700_v6 = vsub.f32 %v20158_v52, %v3662_v48 }
 0x3fb   : > { %v20224_v56 = vpop.eup %17525 }
 0x3fc   : > { %v3720_v4 = vmul.f32 1.442695, %v3700_v6  ;;  %v3744_v8 = vsel %vm3647_vm3, %v20224_v56, 0.0 }
 0x3fd   : > { %v3665_v49 = vpop.xlane.xlu1 %3664  ;;  %3745 = vadd.xlane.f32.xlu0 %v3744_v8 }
 0x3fe   : > { %17529 = vpow2.f32 %v3720_v4  ;;  %v3701_v46 = vsub.f32 %v20163_v43, %v3665_v49 }
 0x3ff   : > { %v20229_v38 = vpop.eup %17527  ;;  %17531 = vpow2.f32 %v3716_v20 }
 0x400   : > { %v3722_v22 = vmul.f32 1.442695, %v3701_v46  ;;  %v3747_v13 = vsel %vm3647_vm3, %v20229_v38, 0.0 }
 0x401   : > { %v3659_v52 = vpop.xlane.xlu1 %3658  ;;  %3748 = vadd.xlane.f32.xlu1 %v3747_v13  ;;  %v3668_v2 = vpop.xlane.xlu0 %3667 }
 0x402   : > { %17533 = vpow2.f32 %v3722_v22  ;;  %v3699_v25 = vsub.f32 %v20167_v55, %v3659_v52  ;;  %v3702_v10 = vsub.f32 %v20170_v12, %v3668_v2 }
 0x404   : > { %v3718_v1 = vmul.f32 1.442695, %v3699_v25  ;;  %v3724_v26 = vmul.f32 1.442695, %v3702_v10 }
 0x405   : > { %v3671_v35 = vpop.xlane.xlu1 %3670 }
 0x406   : > { %17535 = vpow2.f32 %v3718_v1  ;;  %v3703_v43 = vsub.f32 %v20177_v59, %v3671_v35 }
 0x407   : > { %17537 = vpow2.f32 %v3724_v26 }
 0x408   : > { %v3726_v48 = vmul.f32 1.442695, %v3703_v43 }
 0x409   : > { %v3674_v6 = vpop.xlane.xlu0 %3673 }
 0x40a   : > { %17539 = vpow2.f32 %v3726_v48  ;;  %v3704_v20 = vsub.f32 %v20182_v34, %v3674_v6 }
 0x40b   : > { %v20237_v4 = vpop.eup %17529 }
 0x40c   : > { %v3728_v8 = vmul.f32 1.442695, %v3704_v20  ;;  %v3756_v55 = vsel %vm3647_vm3, %v20237_v4, 0.0  ;;  %v20241_v49 = vpop.eup %17531 }
 0x40d   : > { %v3677_v12 = vpop.xlane.xlu1 %3676  ;;  %3757 = vadd.xlane.f32.xlu0 %v3756_v55  ;;  %v3750_v34 = vsel %vm3647_vm3, %v20241_v49, 0.0 }
 0x40e   : > { %17541 = vpow2.f32 %v3728_v8  ;;  %v3705_v46 = vsub.f32 %v20187_v18, %v3677_v12 }
 0x40f   : > { %v20244_v59 = vpop.eup %17533 }
 0x410   : > { %v3730_v22 = vmul.f32 1.442695, %v3705_v46  ;;  %v3759_v13 = vsel %vm3647_vm3, %v20244_v59, 0.0 }
 0x411   : > { %3760 = vadd.xlane.f32.xlu1 %v3759_v13  ;;  %3751 = vadd.xlane.f32.xlu0 %v3750_v34  ;;  %v3680_v52 = vpop.xlane.xlu0 %3679 }
 0x412   : > { %17543 = vpow2.f32 %v3730_v22  ;;  %v3706_v2 = vsub.f32 %v20192_v5, %v3680_v52 }
 0x413   : > { %v20251_v25 = vpop.eup %17535 }
 0x414   : > { %v20253_v10 = vpop.eup %17537  ;;  %v3732_v18 = vmul.f32 1.442695, %v3706_v2  ;;  %v3753_v1 = vsel %vm3647_vm3, %v20251_v25, 0.0 }
 0x415   : > { %v3683_v26 = vpop.xlane.xlu1 %3682  ;;  %3754 = vadd.xlane.f32.xlu1 %v3753_v1  ;;  %v3762_v35 = vsel %vm3647_vm3, %v20253_v10, 0.0 }
 0x416   : > { %17545 = vpow2.f32 %v3732_v18  ;;  %v3707_v43 = vsub.f32 %v20197_v63, %v3683_v26  ;;  %3763 = vadd.xlane.f32.xlu0 %v3762_v35 }
 0x417   : > { %v20260_v48 = vpop.eup %17539 }
 0x418   : > { %v3734_v5 = vmul.f32 1.442695, %v3707_v43  ;;  %v3765_v6 = vsel %vm3647_vm3, %v20260_v48, 0.0 }
 0x419   : > { %3766 = vadd.xlane.f32.xlu1 %v3765_v6  ;;  %v3686_v20 = vpop.xlane.xlu0 %3685 }
 0x41a   : > { %17547 = vpow2.f32 %v3734_v5  ;;  %v3708_v8 = vsub.f32 %v20202_v42, %v3686_v20 }
 0x41b   : > { %v20265_v55 = vpop.eup %17541 }
 0x41c   : > { %v3736_v12 = vmul.f32 1.442695, %v3708_v8  ;;  %v3768_v46 = vsel %vm3647_vm3, %v20265_v55, 0.0 }
 0x41d   : > { %v3689_v22 = vpop.xlane.xlu1 %3688  ;;  %3769 = vadd.xlane.f32.xlu0 %v3768_v46 }
 0x41e   : > { %17549 = vpow2.f32 %v3736_v12  ;;  %v3709_v63 = vsub.f32 %v20207_v31, %v3689_v22 }
 0x41f   : > { %v20270_v13 = vpop.eup %17543 }
 0x420   : > { %v3738_v34 = vmul.f32 1.442695, %v3709_v63  ;;  %v3771_v52 = vsel %vm3647_vm3, %v20270_v13, 0.0 }
 0x421   : > { %3772 = vadd.xlane.f32.xlu1 %v3771_v52  ;;  %v3692_v2 = vpop.xlane.xlu0 %3691 }
 0x422   : > { %17551 = vpow2.f32 %v3738_v34  ;;  %v3710_v42 = vsub.f32 %v20212_v58, %v3692_v2 }
 0x423   : > { %v20275_v18 = vpop.eup %17545 }
 0x424   : > { %v3740_v1 = vmul.f32 1.442695, %v3710_v42  ;;  %v3774_v26 = vsel %vm3647_vm3, %v20275_v18, 0.0 }
 0x425   : > { %v3695_v35 = vpop.xlane.xlu1 %3694  ;;  %3775 = vadd.xlane.f32.xlu0 %v3774_v26 }
 0x426   : > { %17553 = vpow2.f32 %v3740_v1  ;;  %v3711_v31 = vsub.f32 %v20216_v33, %v3695_v35 }
 0x427   : > { %v20280_v43 = vpop.eup %17547 }
 0x428   : > { %v3742_v5 = vmul.f32 1.442695, %v3711_v31  ;;  %v3777_v6 = vsel %vm3647_vm3, %v20280_v43, 0.0 }
 0x429   : > { %3778 = vadd.xlane.f32.xlu1 %v3777_v6 }
 0x42a   : > { %17555 = vpow2.f32 %v3742_v5 }
 0x42b   : > { %v20284_v58 = vpop.eup %17549 }
 0x42c   : > { %v3780_v20 = vsel %vm3647_vm3, %v20284_v58, 0.0 }
 0x42d   : > { %3781 = vadd.xlane.f32.xlu0 %v3780_v20  ;;  %v22740_v20 = vpack.c.bf16 %v20076_v27, %v20072_v24 }
 0x42f   : > { %v20288_v8 = vpop.eup %17551 }
 0x430   : > { %v3783_v12 = vsel %vm3647_vm3, %v20288_v8, 0.0 }
 0x431   : > { %3784 = vadd.xlane.f32.xlu1 %v3783_v12 }
 0x433   : > { %v20292_v33 = vpop.eup %17553 }
 0x434   : > { %v3786_v46 = vsel %vm3647_vm3, %v20292_v33, 0.0 }
 0x435   : > { %3787 = vadd.xlane.f32.xlu0 %v3786_v46 }
 0x437   : > { %v20296_v22 = vpop.eup %17555 }
 0x438   : > { %v3789_v63 = vsel %vm3647_vm3, %v20296_v22, 0.0 }
 0x439   : > { %3790 = vadd.xlane.f32.xlu1 %v3789_v63 }
 0x486   : > { %v3746_v34 = vpop.xlane.xlu0 %3745 }
 0x487   : > { %17557 = vrcp.f32 %v3746_v34 }
 0x48a   : > { %v3749_v52 = vpop.xlane.xlu1 %3748 }
 0x48b   : > { %17559 = vrcp.f32 %v3749_v52 }
 0x494   : > { %v17558_v2 = vpop.eup %17557 }
 0x495   : > { %v3808_v26 = vmul.f32 %v17558_v2, %v20224_v56 }
 0x496   : > { %v3758_v42 = vpop.xlane.xlu0 %3757 }
 0x497   : > { %17561 = vrcp.f32 %v3758_v42 }
 0x498   : > { %v17560_v1 = vpop.eup %17559 }
 0x499   : > { %v3809_v35 = vmul.f32 %v17560_v1, %v20229_v38 }
 0x49a   : > { %v3761_v31 = vpop.xlane.xlu1 %3760  ;;  %v3752_v5 = vpop.xlane.xlu0 %3751 }
 0x49b   : > { %v20302_v6 = vpack.c.bf16 %v3809_v35, %v3808_v26  ;;  %17563 = vrcp.f32 %v3761_v31 }
 0x49c   : > { %17565 = vrcp.f32 %v3752_v5  ;;  %v22741_v5 = vpack.c.bf16 %v20084_v36, %v20080_v23  ;;  %v22743_v36 = vpack.c.bf16 %v20001_v37, %v19966_v3 }
 0x49d   : > { %16605 = vmatmul.mubr.msk.bf16.vlgmr.msra.gmra.mxu1 %vm3647_vm3, %v20302_v6 }
 0x49e   : > { %16609 = vmatpush3.bf16.msra.mxu1 %v22740_v20  ;;  %v3755_v12 = vpop.xlane.xlu1 %3754  ;;  %16610 = vmatprep.mubr.msk.bf16.mxu1 %vm18733_vm2, %v22669_v53 }
 0x49f   : > { %17567 = vrcp.f32 %v3755_v12  ;;  %v3764_v56 = vpop.xlane.xlu0 %3763  ;;  %16614 = vmatprep.subr.bf16.mxu1 %v22669_v53  ;;  %v22742_v12 = vpack.c.bf16 %v20092_v11, %v20088_v30  ;;  %v22745_v11 = vpack.c.bf16 %v19982_v39, %v19947_v47 }
 0x4a0   : > { %17569 = vrcp.f32 %v3764_v56 }
 0x4a2   : > { %v3767_v38 = vpop.xlane.xlu1 %3766 }
 0x4a3   : > { %17571 = vrcp.f32 %v3767_v38 }
 0x4a4   : > { %v17562_v46 = vpop.eup %17561 }
 0x4a5   : > { %v3812_v52 = vmul.f32 %v17562_v46, %v20237_v4 }
 0x4a6   : > { %v3770_v63 = vpop.xlane.xlu0 %3769 }
 0x4a7   : > { %17573 = vrcp.f32 %v3770_v63 }
 0x4a8   : > { %v17564_v34 = vpop.eup %17563 }
 0x4a9   : > { %v3813_v24 = vmul.f32 %v17564_v34, %v20244_v59  ;;  %v17566_v27 = vpop.eup %17565 }
 0x4aa   : > { %v3773_v2 = vpop.xlane.xlu1 %3772  ;;  %v3810_v26 = vmul.f32 %v17566_v27, %v20241_v49  ;;  %v22765_v27 = vld [vmem:[#allocation101_spill] sm:$0xff] }
 0x4ab   : > { %17575 = vrcp.f32 %v3773_v2  ;;  %v4018_v42 = vpack.c.bf16 %v3813_v24, %v3812_v52  ;;  %v22753_v52 = vpack.c.bf16 %v20134_v50, %v20130_v54  ;;  %v22756_v50 = vld [vmem:[#allocation73_spill] sm:$0xff]  ;;  %v22766_v2 = vld [vmem:[#allocation103_spill] sm:$0xff] }
 0x4ac   : > { %v17568_v1 = vpop.eup %17567 }
 0x4ad   : > { %v3811_v35 = vmul.f32 %v17568_v1, %v20251_v25  ;;  %16611 = vmatmul.mubr.msk.bf16.vlgmr.msra.gmra.mxu1 %vm3647_vm3, %v4018_v42  ;;  %v17570_v31 = vpop.eup %17569  ;;  %v22768_v1 = vld [vmem:[#allocation105_spill] sm:$0xff] }
 0x4ae   : > { %16615 = vmatpush3.bf16.msra.mxu1 %v22741_v5  ;;  %v3776_v20 = vpop.xlane.xlu0 %3775  ;;  %16616 = vmatprep.mubr.msk.bf16.mxu1 %vm18733_vm2, %v22669_v53  ;;  %v3814_v49 = vmul.f32 %v17570_v31, %v20253_v10  ;;  %v22744_v10 = vpack.c.bf16 %v20100_v40, %v20096_v41  ;;  %v22746_v40 = vpack.c.bf16 %v20006_v9, %v19969_v29  ;;  %v17183_v31 = vld [vmem:[%s19230_s14 + $0xa8] ss:$12 sps:$4 sm:$0xff]   ;;  %v17185_v5 = vld [vmem:[%s19230_s14 + $0xac] ss:$12 sps:$4 sm:$0xff]  }
 0x4af   : > { %v3834_v4 = vpack.c.bf16 %v3811_v35, %v3810_v26  ;;  %16620 = vmatprep.subr.bf16.mxu1 %v22669_v53  ;;  %17577 = vrcp.f32 %v3776_v20  ;;  %v22748_v9 = vpack.c.bf16 %v19985_v19, %v19953_v51  ;;  %v22769_v26 = vld [vmem:[#allocation81_spill] sm:$0xff] }
 0x4b0   : > { %v17572_v59 = vpop.eup %17571  ;;  %v22770_v35 = vpack.c.bf16 %v22768_v1, %v22769_v26  ;;  %v17186_v20 = vld [vmem:[%s19230_s14 + $0x90] ss:$12 sps:$4 sm:$0xff]  }
 0x4b1   : > { %15229 = vmatmul.mubr.msk.bf16.vlgmr.msra.gmra.mxu0 %vm3647_vm3, %v3834_v4  ;;  %v3815_v25 = vmul.f32 %v17572_v59, %v20260_v48  ;;  %v17191_v59 = vld [vmem:[%s19230_s14 + $0x7c] ss:$12 sps:$4 sm:$0xff]  }
 0x4b2   : > { %16597 = vmatpush3.bf16.msra.mxu0 %v22742_v12  ;;  %v3779_v23 = vpop.xlane.xlu1 %3778  ;;  %16598 = vmatprep.mubr.msk.bf16.mxu0 %vm18733_vm2, %v22669_v53  ;;  %v17192_v12 = vld [vmem:[%s19230_s14 + $0x60] ss:$12 sps:$4 sm:$0xff]  }
 0x4b3   : > { %17579 = vrcp.f32 %v3779_v23  ;;  %3948 = vmatprep.subr.bf16.mxu0 %v22743_v36  ;;  %v4121_v56 = vpack.c.bf16 %v3815_v25, %v3814_v49  ;;  %v17189_v49 = vld [vmem:[%s19230_s14 + $0x78] ss:$12 sps:$4 sm:$0xff]   ;;  %v17195_v36 = vld [vmem:[%s19230_s14 + $0x48] ss:$12 sps:$4 sm:$0xff]  }
 0x4b4   : > { %v17574_v38 = vpop.eup %17573  ;;  %v17194_v25 = vld [vmem:[%s19230_s14 + $0x64] ss:$12 sps:$4 sm:$0xff]   ;;  %v17197_v23 = vld [vmem:[%s19230_s14 + $0x4c] ss:$12 sps:$4 sm:$0xff]  }
 0x4b5   : > { %16617 = vmatmul.mubr.msk.bf16.vlgmr.msra.gmra.mxu1 %vm3647_vm3, %v4121_v56  ;;  %v3816_v3 = vmul.f32 %v17574_v38, %v20265_v55  ;;  %v22747_v55 = vpack.c.bf16 %v20112_v57, %v20108_v17  ;;  %v22749_v57 = vpack.c.bf16 %v20011_v44, %v19972_v21  ;;  %v22751_v44 = vpack.c.bf16 %v19988_v14, %v19956_v60  ;;  %v17198_v38 = vld [vmem:[%s19230_s14 + $0x30] ss:$12 sps:$4 sm:$0xff]  }
 0x4b6   : > { %16621 = vmatpush3.bf16.msra.mxu1 %v22744_v10  ;;  %v3782_v48 = vpop.xlane.xlu0 %3781  ;;  %16622 = vmatprep.mubr.msk.bf16.mxu1 %vm18733_vm2, %v22669_v53  ;;  %v17203_v10 = vld [vmem:[%s19230_s14 + $0x1c] ss:$12 sps:$4 sm:$0xff]  }
 0x4b7   : > { %16626 = vmatprep.subr.bf16.mxu1 %v22669_v53  ;;  %17581 = vrcp.f32 %v3782_v48  ;;  %v17204_v48 = vld [vmem:[%s19230_s14 + $0x198] ss:$12 sps:$4 sm:$0xff]  }
 0x4b8   : > { %v17576_v30 = vpop.eup %17575 }
 0x4b9   : > { %16599 = vmatmul.mubr.msk.bf16.vlgmr.msra.gmra.mxu0 %vm3647_vm3, %v3834_v4  ;;  %v3817_v37 = vmul.f32 %v17576_v30, %v20270_v13  ;;  %v17188_v4 = vld [vmem:[%s19230_s14 + $0x94] ss:$12 sps:$4 sm:$0xff]   ;;  %v17201_v30 = vld [vmem:[%s19230_s14 + $0x18] ss:$12 sps:$4 sm:$0xff]  }
 0x4ba   : > { %3949 = vmatpush1.bf16.msra.mxu0 %v22745_v11  ;;  %v3785_v41 = vpop.xlane.xlu1 %3784  ;;  %3966 = vmatprep.mubr.bf16.mxu0 %v22682_v61  ;;  %v17209_v11 = vld [vmem:[%s19230_s14 + $0x4] ss:$12 sps:$4 sm:$0xff]  }
 0x4bb   : > { %17583 = vrcp.f32 %v3785_v41  ;;  %4045 = vmatprep.subr.bf16.mxu0 %v22746_v40  ;;  %v4224_v46 = vpack.c.bf16 %v3817_v37, %v3816_v3  ;;  %v17206_v3 = vld [vmem:[%s19230_s14 + $0x19c] ss:$12 sps:$4 sm:$0xff]   ;;  %v17207_v37 = vld [vmem:[%s19230_s14] ss:$12 sps:$4 sm:$0xff]   ;;  %v17212_v40 = vld [vmem:[%s19230_s14 + $0x184] ss:$12 sps:$4 sm:$0xff]  }
 0x4bc   : > { %v17578_v63 = vpop.eup %17577  ;;  %v17210_v41 = vld [vmem:[%s19230_s14 + $0x180] ss:$12 sps:$4 sm:$0xff]  }
 0x4bd   : > { %16623 = vmatmul.mubr.msk.bf16.vlgmr.msra.gmra.mxu1 %vm3647_vm3, %v4224_v46  ;;  %v3818_v29 = vmul.f32 %v17578_v63, %v20275_v18  ;;  %v22750_v18 = vpack.c.bf16 %v20124_v15, %v20120_v45  ;;  %v22752_v15 = vpack.c.bf16 %v20021_v32, %v19975_v28  ;;  %v22754_v28 = vpack.c.bf16 %v19991_v0, %v19959_v62  ;;  %v22759_v62 = vld [vmem:[#allocation100_spill] sm:$0xff]  ;;  %v17216_v63 = vld [vmem:[%s19230_s14 + $0x170] ss:$12 sps:$4 sm:$0xff]  }
 0x4be   : > { %16627 = vmatpush3.bf16.msra.mxu1 %v22747_v55  ;;  %v3788_v13 = vpop.xlane.xlu0 %3787  ;;  %16628 = vmatprep.mubr.msk.bf16.mxu1 %vm18733_vm2, %v22669_v53  ;;  %v22755_v32 = vpack.c.bf16 %v20032_v7, %v19978_v16  ;;  %v22760_v16 = vld [vmem:[#allocation102_spill] sm:$0xff] }
 0x4bf   : > { %16632 = vmatprep.subr.bf16.mxu1 %v22669_v53  ;;  %17585 = vrcp.f32 %v3788_v13  ;;  %v22761_v0 = vpack.c.bf16 %v22759_v62, %v22760_v16  ;;  %v22762_v7 = vld [vmem:[#allocation98_spill] sm:$0xff] }
 0x4c0   : > { %v17580_v47 = vpop.eup %17579  ;;  %v17213_v55 = vld [vmem:[%s19230_s14 + $0x168] ss:$12 sps:$4 sm:$0xff]  }
 0x4c1   : > { %15231 = vmatmul.mubr.msk.bf16.vlgmr.msra.gmra.mxu0 %vm3647_vm3, %v20302_v6  ;;  %v3819_v39 = vmul.f32 %v17580_v47, %v20280_v43  ;;  %v17220_v13 = vld [vmem:[%s19230_s14 + $0x154] ss:$12 sps:$4 sm:$0xff]   ;;  %v17218_v47 = vld [vmem:[%s19230_s14 + $0x150] ss:$12 sps:$4 sm:$0xff]  }
 0x4c2   : > { %4046 = vmatpush1.bf16.msra.mxu0 %v22748_v9  ;;  %v3791_v17 = vpop.xlane.xlu1 %3790  ;;  %4063 = vmatprep.mubr.bf16.mxu0 %v22682_v61  ;;  %v17230_v9 = vld [vmem:[%s19230_s14 + $0x124] ss:$12 sps:$4 sm:$0xff]  }
 0x4c3   : > { %17587 = vrcp.f32 %v3791_v17  ;;  %4148 = vmatprep.subr.bf16.mxu0 %v22749_v57  ;;  %v4327_v34 = vpack.c.bf16 %v3819_v39, %v3818_v29  ;;  %v17225_v29 = vld [vmem:[%s19230_s14 + $0x13c] ss:$12 sps:$4 sm:$0xff]   ;;  %v17223_v39 = vld [vmem:[%s19230_s14 + $0x138] ss:$12 sps:$4 sm:$0xff]   ;;  %v17228_v17 = vld [vmem:[%s19230_s14 + $0x120] ss:$12 sps:$4 sm:$0xff]  }
 0x4c4   : > { %v17582_v6 = vpop.eup %17581  ;;  %v17235_v57 = vld [vmem:[%s19230_s14 + $0x10c] ss:$12 sps:$4 sm:$0xff]  }
 0x4c5   : > { %16629 = vmatmul.mubr.msk.bf16.vlgmr.msra.gmra.mxu1 %vm3647_vm3, %v4327_v34  ;;  %v3820_v19 = vmul.f32 %v17582_v6, %v20284_v58  ;;  %v17240_v6 = vld [vmem:[%s19230_s14 + $0xf4] ss:$12 sps:$4 sm:$0xff]  }
 0x4c6   : > { %16633 = vmatpush3.bf16.msra.mxu1 %v22750_v18  ;;  %16634 = vmatprep.mubr.msk.bf16.mxu1 %vm18733_vm2, %v22669_v53  ;;  %v17238_v18 = vld [vmem:[%s19230_s14 + $0xf0] ss:$12 sps:$4 sm:$0xff]  }
 0x4c7   : > { %16638 = vmatprep.subr.bf16.mxu1 %v22669_v53 }
 0x4c8   : > { %v17584_v51 = vpop.eup %17583 }
 0x4c9   : > { %15233 = vmatmul.mubr.msk.bf16.vlgmr.msra.gmra.mxu0 %vm3647_vm3, %v4018_v42  ;;  %v3821_v21 = vmul.f32 %v17584_v51, %v20288_v8  ;;  %v22757_v8 = vld [vmem:[#allocation97_spill] sm:$0xff]  ;;  %v22767_v42 = vpack.c.bf16 %v22765_v27, %v22766_v2  ;;  %v17243_v51 = vld [vmem:[%s19230_s14 + $0xd8] ss:$12 sps:$4 sm:$0xff]  }
 0x4ca   : > { %4149 = vmatpush1.bf16.msra.mxu0 %v22751_v44  ;;  %4166 = vmatprep.mubr.bf16.mxu0 %v22682_v61  ;;  %v17248_v44 = vld [vmem:[%s19230_s14 + $0xc0] ss:$12 sps:$4 sm:$0xff]  }
 0x4cb   : > { %4251 = vmatprep.subr.bf16.mxu0 %v22752_v15  ;;  %v4430_v45 = vpack.c.bf16 %v3821_v21, %v3820_v19  ;;  %v17245_v19 = vld [vmem:[%s19230_s14 + $0xdc] ss:$12 sps:$4 sm:$0xff]   ;;  %v17250_v21 = vld [vmem:[%s19230_s14 + $0xc4] ss:$12 sps:$4 sm:$0xff]  }
 0x4cc   : > { %v17586_v43 = vpop.eup %17585 }
 0x4cd   : > { %16635 = vmatmul.mubr.msk.bf16.vlgmr.msra.gmra.mxu1 %vm3647_vm3, %v4430_v45  ;;  %v3822_v60 = vmul.f32 %v17586_v43, %v20292_v33  ;;  %v22758_v33 = vpack.c.bf16 %v22756_v50, %v22757_v8 }
 0x4ce   : > { %16639 = vmatpush3.bf16.msra.mxu1 %v22753_v52  ;;  %16640 = vmatprep.mubr.msk.bf16.mxu1 %vm18733_vm2, %v22669_v53 }
 0x4cf   : > { %5069 = vmatprep.subr.bf16.mxu1 %v17206_v3 }
 0x4d0   : > { %v17588_v58 = vpop.eup %17587 }
 0x4d1   : > { %15235 = vmatmul.mubr.msk.bf16.vlgmr.msra.gmra.mxu0 %vm3647_vm3, %v4121_v56  ;;  %v3823_v14 = vmul.f32 %v17588_v58, %v20296_v22  ;;  %v22763_v22 = vld [vmem:[#allocation99_spill] sm:$0xff] }
 0x4d2   : > { %4252 = vmatpush1.bf16.msra.mxu0 %v22754_v28  ;;  %4269 = vmatprep.mubr.bf16.mxu0 %v22682_v61  ;;  %v22764_v24 = vpack.c.bf16 %v22762_v7, %v22763_v22  ;;  %v17200_v56 = vld [vmem:[%s19230_s14 + $0x34] ss:$12 sps:$4 sm:$0xff]  }
 0x4d3   : > { %4354 = vmatprep.subr.bf16.mxu0 %v22755_v32  ;;  %v4533_v54 = vpack.c.bf16 %v3823_v14, %v3822_v60 }
 0x4d5   : > { %16641 = vmatmul.mubr.msk.bf16.vlgmr.msra.gmra.mxu1 %vm3647_vm3, %v4533_v54 }
 0x4d6   : > { %5089 = vmatprep.mubr.bf16.mxu1 %v22682_v61  ;;  %5070 = vmatpush1.bf16.msra.mxu1 %v17204_v48 }
 0x4d7   : > { %5071 = vmatprep.subr.bf16.mxu1 %v17212_v40 }
 0x4d9   : > { %15237 = vmatmul.mubr.msk.bf16.vlgmr.msra.gmra.mxu0 %vm3647_vm3, %v4224_v46  ;;  %v17215_v46 = vld [vmem:[%s19230_s14 + $0x16c] ss:$12 sps:$4 sm:$0xff]  }
 0x4da   : > { %4355 = vmatpush1.bf16.msra.mxu0 %v22758_v33  ;;  %4372 = vmatprep.mubr.bf16.mxu0 %v22682_v61 }
 0x4db   : > { %4457 = vmatprep.subr.bf16.mxu0 %v22761_v0  ;;  %5072 = vmatpush1.bf16.msra.mxu1 %v17210_v41 }
 0x4dc   : > { %16213 = vmatprep.subr.bf16.mxu1 %v17216_v63 }
 0x4e1   : > { %15239 = vmatmul.mubr.msk.bf16.vlgmr.msra.gmra.mxu0 %vm3647_vm3, %v4327_v34  ;;  %v17233_v34 = vld [vmem:[%s19230_s14 + $0x108] ss:$12 sps:$4 sm:$0xff]  }
 0x4e2   : > { %4458 = vmatpush1.bf16.msra.mxu0 %v22764_v24  ;;  %4475 = vmatprep.mubr.bf16.mxu0 %v22682_v61 }
 0x4e3   : > { %4560 = vmatprep.subr.bf16.mxu0 %v22767_v42 }
 0x4e9   : > { %15241 = vmatmul.mubr.msk.bf16.vlgmr.msra.gmra.mxu0 %vm3647_vm3, %v4430_v45 }
 0x4ea   : > { %4561 = vmatpush1.bf16.msra.mxu0 %v22770_v35  ;;  %4578 = vmatprep.mubr.bf16.mxu0 %v22682_v61 }
 0x4eb   : > { %5014 = vmatprep.subr.bf16.mxu0 %v17185_v5 }
 0x4f1   : > { %15243 = vmatmul.mubr.msk.bf16.vlgmr.msra.gmra.mxu0 %vm3647_vm3, %v4533_v54 }
 0x4f2   : > { %5015 = vmatpush1.bf16.msra.mxu0 %v17183_v31 }
 0x4f3   : > { %5016 = vmatprep.subr.bf16.mxu0 %v17188_v4 }
 0x4f6   : > { %5017 = vmatpush1.bf16.msra.mxu0 %v17186_v20 }
 0x4f7   : > { %5018 = vmatprep.subr.bf16.mxu0 %v17191_v59 }
 0x4fa   : > { %5019 = vmatpush1.bf16.msra.mxu0 %v17189_v49 }
 0x4fb   : > { %5020 = vmatprep.subr.bf16.mxu0 %v17194_v25 }
 0x4fe   : > { %5021 = vmatpush1.bf16.msra.mxu0 %v17192_v12 }
 0x4ff   : > { %5022 = vmatprep.subr.bf16.mxu0 %v17197_v23 }
 0x502   : > { %5023 = vmatpush1.bf16.msra.mxu0 %v17195_v36 }
 0x503   : > { %5024 = vmatprep.subr.bf16.mxu0 %v17200_v56 }
 0x506   : > { %5025 = vmatpush1.bf16.msra.mxu0 %v17198_v38 }
 0x507   : > { %5026 = vmatprep.subr.bf16.mxu0 %v17203_v10 }
 0x50a   : > { %5027 = vmatpush1.bf16.msra.mxu0 %v17201_v30 }
 0x50b   : > { %5028 = vmatprep.subr.bf16.mxu0 %v17209_v11 }
 0x50e   : > { %5029 = vmatpush1.bf16.msra.mxu0 %v17207_v37 }
 0x50f   : > { %5030 = vmatprep.subr.bf16.mxu0 %v17215_v46 }
 0x512   : > { %5031 = vmatpush2.bf16.msra.mxu0 %v17213_v55 }
 0x513   : > { %5032 = vmatprep.subr.bf16.mxu0 %v17220_v13 }
 0x516   : > { %5033 = vmatpush2.bf16.msra.mxu0 %v17218_v47 }
 0x517   : > { %5034 = vmatprep.subr.bf16.mxu0 %v17225_v29 }
 0x51a   : > { %5035 = vmatpush2.bf16.msra.mxu0 %v17223_v39 }
 0x51b   : > { %5036 = vmatprep.subr.bf16.mxu0 %v17230_v9 }
 0x51e   : > { %5037 = vmatpush2.bf16.msra.mxu0 %v17228_v17 }
 0x51f   : > { %5038 = vmatprep.subr.bf16.mxu0 %v17235_v57 }
 0x522   : > { %5039 = vmatpush2.bf16.msra.mxu0 %v17233_v34 }
 0x523   : > { %5040 = vmatprep.subr.bf16.mxu0 %v17240_v6 }
 0x526   : > { %5041 = vmatpush2.bf16.msra.mxu0 %v17238_v18 }
 0x527   : > { %5042 = vmatprep.subr.bf16.mxu0 %v17245_v19 }
 0x52a   : > { %5043 = vmatpush2.bf16.msra.mxu0 %v17243_v51 }
 0x52b   : > { %5044 = vmatprep.subr.bf16.mxu0 %v17250_v21 }
 0x52e   : > { %5045 = vmatpush2.bf16.msra.mxu0 %v17248_v44 }
 0x55d   : > { %v4011_v15 = vpop.f32.mrf.mxu1 }
 0x55f   : > { %v16606_v45 = vpop.f32.mrf.mxu1 }
 0x561   : > { %v4014_v43 = vpop.f32.mrf.mxu1 }
 0x563   : > { %v16607_v52 = vpop.f32.mrf.mxu1 }
 0x56d   : > { %v4108_v58 = vpop.f32.mrf.mxu1 }
 0x56f   : > { %v16612_v60 = vpop.f32.mrf.mxu1 }
 0x571   : > { %v20463_v14 = vpop.f32.mrf.mxu0  ;;  %v4111_v28 = vpop.f32.mrf.mxu1 }
 0x573   : > { %v20465_v32 = vpop.f32.mrf.mxu0  ;;  %v16613_v54 = vpop.f32.mrf.mxu1 }
 0x574   : > { %v17222_v54 = vld [vmem:[%s19230_s14 + $0x98] ss:$12 sps:$4 sm:$0xff]  }
 0x575   : > { %v20467_v50 = vpop.f32.mrf.mxu0  ;;  %v4211_v8 = vpop.f32.mrf.mxu1 }
 0x577   : > { %v20469_v33 = vpop.f32.mrf.mxu0  ;;  %v16618_v62 = vpop.f32.mrf.mxu1 }
 0x579   : > { %v3924_v16 = vpop.f32.mrf.mxu0  ;;  %v4214_v0 = vpop.f32.mrf.mxu1 }
 0x57a   : > { %v4012_v49 = vadd.f32 %v4011_v15, %v3924_v16 }
 0x57b   : > { %v16600_v7 = vpop.f32.mrf.mxu0  ;;  %v16619_v22 = vpop.f32.mrf.mxu1 }
 0x57c   : > { %v4117_v38 = vadd.f32 %v4108_v58, %v4012_v49  ;;  %v17221_v58 = vld [vmem:[%s19230_s14 + $0x158] ss:$12 sps:$4 sm:$0xff]   ;;  %v17231_v7 = vld [vmem:[%s19230_s14 + $0x128] ss:$12 sps:$4 sm:$0xff]  }
 0x57d   : > { %v3927_v24 = vpop.f32.mrf.mxu0  ;;  %v4314_v27 = vpop.f32.mrf.mxu1 }
 0x57e   : > { %v4015_v25 = vadd.f32 %v4014_v43, %v3927_v24  ;;  %v4220_v11 = vadd.f32 %v4211_v8, %v4117_v38  ;;  %v17217_v43 = vld [vmem:[%s19230_s14 + $0xb0] ss:$12 sps:$4 sm:$0xff]   ;;  %v17226_v8 = vld [vmem:[%s19230_s14 + $0x140] ss:$12 sps:$4 sm:$0xff]  }
 0x57f   : > { %v16601_v2 = vpop.f32.mrf.mxu0  ;;  %v16624_v42 = vpop.f32.mrf.mxu1 }
 0x580   : > { %v4120_v10 = vadd.f32 %v4111_v28, %v4015_v25  ;;  %v4323_v13 = vadd.f32 %v4314_v27, %v4220_v11  ;;  %v17232_v27 = vld [vmem:[%s19230_s14 + $0x68] ss:$12 sps:$4 sm:$0xff]   ;;  %v17236_v2 = vld [vmem:[%s19230_s14 + $0x110] ss:$12 sps:$4 sm:$0xff]   ;;  %v17241_v25 = vld [vmem:[%s19230_s14 + $0xf8] ss:$12 sps:$4 sm:$0xff]  }
 0x581   : > { %v20471_v1 = vpop.f32.mrf.mxu0  ;;  %v4317_v26 = vpop.f32.mrf.mxu1 }
 0x582   : > { %v4223_v41 = vadd.f32 %v4214_v0, %v4120_v10  ;;  %v17227_v0 = vld [vmem:[%s19230_s14 + $0x80] ss:$12 sps:$4 sm:$0xff]  }
 0x583   : > { %v20473_v35 = vpop.f32.mrf.mxu0  ;;  %v16625_v31 = vpop.f32.mrf.mxu1 }
 0x584   : > { %v4326_v47 = vadd.f32 %v4317_v26, %v4223_v41 }
 0x585   : > { %v3972_v5 = vpop.f32.mrf.mxu0  ;;  %v4417_v20 = vpop.f32.mrf.mxu1 }
 0x586   : > { %v4426_v9 = vadd.f32 %v4417_v20, %v4323_v13  ;;  %v3973_v26 = vadd.f32 %v3972_v5, %v20467_v50  ;;  %v17237_v20 = vld [vmem:[%s19230_s14 + $0x50] ss:$12 sps:$4 sm:$0xff]  }
 0x587   : > { %v20475_v4 = vpop.f32.mrf.mxu0  ;;  %v16630_v59 = vpop.f32.mrf.mxu1 }
 0x588   : > { %v3971_v59 = vadd.f32 %v20473_v35, %v20465_v32  ;;  %v3975_v49 = vadd.f32 %v20475_v4, %v20469_v33  ;;  %v17242_v35 = vld [vmem:[%s19230_s14 + $0x38] ss:$12 sps:$4 sm:$0xff]   ;;  %v17246_v4 = vld [vmem:[%s19230_s14 + $0xe0] ss:$12 sps:$4 sm:$0xff]  }
 0x589   : > { %v20477_v12 = vpop.f32.mrf.mxu0  ;;  %v4420_v23 = vpop.f32.mrf.mxu1 }
 0x58a   : > { %v4429_v17 = vadd.f32 %v4420_v23, %v4326_v47  ;;  %v3969_v23 = vadd.f32 %v20471_v1, %v20463_v14 }
 0x58b   : > { %v20479_v36 = vpop.f32.mrf.mxu0  ;;  %v16631_v56 = vpop.f32.mrf.mxu1 }
 0x58c   : > { %v4116_v50 = vadd.f32 %v20479_v36, %v3971_v59  ;;  %v4115_v10 = vadd.f32 %v20477_v12, %v3969_v23  ;;  %v22771_v59 = vld [vmem:[#allocation68_spill] sm:$0xff] }
 0x58d   : > { %v4069_v48 = vpop.f32.mrf.mxu0  ;;  %v4520_v30 = vpop.f32.mrf.mxu1 }
 0x58e   : > { %v4529_v6 = vadd.f32 %v4520_v30, %v4426_v9  ;;  %v4118_v56 = vadd.f32 %v4069_v48, %v3973_v26 }
 0x58f   : > { %v4071_v3 = vpop.f32.mrf.mxu0  ;;  %v16636_v37 = vpop.f32.mrf.mxu1 }
 0x590   : > { %v4119_v5 = vadd.f32 %v4071_v3, %v3975_v49 }
 0x591   : > { %v20481_v40 = vpop.f32.mrf.mxu0  ;;  %v4523_v46 = vpop.f32.mrf.mxu1 }
 0x592   : > { %v4532_v18 = vadd.f32 %v4523_v46, %v4429_v17  ;;  %v4218_v11 = vadd.f32 %v20481_v40, %v4115_v10  ;;  %v17247_v46 = vld [vmem:[%s19230_s14 + $0x20] ss:$12 sps:$4 sm:$0xff]  }
 0x593   : > { %v4170_v63 = vpop.f32.mrf.mxu0  ;;  %v16637_v55 = vpop.f32.mrf.mxu1 }
 0x594   : > { %v4219_v37 = vadd.f32 %v4170_v63, %v4116_v50  ;;  %v17251_v63 = vld [vmem:[%s19230_s14 + $0xc8] ss:$12 sps:$4 sm:$0xff]  }
 0x595   : > { %v4172_v29 = vpop.f32.mrf.mxu0  ;;  %v4623_v39 = vpop.f32.mrf.mxu1 }
 0x596   : > { %v4632_v21 = vadd.f32 %v4623_v39, %v4529_v6  ;;  %v4221_v30 = vadd.f32 %v4172_v29, %v4118_v56  ;;  %v17252_v6 = vld [vmem:[%s19230_s14 + $0x8] ss:$12 sps:$4 sm:$0xff]  }
 0x597   : > { %v4174_v57 = vpop.f32.mrf.mxu0  ;;  %v16642_v34 = vpop.f32.mrf.mxu1 }
 0x598   : > { %v4222_v33 = vadd.f32 %v4174_v57, %v4119_v5 }
 0x599   : > { %v4271_v51 = vpop.f32.mrf.mxu0  ;;  %v4626_v19 = vpop.f32.mrf.mxu1 }
 0x59a   : > { %v4635_v44 = vadd.f32 %v4626_v19, %v4532_v18  ;;  %v4321_v36 = vadd.f32 %v4271_v51, %v4218_v11 }
 0x59b   : > { %v4273_v15 = vpop.f32.mrf.mxu0  ;;  %v16643_v45 = vpop.f32.mrf.mxu1 }
 0x59c   : > { %v20484_v52 = vpack.c.bf16 %v4635_v44, %v4632_v21  ;;  %v4322_v48 = vadd.f32 %v4273_v15, %v4219_v37  ;;  %v17253_v15 = vld [vmem:[%s19230_s14 + $0x1a0] ss:$12 sps:$4 sm:$0xff]   ;;  %v17254_v45 = vld [vmem:[%s19230_s14 + $0x188] ss:$12 sps:$4 sm:$0xff]  }
 0x59d   : > { %v4275_v60 = vpop.f32.mrf.mxu0  ;;  %v20546_v37 = vld [vmem:[%s19293_s6 + $0x10] sm:$0xff] }
 0x59e   : > { %15299 = vmatmul.mubr.msk.bf16.vlgmr.msra.gmra.mxu1 %vm1987_vm1, %v20484_v52  ;;  %v4324_v14 = vadd.f32 %v4275_v60, %v4221_v30  ;;  %v17260_v60 = vld [vmem:[%s19278_s16 + $0xf4] ss:$20 sps:$4 sm:$0xff]  }
 0x59f   : > { %16214 = vmatpush3.bf16.msra.mxu1 %v17217_v43  ;;  %v4277_v28 = vpop.f32.mrf.mxu0  ;;  %v17255_v43 = vld [vmem:[%s19278_s16 + $0x118] ss:$20 sps:$4 sm:$0xff]  }
 0x5a0   : > { %16215 = vmatprep.subr.bf16.mxu1 %v17221_v58  ;;  %v4325_v41 = vadd.f32 %v4277_v28, %v4222_v33  ;;  %v17257_v58 = vld [vmem:[%s19278_s16 + $0x11c] ss:$20 sps:$4 sm:$0xff]   ;;  %v4722_v33 = vrot.slane %v20546_v37, %v22771_v59 }
 0x5a1   : > { %v4374_v62 = vpop.f32.mrf.mxu0  ;;  %v17258_v28 = vld [vmem:[%s19278_s16 + $0xf0] ss:$20 sps:$4 sm:$0xff]  }
 0x5a2   : > { %v4424_v47 = vadd.f32 %v4374_v62, %v4321_v36  ;;  %v17266_v62 = vld [vmem:[%s19278_s16 + $0xa4] ss:$20 sps:$4 sm:$0xff]  }
 0x5a3   : > { %16216 = vmatpush3.bf16.msra.mxu1 %v17222_v54  ;;  %v4376_v16 = vpop.f32.mrf.mxu0  ;;  %v17263_v54 = vld [vmem:[%s19278_s16 + $0xcc] ss:$20 sps:$4 sm:$0xff]  }
 0x5a4   : > { %16217 = vmatprep.subr.bf16.mxu1 %v17226_v8  ;;  %v4425_v55 = vadd.f32 %v4376_v16, %v4322_v48  ;;  %v17261_v8 = vld [vmem:[%s19278_s16 + $0xc8] ss:$20 sps:$4 sm:$0xff]  }
 0x5a5   : > { %v4378_v22 = vpop.f32.mrf.mxu0  ;;  %v17269_v16 = vld [vmem:[%s19278_s16 + $0x7c] ss:$20 sps:$4 sm:$0xff]  }
 0x5a6   : > { %v4427_v3 = vadd.f32 %v4378_v22, %v4324_v14  ;;  %v17270_v22 = vld [vmem:[%s19278_s16 + $0x50] ss:$20 sps:$4 sm:$0xff]  }
 0x5a7   : > { %16218 = vmatpush3.bf16.msra.mxu1 %v17227_v0  ;;  %v4380_v24 = vpop.f32.mrf.mxu0  ;;  %v17267_v0 = vld [vmem:[%s19278_s16 + $0x78] ss:$20 sps:$4 sm:$0xff]  }
 0x5a8   : > { %16219 = vmatprep.subr.bf16.mxu1 %v17231_v7  ;;  %v4428_v13 = vadd.f32 %v4380_v24, %v4325_v41  ;;  %v17272_v7 = vld [vmem:[%s19278_s16 + $0x54] ss:$20 sps:$4 sm:$0xff]   ;;  %v17275_v24 = vld [vmem:[%s19278_s16 + $0x2c] ss:$20 sps:$4 sm:$0xff]  }
 0x5a9   : > { %v4477_v42 = vpop.f32.mrf.mxu0 }
 0x5aa   : > { %v4527_v17 = vadd.f32 %v4477_v42, %v4424_v47 }
 0x5ab   : > { %16220 = vmatpush3.bf16.msra.mxu1 %v17232_v27  ;;  %v4479_v31 = vpop.f32.mrf.mxu0  ;;  %v17273_v27 = vld [vmem:[%s19278_s16 + $0x28] ss:$20 sps:$4 sm:$0xff]  }
 0x5ac   : > { %16221 = vmatprep.subr.bf16.mxu1 %v17236_v2  ;;  %v4528_v9 = vadd.f32 %v4479_v31, %v4425_v55 }
 0x5ad   : > { %v4481_v38 = vpop.f32.mrf.mxu0 }
 0x5ae   : > { %v4530_v29 = vadd.f32 %v4481_v38, %v4427_v3 }
 0x5af   : > { %16222 = vmatpush3.bf16.msra.mxu1 %v17237_v20  ;;  %v4483_v32 = vpop.f32.mrf.mxu0  ;;  %v20536_v20 = vld [vmem:[%s19293_s6] sm:$0xff] }
 0x5b0   : > { %16223 = vmatprep.subr.bf16.mxu1 %v17241_v25  ;;  %v4531_v40 = vadd.f32 %v4483_v32, %v4428_v13  ;;  %v4714_v49 = vrot.slane %v20536_v20, %v22771_v59  ;;  %v20541_v25 = vld [vmem:[%s19293_s6 + $0x8] sm:$0xff] }
 0x5b1   : > { %v4580_v1 = vpop.f32.mrf.mxu0  ;;  %v4718_v23 = vrot.slane %v20541_v25, %v22771_v59 }
 0x5b2   : > { %v4630_v19 = vadd.f32 %v4580_v1, %v4527_v17  ;;  %v17602_v17 = vld [vmem:[#allocation2 + $0x10] sm:$0xff] }
 0x5b3   : > { %16224 = vmatpush3.bf16.msra.mxu1 %v17242_v35  ;;  %v4582_v12 = vpop.f32.mrf.mxu0 }
 0x5b4   : > { %16225 = vmatprep.subr.bf16.mxu1 %v17246_v4  ;;  %v4631_v18 = vadd.f32 %v4582_v12, %v4528_v9 }
 0x5b5   : > { %v4584_v39 = vpop.f32.mrf.mxu0 }
 0x5b6   : > { %v4633_v57 = vadd.f32 %v4584_v39, %v4530_v29  ;;  %v17601_v29 = vld [vmem:[#allocation2] sm:$0xff] }
 0x5b7   : > { %16226 = vmatpush3.bf16.msra.mxu1 %v17247_v46  ;;  %v4586_v34 = vpop.f32.mrf.mxu0  ;;  %v17600_v46 = vld [vmem:[#allocation2 + $0x8] sm:$0xff] }
 0x5b8   : > { %v4634_v51 = vadd.f32 %v4586_v34, %v4531_v40  ;;  %16227 = vmatprep.subr.bf16.mxu1 %v17251_v63  ;;  %v4708_v44 = vpack.c.bf16 %v4633_v57, %v4630_v19 }
 0x5ba   : > { %v4709_v21 = vpack.c.bf16 %v4634_v51, %v4631_v18 }
 0x5bb   : > { %16228 = vmatpush3.bf16.msra.mxu1 %v17252_v6  ;;  %v17603_v6 = vld [vmem:[#allocation2 + $0x20] sm:$0xff] }
 0x5bc   : > { %5046 = vmatprep.mubr.bf16.mxu0 %v4709_v21  ;;  %5132 = vmatprep.mubr.bf16.mxu1 %v4709_v21 }
 0x5bd   : > { %5047 = vmatmul.mubr.bf16.vlgmr.msra.gmra.mxu0 %v4708_v44  ;;  %16644 = vmatprep.subr.bf16.mxu1 %v22669_v53 }
 0x5be   : > { %5133 = vmatmul.mubr.bf16.vlgmr.msra.gmra.mxu1 %v4708_v44  ;;  %5959 = vmatprep.mubr.bf16.mxu0 %v22682_v61 }
 0x5bf   : > { %16645 = vmatpush3.bf16.msra.mxu1 %v17253_v15  ;;  %16648 = vmatprep.mubr.msk.bf16.mxu1 %vm18733_vm2, %v22669_v53 }
 0x5c0   : > { %16646 = vmatprep.subr.bf16.mxu1 %v22669_v53 }
 0x5c3   : > { %16647 = vmatpush3.bf16.msra.mxu1 %v17254_v45 }
 0x5c4   : > { %5884 = vmatprep.subr.bf16.mxu1 %v17257_v58 }
 0x5c6   : > { %16649 = vmatmul.mubr.msk.bf16.vlgmr.msra.gmra.mxu1 %vm1987_vm1, %v20484_v52  ;;  %v17264_v52 = vld [vmem:[%s19278_s16 + $0xa0] ss:$20 sps:$4 sm:$0xff]  }
 0x5c7   : > { %5885 = vmatpush1.bf16.msra.mxu1 %v17255_v43  ;;  %v17604_v43 = vld [vmem:[#allocation2 + $0x18] sm:$0xff] }
 0x5c8   : > { %5886 = vmatprep.subr.bf16.mxu1 %v17260_v60 }
 0x5cb   : > { %5887 = vmatpush1.bf16.msra.mxu1 %v17258_v28 }
 0x5cc   : > { %5888 = vmatprep.subr.bf16.mxu1 %v17263_v54 }
 0x5cf   : > { %5889 = vmatpush1.bf16.msra.mxu1 %v17261_v8  ;;  %v17605_v8 = vld [vmem:[#allocation2 + $0x28] sm:$0xff] }
 0x5d0   : > { %5890 = vmatprep.subr.bf16.mxu1 %v17266_v62 }
 0x5d3   : > { %5891 = vmatpush1.bf16.msra.mxu1 %v17264_v52 }
 0x5d4   : > { %5892 = vmatprep.subr.bf16.mxu1 %v17269_v16 }
 0x5d7   : > { %5893 = vmatpush1.bf16.msra.mxu1 %v17267_v0 }
 0x5d8   : > { %5894 = vmatprep.subr.bf16.mxu1 %v17272_v7 }
 0x5db   : > { %5895 = vmatpush1.bf16.msra.mxu1 %v17270_v22 }
 0x5dc   : > { %5896 = vmatprep.subr.bf16.mxu1 %v17275_v24 }
 0x5df   : > { %5897 = vmatpush1.bf16.msra.mxu1 %v17273_v27 }
 0x65e   : > { %v5091_v2 = vpop.f32.mrf.mxu1 }
 0x660   : > { %v5093_v42 = vpop.f32.mrf.mxu1 }
 0x662   : > { %v5095_v26 = vpop.f32.mrf.mxu1 }
 0x664   : > { %v5097_v31 = vpop.f32.mrf.mxu1 }
 0x67d   : > { %v5048_v56 = vpop.f32.mrf.mxu0 }
 0x67e   : > { %v16229_v38 = vpop.f32.mrf.mxu1  ;;  %v5049_v5 = vadd.f32 %v5048_v56, %v4714_v49  ;;  %v17278_v56 = vld [vmem:[%s19278_s16 + $0x4] ss:$20 sps:$4 sm:$0xff]  }
 0x67f   : > { %v5050_v50 = vpop.f32.mrf.mxu0  ;;  %5898 = vmatprep.subr.bf16.mxu1 %v17278_v56 }
 0x680   : > { %v5051_v10 = vadd.f32 %v5050_v50, %v4718_v23  ;;  %v16230_v30 = vpop.f32.mrf.mxu1  ;;  %v5092_v1 = vadd.f32 %v5091_v2, %v5049_v5  ;;  %v17281_v50 = vld [vmem:[%s19278_s16 + $0x25c] ss:$20 sps:$4 sm:$0xff]  }
 0x681   : > { %v16231_v32 = vadd.f32 %v16230_v30, %v16229_v38  ;;  %v5052_v35 = vpop.f32.mrf.mxu0  ;;  %v17279_v38 = vld [vmem:[%s19278_s16 + $0x258] ss:$20 sps:$4 sm:$0xff]   ;;  %v17282_v5 = vld [vmem:[%s19278_s16 + $0x230] ss:$20 sps:$4 sm:$0xff]  }
 0x682   : > { %v5094_v4 = vadd.f32 %v5093_v42, %v5051_v10  ;;  %v16232_v11 = vpop.f32.mrf.mxu1  ;;  %v5053_v48 = vadd.f32 %v5052_v35, %v4714_v49  ;;  %v20552_v39 = vadd.f32 %v17601_v29, %v5092_v1  ;;  %v17284_v10 = vld [vmem:[%s19278_s16 + $0x234] ss:$20 sps:$4 sm:$0xff]   ;;  %v17287_v30 = vld [vmem:[%s19278_s16 + $0x20c] ss:$20 sps:$4 sm:$0xff]  }
 0x683   : > { %v5054_v14 = vpop.f32.mrf.mxu0  ;;  %v5135_v12 = vadd.f32 %v16231_v32, %v4722_v33  ;;  %v17285_v32 = vld [vmem:[%s19278_s16 + $0x208] ss:$20 sps:$4 sm:$0xff]   ;;  %v17288_v1 = vld [vmem:[%s19278_s16 + $0x1e0] ss:$20 sps:$4 sm:$0xff]  }
 0x684   : > { %v5055_v41 = vadd.f32 %v5054_v14, %v4718_v23  ;;  %v16233_v36 = vpop.f32.mrf.mxu1  ;;  %v20550_v55 = vadd.f32 %v17600_v46, %v5094_v4  ;;  %v5096_v9 = vadd.f32 %v5095_v26, %v5053_v48  ;;  %v5201_v54 = vmul.f32 %v20552_v39, %v20552_v39  ;;  %v17276_v23 = vld [vmem:[%s19278_s16] ss:$20 sps:$4 sm:$0xff]   ;;  %v17297_v35 = vld [vmem:[%s19278_s16 + $0x2a8] ss:$20 sps:$4 sm:$0xff]   ;;  %v17290_v4 = vld [vmem:[%s19278_s16 + $0x1e4] ss:$20 sps:$4 sm:$0xff]  }
 0x685   : > { %v16234_v3 = vadd.f32 %v16233_v36, %v16232_v11  ;;  %5899 = vmatpush1.bf16.msra.mxu1 %v17276_v23  ;;  %v17305_v11 = vld [vmem:[%s19278_s16 + $0x284] ss:$20 sps:$4 sm:$0xff]   ;;  %v17303_v14 = vld [vmem:[%s19278_s16 + $0x280] ss:$20 sps:$4 sm:$0xff]  }
 0x686   : > { %v5098_v13 = vadd.f32 %v5097_v31, %v5055_v41  ;;  %v5175_v63 = vpop.f32.mrf.mxu1  ;;  %v5188_v19 = vadd.f32 %v20550_v55, %v20552_v39  ;;  %v5202_v21 = vmul.f32 %v20550_v55, %v20550_v55  ;;  %v20566_v58 = vadd.f32 %v17604_v43, %v5096_v9  ;;  %5900 = vmatprep.subr.bf16.mxu1 %v17281_v50  ;;  %v17311_v48 = vld [vmem:[%s19278_s16 + $0x124] ss:$20 sps:$4 sm:$0xff]   ;;  %v17293_v41 = vld [vmem:[%s19278_s16 + $0x1bc] ss:$20 sps:$4 sm:$0xff]   ;;  %v17302_v46 = vld [vmem:[%s19278_s16 + $0x16c] ss:$20 sps:$4 sm:$0xff]  }
 0x687   : > { %v5176_v47 = vadd.f32 %v5175_v63, %v5135_v12  ;;  %v5138_v34 = vadd.f32 %v16234_v3, %v4722_v33  ;;  %v17299_v33 = vld [vmem:[%s19278_s16 + $0x2ac] ss:$20 sps:$4 sm:$0xff]   ;;  %v17296_v3 = vld [vmem:[%s19278_s16 + $0x194] ss:$20 sps:$4 sm:$0xff]   ;;  %v17294_v12 = vld [vmem:[%s19278_s16 + $0x190] ss:$20 sps:$4 sm:$0xff]  }
 0x688   : > { %v16650_v40 = vpop.f32.mrf.mxu1  ;;  %v20556_v18 = vadd.f32 %v17603_v6, %v5098_v13  ;;  %v5207_v0 = vadd.f32 %v5202_v21, %v5201_v54  ;;  %v5204_v42 = vmul.f32 %v20566_v58, %v20566_v58  ;;  %5939 = vmatprep.subr.bf16.mxu0 %v17299_v33  ;;  %v17291_v36 = vld [vmem:[%s19278_s16 + $0x1b8] ss:$20 sps:$4 sm:$0xff]   ;;  %v17300_v13 = vld [vmem:[%s19278_s16 + $0x168] ss:$20 sps:$4 sm:$0xff]  }
 0x689   : > { %v20554_v57 = vadd.f32 %v17602_v17, %v5176_v47  ;;  %5901 = vmatpush2.bf16.msra.mxu1 %v17279_v38  ;;  %5940 = vmatpush1.bf16.msra.mxu0 %v17297_v35  ;;  %v17308_v63 = vld [vmem:[%s19278_s16 + $0x144] ss:$20 sps:$4 sm:$0xff]   ;;  %v17306_v47 = vld [vmem:[%s19278_s16 + $0x140] ss:$20 sps:$4 sm:$0xff]  }
 0x68a   : > { %v5178_v51 = vpop.f32.mrf.mxu1  ;;  %v5193_v16 = vadd.f32 %v20556_v18, %v20566_v58  ;;  %v5205_v7 = vmul.f32 %v20556_v18, %v20556_v18  ;;  %5902 = vmatprep.subr.bf16.mxu1 %v17284_v10  ;;  %5941 = vmatprep.subr.bf16.mxu0 %v17305_v11  ;;  %v17314_v29 = vld [vmem:[%s19278_s16 + $0x2b4] ss:$20 sps:$4 sm:$0xff]  }
 0x68b   : > { %v5179_v44 = vadd.f32 %v5178_v51, %v5138_v34  ;;  %v5189_v15 = vsel %vm1987_vm1, %v20554_v57, 0.0  ;;  %v5203_v45 = vmul.f32 %v20554_v57, %v20554_v57 }
 0x68c   : > { %v16651_v60 = vpop.f32.mrf.mxu1  ;;  %v5190_v28 = vadd.f32 %v5189_v15, %v5188_v19  ;;  %v5212_v31 = vadd.f32 %v5205_v7, %v5204_v42  ;;  %v22772_v7 = vld [vmem:[#allocation71_spill] sm:$0xff] }
 0x68d   : > { %v20570_v62 = vadd.f32 %v17605_v8, %v5179_v44  ;;  %v5208_v52 = vsel %vm1987_vm1, %v5203_v45, 0.0  ;;  %5903 = vmatpush2.bf16.msra.mxu1 %v17282_v5  ;;  %5942 = vmatpush1.bf16.msra.mxu0 %v17303_v14  ;;  %v5242_v42 = vrot.slane %v20536_v20, %v22772_v7 }
 0x68e   : > { %5191 = vadd.xlane.f32.xlu0 %v5190_v28  ;;  %v5209_v2 = vadd.f32 %v5208_v52, %v5207_v0  ;;  %5904 = vmatprep.subr.bf16.mxu1 %v17287_v30 }
 0x68f   : > { %v5194_v22 = vsel %vm1987_vm1, %v20570_v62, 0.0  ;;  %v5206_v24 = vmul.f32 %v20570_v62, %v20570_v62  ;;  %5970 = vmatprep.subr.bf16.mxu0 %v17311_v48  ;;  %v17312_v48 = vld [vmem:[%s19278_s16 + $0x2b0] ss:$20 sps:$4 sm:$0xff]  }
 0x690   : > { %v5195_v27 = vadd.f32 %v5194_v22, %v5193_v16  ;;  %v5246_v22 = vrot.slane %v20541_v25, %v22772_v7 }
 0x691   : > { %v5213_v26 = vsel %vm1987_vm1, %v5206_v24, 0.0  ;;  %5905 = vmatpush2.bf16.msra.mxu1 %v17285_v32 }
 0x692   : > { %5196 = vadd.xlane.f32.xlu1 %v5195_v27  ;;  %5210 = vadd.xlane.f32.xlu0 %v5209_v2  ;;  %v5214_v49 = vadd.f32 %v5213_v26, %v5212_v31  ;;  %v5250_v27 = vrot.slane %v20546_v37, %v22772_v7  ;;  %v17350_v7 = vld [vmem:[%s19278_s16 + $0x60] ss:$20 sps:$4 sm:$0xff]  }
 0x693   : > { %5906 = vmatprep.subr.bf16.mxu1 %v17290_v4  ;;  %v17309_v4 = vld [vmem:[%s19278_s16 + $0x120] ss:$20 sps:$4 sm:$0xff]  }
 0x695   : > { %5907 = vmatpush2.bf16.msra.mxu1 %v17288_v1 }
 0x696   : > { %5215 = vadd.xlane.f32.xlu1 %v5214_v49  ;;  %5908 = vmatprep.subr.bf16.mxu1 %v17293_v41 }
 0x699   : > { %5909 = vmatpush2.bf16.msra.mxu1 %v17291_v36  ;;  %v17317_v36 = vld [vmem:[%s19278_s16 + $0xfc] ss:$20 sps:$4 sm:$0xff]  }
 0x69a   : > { %5910 = vmatprep.subr.bf16.mxu1 %v17296_v3  ;;  %v17320_v3 = vld [vmem:[%s19278_s16 + $0x28c] ss:$20 sps:$4 sm:$0xff]  }
 0x69d   : > { %5911 = vmatpush2.bf16.msra.mxu1 %v17294_v12  ;;  %v17315_v12 = vld [vmem:[%s19278_s16 + $0xf8] ss:$20 sps:$4 sm:$0xff]  }
 0x69e   : > { %5912 = vmatprep.subr.bf16.mxu1 %v17302_v46  ;;  %v17318_v46 = vld [vmem:[%s19278_s16 + $0x288] ss:$20 sps:$4 sm:$0xff]  }
 0x6a1   : > { %5913 = vmatpush2.bf16.msra.mxu1 %v17300_v13  ;;  %v17323_v13 = vld [vmem:[%s19278_s16 + $0xd4] ss:$20 sps:$4 sm:$0xff]  }
 0x6a2   : > { %5914 = vmatprep.subr.bf16.mxu1 %v17308_v63  ;;  %v17324_v63 = vld [vmem:[%s19278_s16 + $0x268] ss:$20 sps:$4 sm:$0xff]  }
 0x6a5   : > { %5915 = vmatpush2.bf16.msra.mxu1 %v17306_v47  ;;  %v17321_v47 = vld [vmem:[%s19278_s16 + $0xd0] ss:$20 sps:$4 sm:$0xff]  }
 0x6a6   : > { %6025 = vmatprep.subr.bf16.mxu1 %v17314_v29  ;;  %v17325_v29 = vld [vmem:[%s19278_s16 + $0x128] ss:$20 sps:$4 sm:$0xff]  }
 0x717   : > { %v5192_v9 = vpop.xlane.xlu0 %5191 }
 0x718   : > { %v5199_v40 = vmul.f32 0.0034722222, %v5192_v9  ;;  %v17328_v9 = vld [vmem:[%s19278_s16 + $0xac] ss:$20 sps:$4 sm:$0xff]  }
 0x71a   : > { %v5219_v51 = vmul.f32 %v5199_v40, %v5199_v40  ;;  %v5228_v54 = vsub.f32 %v20550_v55, %v5199_v40  ;;  %v5229_v8 = vsub.f32 %v20554_v57, %v5199_v40  ;;  %v5227_v16 = vsub.f32 %v20552_v39, %v5199_v40  ;;  %v22773_v39 = vld [vmem:[#allocation72_spill] sm:$0xff]  ;;  %v17329_v40 = vld [vmem:[%s19278_s16 + $0x240] ss:$20 sps:$4 sm:$0xff]  }
 0x71b   : > { %v5197_v17 = vpop.xlane.xlu1 %5196  ;;  %v5211_v34 = vpop.xlane.xlu0 %5210  ;;  %v5264_v49 = vrot.slane %v20541_v25, %v22773_v39  ;;  %v5268_v23 = vrot.slane %v20546_v37, %v22773_v39 }
 0x71c   : > { %v5200_v6 = vmul.f32 0.0034722222, %v5197_v17  ;;  %v5217_v19 = vmul.f32 0.0034722222, %v5211_v34  ;;  %v17326_v17 = vld [vmem:[%s19278_s16 + $0xa8] ss:$20 sps:$4 sm:$0xff]  }
 0x71d   : > { %v17330_v34 = vld [vmem:[%s19278_s16 + $0x100] ss:$20 sps:$4 sm:$0xff]  }
 0x71e   : > { %v5221_v21 = vsub.f32 %v5217_v19, %v5219_v51  ;;  %v5220_v45 = vmul.f32 %v5200_v6, %v5200_v6  ;;  %v5231_v26 = vsub.f32 %v20556_v18, %v5200_v6  ;;  %v5232_v55 = vsub.f32 %v20570_v62, %v5200_v6  ;;  %v17334_v51 = vld [vmem:[%s19278_s16 + $0x218] ss:$20 sps:$4 sm:$0xff]   ;;  %v17331_v19 = vld [vmem:[%s19278_s16 + $0x80] ss:$20 sps:$4 sm:$0xff]  }
 0x71f   : > { %v5216_v44 = vpop.xlane.xlu1 %5215  ;;  %v5230_v31 = vsub.f32 %v20566_v58, %v5200_v6  ;;  %v5260_v18 = vrot.slane %v20536_v20, %v22773_v39  ;;  %v17333_v6 = vld [vmem:[%s19278_s16 + $0x84] ss:$20 sps:$4 sm:$0xff]  }
 0x720   : > { %v5223_v15 = vadd.f32 1e-05, %v5221_v21  ;;  %v5218_v43 = vmul.f32 0.0034722222, %v5216_v44  ;;  %v17335_v21 = vld [vmem:[%s19278_s16 + $0xd8] ss:$20 sps:$4 sm:$0xff]  }
 0x721   : > { %v17338_v44 = vld [vmem:[%s19278_s16 + $0x5c] ss:$20 sps:$4 sm:$0xff]  }
 0x722   : > { %17589 = vrsqrt.f32 %v5223_v15  ;;  %v5222_v60 = vsub.f32 %v5218_v43, %v5220_v45  ;;  %v17339_v15 = vld [vmem:[%s19278_s16 + $0x1f0] ss:$20 sps:$4 sm:$0xff]   ;;  %v17336_v45 = vld [vmem:[%s19278_s16 + $0x58] ss:$20 sps:$4 sm:$0xff]  }
 0x723   : > { %v17340_v43 = vld [vmem:[%s19278_s16 + $0xb0] ss:$20 sps:$4 sm:$0xff]  }
 0x724   : > { %v5224_v28 = vadd.f32 1e-05, %v5222_v60  ;;  %v17343_v60 = vld [vmem:[%s19278_s16 + $0x34] ss:$20 sps:$4 sm:$0xff]   ;;  %v17361_v39 = vld [vmem:[%s19278_s16 + $0x210] ss:$20 sps:$4 sm:$0xff]  }
 0x726   : > { %17591 = vrsqrt.f32 %v5224_v28  ;;  %v17344_v28 = vld [vmem:[%s19278_s16 + $0x1c8] ss:$20 sps:$4 sm:$0xff]  }
 0x72f   : > { %v17590_v52 = vpop.eup %17589 }
 0x730   : > { %v5234_v0 = vmul.f32 %v17590_v52, %v5228_v54  ;;  %v5235_v24 = vmul.f32 %v17590_v52, %v5229_v8  ;;  %v5233_v2 = vmul.f32 %v17590_v52, %v5227_v16  ;;  %v17341_v54 = vld [vmem:[%s19278_s16 + $0x30] ss:$20 sps:$4 sm:$0xff]   ;;  %v17345_v8 = vld [vmem:[%s19278_s16 + $0x88] ss:$20 sps:$4 sm:$0xff]   ;;  %v17348_v52 = vld [vmem:[%s19278_s16 + $0xc] ss:$20 sps:$4 sm:$0xff]  }
 0x731   : > { %v17349_v16 = vld [vmem:[%s19278_s16 + $0x1a0] ss:$20 sps:$4 sm:$0xff]  }
 0x732   : > { %v5252_v38 = vmul.f32 %v5246_v22, %v5234_v0  ;;  %v5253_v5 = vmul.f32 %v5250_v27, %v5235_v24  ;;  %v5251_v30 = vmul.f32 %v5242_v42, %v5233_v2  ;;  %v17346_v0 = vld [vmem:[%s19278_s16 + $0x8] ss:$20 sps:$4 sm:$0xff]   ;;  %v17354_v24 = vld [vmem:[%s19278_s16 + $0x178] ss:$20 sps:$4 sm:$0xff]  }
 0x733   : > { %v17592_v57 = vpop.eup %17591  ;;  %v17355_v2 = vld [vmem:[%s19278_s16 + $0x38] ss:$20 sps:$4 sm:$0xff]  }
 0x734   : > { %v5237_v56 = vmul.f32 %v17592_v57, %v5231_v26  ;;  %v5238_v50 = vmul.f32 %v17592_v57, %v5232_v55  ;;  %v5236_v10 = vmul.f32 %v17592_v57, %v5230_v31  ;;  %v20626_v25 = vadd.f32 %v5264_v49, %v5252_v38  ;;  %v17359_v26 = vld [vmem:[%s19278_s16 + $0x150] ss:$20 sps:$4 sm:$0xff]   ;;  %v17356_v55 = vld [vmem:[%s19278_s16 + $0x238] ss:$20 sps:$4 sm:$0xff]   ;;  %v17363_v31 = vld [vmem:[%s19278_s16 + $0x214] ss:$20 sps:$4 sm:$0xff]  }
 0x735   : > { %v20630_v37 = vadd.f32 %v5268_v23, %v5253_v5  ;;  %v20635_v11 = vadd.f32 %v5260_v18, %v5251_v30  ;;  %v17360_v57 = vld [vmem:[%s19278_s16 + $0x10] ss:$20 sps:$4 sm:$0xff]   ;;  %v17367_v38 = vld [vmem:[%s19278_s16 + $0x1c0] ss:$20 sps:$4 sm:$0xff]   ;;  %v17370_v5 = vld [vmem:[%s19278_s16 + $0x198] ss:$20 sps:$4 sm:$0xff]  }
 0x736   : > { %v5255_v58 = vmul.f32 %v5246_v22, %v5237_v56  ;;  %v5256_v62 = vmul.f32 %v5250_v27, %v5238_v50  ;;  %v5254_v32 = vmul.f32 %v5242_v42, %v5236_v10  ;;  %v17353_v22 = vld [vmem:[%s19278_s16 + $0x264] ss:$20 sps:$4 sm:$0xff]   ;;  %v17351_v27 = vld [vmem:[%s19278_s16 + $0x260] ss:$20 sps:$4 sm:$0xff]   ;;  %v17358_v42 = vld [vmem:[%s19278_s16 + $0x23c] ss:$20 sps:$4 sm:$0xff]  }
 0x737   : > { %v17369_v56 = vld [vmem:[%s19278_s16 + $0x1c4] ss:$20 sps:$4 sm:$0xff]   ;;  %v17372_v50 = vld [vmem:[%s19278_s16 + $0x19c] ss:$20 sps:$4 sm:$0xff]   ;;  %v17375_v10 = vld [vmem:[%s19278_s16 + $0x174] ss:$20 sps:$4 sm:$0xff]  }
 0x738   : > { %v20628_v35 = vadd.f32 %v5264_v49, %v5255_v58  ;;  %v20632_v33 = vadd.f32 %v5268_v23, %v5256_v62  ;;  %v20637_v14 = vadd.f32 %v5260_v18, %v5254_v32  ;;  %v17366_v49 = vld [vmem:[%s19278_s16 + $0x1ec] ss:$20 sps:$4 sm:$0xff]   ;;  %v17364_v23 = vld [vmem:[%s19278_s16 + $0x1e8] ss:$20 sps:$4 sm:$0xff]   ;;  %v17373_v30 = vld [vmem:[%s19278_s16 + $0x170] ss:$20 sps:$4 sm:$0xff]  }
 0x739   : > { %v17378_v18 = vld [vmem:[%s19278_s16 + $0x14c] ss:$20 sps:$4 sm:$0xff]   ;;  %v17376_v58 = vld [vmem:[%s19278_s16 + $0x148] ss:$20 sps:$4 sm:$0xff]   ;;  %v17380_v32 = vld [vmem:[%s19278_s16 + $0x290] ss:$20 sps:$4 sm:$0xff]  }
 0x73a   : > { %v5385_v20 = vpack.c.bf16 %v20628_v35, %v20626_v25  ;;  %v20643_v1 = vpack.c.bf16 %v20632_v33, %v20630_v37  ;;  %v20648_v41 = vpack.c.bf16 %v20637_v14, %v20635_v11  ;;  %v17379_v62 = vld [vmem:[%s19278_s16 + $0x2b8] ss:$20 sps:$4 sm:$0xff]  }
 0x73c   : > { %5916 = vmatprep.mubr.bf16.mxu1 %v5385_v20  ;;  %15391 = vmatmul.mubr.msk.bf16.vlgmr.msra.gmra.mxu0 %vm1987_vm1, %v20643_v1 }
 0x73d   : > { %5971 = vmatpush1.bf16.msra.mxu0 %v17309_v4  ;;  %5917 = vmatmul.mubr.bf16.vlgmr.msra.gmra.mxu1 %v20648_v41  ;;  %v17383_v4 = vld [vmem:[%s19281_s11 + $0xac] ss:$12 sps:$4 sm:$0xff]  }
 0x73e   : > { %6002 = vmatprep.mubr.bf16.mxu0 %v5385_v20  ;;  %6026 = vmatpush1.bf16.msra.mxu1 %v17312_v48  ;;  %v17386_v48 = vld [vmem:[%s19281_s11 + $0x94] ss:$12 sps:$4 sm:$0xff]  }
 0x73f   : > { %5972 = vmatprep.subr.bf16.mxu0 %v17317_v36  ;;  %6027 = vmatprep.subr.bf16.mxu1 %v17320_v3  ;;  %v17389_v36 = vld [vmem:[%s19281_s11 + $0x7c] ss:$12 sps:$4 sm:$0xff]   ;;  %v17387_v3 = vld [vmem:[%s19281_s11 + $0x78] ss:$12 sps:$4 sm:$0xff]  }
 0x740   : > { %6045 = vmatprep.mubr.bf16.mxu1 %v22682_v61 }
 0x741   : > { %5973 = vmatpush1.bf16.msra.mxu0 %v17315_v12  ;;  %v17392_v12 = vld [vmem:[%s19281_s11 + $0x64] ss:$12 sps:$4 sm:$0xff]  }
 0x742   : > { %6028 = vmatpush1.bf16.msra.mxu1 %v17318_v46  ;;  %5974 = vmatprep.subr.bf16.mxu0 %v17323_v13  ;;  %v17429_v46 = vld [vmem:[%s19281_s11 + $0x228] ss:$12 sps:$4 sm:$0xff]   ;;  %v17431_v13 = vld [vmem:[%s19281_s11 + $0x22c] ss:$12 sps:$4 sm:$0xff]  }
 0x743   : > { %16238 = vmatprep.subr.bf16.mxu1 %v17324_v63  ;;  %v17432_v63 = vld [vmem:[%s19281_s11 + $0x210] ss:$12 sps:$4 sm:$0xff]  }
 0x745   : > { %5975 = vmatpush1.bf16.msra.mxu0 %v17321_v47  ;;  %15392 = vmatmul.mubr.msk.bf16.vlgmr.msra.gmra.mxu1 %vm1987_vm1, %v20643_v1  ;;  %v17434_v47 = vld [vmem:[%s19281_s11 + $0x214] ss:$12 sps:$4 sm:$0xff]  }
 0x746   : > { %16239 = vmatpush3.bf16.msra.mxu1 %v17325_v29  ;;  %6088 = vmatprep.mubr.bf16.mxu1 %v5385_v20  ;;  %v17381_v20 = vld [vmem:[%s19281_s11 + $0xa8] ss:$12 sps:$4 sm:$0xff]   ;;  %v17395_v29 = vld [vmem:[%s19281_s11 + $0x4c] ss:$12 sps:$4 sm:$0xff]  }
 0x747   : > { %5976 = vmatprep.subr.bf16.mxu0 %v17328_v9  ;;  %16240 = vmatprep.subr.bf16.mxu1 %v17329_v40  ;;  %v17437_v9 = vld [vmem:[%s19281_s11 + $0x1fc] ss:$12 sps:$4 sm:$0xff]  }
 0x748   : > { %v17393_v40 = vld [vmem:[%s19281_s11 + $0x48] ss:$12 sps:$4 sm:$0xff]  }
 0x749   : > { %5977 = vmatpush1.bf16.msra.mxu0 %v17326_v17  ;;  %v17435_v17 = vld [vmem:[%s19281_s11 + $0x1f8] ss:$12 sps:$4 sm:$0xff]  }
 0x74a   : > { %16241 = vmatpush3.bf16.msra.mxu1 %v17330_v34  ;;  %5978 = vmatprep.subr.bf16.mxu0 %v17333_v6  ;;  %v17398_v34 = vld [vmem:[%s19281_s11 + $0x34] ss:$12 sps:$4 sm:$0xff]   ;;  %v17440_v6 = vld [vmem:[%s19281_s11 + $0x1e4] ss:$12 sps:$4 sm:$0xff]  }
 0x74b   : > { %16242 = vmatprep.subr.bf16.mxu1 %v17334_v51  ;;  %v17396_v51 = vld [vmem:[%s19281_s11 + $0x30] ss:$12 sps:$4 sm:$0xff]  }
 0x74d   : > { %5979 = vmatpush1.bf16.msra.mxu0 %v17331_v19  ;;  %v17438_v19 = vld [vmem:[%s19281_s11 + $0x1e0] ss:$12 sps:$4 sm:$0xff]  }
 0x74e   : > { %16243 = vmatpush3.bf16.msra.mxu1 %v17335_v21  ;;  %5980 = vmatprep.subr.bf16.mxu0 %v17338_v44  ;;  %v17401_v21 = vld [vmem:[%s19281_s11 + $0x1c] ss:$12 sps:$4 sm:$0xff]   ;;  %v17443_v44 = vld [vmem:[%s19281_s11 + $0x1cc] ss:$12 sps:$4 sm:$0xff]  }
 0x74f   : > { %16244 = vmatprep.subr.bf16.mxu1 %v17339_v15  ;;  %v17399_v15 = vld [vmem:[%s19281_s11 + $0x18] ss:$12 sps:$4 sm:$0xff]  }
 0x751   : > { %5981 = vmatpush1.bf16.msra.mxu0 %v17336_v45  ;;  %v17441_v45 = vld [vmem:[%s19281_s11 + $0x1c8] ss:$12 sps:$4 sm:$0xff]  }
 0x752   : > { %16245 = vmatpush3.bf16.msra.mxu1 %v17340_v43  ;;  %5982 = vmatprep.subr.bf16.mxu0 %v17343_v60  ;;  %v17404_v43 = vld [vmem:[%s19281_s11 + $0x4] ss:$12 sps:$4 sm:$0xff]   ;;  %v17446_v60 = vld [vmem:[%s19281_s11 + $0x1b4] ss:$12 sps:$4 sm:$0xff]  }
 0x753   : > { %16246 = vmatprep.subr.bf16.mxu1 %v17344_v28  ;;  %v17402_v28 = vld [vmem:[%s19281_s11] ss:$12 sps:$4 sm:$0xff]  }
 0x755   : > { %5983 = vmatpush1.bf16.msra.mxu0 %v17341_v54  ;;  %v17444_v54 = vld [vmem:[%s19281_s11 + $0x1b0] ss:$12 sps:$4 sm:$0xff]  }
 0x756   : > { %16247 = vmatpush3.bf16.msra.mxu1 %v17345_v8  ;;  %5984 = vmatprep.subr.bf16.mxu0 %v17348_v52  ;;  %v17407_v8 = vld [vmem:[%s19281_s11 + $0x16c] ss:$12 sps:$4 sm:$0xff]   ;;  %v17449_v52 = vld [vmem:[%s19281_s11 + $0x19c] ss:$12 sps:$4 sm:$0xff]  }
 0x757   : > { %16248 = vmatprep.subr.bf16.mxu1 %v17349_v16  ;;  %v17405_v16 = vld [vmem:[%s19281_s11 + $0x168] ss:$12 sps:$4 sm:$0xff]  }
 0x759   : > { %5985 = vmatpush1.bf16.msra.mxu0 %v17346_v0  ;;  %v17447_v0 = vld [vmem:[%s19281_s11 + $0x198] ss:$12 sps:$4 sm:$0xff]  }
 0x75a   : > { %16249 = vmatpush3.bf16.msra.mxu1 %v17350_v7  ;;  %5986 = vmatprep.subr.bf16.mxu0 %v17353_v22  ;;  %v17410_v7 = vld [vmem:[%s19281_s11 + $0x154] ss:$12 sps:$4 sm:$0xff]   ;;  %v17408_v22 = vld [vmem:[%s19281_s11 + $0x150] ss:$12 sps:$4 sm:$0xff]  }
 0x75b   : > { %16250 = vmatprep.subr.bf16.mxu1 %v17354_v24  ;;  %v17413_v24 = vld [vmem:[%s19281_s11 + $0x13c] ss:$12 sps:$4 sm:$0xff]  }
 0x75d   : > { %5987 = vmatpush2.bf16.msra.mxu0 %v17351_v27  ;;  %v17450_v27 = vld [vmem:[%s19281_s11 + $0x180] ss:$12 sps:$4 sm:$0xff]  }
 0x75e   : > { %16251 = vmatpush3.bf16.msra.mxu1 %v17355_v2  ;;  %5988 = vmatprep.subr.bf16.mxu0 %v17358_v42  ;;  %v17452_v2 = vld [vmem:[%s19281_s11 + $0x184] ss:$12 sps:$4 sm:$0xff]  }
 0x75f   : > { %16252 = vmatprep.subr.bf16.mxu1 %v17359_v26  ;;  %v17411_v42 = vld [vmem:[%s19281_s11 + $0x138] ss:$12 sps:$4 sm:$0xff]  }
 0x760   : > { %v17416_v26 = vld [vmem:[%s19281_s11 + $0x124] ss:$12 sps:$4 sm:$0xff]  }
 0x761   : > { %5989 = vmatpush2.bf16.msra.mxu0 %v17356_v55  ;;  %v17453_v55 = vld [vmem:[%s19281_s11 + $0x2e8] ss:$12 sps:$4 sm:$0xff]  }
 0x762   : > { %16253 = vmatpush3.bf16.msra.mxu1 %v17360_v57  ;;  %5990 = vmatprep.subr.bf16.mxu0 %v17363_v31  ;;  %v17455_v57 = vld [vmem:[%s19281_s11 + $0x2ec] ss:$12 sps:$4 sm:$0xff]  }
 0x763   : > { %6932 = vmatprep.subr.bf16.mxu1 %v17431_v13  ;;  %v17414_v31 = vld [vmem:[%s19281_s11 + $0x120] ss:$12 sps:$4 sm:$0xff]   ;;  %v17485_v13 = vld [vmem:[%s19281_s11 + $0x244] ss:$12 sps:$4 sm:$0xff]  }
 0x765   : > { %5991 = vmatpush2.bf16.msra.mxu0 %v17361_v39  ;;  %6089 = vmatmul.mubr.bf16.vlgmr.msra.gmra.mxu1 %v20648_v41  ;;  %v17458_v39 = vld [vmem:[%s19281_s11 + $0x2d4] ss:$12 sps:$4 sm:$0xff]  }
 0x766   : > { %5992 = vmatprep.subr.bf16.mxu0 %v17366_v49  ;;  %6933 = vmatpush1.bf16.msra.mxu1 %v17429_v46  ;;  %v17419_v49 = vld [vmem:[%s19281_s11 + $0x10c] ss:$12 sps:$4 sm:$0xff]   ;;  %v17479_v46 = vld [vmem:[%s19281_s11 + $0x25c] ss:$12 sps:$4 sm:$0xff]  }
 0x767   : > { %6934 = vmatprep.subr.bf16.mxu1 %v17434_v47  ;;  %v5383_v47 = vld [vmem:[%s19275_s8] sm:$0x1f] }
 0x769   : > { %5993 = vmatpush2.bf16.msra.mxu0 %v17364_v23  ;;  %v17456_v23 = vld [vmem:[%s19281_s11 + $0x2d0] ss:$12 sps:$4 sm:$0xff]  }
 0x76a   : > { %5994 = vmatprep.subr.bf16.mxu0 %v17369_v56  ;;  %6935 = vmatpush1.bf16.msra.mxu1 %v17432_v63  ;;  %v17461_v56 = vld [vmem:[%s19281_s11 + $0x2bc] ss:$12 sps:$4 sm:$0xff]  }
 0x76b   : > { %6936 = vmatprep.subr.bf16.mxu1 %v17437_v9  ;;  %v17489_v63 = vld [vmem:[%s19281_s11 + $0x170] ss:$12 sps:$4 sm:$0xff]  }
 0x76c   : > { %v22774_v9 = vld [vmem:[#allocation66_spill] sm:$0xff] }
 0x76d   : > { %5995 = vmatpush2.bf16.msra.mxu0 %v17367_v38  ;;  %v17417_v38 = vld [vmem:[%s19281_s11 + $0x108] ss:$12 sps:$4 sm:$0xff]  }
 0x76e   : > { %5996 = vmatprep.subr.bf16.mxu0 %v17372_v50  ;;  %6937 = vmatpush1.bf16.msra.mxu1 %v17435_v17  ;;  %v17422_v50 = vld [vmem:[%s19281_s11 + $0xf4] ss:$12 sps:$4 sm:$0xff]  }
 0x76f   : > { %6938 = vmatprep.subr.bf16.mxu1 %v17440_v6  ;;  %v22775_v17 = vld [vmem:[#allocation65_spill] sm:$0xff] }
 0x771   : > { %5997 = vmatpush2.bf16.msra.mxu0 %v17370_v5  ;;  %v17459_v5 = vld [vmem:[%s19281_s11 + $0x2b8] ss:$12 sps:$4 sm:$0xff]  }
 0x772   : > { %5998 = vmatprep.subr.bf16.mxu0 %v17375_v10  ;;  %6939 = vmatpush1.bf16.msra.mxu1 %v17438_v19  ;;  %v17464_v10 = vld [vmem:[%s19281_s11 + $0x2a4] ss:$12 sps:$4 sm:$0xff]  }
 0x773   : > { %6940 = vmatprep.subr.bf16.mxu1 %v17443_v44 }
 0x775   : > { %5999 = vmatpush2.bf16.msra.mxu0 %v17373_v30  ;;  %v17420_v30 = vld [vmem:[%s19281_s11 + $0xf0] ss:$12 sps:$4 sm:$0xff]  }
 0x776   : > { %6000 = vmatprep.subr.bf16.mxu0 %v17378_v18  ;;  %6941 = vmatpush1.bf16.msra.mxu1 %v17441_v45  ;;  %v17425_v18 = vld [vmem:[%s19281_s11 + $0xdc] ss:$12 sps:$4 sm:$0xff]  }
 0x777   : > { %6942 = vmatprep.subr.bf16.mxu1 %v17446_v60 }
 0x779   : > { %6001 = vmatpush2.bf16.msra.mxu0 %v17376_v58  ;;  %v17462_v58 = vld [vmem:[%s19281_s11 + $0x2a0] ss:$12 sps:$4 sm:$0xff]  }
 0x77a   : > { %16652 = vmatprep.subr.bf16.mxu0 %v22669_v53  ;;  %6943 = vmatpush1.bf16.msra.mxu1 %v17444_v54 }
 0x77b   : > { %6944 = vmatprep.subr.bf16.mxu1 %v17449_v52 }
 0x77c   : > { %6003 = vmatmul.mubr.bf16.vlgmr.msra.gmra.mxu0 %v20648_v41  ;;  %v17384_v41 = vld [vmem:[%s19281_s11 + $0x90] ss:$12 sps:$4 sm:$0xff]  }
 0x77d   : > { %16653 = vmatpush3.bf16.msra.mxu0 %v17379_v62  ;;  %16656 = vmatprep.mubr.msk.bf16.mxu0 %vm18733_vm2, %v22669_v53  ;;  %v17467_v62 = vld [vmem:[%s19281_s11 + $0x28c] ss:$12 sps:$4 sm:$0xff]  }
 0x77e   : > { %16654 = vmatprep.subr.bf16.mxu0 %v22669_v53  ;;  %6945 = vmatpush1.bf16.msra.mxu1 %v17447_v0 }
 0x77f   : > { %6946 = vmatprep.subr.bf16.mxu1 %v17452_v2 }
 0x781   : > { %16655 = vmatpush3.bf16.msra.mxu0 %v17380_v32  ;;  %v17423_v32 = vld [vmem:[%s19281_s11 + $0xd8] ss:$12 sps:$4 sm:$0xff]  }
 0x782   : > { %6889 = vmatprep.subr.bf16.mxu0 %v17383_v4  ;;  %6947 = vmatpush1.bf16.msra.mxu1 %v17450_v27  ;;  %v17428_v4 = vld [vmem:[%s19281_s11 + $0xc4] ss:$12 sps:$4 sm:$0xff]  }
 0x783   : > { %6948 = vmatprep.subr.bf16.mxu1 %v17455_v57  ;;  %v17474_v57 = vld [vmem:[%s19281_s11 + $0x330] ss:$12 sps:$4 sm:$0xff]  }
 0x784   : > { %16657 = vmatmul.mubr.msk.bf16.vlgmr.msra.gmra.mxu0 %vm1987_vm1, %v20643_v1  ;;  %v17390_v1 = vld [vmem:[%s19281_s11 + $0x60] ss:$12 sps:$4 sm:$0xff]  }
 0x785   : > { %6890 = vmatpush1.bf16.msra.mxu0 %v17381_v20  ;;  %v17465_v20 = vld [vmem:[%s19281_s11 + $0x288] ss:$12 sps:$4 sm:$0xff]  }
 0x786   : > { %6891 = vmatprep.subr.bf16.mxu0 %v17386_v48  ;;  %6949 = vmatpush2.bf16.msra.mxu1 %v17453_v55  ;;  %v17426_v48 = vld [vmem:[%s19281_s11 + $0xc0] ss:$12 sps:$4 sm:$0xff]  }
 0x787   : > { %6950 = vmatprep.subr.bf16.mxu1 %v17458_v39  ;;  %v17476_v55 = vld [vmem:[%s19281_s11 + $0x334] ss:$12 sps:$4 sm:$0xff]   ;;  %v17480_v39 = vld [vmem:[%s19281_s11 + $0x318] ss:$12 sps:$4 sm:$0xff]  }
 0x789   : > { %6892 = vmatpush1.bf16.msra.mxu0 %v17384_v41  ;;  %v17470_v41 = vld [vmem:[%s19281_s11 + $0x34c] ss:$12 sps:$4 sm:$0xff]  }
 0x78a   : > { %6893 = vmatprep.subr.bf16.mxu0 %v17389_v36  ;;  %6951 = vmatpush2.bf16.msra.mxu1 %v17456_v23  ;;  %v17471_v36 = vld [vmem:[%s19281_s11 + $0x270] ss:$12 sps:$4 sm:$0xff]   ;;  %v17486_v23 = vld [vmem:[%s19281_s11 + $0x300] ss:$12 sps:$4 sm:$0xff]  }
 0x78b   : > { %6952 = vmatprep.subr.bf16.mxu1 %v17461_v56  ;;  %v17491_v56 = vld [vmem:[%s19281_s11 + $0x2f0] ss:$12 sps:$4 sm:$0xff]  }
 0x78d   : > { %6894 = vmatpush1.bf16.msra.mxu0 %v17387_v3  ;;  %v17473_v3 = vld [vmem:[%s19281_s11 + $0x274] ss:$12 sps:$4 sm:$0xff]  }
 0x78e   : > { %6895 = vmatprep.subr.bf16.mxu0 %v17392_v12  ;;  %6953 = vmatpush2.bf16.msra.mxu1 %v17459_v5  ;;  %v17477_v12 = vld [vmem:[%s19281_s11 + $0x258] ss:$12 sps:$4 sm:$0xff]  }
 0x78f   : > { %6954 = vmatprep.subr.bf16.mxu1 %v17464_v10 }
 0x791   : > { %6896 = vmatpush1.bf16.msra.mxu0 %v17390_v1  ;;  %v17483_v1 = vld [vmem:[%s19281_s11 + $0x240] ss:$12 sps:$4 sm:$0xff]  }
 0x792   : > { %6897 = vmatprep.subr.bf16.mxu0 %v17395_v29  ;;  %6955 = vmatpush2.bf16.msra.mxu1 %v17462_v58 }
 0x793   : > { %6956 = vmatprep.subr.bf16.mxu1 %v17467_v62  ;;  %v22776_v62 = vld [vmem:[#allocation67_spill] sm:$0xff] }
 0x795   : > { %6898 = vmatpush1.bf16.msra.mxu0 %v17393_v40  ;;  %v5395_v40 = vrot.slane %v5383_v47, %v22774_v9 }
 0x796   : > { %6899 = vmatprep.subr.bf16.mxu0 %v17398_v34  ;;  %6957 = vmatpush2.bf16.msra.mxu1 %v17465_v20  ;;  %v5391_v34 = vrot.slane %v5383_v47, %v22775_v17 }
 0x797   : > { %6958 = vmatprep.subr.bf16.mxu1 %v17473_v3 }
 0x799   : > { %6900 = vmatpush1.bf16.msra.mxu0 %v17396_v51 }
 0x79a   : > { %6901 = vmatprep.subr.bf16.mxu0 %v17401_v21  ;;  %6959 = vmatpush2.bf16.msra.mxu1 %v17471_v36 }
 0x79b   : > { %6960 = vmatprep.subr.bf16.mxu1 %v17479_v46 }
 0x79d   : > { %6902 = vmatpush1.bf16.msra.mxu0 %v17399_v15 }
 0x79e   : > { %6903 = vmatprep.subr.bf16.mxu0 %v17404_v43  ;;  %6961 = vmatpush2.bf16.msra.mxu1 %v17477_v12 }
 0x79f   : > { %6962 = vmatprep.subr.bf16.mxu1 %v17485_v13  ;;  %v22777_v13 = vld [vmem:[#allocation70_spill] sm:$0xff] }
 0x7a1   : > { %6904 = vmatpush1.bf16.msra.mxu0 %v17402_v28 }
 0x7a2   : > { %6905 = vmatprep.subr.bf16.mxu0 %v17407_v8  ;;  %6963 = vmatpush2.bf16.msra.mxu1 %v17483_v1  ;;  %v5407_v1 = vrot.slane %v5383_v47, %v22777_v13 }
 0x7a3   : > { %16263 = vmatprep.subr.bf16.mxu1 %v17489_v63 }
 0x7a5   : > { %6906 = vmatpush2.bf16.msra.mxu0 %v17405_v16 }
 0x7a6   : > { %6907 = vmatprep.subr.bf16.mxu0 %v17410_v7 }
 0x7a9   : > { %6908 = vmatpush2.bf16.msra.mxu0 %v17408_v22 }
 0x7aa   : > { %6909 = vmatprep.subr.bf16.mxu0 %v17413_v24 }
 0x7ad   : > { %6910 = vmatpush2.bf16.msra.mxu0 %v17411_v42  ;;  %v17468_v42 = vld [vmem:[%s19281_s11 + $0x348] ss:$12 sps:$4 sm:$0xff]  }
 0x7ae   : > { %6911 = vmatprep.subr.bf16.mxu0 %v17416_v26 }
 0x7b1   : > { %6912 = vmatpush2.bf16.msra.mxu0 %v17414_v31  ;;  %v17482_v31 = vld [vmem:[%s19281_s11 + $0x31c] ss:$12 sps:$4 sm:$0xff]  }
 0x7b2   : > { %6913 = vmatprep.subr.bf16.mxu0 %v17419_v49  ;;  %v17488_v49 = vld [vmem:[%s19281_s11 + $0x304] ss:$12 sps:$4 sm:$0xff]  }
 0x7b5   : > { %6914 = vmatpush2.bf16.msra.mxu0 %v17417_v38 }
 0x7b6   : > { %6915 = vmatprep.subr.bf16.mxu0 %v17422_v50 }
 0x7b9   : > { %6916 = vmatpush2.bf16.msra.mxu0 %v17420_v30 }
 0x7ba   : > { %6917 = vmatprep.subr.bf16.mxu0 %v17425_v18 }
 0x7bd   : > { %6918 = vmatpush2.bf16.msra.mxu0 %v17423_v32  ;;  %v5399_v32 = vrot.slane %v5383_v47, %v22776_v62  ;;  %v17511_v62 = vld [vmem:[%s19281_s11 + $0x278] ss:$12 sps:$4 sm:$0xff]  }
 0x7be   : > { %6919 = vmatprep.subr.bf16.mxu0 %v17428_v4 }
 0x7c1   : > { %6920 = vmatpush2.bf16.msra.mxu0 %v17426_v48 }
 0x7c2   : > { %6983 = vmatprep.subr.bf16.mxu0 %v17470_v41 }
 0x7fc   : > { %v5961_v29 = vpop.f32.mrf.mxu0 }
 0x7fd   : > { %v5918_v6 = vpop.f32.mrf.mxu1 }
 0x7fe   : > { %v5963_v51 = vpop.f32.mrf.mxu0  ;;  %v5919_v44 = vadd.f32 %v5918_v6, %v5391_v34 }
 0x7ff   : > { %v5920_v19 = vpop.f32.mrf.mxu1 }
 0x800   : > { %v5921_v21 = vadd.f32 %v5920_v19, %v5395_v40  ;;  %v5965_v15 = vpop.f32.mrf.mxu0  ;;  %v5962_v52 = vadd.f32 %v5961_v29, %v5919_v44 }
 0x801   : > { %v5922_v45 = vpop.f32.mrf.mxu1 }
 0x802   : > { %v5923_v43 = vadd.f32 %v5922_v45, %v5391_v34  ;;  %v5964_v28 = vadd.f32 %v5963_v51, %v5921_v21  ;;  %v5967_v16 = vpop.f32.mrf.mxu0  ;;  %v6138_v27 = vmax.f32 %v5962_v52, 0.0 }
 0x803   : > { %v5924_v60 = vpop.f32.mrf.mxu1 }
 0x804   : > { %v5966_v54 = vadd.f32 %v5965_v15, %v5923_v43  ;;  %v5925_v8 = vadd.f32 %v5924_v60, %v5395_v40  ;;  %v6139_v22 = vmax.f32 %v5964_v28, 0.0 }
 0x805   : > { %v6047_v38 = vpop.f32.mrf.mxu1 }
 0x806   : > { %v5968_v0 = vadd.f32 %v5967_v16, %v5925_v8  ;;  %v6143_v7 = vmax.f32 %v5966_v54, 0.0  ;;  %v17490_v8 = vld [vmem:[%s19281_s11 + $0xb0] ss:$12 sps:$4 sm:$0xff]  }
 0x807   : > { %v6049_v50 = vpop.f32.mrf.mxu1 }
 0x808   : > { %v6144_v24 = vmax.f32 %v5968_v0, 0.0  ;;  %v20786_v26 = vpack.c.bf16 %v6143_v7, %v6138_v27  ;;  %v17492_v0 = vld [vmem:[%s19281_s11 + $0x158] ss:$12 sps:$4 sm:$0xff]  }
 0x809   : > { %v6051_v5 = vpop.f32.mrf.mxu1 }
 0x80a   : > { %v20783_v2 = vpack.c.bf16 %v6144_v24, %v6139_v22  ;;  %v17493_v24 = vld [vmem:[%s19281_s11 + $0x230] ss:$12 sps:$4 sm:$0xff]  }
 0x80b   : > { %v6053_v10 = vpop.f32.mrf.mxu1 }
 0x80c   : > { %6921 = vmatprep.mubr.bf16.mxu0 %v20783_v2 }
 0x80d   : > { %6922 = vmatmul.mubr.bf16.vlgmr.msra.gmra.mxu0 %v20786_v26 }
 0x80e   : > { %6984 = vmatpush1.bf16.msra.mxu0 %v17468_v42  ;;  %7007 = vmatprep.mubr.bf16.mxu0 %v22682_v61  ;;  %v5403_v61 = vrot.slane %v5383_v47, %v22771_v59  ;;  %v17494_v42 = vld [vmem:[%s19281_s11 + $0x98] ss:$12 sps:$4 sm:$0xff]  }
 0x80f   : > { %6985 = vmatprep.subr.bf16.mxu0 %v17476_v55  ;;  %v17495_v55 = vld [vmem:[%s19281_s11 + $0x2d8] ss:$12 sps:$4 sm:$0xff]  }
 0x812   : > { %6986 = vmatpush1.bf16.msra.mxu0 %v17474_v57  ;;  %v17496_v57 = vld [vmem:[%s19281_s11 + $0x140] ss:$12 sps:$4 sm:$0xff]  }
 0x813   : > { %6987 = vmatprep.subr.bf16.mxu0 %v17482_v31  ;;  %v17497_v31 = vld [vmem:[%s19281_s11 + $0x218] ss:$12 sps:$4 sm:$0xff]  }
 0x816   : > { %6988 = vmatpush1.bf16.msra.mxu0 %v17480_v39  ;;  %v17498_v39 = vld [vmem:[%s19281_s11 + $0x80] ss:$12 sps:$4 sm:$0xff]  }
 0x817   : > { %6989 = vmatprep.subr.bf16.mxu0 %v17488_v49  ;;  %v17500_v49 = vld [vmem:[%s19281_s11 + $0x128] ss:$12 sps:$4 sm:$0xff]  }
 0x81a   : > { %6990 = vmatpush1.bf16.msra.mxu0 %v17486_v23  ;;  %v17501_v23 = vld [vmem:[%s19281_s11 + $0x200] ss:$12 sps:$4 sm:$0xff]  }
 0x81b   : > { %16285 = vmatprep.subr.bf16.mxu0 %v17491_v56  ;;  %v17502_v56 = vld [vmem:[%s19281_s11 + $0x68] ss:$12 sps:$4 sm:$0xff]  }
 0x825   : > { %v16254_v30 = vpop.f32.mrf.mxu1 }
 0x827   : > { %v16255_v18 = vpop.f32.mrf.mxu1 }
 0x828   : > { %v16256_v12 = vadd.f32 %v16255_v18, %v16254_v30  ;;  %v17507_v30 = vld [vmem:[%s19281_s11 + $0x290] ss:$12 sps:$4 sm:$0xff]   ;;  %v17508_v18 = vld [vmem:[%s19281_s11 + $0xf8] ss:$12 sps:$4 sm:$0xff]  }
 0x829   : > { %v16257_v58 = vpop.f32.mrf.mxu1 }
 0x82a   : > { %v6091_v51 = vadd.f32 %v16256_v12, %v5407_v1  ;;  %v17519_v12 = vld [vmem:[%s19281_s11 + $0x248] ss:$12 sps:$4 sm:$0xff]  }
 0x82b   : > { %v16258_v41 = vpop.f32.mrf.mxu1 }
 0x82c   : > { %v16259_v29 = vadd.f32 %v16258_v41, %v16257_v58  ;;  %v17510_v58 = vld [vmem:[%s19281_s11 + $0x38] ss:$12 sps:$4 sm:$0xff]   ;;  %v17516_v41 = vld [vmem:[%s19281_s11 + $0xc8] ss:$12 sps:$4 sm:$0xff]  }
 0x82e   : > { %v6094_v43 = vadd.f32 %v16259_v29, %v5407_v1  ;;  %v17521_v1 = vld [vmem:[%s19281_s11 + $0x350] ss:$12 sps:$4 sm:$0xff]   ;;  %v17523_v29 = vld [vmem:[%s19281_s11 + $0x320] ss:$12 sps:$4 sm:$0xff]  }
 0x83c   : > { %v6004_v4 = vpop.f32.mrf.mxu0 }
 0x83d   : > { %v6005_v36 = vadd.f32 %v6004_v4, %v5399_v32  ;;  %v17513_v4 = vld [vmem:[%s19281_s11 + $0x1b8] ss:$12 sps:$4 sm:$0xff]  }
 0x83e   : > { %v6006_v20 = vpop.f32.mrf.mxu0 }
 0x83f   : > { %v6007_v48 = vadd.f32 %v6006_v20, %v5403_v61  ;;  %v6048_v59 = vadd.f32 %v6047_v38, %v6005_v36  ;;  %v17503_v38 = vld [vmem:[%s19281_s11 + $0x2a8] ss:$12 sps:$4 sm:$0xff]   ;;  %v17514_v20 = vld [vmem:[%s19281_s11 + $0x20] ss:$12 sps:$4 sm:$0xff]  }
 0x840   : > { %v6008_v3 = vpop.f32.mrf.mxu0  ;;  %v17517_v36 = vld [vmem:[%s19281_s11 + $0x1a0] ss:$12 sps:$4 sm:$0xff]  }
 0x841   : > { %v6009_v46 = vadd.f32 %v6008_v3, %v5399_v32  ;;  %v6050_v9 = vadd.f32 %v6049_v50, %v6007_v48  ;;  %v6140_v60 = vmax.f32 %v6048_v59, 0.0  ;;  %v17504_v50 = vld [vmem:[%s19281_s11 + $0x110] ss:$12 sps:$4 sm:$0xff]   ;;  %v17512_v32 = vld [vmem:[%s19281_s11 + $0xe0] ss:$12 sps:$4 sm:$0xff]  }
 0x842   : > { %v6010_v63 = vpop.f32.mrf.mxu0  ;;  %v17515_v48 = vld [vmem:[%s19281_s11 + $0x260] ss:$12 sps:$4 sm:$0xff]   ;;  %v17518_v3 = vld [vmem:[%s19281_s11 + $0x8] ss:$12 sps:$4 sm:$0xff]  }
 0x843   : > { %v6052_v40 = vadd.f32 %v6051_v5, %v6009_v46  ;;  %v6011_v17 = vadd.f32 %v6010_v63, %v5403_v61  ;;  %v6141_v44 = vmax.f32 %v6050_v9, 0.0  ;;  %v17505_v5 = vld [vmem:[%s19281_s11 + $0x1e8] ss:$12 sps:$4 sm:$0xff]   ;;  %v17509_v61 = vld [vmem:[%s19281_s11 + $0x1d0] ss:$12 sps:$4 sm:$0xff]  }
 0x844   : > { %v6131_v34 = vpop.f32.mrf.mxu0  ;;  %v17520_v46 = vld [vmem:[%s19281_s11 + $0x188] ss:$12 sps:$4 sm:$0xff]   ;;  %v17522_v63 = vld [vmem:[%s19281_s11 + $0x338] ss:$12 sps:$4 sm:$0xff]  }
 0x845   : > { %v6054_v6 = vadd.f32 %v6053_v10, %v6011_v17  ;;  %v6145_v19 = vmax.f32 %v6052_v40, 0.0  ;;  %v6132_v45 = vadd.f32 %v6131_v34, %v6091_v51  ;;  %v17506_v10 = vld [vmem:[%s19281_s11 + $0x50] ss:$12 sps:$4 sm:$0xff]   ;;  %v17524_v9 = vld [vmem:[%s19281_s11 + $0x308] ss:$12 sps:$4 sm:$0xff]  }
 0x846   : > { %v16658_v21 = vpop.f32.mrf.mxu0 }
 0x847   : > { %v6146_v15 = vmax.f32 %v6054_v6, 0.0  ;;  %v20802_v52 = vpack.c.bf16 %v6145_v19, %v6140_v60  ;;  %v6142_v7 = vmax.f32 %v6132_v45, 0.0 }
 0x848   : > { %v6134_v47 = vpop.f32.mrf.mxu0 }
 0x849   : > { %v6135_v28 = vadd.f32 %v6134_v47, %v6094_v43  ;;  %v6295_v54 = vpack.c.bf16 %v6146_v15, %v6141_v44  ;;  %v20854_v43 = vld [vmem:[%s19293_s6 + $0x8] sm:$0xff] }
 0x84a   : > { %v16659_v16 = vpop.f32.mrf.mxu0  ;;  %v6304_v60 = vrot.slane %v20854_v43, %v22777_v13 }
 0x84b   : > { %v6147_v22 = vmax.f32 %v6135_v28, 0.0  ;;  %6964 = vmatprep.mubr.bf16.mxu1 %v6295_v54 }
 0x84c   : > { %6965 = vmatmul.mubr.bf16.vlgmr.msra.gmra.mxu1 %v20802_v52 }
 0x84d   : > { %v20807_v27 = vpack.c.bf16 %v6147_v22, %v6142_v7  ;;  %16264 = vmatpush3.bf16.msra.mxu1 %v17490_v8  ;;  %7050 = vmatprep.mubr.bf16.mxu1 %v20783_v2  ;;  %v17499_v2 = vld [vmem:[%s19281_s11 + $0x2c0] ss:$12 sps:$4 sm:$0xff]   ;;  %v20864_v7 = vld [vmem:[%s19293_s6 + $0x10] sm:$0xff] }
 0x84e   : > { %16265 = vmatprep.subr.bf16.mxu1 %v17492_v0  ;;  %v6308_v22 = vrot.slane %v20864_v7, %v22777_v13 }
 0x84f   : > { %15502 = vmatmul.mubr.msk.bf16.vlgmr.msra.gmra.mxu0 %vm6885_vm4, %v20807_v27 }
 0x850   : > { %16286 = vmatpush3.bf16.msra.mxu0 %v17493_v24  ;;  %7091 = vmatprep.mubr.bf16.mxu0 %v6295_v54  ;;  %v20859_v54 = vld [vmem:[%s19293_s6] sm:$0xff] }
 0x851   : > { %16266 = vmatpush3.bf16.msra.mxu1 %v17494_v42  ;;  %16287 = vmatprep.subr.bf16.mxu0 %v17495_v55  ;;  %v6300_v8 = vrot.slane %v20859_v54, %v22777_v13 }
 0x852   : > { %16267 = vmatprep.subr.bf16.mxu1 %v17496_v57 }
 0x854   : > { %16288 = vmatpush3.bf16.msra.mxu0 %v17497_v31 }
 0x855   : > { %16268 = vmatpush3.bf16.msra.mxu1 %v17498_v39  ;;  %16289 = vmatprep.subr.bf16.mxu0 %v17499_v2 }
 0x856   : > { %16269 = vmatprep.subr.bf16.mxu1 %v17500_v49 }
 0x858   : > { %16290 = vmatpush3.bf16.msra.mxu0 %v17501_v23 }
 0x859   : > { %16270 = vmatpush3.bf16.msra.mxu1 %v17502_v56  ;;  %16291 = vmatprep.subr.bf16.mxu0 %v17503_v38 }
 0x85a   : > { %16271 = vmatprep.subr.bf16.mxu1 %v17504_v50 }
 0x85c   : > { %16292 = vmatpush3.bf16.msra.mxu0 %v17505_v5 }
 0x85d   : > { %16272 = vmatpush3.bf16.msra.mxu1 %v17506_v10  ;;  %16293 = vmatprep.subr.bf16.mxu0 %v17507_v30 }
 0x85e   : > { %16273 = vmatprep.subr.bf16.mxu1 %v17508_v18 }
 0x860   : > { %16294 = vmatpush3.bf16.msra.mxu0 %v17509_v61 }
 0x861   : > { %16274 = vmatpush3.bf16.msra.mxu1 %v17510_v58  ;;  %16295 = vmatprep.subr.bf16.mxu0 %v17511_v62 }
 0x862   : > { %16275 = vmatprep.subr.bf16.mxu1 %v17512_v32 }
 0x864   : > { %16296 = vmatpush3.bf16.msra.mxu0 %v17513_v4 }
 0x865   : > { %16276 = vmatpush3.bf16.msra.mxu1 %v17514_v20  ;;  %16297 = vmatprep.subr.bf16.mxu0 %v17515_v48 }
 0x866   : > { %16277 = vmatprep.subr.bf16.mxu1 %v17516_v41 }
 0x868   : > { %16298 = vmatpush3.bf16.msra.mxu0 %v17517_v36 }
 0x869   : > { %16278 = vmatpush3.bf16.msra.mxu1 %v17518_v3  ;;  %16299 = vmatprep.subr.bf16.mxu0 %v17519_v12 }
 0x86a   : > { %16660 = vmatprep.subr.bf16.mxu1 %v22669_v53 }
 0x86c   : > { %7051 = vmatmul.mubr.bf16.vlgmr.msra.gmra.mxu1 %v20786_v26  ;;  %16300 = vmatpush3.bf16.msra.mxu0 %v17520_v46 }
 0x86d   : > { %16661 = vmatpush3.bf16.msra.mxu1 %v17521_v1  ;;  %16668 = vmatprep.mubr.msk.bf16.mxu1 %vm18733_vm2, %v22669_v53 }
 0x86e   : > { %16662 = vmatprep.subr.bf16.mxu1 %v22669_v53 }
 0x86f   : > { %7092 = vmatmul.mubr.bf16.vlgmr.msra.gmra.mxu0 %v20802_v52 }
 0x871   : > { %16663 = vmatpush3.bf16.msra.mxu1 %v17522_v63 }
 0x872   : > { %16664 = vmatprep.subr.bf16.mxu1 %v22669_v53 }
 0x875   : > { %16665 = vmatpush3.bf16.msra.mxu1 %v17523_v29 }
 0x876   : > { %16666 = vmatprep.subr.bf16.mxu1 %v22669_v53 }
 0x879   : > { %16667 = vmatpush3.bf16.msra.mxu1 %v17524_v9 }
 0x87c   : > { %16669 = vmatmul.mubr.msk.bf16.vlgmr.msra.gmra.mxu1 %vm6885_vm4, %v20807_v27 }
 0x8cd   : > { %v6923_v26 = vpop.f32.mrf.mxu0 }
 0x8ce   : > { %v6924_v27 = vadd.f32 %v6923_v26, %v6300_v8 }
 0x8cf   : > { %v6925_v40 = vpop.f32.mrf.mxu0 }
 0x8d0   : > { %v6926_v0 = vadd.f32 %v6925_v40, %v6304_v60 }
 0x8d1   : > { %v6927_v17 = vpop.f32.mrf.mxu0 }
 0x8d2   : > { %v6928_v56 = vadd.f32 %v6927_v17, %v6300_v8 }
 0x8d3   : > { %v6929_v34 = vpop.f32.mrf.mxu0 }
 0x8d4   : > { %v6930_v31 = vadd.f32 %v6929_v34, %v6304_v60 }
 0x90c   : > { %v6966_v59 = vpop.f32.mrf.mxu1 }
 0x90d   : > { %v6967_v39 = vadd.f32 %v6966_v59, %v6924_v27 }
 0x90e   : > { %v6968_v51 = vpop.f32.mrf.mxu1 }
 0x90f   : > { %v7009_v6 = vpop.f32.mrf.mxu0  ;;  %v6969_v42 = vadd.f32 %v6968_v51, %v6926_v0 }
 0x910   : > { %v6970_v21 = vpop.f32.mrf.mxu1  ;;  %v7010_v10 = vadd.f32 %v7009_v6, %v6967_v39 }
 0x911   : > { %v7011_v19 = vpop.f32.mrf.mxu0  ;;  %v6971_v30 = vadd.f32 %v6970_v21, %v6928_v56 }
 0x912   : > { %v6972_v15 = vpop.f32.mrf.mxu1  ;;  %v7012_v38 = vadd.f32 %v7011_v19, %v6969_v42  ;;  %v7141_v20 = vadd.f32 %v7010_v10, %v20635_v11 }
 0x913   : > { %v7013_v44 = vpop.f32.mrf.mxu0  ;;  %v6973_v50 = vadd.f32 %v6972_v15, %v6930_v31  ;;  %v22778_v31 = vld [vmem:[#allocation69_spill] sm:$0xff] }
 0x914   : > { %v7142_v13 = vadd.f32 %v7012_v38, %v20626_v25  ;;  %v7014_v48 = vadd.f32 %v7013_v44, %v6971_v30  ;;  %v7159_v11 = vmul.f32 %v7141_v20, %v7141_v20  ;;  %v7200_v39 = vrot.slane %v20859_v54, %v22778_v31 }
 0x915   : > { %v7015_v53 = vpop.f32.mrf.mxu0  ;;  %v7208_v38 = vrot.slane %v20864_v7, %v22778_v31 }
 0x916   : > { %v7016_v62 = vadd.f32 %v7015_v53, %v6973_v50  ;;  %v7147_v1 = vadd.f32 %v7142_v13, %v7141_v20  ;;  %v7160_v63 = vmul.f32 %v7142_v13, %v7142_v13  ;;  %v7144_v26 = vadd.f32 %v7014_v48, %v20637_v14 }
 0x918   : > { %v20872_v12 = vadd.f32 %v7016_v62, %v20628_v35  ;;  %v7165_v34 = vadd.f32 %v7160_v63, %v7159_v11  ;;  %v7162_v14 = vmul.f32 %v7144_v26, %v7144_v26 }
 0x91a   : > { %v7152_v35 = vadd.f32 %v20872_v12, %v7144_v26  ;;  %v7163_v6 = vmul.f32 %v20872_v12, %v20872_v12 }
 0x92c   : > { %v16279_v45 = vpop.f32.mrf.mxu1 }
 0x92e   : > { %v16280_v47 = vpop.f32.mrf.mxu1 }
 0x92f   : > { %v16301_v28 = vpop.f32.mrf.mxu0  ;;  %v16281_v24 = vadd.f32 %v16280_v47, %v16279_v45 }
 0x930   : > { %v16282_v52 = vpop.f32.mrf.mxu1 }
 0x931   : > { %v16302_v16 = vpop.f32.mrf.mxu0  ;;  %v7053_v2 = vadd.f32 %v16281_v24, %v6308_v22 }
 0x932   : > { %v16283_v55 = vpop.f32.mrf.mxu1  ;;  %v16303_v49 = vadd.f32 %v16302_v16, %v16301_v28 }
 0x933   : > { %v16304_v57 = vpop.f32.mrf.mxu0  ;;  %v16284_v23 = vadd.f32 %v16283_v55, %v16282_v52 }
 0x934   : > { %v7094_v58 = vadd.f32 %v16303_v49, %v7053_v2  ;;  %v7204_v2 = vrot.slane %v20854_v43, %v22778_v31 }
 0x935   : > { %v16305_v5 = vpop.f32.mrf.mxu0  ;;  %v7056_v18 = vadd.f32 %v16284_v23, %v6308_v22 }
 0x936   : > { %v16306_v61 = vadd.f32 %v16305_v5, %v16304_v57 }
 0x938   : > { %v7097_v3 = vadd.f32 %v16306_v61, %v7056_v18  ;;  %v15504_v18 = vld [vmem:[%s19293_s6 + $0x18] ss:$0 sm:$0xff]  ;;  %v15505_v61 = vld [vmem:[%s19293_s6 + $0x20] ss:$0 sm:$0xff] }
 0x93c   : > { %v7134_v32 = vpop.f32.mrf.mxu1 }
 0x93d   : > { %v7135_v4 = vadd.f32 %v7134_v32, %v7094_v58  ;;  %v15506_v58 = vld [vmem:[%s19293_s6 + $0x28] ss:$0 sm:$0xff] }
 0x93e   : > { %v16670_v41 = vpop.f32.mrf.mxu1 }
 0x93f   : > { %v7143_v36 = vadd.f32 %v7135_v4, %v20630_v37 }
 0x940   : > { %v7137_v46 = vpop.f32.mrf.mxu1 }
 0x941   : > { %v7138_v29 = vadd.f32 %v7137_v46, %v7097_v3  ;;  %v7148_v9 = vsel %vm1987_vm1, %v7143_v36, 0.0  ;;  %v7161_v25 = vmul.f32 %v7143_v36, %v7143_v36 }
 0x942   : > { %v16671_v40 = vpop.f32.mrf.mxu1  ;;  %v7149_v17 = vadd.f32 %v7148_v9, %v7147_v1 }
 0x943   : > { %v7146_v59 = vadd.f32 %v7138_v29, %v20632_v33  ;;  %v7166_v37 = vsel %vm1987_vm1, %v7161_v25, 0.0  ;;  %v7170_v33 = vadd.f32 %v7163_v6, %v7162_v14 }
 0x944   : > { %7150 = vadd.xlane.f32.xlu0 %v7149_v17  ;;  %v7167_v44 = vadd.f32 %v7166_v37, %v7165_v34 }
 0x945   : > { %v7153_v51 = vsel %vm1987_vm1, %v7146_v59, 0.0  ;;  %v7164_v19 = vmul.f32 %v7146_v59, %v7146_v59 }
 0x946   : > { %v7154_v21 = vadd.f32 %v7153_v51, %v7152_v35 }
 0x947   : > { %v7171_v15 = vsel %vm1987_vm1, %v7164_v19, 0.0 }
 0x948   : > { %7155 = vadd.xlane.f32.xlu1 %v7154_v21  ;;  %7168 = vadd.xlane.f32.xlu0 %v7167_v44  ;;  %v7172_v45 = vadd.f32 %v7171_v15, %v7170_v33 }
 0x94c   : > { %7173 = vadd.xlane.f32.xlu1 %v7172_v45 }
 0x9cd   : > { %v7151_v53 = vpop.xlane.xlu0 %7150 }
 0x9ce   : > { %v7157_v60 = vmul.f32 0.0034722222, %v7151_v53 }
 0x9d0   : > { %v7177_v52 = vmul.f32 %v7157_v60, %v7157_v60  ;;  %v7185_v49 = vsub.f32 %v7141_v20, %v7157_v60  ;;  %v7186_v23 = vsub.f32 %v7142_v13, %v7157_v60  ;;  %v7187_v56 = vsub.f32 %v7143_v36, %v7157_v60 }
 0x9d1   : > { %v7156_v47 = vpop.xlane.xlu1 %7155  ;;  %v7169_v28 = vpop.xlane.xlu0 %7168 }
 0x9d2   : > { %v7158_v8 = vmul.f32 0.0034722222, %v7156_v47  ;;  %v7175_v16 = vmul.f32 0.0034722222, %v7169_v28 }
 0x9d4   : > { %v7179_v0 = vsub.f32 %v7175_v16, %v7177_v52  ;;  %v7178_v27 = vmul.f32 %v7158_v8, %v7158_v8  ;;  %v7188_v62 = vsub.f32 %v7144_v26, %v7158_v8  ;;  %v7189_v43 = vsub.f32 %v20872_v12, %v7158_v8 }
 0x9d5   : > { %v7174_v22 = vpop.xlane.xlu1 %7173  ;;  %v7190_v20 = vsub.f32 %v7146_v59, %v7158_v8 }
 0x9d6   : > { %v7181_v24 = vadd.f32 1e-05, %v7179_v0  ;;  %v7176_v42 = vmul.f32 0.0034722222, %v7174_v22 }
 0x9d8   : > { %17593 = vrsqrt.f32 %v7181_v24  ;;  %v7180_v55 = vsub.f32 %v7176_v42, %v7178_v27 }
 0x9da   : > { %v7182_v57 = vadd.f32 1e-05, %v7180_v55 }
 0x9dc   : > { %17595 = vrsqrt.f32 %v7182_v57 }
 0x9e5   : > { %v17594_v50 = vpop.eup %17593 }
 0x9e6   : > { %v7191_v5 = vmul.f32 %v17594_v50, %v7185_v49  ;;  %v7192_v10 = vmul.f32 %v17594_v50, %v7186_v23  ;;  %v7193_v30 = vmul.f32 %v17594_v50, %v7187_v56 }
 0x9e8   : > { %v7209_v32 = vmul.f32 %v7200_v39, %v7191_v5  ;;  %v7210_v4 = vmul.f32 %v7204_v2, %v7192_v10  ;;  %v7211_v54 = vmul.f32 %v7208_v38, %v7193_v30 }
 0x9e9   : > { %v17596_v48 = vpop.eup %17595 }
 0x9ea   : > { %v7227_v13 = vadd.f32 %v15504_v18, %v7209_v32  ;;  %v7228_v41 = vadd.f32 %v15505_v61, %v7210_v4  ;;  %v7229_v36 = vadd.f32 %v15506_v58, %v7211_v54  ;;  %v7194_v3 = vmul.f32 %v17596_v48, %v7188_v62 }
 0x9eb   : > { %v7195_v7 = vmul.f32 %v17596_v48, %v7189_v43  ;;  %v7196_v46 = vmul.f32 %v17596_v48, %v7190_v20 }
 0x9ec   : > { %7233 = vst [vmem:[#allocation2] sm:$0xff] %v7227_v13  ;;  %7234 = vst [vmem:[#allocation2 + $0x8] sm:$0xff] %v7228_v41  ;;  %v7212_v1 = vmul.f32 %v7200_v39, %v7194_v3 }
 0x9ed   : > { %7235 = vst.msk [vmem:[#allocation2 + $0x10] sm:$0xff] %vm1987_vm1, %v7229_v36  ;;  %v7213_v63 = vmul.f32 %v7204_v2, %v7195_v7  ;;  %v7214_v29 = vmul.f32 %v7208_v38, %v7196_v46 }
 0x9ee   : > { %v7230_v9 = vadd.f32 %v15504_v18, %v7212_v1 }
 0x9ef   : > { %v7231_v25 = vadd.f32 %v15505_v61, %v7213_v63  ;;  %v7232_v26 = vadd.f32 %v15506_v58, %v7214_v29 }
 0x9f0   : > { %7236 = vst [vmem:[#allocation2 + $0x18] sm:$0xff] %v7230_v9 }
 0x9f1   : > { %7237 = vst [vmem:[#allocation2 + $0x20] sm:$0xff] %v7231_v25  ;;  %7238 = vst.msk [vmem:[#allocation2 + $0x28] sm:$0xff] %vm1987_vm1, %v7232_v26 }
 0x9f2 PF: > { %p15507_p10 = scmp.ne.s32.totalorder %s19066_s24, 6 }
 0x9f3   : > { %s22779_s8 = sld [smem:[#allocation45_spill]] (!%p15507_p10) }
 0x9f4   : > { %7242 = sbr.rel (%p15507_p10) target bundleno = 2730 (0xaaa), region = 176  ;;  %s22780_s4 = sld [smem:[#allocation44_spill]] (!%p15507_p10) }
 0x9f9   : > { %v20896_v12 = vld [vmem:[#allocation2] sm:$0xff]  ;;  %v20898_v40 = vld [vmem:[#allocation2 + $0x8] sm:$0xff]  ;;  %v20900_v17 = vld [vmem:[#allocation2 + $0x10] sm:$0xff]  ;;  %vm7252_vm5 = vcmask 261120   ;;  %vm7353_vm6 = vcmask 1041408   ;;  %vm7354_vm7 = vcmask 1043458   ;;  %v7304_v38 = vlaneseq }
 0x9fa   : > { %v7251_v11 = vadd.f32 %v20898_v40, %v20896_v12  ;;  %v7253_v59 = vsel %vm7252_vm5, %v20900_v17, 0.0  ;;  %v7265_v37 = vmul.f32 %v20896_v12, %v20896_v12  ;;  %v7266_v35 = vmul.f32 %v20898_v40, %v20898_v40  ;;  %v20910_v34 = vld [vmem:[#allocation2 + $0x18] sm:$0xff]  ;;  %v20912_v6 = vld [vmem:[#allocation2 + $0x20] sm:$0xff]  ;;  %v20914_v51 = vld [vmem:[#allocation2 + $0x28] sm:$0xff] }
 0x9fb   : > { %v7267_v19 = vmul.f32 %v20900_v17, %v20900_v17  ;;  %v7257_v21 = vadd.f32 %v20912_v6, %v20910_v34  ;;  %v7258_v44 = vsel %vm7252_vm5, %v20914_v51, 0.0  ;;  %v7268_v14 = vmul.f32 %v20910_v34, %v20910_v34  ;;  %vm7355_vm8 = vmor %vm7354_vm7, %vm7353_vm6  ;;  %v7249_v61 = vld [vmem:[%s22779_s8] sm:$0x7] }
 0x9fc   : > { %v7254_v15 = vadd.f32 %v7253_v59, %v7251_v11  ;;  %v7271_v33 = vadd.f32 %v7266_v35, %v7265_v37  ;;  %v7269_v45 = vmul.f32 %v20912_v6, %v20912_v6  ;;  %v7270_v53 = vmul.f32 %v20914_v51, %v20914_v51  ;;  %v7250_v62 = vld [vmem:[%s22780_s4] sm:$0x7] }
 0x9fd   : > { %v7272_v60 = vsel %vm7252_vm5, %v7267_v19, 0.0  ;;  %v7259_v28 = vadd.f32 %v7258_v44, %v7257_v21  ;;  %vm7356_vm9 = vcmask 259076   ;;  %v18734_v0 = vmov 1.0  }
 0x9fe   : > { %7255 = vadd.xlane.f32.xlu0 %v7254_v15  ;;  %v7273_v47 = vadd.f32 %v7272_v60, %v7271_v33  ;;  %v7276_v8 = vadd.f32 %v7269_v45, %v7268_v14  ;;  %v7277_v52 = vsel %vm7252_vm5, %v7270_v53, 0.0  ;;  %vm7357_vm10 = vmor %vm7356_vm9, %vm7355_vm8  ;;  %v7305_v10 = vshrl.u32 %v7304_v38, 7 }
 0x9ff   : > { %7358 = vst.msk [vmem:[#allocation3] sm:$0x3f] %vm7357_vm10, %v18734_v0 }
 0xa00   : > { %7274 = vadd.xlane.f32.xlu1 %v7273_v47  ;;  %v7278_v16 = vadd.f32 %v7277_v52, %v7276_v8  ;;  %v7306_v30 = vsub.s32 0, %v7305_v10  ;;  %v7310_v18 = vsub.s32 1, %v7305_v10  ;;  %v7314_v58 = vsub.s32 2, %v7305_v10 }
 0xa02   : > { %7260 = vadd.xlane.f32.xlu0 %v7259_v28  ;;  %v7307_v32 = vrot.slane %v7249_v61, %v7306_v30  ;;  %v7311_v4 = vrot.slane %v7249_v61, %v7310_v18  ;;  %v7315_v20 = vrot.slane %v7249_v61, %v7314_v58  ;;  %v7329_v41 = vrot.slane %v7250_v62, %v7306_v30 }
 0xa03   : > { %v7333_v36 = vrot.slane %v7250_v62, %v7310_v18  ;;  %v7337_v3 = vrot.slane %v7250_v62, %v7314_v58 }
 0xa04   : > { %7279 = vadd.xlane.f32.xlu1 %v7278_v16 }
 0xa87   : > { %v7256_v22 = vpop.xlane.xlu0 %7255 }
 0xa88   : > { %v7263_v24 = vmul.f32 0.0034722222, %v7256_v22 }
 0xa89   : > { %v7275_v27 = vpop.xlane.xlu1 %7274 }
 0xa8a   : > { %v7281_v42 = vmul.f32 0.0034722222, %v7275_v27  ;;  %v7283_v55 = vmul.f32 %v7263_v24, %v7263_v24  ;;  %v7291_v54 = vsub.f32 %v20896_v12, %v7263_v24  ;;  %v7292_v48 = vsub.f32 %v20898_v40, %v7263_v24 }
 0xa8b   : > { %v7261_v57 = vpop.xlane.xlu0 %7260  ;;  %v7293_v43 = vsub.f32 %v20900_v17, %v7263_v24 }
 0xa8c   : > { %v7264_v31 = vmul.f32 0.0034722222, %v7261_v57  ;;  %v7285_v39 = vsub.f32 %v7281_v42, %v7283_v55 }
 0xa8d   : > { %v7280_v2 = vpop.xlane.xlu1 %7279 }
 0xa8e   : > { %v7282_v49 = vmul.f32 0.0034722222, %v7280_v2  ;;  %v7287_v23 = vadd.f32 1e-05, %v7285_v39  ;;  %v7284_v56 = vmul.f32 %v7264_v31, %v7264_v31  ;;  %v7294_v25 = vsub.f32 %v20910_v34, %v7264_v31 }
 0xa8f   : > { %v7295_v12 = vsub.f32 %v20912_v6, %v7264_v31  ;;  %v7296_v40 = vsub.f32 %v20914_v51, %v7264_v31 }
 0xa90   : > { %17609 = vrsqrt.f32 %v7287_v23  ;;  %v7286_v50 = vsub.f32 %v7282_v49, %v7284_v56 }
 0xa92   : > { %v7288_v5 = vadd.f32 1e-05, %v7286_v50 }
 0xa94   : > { %17611 = vrsqrt.f32 %v7288_v5 }
 0xa9d   : > { %v17610_v13 = vpop.eup %17609 }
 0xa9e   : > { %v7297_v7 = vmul.f32 %v17610_v13, %v7291_v54  ;;  %v7298_v46 = vmul.f32 %v17610_v13, %v7292_v48  ;;  %v7299_v1 = vmul.f32 %v17610_v13, %v7293_v43 }
 0xaa0   : > { %v7319_v63 = vmul.f32 %v7307_v32, %v7297_v7  ;;  %v7320_v29 = vmul.f32 %v7311_v4, %v7298_v46  ;;  %v7321_v9 = vmul.f32 %v7315_v20, %v7299_v1 }
 0xaa1   : > { %v17612_v26 = vpop.eup %17611 }
 0xaa2   : > { %v7341_v11 = vadd.f32 %v7329_v41, %v7319_v63  ;;  %v7342_v17 = vadd.f32 %v7333_v36, %v7320_v29  ;;  %v7343_v59 = vadd.f32 %v7337_v3, %v7321_v9  ;;  %v7300_v37 = vmul.f32 %v17612_v26, %v7294_v25 }
 0xaa3   : > { %v7301_v35 = vmul.f32 %v17612_v26, %v7295_v12  ;;  %v7302_v19 = vmul.f32 %v17612_v26, %v7296_v40 }
 0xaa4   : > { %7347 = vst [vmem:[#allocation2] sm:$0xff] %v7341_v11  ;;  %7348 = vst [vmem:[#allocation2 + $0x8] sm:$0xff] %v7342_v17  ;;  %v7322_v21 = vmul.f32 %v7307_v32, %v7300_v37 }
 0xaa5   : > { %7349 = vst.msk [vmem:[#allocation2 + $0x10] sm:$0xff] %vm7252_vm5, %v7343_v59  ;;  %v7323_v44 = vmul.f32 %v7311_v4, %v7301_v35  ;;  %v7324_v14 = vmul.f32 %v7315_v20, %v7302_v19 }
 0xaa6   : > { %v7344_v15 = vadd.f32 %v7329_v41, %v7322_v21 }
 0xaa7   : > { %v7345_v34 = vadd.f32 %v7333_v36, %v7323_v44  ;;  %v7346_v33 = vadd.f32 %v7337_v3, %v7324_v14 }
 0xaa8   : > { %7350 = vst [vmem:[#allocation2 + $0x18] sm:$0xff] %v7344_v15 }
 0xaa9   : > { %7351 = vst [vmem:[#allocation2 + $0x20] sm:$0xff] %v7345_v34  ;;  %7352 = vst.msk [vmem:[#allocation2 + $0x28] sm:$0xff] %vm7252_vm5, %v7346_v33 }
 0xaaa PF: > { %p15508_p5 = scmp.lt.s32.totalorder %s19066_s24, 6 }
 0xaac   : > { %7362 = sbr.rel (%p15508_p5) target bundleno = 5396 (0x1514), region = 180 }
 0xab1   : > { %v17613_v6 = vld [vmem:[%s19254_s9 + $0xac] ss:$12 sps:$4 sm:$0xff]   ;;  %v17615_v51 = vld [vmem:[%s19254_s9 + $0xa8] ss:$12 sps:$4 sm:$0xff]   ;;  %v22526_v45 = vmov 0   ;;  %v7453_v52 = vlaneseq  ;;  %vm7771_vm11 = vcmask 261120  }
 0xab2   : > { %7848 = vmatprep.mubr.bf16.mxu1 %v22526_v45  ;;  %7775 = vmatprep.subr.bf16.mxu0 %v17613_v6  ;;  %v17616_v53 = vld [vmem:[%s19254_s9 + $0x94] ss:$12 sps:$4 sm:$0xff]   ;;  %v17618_v60 = vld [vmem:[%s19254_s9 + $0x90] ss:$12 sps:$4 sm:$0xff]   ;;  %v18736_v28 = vmov 1983009808  }
 0xab3   : > { %7776 = vmatpush1.bf16.msra.mxu0 %v17615_v51  ;;  %v17619_v47 = vld [vmem:[%s19254_s9 + $0x7c] ss:$12 sps:$4 sm:$0xff]   ;;  %v7451_v8 = vunpack.c.l.s4 %v18736_v28  ;;  %v17621_v16 = vld [vmem:[%s19254_s9 + $0x78] ss:$12 sps:$4 sm:$0xff]   ;;  %v20951_v42 = vshrl.u32 %v7453_v52, 7  ;;  %v22528_v51 = vmov 0.0  }
 0xab4   : > { %7777 = vmatprep.subr.bf16.mxu0 %v17616_v53  ;;  %v17627_v0 = vld [vmem:[%s19254_s9 + $0x19c] ss:$12 sps:$4 sm:$0xff]   ;;  %v17630_v22 = vld [vmem:[%s19254_s9 + $0x198] ss:$12 sps:$4 sm:$0xff]   ;;  %v17636_v57 = vld [vmem:[%s19254_s9 + $0x180] ss:$12 sps:$4 sm:$0xff]  }
 0xab5   : > { %v17622_v24 = vld [vmem:[%s19254_s9 + $0x64] ss:$12 sps:$4 sm:$0xff]   ;;  %v7452_v27 = vunpack.c.0.s8 %v7451_v8  ;;  %7828 = vmatprep.subr.bf16.mxu1 %v17627_v0  ;;  %v17624_v31 = vld [vmem:[%s19254_s9 + $0x60] ss:$12 sps:$4 sm:$0xff]   ;;  %v17629_v50 = vld [vmem:[%s19254_s9 + $0x48] ss:$12 sps:$4 sm:$0xff]  }
 0xab6   : > { %v17633_v55 = vld [vmem:[%s19254_s9 + $0x184] ss:$12 sps:$4 sm:$0xff]   ;;  %7829 = vmatpush1.bf16.msra.mxu1 %v17630_v22  ;;  %v17625_v39 = vld [vmem:[%s19254_s9 + $0x4c] ss:$12 sps:$4 sm:$0xff]   ;;  %v17631_v5 = vld [vmem:[%s19254_s9 + $0x34] ss:$12 sps:$4 sm:$0xff]  }
 0xab7   : > { %7778 = vmatpush1.bf16.msra.mxu0 %v17618_v60  ;;  %7830 = vmatprep.subr.bf16.mxu1 %v17633_v55  ;;  %v17639_v2 = vld [vmem:[%s19254_s9 + $0x170] ss:$12 sps:$4 sm:$0xff]   ;;  %v20959_v49 = vsub.s32 %v7452_v27, %v20951_v42  ;;  %v17645_v58 = vld [vmem:[%s19254_s9 + $0x158] ss:$12 sps:$4 sm:$0xff]   ;;  %v17650_v48 = vld [vmem:[%s19254_s9 + $0x140] ss:$12 sps:$4 sm:$0xff]  }
 0xab8   : > { %7779 = vmatprep.subr.bf16.mxu0 %v17619_v47  ;;  %v7369_v23 = vld [vmem:[#allocation3] sm:$0x3f]  ;;  %v17643_v20 = vld [vmem:[%s19254_s9 + $0x4] ss:$12 sps:$4 sm:$0xff]   ;;  %v17653_v63 = vld [vmem:[%s19254_s9 + $0x154] ss:$12 sps:$4 sm:$0xff]  }
 0xab9   : > { %v7449_v56 = vcombine.high %v7369_v23, %v7369_v23  ;;  %v20962_v38 = vrot.slane %v7369_v23, %v20959_v49  ;;  %v17642_v18 = vld [vmem:[%s19254_s9 + $0xb0] ss:$12 sps:$4 sm:$0xff]   ;;  %v17647_v54 = vld [vmem:[%s19254_s9 + $0x98] ss:$12 sps:$4 sm:$0xff]   ;;  %v17652_v13 = vld [vmem:[%s19254_s9 + $0x80] ss:$12 sps:$4 sm:$0xff]  }
 0xaba   : > { %7831 = vmatpush1.bf16.msra.mxu1 %v17636_v57  ;;  %v17635_v32 = vld [vmem:[%s19254_s9 + $0x30] ss:$12 sps:$4 sm:$0xff]   ;;  %v17640_v43 = vld [vmem:[%s19254_s9 + $0x18] ss:$12 sps:$4 sm:$0xff]   ;;  %v17655_v41 = vld [vmem:[%s19254_s9 + $0x128] ss:$12 sps:$4 sm:$0xff]  }
 0xabb   : > { %7780 = vmatpush1.bf16.msra.mxu0 %v17621_v16  ;;  %16312 = vmatprep.subr.bf16.mxu1 %v17639_v2  ;;  %v7463_v10 = vrot.slane %v7449_v56, %v20959_v49  ;;  %v7464_v30 = vcombine.high %v20962_v38, %v20962_v38  ;;  %v17637_v4 = vld [vmem:[%s19254_s9 + $0x1c] ss:$12 sps:$4 sm:$0xff]   ;;  %v17646_v36 = vld [vmem:[%s19254_s9] ss:$12 sps:$4 sm:$0xff]   ;;  %v17665_v9 = vld [vmem:[%s19254_s9 + $0xf8] ss:$12 sps:$4 sm:$0xff]   ;;  %v7468_v34 = vpack.c.bf16 %v20962_v38, %v20962_v38 }
 0xabc   : > { %7781 = vmatprep.subr.bf16.mxu0 %v17622_v24  ;;  %v17648_v3 = vld [vmem:[%s19254_s9 + $0x16c] ss:$12 sps:$4 sm:$0xff]   ;;  %v17657_v7 = vld [vmem:[%s19254_s9 + $0x68] ss:$12 sps:$4 sm:$0xff]   ;;  %v17660_v46 = vld [vmem:[%s19254_s9 + $0x110] ss:$12 sps:$4 sm:$0xff]  }
 0xabd   : > { %v20970_v61 = vpack.c.bf16 %v7463_v10, %v7463_v10  ;;  %v7469_v62 = vpack.c.bf16 %v7464_v30, %v7464_v30  ;;  %v17651_v1 = vld [vmem:[%s19254_s9 + $0x168] ss:$12 sps:$4 sm:$0xff]   ;;  %v17662_v29 = vld [vmem:[%s19254_s9 + $0x50] ss:$12 sps:$4 sm:$0xff]   ;;  %v17667_v12 = vld [vmem:[%s19254_s9 + $0x38] ss:$12 sps:$4 sm:$0xff]  }
 0xabe   : > { %v17656_v25 = vld [vmem:[%s19254_s9 + $0x150] ss:$12 sps:$4 sm:$0xff]   ;;  %v17670_v40 = vld [vmem:[%s19254_s9 + $0xe0] ss:$12 sps:$4 sm:$0xff]   ;;  %v17661_v11 = vld [vmem:[%s19254_s9 + $0x138] ss:$12 sps:$4 sm:$0xff]  }
 0xabf   : > { %7782 = vmatpush1.bf16.msra.mxu0 %v17624_v31  ;;  %15563 = vmatmul.mubr.msk.bf16.vlgmr.msra.gmra.mxu1 %vm7771_vm11, %v20970_v61  ;;  %v17658_v26 = vld [vmem:[%s19254_s9 + $0x13c] ss:$12 sps:$4 sm:$0xff]   ;;  %v17663_v17 = vld [vmem:[%s19254_s9 + $0x124] ss:$12 sps:$4 sm:$0xff]   ;;  %v17666_v59 = vld [vmem:[%s19254_s9 + $0x120] ss:$12 sps:$4 sm:$0xff]  }
 0xac0   : > { %7783 = vmatprep.subr.bf16.mxu0 %v17625_v39  ;;  %16313 = vmatpush3.bf16.msra.mxu1 %v17642_v18  ;;  %v17672_v37 = vld [vmem:[%s19254_s9 + $0x20] ss:$12 sps:$4 sm:$0xff]   ;;  %v17675_v19 = vld [vmem:[%s19254_s9 + $0xc8] ss:$12 sps:$4 sm:$0xff]   ;;  %v17676_v33 = vld [vmem:[%s19254_s9 + $0xf0] ss:$12 sps:$4 sm:$0xff]  }
 0xac1   : > { %7889 = vmatprep.mubr.bf16.mxu1 %v7469_v62  ;;  %16314 = vmatprep.subr.bf16.mxu1 %v17645_v58  ;;  %v17668_v35 = vld [vmem:[%s19254_s9 + $0x10c] ss:$12 sps:$4 sm:$0xff]   ;;  %v17677_v21 = vld [vmem:[%s19254_s9 + $0x8] ss:$12 sps:$4 sm:$0xff]   ;;  %vm18738_vm12 = vmmov 0   ;;  %vm7978_vm13 = vcmask 1041408  }
 0xac2   : > { %7807 = vmatprep.mubr.bf16.mxu0 %v7469_v62  ;;  %v17671_v44 = vld [vmem:[%s19254_s9 + $0x108] ss:$12 sps:$4 sm:$0xff]   ;;  %v17681_v15 = vld [vmem:[%s19254_s9 + $0x1a0] ss:$12 sps:$4 sm:$0xff]   ;;  %v17680_v60 = vld [vmem:[%s19254_s9 + $0xd8] ss:$12 sps:$4 sm:$0xff]  }
 0xac3   : > { %7784 = vmatpush1.bf16.msra.mxu0 %v17629_v50  ;;  %v17673_v14 = vld [vmem:[%s19254_s9 + $0xf4] ss:$12 sps:$4 sm:$0xff]   ;;  %v17678_v6 = vld [vmem:[%s19254_s9 + $0xdc] ss:$12 sps:$4 sm:$0xff]   ;;  %v17682_v47 = vld [vmem:[%s19254_s9 + $0xc4] ss:$12 sps:$4 sm:$0xff]  }
 0xac4   : > { %7785 = vmatprep.subr.bf16.mxu0 %v17631_v5  ;;  %16315 = vmatpush3.bf16.msra.mxu1 %v17647_v54  ;;  %v17685_v53 = vld [vmem:[%s19254_s9 + $0x188] ss:$12 sps:$4 sm:$0xff]   ;;  %v17684_v28 = vld [vmem:[%s19254_s9 + $0xc0] ss:$12 sps:$4 sm:$0xff]   ;;  %v17689_v0 = vld [vmem:[%s19244_s3 + $0x90] ss:$12 sps:$4 sm:$0xff]  }
 0xac5   : > { %16316 = vmatprep.subr.bf16.mxu1 %v17650_v48  ;;  %v17686_v8 = vld [vmem:[%s19244_s3 + $0xa8] ss:$12 sps:$4 sm:$0xff]   ;;  %v17688_v52 = vld [vmem:[%s19244_s3 + $0xac] ss:$12 sps:$4 sm:$0xff]   ;;  %v17697_v27 = vld [vmem:[%s19244_s3 + $0x64] ss:$12 sps:$4 sm:$0xff]  }
 0xac6   : > { %v17691_v16 = vld [vmem:[%s19244_s3 + $0x94] ss:$12 sps:$4 sm:$0xff]   ;;  %v17694_v22 = vld [vmem:[%s19244_s3 + $0x7c] ss:$12 sps:$4 sm:$0xff]   ;;  %v17692_v24 = vld [vmem:[%s19244_s3 + $0x78] ss:$12 sps:$4 sm:$0xff]  }
 0xac7   : > { %7786 = vmatpush1.bf16.msra.mxu0 %v17635_v32  ;;  %v17695_v55 = vld [vmem:[%s19244_s3 + $0x60] ss:$12 sps:$4 sm:$0xff]   ;;  %v17698_v31 = vld [vmem:[%s19244_s3 + $0x48] ss:$12 sps:$4 sm:$0xff]   ;;  %v17701_v2 = vld [vmem:[%s19244_s3 + $0x30] ss:$12 sps:$4 sm:$0xff]  }
 0xac8   : > { %7787 = vmatprep.subr.bf16.mxu0 %v17637_v4  ;;  %16317 = vmatpush3.bf16.msra.mxu1 %v17652_v13  ;;  %v17700_v57 = vld [vmem:[%s19244_s3 + $0x4c] ss:$12 sps:$4 sm:$0xff]   ;;  %v17703_v39 = vld [vmem:[%s19244_s3 + $0x34] ss:$12 sps:$4 sm:$0xff]   ;;  %v17706_v23 = vld [vmem:[%s19244_s3 + $0x1c] ss:$12 sps:$4 sm:$0xff]  }
 0xac9   : > { %16318 = vmatprep.subr.bf16.mxu1 %v17655_v41  ;;  %v17704_v56 = vld [vmem:[%s19244_s3 + $0x18] ss:$12 sps:$4 sm:$0xff]   ;;  %v21035_v62 = vsub.s32 0, %v20951_v42  ;;  %v21041_v4 = vld [vmem:[%s19305_s30 + $0x10] sm:$0xff]  ;;  %v21044_v48 = vld [vmem:[%s19305_s30 + $0x8] sm:$0xff]  ;;  %vm7982_vm14 = vcmask 254976  }
 0xaca   : > { %v21038_v32 = vld [vmem:[%s19305_s30] sm:$0xff]  ;;  %s22781_s10 = sld [smem:[#allocation59_spill]]  ;;  %vm9936_vm15 = vcmask 1043456   ;;  %vm9940_vm0 = vcmask 1045504   ;;  %vm10044_vm1 = vcmask 130048   ;;  %vm13162_vm2 = vcmask 523264  }
 0xacb   : > { %7788 = vmatpush1.bf16.msra.mxu0 %v17640_v43  ;;  %v7474_v13 = vrot.slane %v21038_v32, %v21035_v62  ;;  %v7482_v41 = vrot.slane %v21041_v4, %v21035_v62  ;;  %s22783_s11 = sld [smem:[#allocation60_spill]]  ;;  %vm13577_vm3 = vcmask 1043458   ;;  %vm13579_vm5 = vcmask 259076  }
 0xacc   : > { %7789 = vmatprep.subr.bf16.mxu0 %v17643_v20  ;;  %16319 = vmatpush3.bf16.msra.mxu1 %v17657_v7  ;;  %s22791_s16 = sld [smem:[#allocation40_spill]]  ;;  %vm13578_vm4 = vmor %vm13577_vm3, %vm7978_vm13 }
 0xacd   : > { %16320 = vmatprep.subr.bf16.mxu1 %v17660_v46  ;;  %s22810_s7 = sld [smem:[#allocation61_spill]]  ;;  %vm13580_vm6 = vmor %vm13579_vm5, %vm13578_vm4 }
 0xacf   : > { %7790 = vmatpush1.bf16.msra.mxu0 %v17646_v36 }
 0xad0   : > { %7791 = vmatprep.subr.bf16.mxu0 %v17648_v3  ;;  %16321 = vmatpush3.bf16.msra.mxu1 %v17662_v29  ;;  %v7478_v3 = vrot.slane %v21044_v48, %v21035_v62 }
 0xad1   : > { %16322 = vmatprep.subr.bf16.mxu1 %v17665_v9 }
 0xad2   : > { %s22792_s5 = smov %s22791_s16 }
 0xad3   : > { %7792 = vmatpush2.bf16.msra.mxu0 %v17651_v1 }
 0xad4   : > { %7793 = vmatprep.subr.bf16.mxu0 %v17653_v63  ;;  %16323 = vmatpush3.bf16.msra.mxu1 %v17667_v12 }
 0xad5   : > { %16324 = vmatprep.subr.bf16.mxu1 %v17670_v40 }
 0xad7   : > { %7794 = vmatpush2.bf16.msra.mxu0 %v17656_v25 }
 0xad8   : > { %7795 = vmatprep.subr.bf16.mxu0 %v17658_v26  ;;  %16325 = vmatpush3.bf16.msra.mxu1 %v17672_v37 }
 0xad9   : > { %16326 = vmatprep.subr.bf16.mxu1 %v17675_v19  ;;  %v18258_v19 = vld [vmem:[#allocation3] sm:$0x3f] }
 0xadb   : > { %7796 = vmatpush2.bf16.msra.mxu0 %v17661_v11 }
 0xadc   : > { %7797 = vmatprep.subr.bf16.mxu0 %v17663_v17  ;;  %16327 = vmatpush3.bf16.msra.mxu1 %v17677_v21 }
 0xadd   : > { %16672 = vmatprep.subr.bf16.mxu1 %v22528_v51 }
 0xadf   : > { %7798 = vmatpush2.bf16.msra.mxu0 %v17666_v59  ;;  %7890 = vmatmul.mubr.bf16.vlgmr.msra.gmra.mxu1 %v7468_v34 }
 0xae0   : > { %7799 = vmatprep.subr.bf16.mxu0 %v17668_v35  ;;  %16673 = vmatpush3.bf16.msra.mxu1 %v17681_v15 }
 0xae1   : > { %16676 = vmatprep.mubr.msk.bf16.mxu1 %vm18738_vm12, %v22528_v51  ;;  %16674 = vmatprep.subr.bf16.mxu1 %v22528_v51 }
 0xae3   : > { %7800 = vmatpush2.bf16.msra.mxu0 %v17671_v44 }
 0xae4   : > { %7801 = vmatprep.subr.bf16.mxu0 %v17673_v14  ;;  %16675 = vmatpush3.bf16.msra.mxu1 %v17685_v53 }
 0xae5   : > { %8506 = vmatprep.subr.bf16.mxu1 %v17688_v52 }
 0xae7   : > { %7802 = vmatpush2.bf16.msra.mxu0 %v17676_v33  ;;  %16677 = vmatmul.mubr.msk.bf16.vlgmr.msra.gmra.mxu1 %vm7771_vm11, %v20970_v61 }
 0xae8   : > { %7803 = vmatprep.subr.bf16.mxu0 %v17678_v6  ;;  %8507 = vmatpush1.bf16.msra.mxu1 %v17686_v8 }
 0xae9   : > { %8508 = vmatprep.subr.bf16.mxu1 %v17691_v16 }
 0xaeb   : > { %7804 = vmatpush2.bf16.msra.mxu0 %v17680_v60 }
 0xaec   : > { %7805 = vmatprep.subr.bf16.mxu0 %v17682_v47  ;;  %8509 = vmatpush1.bf16.msra.mxu1 %v17689_v0 }
 0xaed   : > { %8510 = vmatprep.subr.bf16.mxu1 %v17694_v22 }
 0xaef   : > { %7806 = vmatpush2.bf16.msra.mxu0 %v17684_v28 }
 0xaf0   : > { %8511 = vmatpush1.bf16.msra.mxu1 %v17692_v24 }
 0xaf1   : > { %8512 = vmatprep.subr.bf16.mxu1 %v17697_v27 }
 0xaf2   : > { %7808 = vmatmul.mubr.bf16.vlgmr.msra.gmra.mxu0 %v7468_v34 }
 0xaf3   : > { %8579 = vmatprep.mubr.bf16.mxu0 %v22526_v45 }
 0xaf4   : > { %8513 = vmatpush1.bf16.msra.mxu1 %v17695_v55 }
 0xaf5   : > { %8514 = vmatprep.subr.bf16.mxu1 %v17700_v57 }
 0xaf8   : > { %8515 = vmatpush1.bf16.msra.mxu1 %v17698_v31  ;;  %v17709_v31 = vld [vmem:[%s19244_s3 + $0x4] ss:$12 sps:$4 sm:$0xff]  }
 0xaf9   : > { %8516 = vmatprep.subr.bf16.mxu1 %v17703_v39  ;;  %v17707_v39 = vld [vmem:[%s19244_s3] ss:$12 sps:$4 sm:$0xff]  }
 0xafc   : > { %8517 = vmatpush1.bf16.msra.mxu1 %v17701_v2  ;;  %v17712_v2 = vld [vmem:[%s19244_s3 + $0x16c] ss:$12 sps:$4 sm:$0xff]  }
 0xafd   : > { %8518 = vmatprep.subr.bf16.mxu1 %v17706_v23  ;;  %v17710_v23 = vld [vmem:[%s19244_s3 + $0x168] ss:$12 sps:$4 sm:$0xff]  }
 0xb00   : > { %8519 = vmatpush1.bf16.msra.mxu1 %v17704_v56  ;;  %v17715_v56 = vld [vmem:[%s19244_s3 + $0x154] ss:$12 sps:$4 sm:$0xff]  }
 0xb01   : > { %8520 = vmatprep.subr.bf16.mxu1 %v17709_v31 }
 0xb04   : > { %8521 = vmatpush1.bf16.msra.mxu1 %v17707_v39 }
 0xb05   : > { %8522 = vmatprep.subr.bf16.mxu1 %v17712_v2 }
 0xb08   : > { %8523 = vmatpush2.bf16.msra.mxu1 %v17710_v23 }
 0xb09   : > { %8524 = vmatprep.subr.bf16.mxu1 %v17715_v56 }
 0xb7f   : > { %v7850_v38 = vpop.f32.mrf.mxu1 }
 0xb81   : > { %v7852_v50 = vpop.f32.mrf.mxu1 }
 0xb83   : > { %v7854_v5 = vpop.f32.mrf.mxu1 }
 0xb84   : > { %v17716_v5 = vld [vmem:[%s19244_s3 + $0x138] ss:$12 sps:$4 sm:$0xff]  }
 0xb85   : > { %v7855_v10 = vpop.f32.mrf.mxu1 }
 0xb86   : > { %v17721_v10 = vld [vmem:[%s19244_s3 + $0x124] ss:$12 sps:$4 sm:$0xff]  }
 0xb9f   : > { %v16328_v30 = vpop.f32.mrf.mxu1 }
 0xba1   : > { %v16329_v18 = vpop.f32.mrf.mxu1 }
 0xba2   : > { %v16330_v20 = vadd.f32 %v16329_v18, %v16328_v30  ;;  %v17728_v30 = vld [vmem:[%s19244_s3 + $0x198] ss:$12 sps:$4 sm:$0xff]   ;;  %v17730_v18 = vld [vmem:[%s19244_s3 + $0x19c] ss:$12 sps:$4 sm:$0xff]  }
 0xba3   : > { %v16331_v61 = vpop.f32.mrf.mxu1  ;;  %8559 = vmatprep.subr.bf16.mxu0 %v17730_v18  ;;  %v17745_v18 = vld [vmem:[%s19244_s3 + $0x158] ss:$12 sps:$4 sm:$0xff]  }
 0xba4   : > { %v7892_v63 = vadd.f32 %v16330_v20, %v7482_v41  ;;  %v17736_v61 = vld [vmem:[%s19244_s3 + $0x184] ss:$12 sps:$4 sm:$0xff]   ;;  %8560 = vmatpush1.bf16.msra.mxu0 %v17728_v30  ;;  %v17727_v41 = vld [vmem:[%s19244_s3 + $0xf4] ss:$12 sps:$4 sm:$0xff]  }
 0xba5   : > { %v16332_v58 = vpop.f32.mrf.mxu1  ;;  %8561 = vmatprep.subr.bf16.mxu0 %v17736_v61  ;;  %v17740_v20 = vld [vmem:[%s19244_s3 + $0x170] ss:$12 sps:$4 sm:$0xff]  }
 0xba6   : > { %v17719_v58 = vld [vmem:[%s19244_s3 + $0x120] ss:$12 sps:$4 sm:$0xff]  }
 0xba7   : > { %v7931_v54 = vpop.f32.mrf.mxu1  ;;  %v17749_v61 = vld [vmem:[%s22781_s10 + $0x184] ss:$12 sps:$4 sm:$0xff]  }
 0xba8   : > { %v7932_v12 = vadd.f32 %v7931_v54, %v7892_v63  ;;  %v17734_v54 = vld [vmem:[%s19244_s3 + $0x180] ss:$12 sps:$4 sm:$0xff]  }
 0xba9   : > { %v16678_v43 = vpop.f32.mrf.mxu1  ;;  %8562 = vmatpush1.bf16.msra.mxu0 %v17734_v54  ;;  %v17744_v63 = vld [vmem:[%s22781_s10 + $0x19c] ss:$12 sps:$4 sm:$0xff]   ;;  %v17747_v54 = vld [vmem:[%s22781_s10 + $0x180] ss:$12 sps:$4 sm:$0xff]  }
 0xbaa   : > { %v7954_v59 = vrot.slane %v7932_v12, %v20959_v49  ;;  %v17724_v43 = vld [vmem:[%s19244_s3 + $0x10c] ss:$12 sps:$4 sm:$0xff]   ;;  %16337 = vmatprep.subr.bf16.mxu0 %v17740_v20 }
 0xbab   : > { %v7934_v36 = vpop.f32.mrf.mxu1  ;;  %v7372_v20 = vld [vmem:[#allocation2 + $0x10] sm:$0xff] }
 0xbac   : > { %v17725_v36 = vld [vmem:[%s19244_s3 + $0xf0] ss:$12 sps:$4 sm:$0xff]  }
 0xbad   : > { %v16679_v46 = vpop.f32.mrf.mxu1 }
 0xbae   : > { %v17739_v46 = vld [vmem:[%s19244_s3 + $0xc4] ss:$12 sps:$4 sm:$0xff]  }
 0xbb2   : > { %v7809_v7 = vpop.f32.mrf.mxu0 }
 0xbb3   : > { %v7810_v1 = vadd.f32 %v7809_v7, %v7474_v13  ;;  %v17722_v13 = vld [vmem:[%s19244_s3 + $0x108] ss:$12 sps:$4 sm:$0xff]   ;;  %v17731_v7 = vld [vmem:[%s19244_s3 + $0xd8] ss:$12 sps:$4 sm:$0xff]  }
 0xbb4   : > { %v7811_v29 = vpop.f32.mrf.mxu0 }
 0xbb5   : > { %v7812_v9 = vadd.f32 %v7811_v29, %v7478_v3  ;;  %v7851_v26 = vadd.f32 %v7850_v38, %v7810_v1  ;;  %v17713_v38 = vld [vmem:[%s19244_s3 + $0x150] ss:$12 sps:$4 sm:$0xff]   ;;  %v17737_v1 = vld [vmem:[%s19244_s3 + $0xc0] ss:$12 sps:$4 sm:$0xff]  }
 0xbb6   : > { %v7813_v25 = vpop.f32.mrf.mxu0  ;;  %8525 = vmatpush2.bf16.msra.mxu1 %v17713_v38  ;;  %v17733_v3 = vld [vmem:[%s19244_s3 + $0xdc] ss:$12 sps:$4 sm:$0xff]  }
 0xbb7   : > { %v7853_v40 = vadd.f32 %v7852_v50, %v7812_v9  ;;  %v17718_v50 = vld [vmem:[%s19244_s3 + $0x13c] ss:$12 sps:$4 sm:$0xff]  }
 0xbb8   : > { %v7814_v11 = vpop.f32.mrf.mxu0  ;;  %8526 = vmatprep.subr.bf16.mxu1 %v17718_v50  ;;  %v17741_v38 = vld [vmem:[%s19244_s3 + $0xb0] ss:$12 sps:$4 sm:$0xff]  }
 0xbb9   : > { %v7940_v17 = vcombine.low %v7851_v26, %v7853_v40  ;;  %v18739_v11 = vmov 269488144  }
 0xbba   : > { %8527 = vmatpush2.bf16.msra.mxu1 %v17716_v5 }
 0xbbb   : > { %v7947_v37 = vrot.slane %v7940_v17, %v20959_v49  ;;  %8528 = vmatprep.subr.bf16.mxu1 %v17721_v10  ;;  %v8024_v17 = vunpack.c.l.s4 %v18739_v11  ;;  %v17742_v10 = vld [vmem:[%s22781_s10 + $0x198] ss:$12 sps:$4 sm:$0xff]  }
 0xbbc   : > { %v17759_v11 = vld [vmem:[%s19244_s3 + $0x50] ss:$12 sps:$4 sm:$0xff]  }
 0xbbd   : > { %v7955_v35 = vcombine.low %v7947_v37, %v7954_v59  ;;  %v21096_v37 = vsub.s32 6, %v20951_v42 }
 0xbbe   : > { %8529 = vmatpush2.bf16.msra.mxu1 %v17719_v58  ;;  %v17746_v58 = vld [vmem:[%s19244_s3 + $0x98] ss:$12 sps:$4 sm:$0xff]  }
 0xbbf   : > { %v21054_v21 = vadd.f32 %v18258_v19, %v7955_v35  ;;  %8530 = vmatprep.subr.bf16.mxu1 %v17724_v43  ;;  %v21099_v35 = vsub.s32 7, %v20951_v42  ;;  %v8025_v19 = vunpack.c.0.s8 %v8024_v17  ;;  %v17750_v43 = vld [vmem:[%s19244_s3 + $0x140] ss:$12 sps:$4 sm:$0xff]  }
 0xbc0   : > { %v17761_v17 = vld [vmem:[%s22781_s10 + $0x80] ss:$12 sps:$4 sm:$0xff]  }
 0xbc1   : > { %v7959_v44 = vcombine.high %v21054_v21, %v21054_v21  ;;  %v7966_v14 = vrot.slane %v21054_v21, %v20959_v49  ;;  %v7989_v15 = vmul.f32 %v21054_v21, %v21054_v21 }
 0xbc2   : > { %8531 = vmatpush2.bf16.msra.mxu1 %v17722_v13  ;;  %v7375_v13 = vld [vmem:[#allocation2 + $0x28] sm:$0xff] }
 0xbc3   : > { %v7973_v34 = vrot.slane %v7959_v44, %v20959_v49  ;;  %v7974_v33 = vcombine.high %v7966_v14, %v7966_v14  ;;  %v7991_v6 = vcombine.high %v7989_v15, %v7989_v15  ;;  %v7998_v53 = vrot.slane %v7989_v15, %v20959_v49  ;;  %8532 = vmatprep.subr.bf16.mxu1 %v17727_v41  ;;  %v17752_v41 = vld [vmem:[%s22781_s10 + $0x170] ss:$12 sps:$4 sm:$0xff]  }
 0xbc4   : > { %v7979_v60 = vsel %vm7978_vm13, %v7966_v14, 0.0  ;;  %v8045_v44 = vrot.slane %v21038_v32, %v21096_v37  ;;  %v8049_v14 = vrot.slane %v21044_v48, %v21096_v37  ;;  %v8078_v15 = vrot.slane %v21038_v32, %v21099_v35 }
 0xbc5   : > { %v7980_v47 = vsel %vm7978_vm13, %v7974_v33, 0.0  ;;  %v8006_v8 = vcombine.high %v7998_v53, %v7998_v53  ;;  %v7983_v52 = vsel %vm7982_vm14, %v7973_v34, 0.0  ;;  %v8005_v16 = vrot.slane %v7991_v6, %v20959_v49 }
 0xbc6   : > { %v7981_v28 = vadd.f32 %v7980_v47, %v7979_v60  ;;  %v8010_v22 = vsel %vm7978_vm13, %v7998_v53, 0.0  ;;  %8533 = vmatpush2.bf16.msra.mxu1 %v17725_v36  ;;  %v8082_v34 = vrot.slane %v21044_v48, %v21099_v35  ;;  %v21110_v33 = vsub.s32 %v8025_v19, %v20951_v42  ;;  %v7371_v36 = vld [vmem:[#allocation2 + $0x8] sm:$0xff] }
 0xbc7   : > { %v8011_v24 = vsel %vm7978_vm13, %v8006_v8, 0.0  ;;  %v8013_v55 = vsel %vm7982_vm14, %v8005_v16, 0.0  ;;  %8534 = vmatprep.subr.bf16.mxu1 %v17733_v3  ;;  %v8053_v6 = vrot.slane %v21041_v4, %v21096_v37  ;;  %v8057_v53 = vcombine.low %v8045_v44, %v8049_v14  ;;  %v7374_v3 = vld [vmem:[#allocation2 + $0x20] sm:$0xff]  ;;  %v17764_v19 = vld [vmem:[%s22781_s10 + $0x128] ss:$12 sps:$4 sm:$0xff]  }
 0xbc8   : > { %v7984_v0 = vadd.f32 %v7983_v52, %v7981_v28  ;;  %v8012_v27 = vadd.f32 %v8011_v24, %v8010_v22  ;;  %22782 = vst [vmem:[#allocation110_spill] sm:$0xff] %v21110_v33  ;;  %v8086_v60 = vrot.slane %v21041_v4, %v21099_v35  ;;  %v8090_v47 = vcombine.low %v8078_v15, %v8082_v34  ;;  %v17763_v44 = vld [vmem:[%s19244_s3 + $0x38] ss:$12 sps:$4 sm:$0xff]   ;;  %v17766_v15 = vld [vmem:[%s19244_s3 + $0xe0] ss:$12 sps:$4 sm:$0xff]  }
 0xbc9   : > { %v8064_v8 = vrot.slane %v8057_v53, %v20959_v49  ;;  %v8071_v52 = vrot.slane %v8053_v6, %v20959_v49  ;;  %v17765_v14 = vld [vmem:[%s22781_s10 + $0x68] ss:$12 sps:$4 sm:$0xff]   ;;  %v17768_v34 = vld [vmem:[%s22781_s10 + $0x110] ss:$12 sps:$4 sm:$0xff]  }
 0xbca   : > { %7985 = vadd.xlane.f32.xlu0 %v7984_v0  ;;  %v8014_v57 = vadd.f32 %v8013_v55, %v8012_v27  ;;  %8535 = vmatpush2.bf16.msra.mxu1 %v17731_v7  ;;  %v8097_v16 = vrot.slane %v8090_v47, %v20959_v49  ;;  %v8104_v0 = vrot.slane %v8086_v60, %v20959_v49  ;;  %v17751_v7 = vld [vmem:[%s19244_s3 + $0x80] ss:$12 sps:$4 sm:$0xff]   ;;  %v17770_v60 = vld [vmem:[%s19244_s3 + $0xc8] ss:$12 sps:$4 sm:$0xff]  }
 0xbcb   : > { %8536 = vmatprep.subr.bf16.mxu1 %v17739_v46  ;;  %v8072_v4 = vcombine.low %v8064_v8, %v8071_v52  ;;  %v21147_v46 = vpack.c.bf16 %v7375_v13, %v7372_v20  ;;  %v17767_v6 = vld [vmem:[%s19244_s3 + $0x20] ss:$12 sps:$4 sm:$0xff]  }
 0xbcc   : > { %v17769_v53 = vld [vmem:[%s22781_s10 + $0x50] ss:$12 sps:$4 sm:$0xff]   ;;  %v17772_v47 = vld [vmem:[%s22781_s10 + $0xf8] ss:$12 sps:$4 sm:$0xff]   ;;  %v17775_v52 = vld [vmem:[%s22781_s10 + $0xe0] ss:$12 sps:$4 sm:$0xff]  }
 0xbcd   : > { %v17773_v8 = vld [vmem:[%s22781_s10 + $0x38] ss:$12 sps:$4 sm:$0xff]   ;;  %v17794_v20 = vld [vmem:[%s22781_s10 + $0x48] ss:$12 sps:$4 sm:$0xff]  }
 0xbce   : > { %8015 = vadd.xlane.f32.xlu0 %v8014_v57  ;;  %8537 = vmatpush2.bf16.msra.mxu1 %v17737_v1  ;;  %v8105_v57 = vcombine.low %v8097_v16, %v8104_v0  ;;  %v17753_v1 = vld [vmem:[%s22781_s10 + $0xb0] ss:$12 sps:$4 sm:$0xff]   ;;  %v17776_v0 = vld [vmem:[%s22781_s10 + $0x20] ss:$12 sps:$4 sm:$0xff]  }
 0xbcf   : > { %9101 = vmatprep.subr.bf16.mxu1 %v17744_v63  ;;  %v17754_v63 = vld [vmem:[%s19244_s3 + $0x128] ss:$12 sps:$4 sm:$0xff]   ;;  %v17774_v16 = vld [vmem:[%s19244_s3 + $0x1a0] ss:$12 sps:$4 sm:$0xff]  }
 0xbd0   : > { %v17799_v13 = vld [vmem:[%s22781_s10 + $0x34] ss:$12 sps:$4 sm:$0xff]  }
 0xc53   : > { %v7986_v29 = vpop.xlane.xlu0 %7985 }
 0xc54   : > { %v7988_v9 = vmul.f32 0.0034722222, %v7986_v29  ;;  %v17756_v29 = vld [vmem:[%s22781_s10 + $0x158] ss:$12 sps:$4 sm:$0xff]  }
 0xc56   : > { %v8018_v26 = vmul.f32 %v7988_v9, %v7988_v9  ;;  %v8029_v28 = vrot.slane %v7988_v9, %v21110_v33  ;;  %v21152_v9 = vpack.c.bf16 %v7374_v3, %v7371_v36  ;;  %v17802_v36 = vld [vmem:[%s22781_s10 + $0x1c] ss:$12 sps:$4 sm:$0xff]   ;;  %v17800_v3 = vld [vmem:[%s22781_s10 + $0x18] ss:$12 sps:$4 sm:$0xff]  }
 0xc57   : > { %v8016_v25 = vpop.xlane.xlu0 %8015 }
 0xc58   : > { %v8017_v12 = vmul.f32 0.0034722222, %v8016_v25  ;;  %v8031_v24 = vsub.f32 %v21054_v21, %v8029_v28  ;;  %v17755_v25 = vld [vmem:[%s19244_s3 + $0x68] ss:$12 sps:$4 sm:$0xff]  }
 0xc59   : > { %v17771_v28 = vld [vmem:[%s19244_s3 + $0x8] ss:$12 sps:$4 sm:$0xff]  }
 0xc5a   : > { %v8019_v40 = vsub.f32 %v8017_v12, %v8018_v26  ;;  %v17757_v26 = vld [vmem:[%s22781_s10 + $0x98] ss:$12 sps:$4 sm:$0xff]  }
 0xc5b   : > { %v17758_v12 = vld [vmem:[%s19244_s3 + $0x110] ss:$12 sps:$4 sm:$0xff]  }
 0xc5c   : > { %v8020_v59 = vadd.f32 1e-05, %v8019_v40  ;;  %v17760_v40 = vld [vmem:[%s22781_s10 + $0x140] ss:$12 sps:$4 sm:$0xff]  }
 0xc5e   : > { %18244 = vrsqrt.f32 %v8020_v59  ;;  %v17762_v59 = vld [vmem:[%s19244_s3 + $0xf8] ss:$12 sps:$4 sm:$0xff]  }
 0xc6b   : > { %v18245_v22 = vpop.eup %18244 }
 0xc6c   : > { %v8039_v27 = vrot.slane %v18245_v22, %v21110_v33  ;;  %v17778_v22 = vld [vmem:[%s22781_s10 + $0xc8] ss:$12 sps:$4 sm:$0xff]  }
 0xc6e   : > { %v8041_v55 = vmul.f32 %v8039_v27, %v8031_v24  ;;  %v17777_v24 = vld [vmem:[%s19244_s3 + $0x188] ss:$12 sps:$4 sm:$0xff]  }
 0xc6f   : > { %v17779_v27 = vld [vmem:[%s22781_s10 + $0x8] ss:$12 sps:$4 sm:$0xff]  }
 0xc70   : > { %v8074_v31 = vmul.f32 %v8072_v4, %v8041_v55  ;;  %v17782_v4 = vld [vmem:[%s22781_s10 + $0xac] ss:$12 sps:$4 sm:$0xff]   ;;  %v7370_v55 = vld [vmem:[#allocation2] sm:$0xff] }
 0xc72   : > { %v21123_v39 = vadd.f32 %v8105_v57, %v8074_v31  ;;  %v7373_v57 = vld [vmem:[#allocation2 + $0x18] sm:$0xff]  ;;  %v17780_v31 = vld [vmem:[%s22781_s10 + $0xa8] ss:$12 sps:$4 sm:$0xff]  }
 0xc74   : > { %v8188_v2 = vrot.slane %v21123_v39, %v20959_v49  ;;  %v8181_v23 = vcombine.high %v21123_v39, %v21123_v39 }
 0xc76   : > { %v8196_v56 = vcombine.high %v8188_v2, %v8188_v2  ;;  %v8195_v21 = vrot.slane %v8181_v23, %v20959_v49  ;;  %v21134_v30 = vpack.c.bf16 %v8188_v2, %v8188_v2  ;;  %v21188_v2 = vpack.c.bf16 %v7373_v57, %v7370_v55  ;;  %v17783_v23 = vld [vmem:[%s22781_s10 + $0x1a0] ss:$12 sps:$4 sm:$0xff]   ;;  %v17826_v55 = vld [vmem:[%s22781_s10 + $0xdc] ss:$12 sps:$4 sm:$0xff]  }
 0xc77   : > { %v17881_v57 = vld [vmem:[%s22783_s11 + $0x150] ss:$12 sps:$4 sm:$0xff]  }
 0xc78   : > { %v8201_v50 = vpack.c.bf16 %v8196_v56, %v8196_v56  ;;  %v21131_v5 = vpack.c.bf16 %v8195_v21, %v8195_v21  ;;  %v17786_v56 = vld [vmem:[%s22781_s10 + $0x94] ss:$12 sps:$4 sm:$0xff]   ;;  %v17784_v21 = vld [vmem:[%s22781_s10 + $0x90] ss:$12 sps:$4 sm:$0xff]  }
 0xc7a   : > { %8538 = vmatprep.mubr.bf16.mxu1 %v8201_v50  ;;  %15619 = vmatmul.mubr.msk.bf16.vlgmr.msra.gmra.mxu0 %vm7771_vm11, %v21131_v5 }
 0xc7b   : > { %16338 = vmatpush3.bf16.msra.mxu0 %v17741_v38  ;;  %8539 = vmatmul.mubr.bf16.vlgmr.msra.gmra.mxu1 %v21134_v30  ;;  %v17787_v38 = vld [vmem:[%s22781_s10 + $0x188] ss:$12 sps:$4 sm:$0xff]  }
 0xc7c   : > { %8620 = vmatprep.mubr.bf16.mxu0 %v8201_v50  ;;  %9102 = vmatpush1.bf16.msra.mxu1 %v17742_v10  ;;  %v17790_v50 = vld [vmem:[%s22781_s10 + $0x7c] ss:$12 sps:$4 sm:$0xff]   ;;  %v17847_v10 = vld [vmem:[%s22783_s11 + $0xac] ss:$12 sps:$4 sm:$0xff]  }
 0xc7d   : > { %16339 = vmatprep.subr.bf16.mxu0 %v17745_v18  ;;  %9103 = vmatprep.subr.bf16.mxu1 %v17749_v61  ;;  %v17845_v18 = vld [vmem:[%s22783_s11 + $0xa8] ss:$12 sps:$4 sm:$0xff]  }
 0xc7e   : > { %9121 = vmatprep.mubr.bf16.mxu1 %v22526_v45  ;;  %v17852_v61 = vld [vmem:[%s22783_s11 + $0x94] ss:$12 sps:$4 sm:$0xff]  }
 0xc7f   : > { %16340 = vmatpush3.bf16.msra.mxu0 %v17746_v58  ;;  %v17791_v58 = vld [vmem:[%s22781_s10 + $0x60] ss:$12 sps:$4 sm:$0xff]  }
 0xc80   : > { %9104 = vmatpush1.bf16.msra.mxu1 %v17747_v54  ;;  %16341 = vmatprep.subr.bf16.mxu0 %v17750_v43  ;;  %v17796_v54 = vld [vmem:[%s22781_s10 + $0x4c] ss:$12 sps:$4 sm:$0xff]   ;;  %v17850_v43 = vld [vmem:[%s22783_s11 + $0x90] ss:$12 sps:$4 sm:$0xff]  }
 0xc81   : > { %16362 = vmatprep.subr.bf16.mxu1 %v17752_v41  ;;  %v17797_v41 = vld [vmem:[%s22781_s10 + $0x30] ss:$12 sps:$4 sm:$0xff]  }
 0xc83   : > { %16342 = vmatpush3.bf16.msra.mxu0 %v17751_v7  ;;  %15675 = vmatmul.mubr.msk.bf16.vlgmr.msra.gmra.mxu1 %vm7771_vm11, %v21147_v46  ;;  %v17805_v7 = vld [vmem:[%s22781_s10 + $0x4] ss:$12 sps:$4 sm:$0xff]  }
 0xc84   : > { %16363 = vmatpush3.bf16.msra.mxu1 %v17753_v1  ;;  %16343 = vmatprep.subr.bf16.mxu0 %v17754_v63  ;;  %v17857_v1 = vld [vmem:[%s22783_s11 + $0x7c] ss:$12 sps:$4 sm:$0xff]   ;;  %v17803_v63 = vld [vmem:[%s22781_s10] ss:$12 sps:$4 sm:$0xff]  }
 0xc85   : > { %16364 = vmatprep.subr.bf16.mxu1 %v17756_v29  ;;  %9164 = vmatprep.mubr.bf16.mxu1 %v21152_v9  ;;  %v17855_v29 = vld [vmem:[%s22783_s11 + $0x78] ss:$12 sps:$4 sm:$0xff]  }
 0xc87   : > { %16344 = vmatpush3.bf16.msra.mxu0 %v17755_v25  ;;  %v17808_v25 = vld [vmem:[%s22781_s10 + $0x16c] ss:$12 sps:$4 sm:$0xff]  }
 0xc88   : > { %16365 = vmatpush3.bf16.msra.mxu1 %v17757_v26  ;;  %16345 = vmatprep.subr.bf16.mxu0 %v17758_v12  ;;  %v17862_v26 = vld [vmem:[%s22783_s11 + $0x64] ss:$12 sps:$4 sm:$0xff]   ;;  %v17806_v12 = vld [vmem:[%s22781_s10 + $0x168] ss:$12 sps:$4 sm:$0xff]  }
 0xc89   : > { %16366 = vmatprep.subr.bf16.mxu1 %v17760_v40  ;;  %v17860_v40 = vld [vmem:[%s22783_s11 + $0x60] ss:$12 sps:$4 sm:$0xff]  }
 0xc8b   : > { %16346 = vmatpush3.bf16.msra.mxu0 %v17759_v11  ;;  %v17811_v11 = vld [vmem:[%s22781_s10 + $0x154] ss:$12 sps:$4 sm:$0xff]  }
 0xc8c   : > { %16367 = vmatpush3.bf16.msra.mxu1 %v17761_v17  ;;  %16347 = vmatprep.subr.bf16.mxu0 %v17762_v59  ;;  %v17864_v17 = vld [vmem:[%s22783_s11 + $0x48] ss:$12 sps:$4 sm:$0xff]   ;;  %v17866_v59 = vld [vmem:[%s22783_s11 + $0x4c] ss:$12 sps:$4 sm:$0xff]  }
 0xc8d   : > { %16368 = vmatprep.subr.bf16.mxu1 %v17764_v19  ;;  %v17870_v19 = vld [vmem:[%s22783_s11 + $0x34] ss:$12 sps:$4 sm:$0xff]  }
 0xc8f   : > { %16348 = vmatpush3.bf16.msra.mxu0 %v17763_v44  ;;  %v17809_v44 = vld [vmem:[%s22781_s10 + $0x150] ss:$12 sps:$4 sm:$0xff]  }
 0xc90   : > { %16369 = vmatpush3.bf16.msra.mxu1 %v17765_v14  ;;  %16349 = vmatprep.subr.bf16.mxu0 %v17766_v15  ;;  %v17814_v14 = vld [vmem:[%s22781_s10 + $0x13c] ss:$12 sps:$4 sm:$0xff]  }
 0xc91   : > { %16370 = vmatprep.subr.bf16.mxu1 %v17768_v34  ;;  %v17868_v15 = vld [vmem:[%s22783_s11 + $0x30] ss:$12 sps:$4 sm:$0xff]  }
 0xc92   : > { %v17874_v34 = vld [vmem:[%s22783_s11 + $0x1c] ss:$12 sps:$4 sm:$0xff]  }
 0xc93   : > { %16350 = vmatpush3.bf16.msra.mxu0 %v17767_v6  ;;  %v17812_v6 = vld [vmem:[%s22781_s10 + $0x138] ss:$12 sps:$4 sm:$0xff]  }
 0xc94   : > { %16371 = vmatpush3.bf16.msra.mxu1 %v17769_v53  ;;  %16351 = vmatprep.subr.bf16.mxu0 %v17770_v60  ;;  %v17817_v53 = vld [vmem:[%s22781_s10 + $0x124] ss:$12 sps:$4 sm:$0xff]  }
 0xc95   : > { %16372 = vmatprep.subr.bf16.mxu1 %v17772_v47  ;;  %v17872_v60 = vld [vmem:[%s22783_s11 + $0x18] ss:$12 sps:$4 sm:$0xff]   ;;  %v17815_v47 = vld [vmem:[%s22781_s10 + $0x120] ss:$12 sps:$4 sm:$0xff]  }
 0xc97   : > { %16352 = vmatpush3.bf16.msra.mxu0 %v17771_v28  ;;  %v17820_v28 = vld [vmem:[%s22781_s10 + $0x10c] ss:$12 sps:$4 sm:$0xff]  }
 0xc98   : > { %16373 = vmatpush3.bf16.msra.mxu1 %v17773_v8  ;;  %16680 = vmatprep.subr.bf16.mxu0 %v22528_v51  ;;  %v17877_v8 = vld [vmem:[%s22783_s11 + $0x4] ss:$12 sps:$4 sm:$0xff]  }
 0xc99   : > { %16374 = vmatprep.subr.bf16.mxu1 %v17775_v52  ;;  %v17875_v52 = vld [vmem:[%s22783_s11] ss:$12 sps:$4 sm:$0xff]  }
 0xc9a   : > { %8621 = vmatmul.mubr.bf16.vlgmr.msra.gmra.mxu0 %v21134_v30  ;;  %v17793_v30 = vld [vmem:[%s22781_s10 + $0x64] ss:$12 sps:$4 sm:$0xff]  }
 0xc9b   : > { %16681 = vmatpush3.bf16.msra.mxu0 %v17774_v16  ;;  %16684 = vmatprep.mubr.msk.bf16.mxu0 %vm18738_vm12, %v22528_v51  ;;  %v17880_v16 = vld [vmem:[%s22783_s11 + $0x16c] ss:$12 sps:$4 sm:$0xff]  }
 0xc9c   : > { %16375 = vmatpush3.bf16.msra.mxu1 %v17776_v0  ;;  %16682 = vmatprep.subr.bf16.mxu0 %v22528_v51  ;;  %v17818_v0 = vld [vmem:[%s22781_s10 + $0x108] ss:$12 sps:$4 sm:$0xff]  }
 0xc9d   : > { %16376 = vmatprep.subr.bf16.mxu1 %v17778_v22  ;;  %v17823_v22 = vld [vmem:[%s22781_s10 + $0xf4] ss:$12 sps:$4 sm:$0xff]  }
 0xc9f   : > { %16683 = vmatpush3.bf16.msra.mxu0 %v17777_v24  ;;  %v17878_v24 = vld [vmem:[%s22783_s11 + $0x168] ss:$12 sps:$4 sm:$0xff]  }
 0xca0   : > { %16377 = vmatpush3.bf16.msra.mxu1 %v17779_v27  ;;  %9046 = vmatprep.subr.bf16.mxu0 %v17782_v4  ;;  %v17883_v27 = vld [vmem:[%s22783_s11 + $0x154] ss:$12 sps:$4 sm:$0xff]   ;;  %v17821_v4 = vld [vmem:[%s22781_s10 + $0xf0] ss:$12 sps:$4 sm:$0xff]  }
 0xca1   : > { %16688 = vmatprep.subr.bf16.mxu1 %v22528_v51 }
 0xca2   : > { %16685 = vmatmul.mubr.msk.bf16.vlgmr.msra.gmra.mxu0 %vm7771_vm11, %v21131_v5  ;;  %v17788_v5 = vld [vmem:[%s22781_s10 + $0x78] ss:$12 sps:$4 sm:$0xff]  }
 0xca3   : > { %9047 = vmatpush1.bf16.msra.mxu0 %v17780_v31  ;;  %9165 = vmatmul.mubr.bf16.vlgmr.msra.gmra.mxu1 %v21188_v2  ;;  %v17824_v31 = vld [vmem:[%s22781_s10 + $0xd8] ss:$12 sps:$4 sm:$0xff]  }
 0xca4   : > { %16689 = vmatpush3.bf16.msra.mxu1 %v17783_v23  ;;  %9048 = vmatprep.subr.bf16.mxu0 %v17786_v56  ;;  %v17829_v23 = vld [vmem:[%s22781_s10 + $0xc4] ss:$12 sps:$4 sm:$0xff]   ;;  %v17886_v56 = vld [vmem:[%s22783_s11 + $0x13c] ss:$12 sps:$4 sm:$0xff]  }
 0xca5   : > { %16690 = vmatprep.subr.bf16.mxu1 %v22528_v51  ;;  %16692 = vmatprep.mubr.msk.bf16.mxu1 %vm18738_vm12, %v22528_v51 }
 0xca6   : > { %9078 = vmatprep.mubr.bf16.mxu0 %v21152_v9 }
 0xca7   : > { %9049 = vmatpush1.bf16.msra.mxu0 %v17784_v21  ;;  %v17827_v21 = vld [vmem:[%s22781_s10 + $0xc0] ss:$12 sps:$4 sm:$0xff]  }
 0xca8   : > { %16691 = vmatpush3.bf16.msra.mxu1 %v17787_v38  ;;  %9050 = vmatprep.subr.bf16.mxu0 %v17790_v50  ;;  %v17884_v38 = vld [vmem:[%s22783_s11 + $0x138] ss:$12 sps:$4 sm:$0xff]   ;;  %v17832_v50 = vld [vmem:[%s22783_s11 + $0x19c] ss:$12 sps:$4 sm:$0xff]  }
 0xca9   : > { %9586 = vmatprep.subr.bf16.mxu1 %v17847_v10  ;;  %v17889_v10 = vld [vmem:[%s22783_s11 + $0x124] ss:$12 sps:$4 sm:$0xff]  }
 0xcab   : > { %9051 = vmatpush1.bf16.msra.mxu0 %v17788_v5  ;;  %16693 = vmatmul.mubr.msk.bf16.vlgmr.msra.gmra.mxu1 %vm7771_vm11, %v21147_v46  ;;  %v17830_v5 = vld [vmem:[%s22783_s11 + $0x198] ss:$12 sps:$4 sm:$0xff]  }
 0xcac   : > { %9052 = vmatprep.subr.bf16.mxu0 %v17793_v30  ;;  %9587 = vmatpush1.bf16.msra.mxu1 %v17845_v18  ;;  %v17887_v30 = vld [vmem:[%s22783_s11 + $0x120] ss:$12 sps:$4 sm:$0xff]   ;;  %v17835_v18 = vld [vmem:[%s22783_s11 + $0x184] ss:$12 sps:$4 sm:$0xff]  }
 0xcad   : > { %9588 = vmatprep.subr.bf16.mxu1 %v17852_v61  ;;  %9618 = vmatprep.mubr.bf16.mxu1 %v21152_v9  ;;  %v17892_v61 = vld [vmem:[%s22783_s11 + $0x10c] ss:$12 sps:$4 sm:$0xff]  }
 0xcaf   : > { %9053 = vmatpush1.bf16.msra.mxu0 %v17791_v58  ;;  %v17833_v58 = vld [vmem:[%s22783_s11 + $0x180] ss:$12 sps:$4 sm:$0xff]  }
 0xcb0   : > { %9054 = vmatprep.subr.bf16.mxu0 %v17796_v54  ;;  %9589 = vmatpush1.bf16.msra.mxu1 %v17850_v43  ;;  %v17890_v54 = vld [vmem:[%s22783_s11 + $0x108] ss:$12 sps:$4 sm:$0xff]   ;;  %v17836_v43 = vld [vmem:[%s22783_s11 + $0x170] ss:$12 sps:$4 sm:$0xff]  }
 0xcb1   : > { %9590 = vmatprep.subr.bf16.mxu1 %v17857_v1  ;;  %v17896_v1 = vld [vmem:[%s22783_s11 + $0xd8] ss:$12 sps:$4 sm:$0xff]  }
 0xcb3   : > { %9055 = vmatpush1.bf16.msra.mxu0 %v17794_v20  ;;  %v17895_v20 = vld [vmem:[%s22783_s11 + $0xf4] ss:$12 sps:$4 sm:$0xff]  }
 0xcb4   : > { %9056 = vmatprep.subr.bf16.mxu0 %v17799_v13  ;;  %9591 = vmatpush1.bf16.msra.mxu1 %v17855_v29  ;;  %v17837_v13 = vld [vmem:[%s22783_s11 + $0xb0] ss:$12 sps:$4 sm:$0xff]  }
 0xcb5   : > { %9592 = vmatprep.subr.bf16.mxu1 %v17862_v26  ;;  %v17901_v29 = vld [vmem:[%s22783_s11 + $0xc4] ss:$12 sps:$4 sm:$0xff]   ;;  %v17899_v26 = vld [vmem:[%s22783_s11 + $0xc0] ss:$12 sps:$4 sm:$0xff]  }
 0xcb7   : > { %9057 = vmatpush1.bf16.msra.mxu0 %v17797_v41  ;;  %v17893_v41 = vld [vmem:[%s22783_s11 + $0xf0] ss:$12 sps:$4 sm:$0xff]  }
 0xcb8   : > { %9058 = vmatprep.subr.bf16.mxu0 %v17802_v36  ;;  %9593 = vmatpush1.bf16.msra.mxu1 %v17860_v40  ;;  %v17838_v36 = vld [vmem:[%s22783_s11 + $0x158] ss:$12 sps:$4 sm:$0xff]   ;;  %v17844_v40 = vld [vmem:[%s22783_s11 + $0x110] ss:$12 sps:$4 sm:$0xff]  }
 0xcb9   : > { %9594 = vmatprep.subr.bf16.mxu1 %v17866_v59  ;;  %v17853_v59 = vld [vmem:[%s22783_s11 + $0x38] ss:$12 sps:$4 sm:$0xff]  }
 0xcbb   : > { %9059 = vmatpush1.bf16.msra.mxu0 %v17800_v3  ;;  %v17898_v3 = vld [vmem:[%s22783_s11 + $0xdc] ss:$12 sps:$4 sm:$0xff]  }
 0xcbc   : > { %9060 = vmatprep.subr.bf16.mxu0 %v17805_v7  ;;  %9595 = vmatpush1.bf16.msra.mxu1 %v17864_v17  ;;  %v17839_v7 = vld [vmem:[%s22783_s11 + $0x98] ss:$12 sps:$4 sm:$0xff]  }
 0xcbd   : > { %9596 = vmatprep.subr.bf16.mxu1 %v17870_v19  ;;  %v17849_v17 = vld [vmem:[%s22783_s11 + $0xf8] ss:$12 sps:$4 sm:$0xff]   ;;  %v17854_v19 = vld [vmem:[%s22783_s11 + $0xe0] ss:$12 sps:$4 sm:$0xff]  }
 0xcbf   : > { %9061 = vmatpush1.bf16.msra.mxu0 %v17803_v63  ;;  %v17840_v63 = vld [vmem:[%s22783_s11 + $0x140] ss:$12 sps:$4 sm:$0xff]  }
 0xcc0   : > { %9062 = vmatprep.subr.bf16.mxu0 %v17808_v25  ;;  %9597 = vmatpush1.bf16.msra.mxu1 %v17868_v15  ;;  %v17841_v25 = vld [vmem:[%s22783_s11 + $0x80] ss:$12 sps:$4 sm:$0xff]   ;;  %v17863_v15 = vld [vmem:[%s22783_s11 + $0x8] ss:$12 sps:$4 sm:$0xff]  }
 0xcc1   : > { %9598 = vmatprep.subr.bf16.mxu1 %v17874_v34  ;;  %v17867_v34 = vld [vmem:[%s22783_s11 + $0x1a0] ss:$12 sps:$4 sm:$0xff]  }
 0xcc3   : > { %9063 = vmatpush2.bf16.msra.mxu0 %v17806_v12  ;;  %v17842_v12 = vld [vmem:[%s22783_s11 + $0x128] ss:$12 sps:$4 sm:$0xff]  }
 0xcc4   : > { %9064 = vmatprep.subr.bf16.mxu0 %v17811_v11  ;;  %9599 = vmatpush1.bf16.msra.mxu1 %v17872_v60  ;;  %v17848_v11 = vld [vmem:[%s22783_s11 + $0x50] ss:$12 sps:$4 sm:$0xff]  }
 0xcc5   : > { %9600 = vmatprep.subr.bf16.mxu1 %v17877_v8  ;;  %v21318_v8 = vsub.s32 5, %v20951_v42 }
 0xcc7   : > { %9065 = vmatpush2.bf16.msra.mxu0 %v17809_v44  ;;  %v17858_v44 = vld [vmem:[%s22783_s11 + $0x20] ss:$12 sps:$4 sm:$0xff]   ;;  %22786 = vst [vmem:[#allocation113_spill] sm:$0xff] %v21318_v8 }
 0xcc8   : > { %9066 = vmatprep.subr.bf16.mxu0 %v17814_v14  ;;  %9601 = vmatpush1.bf16.msra.mxu1 %v17875_v52  ;;  %v17859_v14 = vld [vmem:[%s22783_s11 + $0xc8] ss:$12 sps:$4 sm:$0xff]  }
 0xcc9   : > { %9602 = vmatprep.subr.bf16.mxu1 %v17880_v16  ;;  %v22787_v16 = vld [vmem:[#allocation63_spill] sm:$0xff] }
 0xccb   : > { %9067 = vmatpush2.bf16.msra.mxu0 %v17812_v6  ;;  %v17871_v6 = vld [vmem:[%s22783_s11 + $0x188] ss:$12 sps:$4 sm:$0xff]  }
 0xccc   : > { %9068 = vmatprep.subr.bf16.mxu0 %v17817_v53  ;;  %9603 = vmatpush2.bf16.msra.mxu1 %v17878_v24  ;;  %v21304_v53 = vsub.s32 1, %v20951_v42 }
 0xccd   : > { %9604 = vmatprep.subr.bf16.mxu1 %v17883_v27 }
 0xcce   : > { %v8206_v60 = vrot.slane %v21038_v32, %v21304_v53 }
 0xccf   : > { %9069 = vmatpush2.bf16.msra.mxu0 %v17815_v47  ;;  %v21309_v47 = vsub.s32 2, %v20951_v42 }
 0xcd0   : > { %9070 = vmatprep.subr.bf16.mxu0 %v17820_v28  ;;  %9605 = vmatpush2.bf16.msra.mxu1 %v17881_v57  ;;  %v21315_v28 = vsub.s32 4, %v20951_v42 }
 0xcd1   : > { %9606 = vmatprep.subr.bf16.mxu1 %v17886_v56  ;;  %22784 = vst [vmem:[#allocation111_spill] sm:$0xff] %v21309_v47  ;;  %v21332_v24 = vrot.slane %v22787_v16, %v21309_v47 }
 0xcd3   : > { %9071 = vmatpush2.bf16.msra.mxu0 %v17818_v0  ;;  %v21324_v0 = vrot.slane %v22787_v16, %v21035_v62 }
 0xcd4   : > { %9072 = vmatprep.subr.bf16.mxu0 %v17823_v22  ;;  %9607 = vmatpush2.bf16.msra.mxu1 %v17884_v38  ;;  %v21328_v22 = vrot.slane %v22787_v16, %v21304_v53 }
 0xcd5   : > { %9608 = vmatprep.subr.bf16.mxu1 %v17889_v10 }
 0xcd7   : > { %9073 = vmatpush2.bf16.msra.mxu0 %v17821_v4 }
 0xcd8   : > { %9074 = vmatprep.subr.bf16.mxu0 %v17826_v55  ;;  %9609 = vmatpush2.bf16.msra.mxu1 %v17887_v30  ;;  %v22788_v55 = vld [vmem:[#allocation62_spill] sm:$0xff] }
 0xcd9   : > { %9610 = vmatprep.subr.bf16.mxu1 %v17892_v61  ;;  %v21344_v57 = vrot.slane %v22788_v55, %v21035_v62  ;;  %v21360_v38 = vrot.slane %v22788_v55, %v21315_v28  ;;  %v21368_v10 = vrot.slane %v22788_v55, %v21096_v37  ;;  %v21372_v61 = vrot.slane %v22787_v16, %v21318_v8 }
 0xcdb   : > { %9075 = vmatpush2.bf16.msra.mxu0 %v17824_v31  ;;  %v21348_v31 = vrot.slane %v22788_v55, %v21304_v53 }
 0xcdc   : > { %9076 = vmatprep.subr.bf16.mxu0 %v17829_v23  ;;  %9611 = vmatpush2.bf16.msra.mxu1 %v17890_v54  ;;  %v21352_v23 = vrot.slane %v22788_v55, %v21309_v47 }
 0xcdd   : > { %9612 = vmatprep.subr.bf16.mxu1 %v17895_v20  ;;  %v21384_v20 = vrot.slane %v22788_v55, %v21099_v35 }
 0xcdf   : > { %9077 = vmatpush2.bf16.msra.mxu0 %v17827_v21 }
 0xce0   : > { %9641 = vmatprep.subr.bf16.mxu0 %v17832_v50  ;;  %9613 = vmatpush2.bf16.msra.mxu1 %v17893_v41  ;;  %v21364_v50 = vrot.slane %v22788_v55, %v21318_v8 }
 0xce1   : > { %9614 = vmatprep.subr.bf16.mxu1 %v17898_v3 }
 0xce2   : > { %9079 = vmatmul.mubr.bf16.vlgmr.msra.gmra.mxu0 %v21188_v2 }
 0xce3   : > { %9642 = vmatpush1.bf16.msra.mxu0 %v17830_v5  ;;  %9661 = vmatprep.mubr.bf16.mxu0 %v22526_v45 }
 0xce4   : > { %9643 = vmatprep.subr.bf16.mxu0 %v17835_v18  ;;  %9615 = vmatpush2.bf16.msra.mxu1 %v17896_v1 }
 0xce5   : > { %9616 = vmatprep.subr.bf16.mxu1 %v17901_v29 }
 0xce7   : > { %9644 = vmatpush1.bf16.msra.mxu0 %v17833_v58  ;;  %v21376_v58 = vrot.slane %v22787_v16, %v21096_v37 }
 0xce8   : > { %16387 = vmatprep.subr.bf16.mxu0 %v17836_v43  ;;  %9617 = vmatpush2.bf16.msra.mxu1 %v17899_v26  ;;  %v21380_v43 = vrot.slane %v22787_v16, %v21099_v35 }
 0xce9   : > { %16704 = vmatprep.subr.bf16.mxu1 %v22528_v51 }
 0xcea   : > { %15731 = vmatmul.mubr.msk.bf16.vlgmr.msra.gmra.mxu0 %vm7771_vm11, %v21147_v46 }
 0xceb   : > { %16388 = vmatpush3.bf16.msra.mxu0 %v17837_v13  ;;  %9704 = vmatprep.mubr.bf16.mxu0 %v21152_v9  ;;  %v17843_v9 = vld [vmem:[%s22783_s11 + $0x68] ss:$12 sps:$4 sm:$0xff]  }
 0xcec   : > { %16389 = vmatprep.subr.bf16.mxu0 %v17838_v36  ;;  %9619 = vmatmul.mubr.bf16.vlgmr.msra.gmra.mxu1 %v21188_v2 }
 0xced   : > { %16706 = vmatprep.mubr.msk.bf16.mxu1 %vm18738_vm12, %v22528_v51 }
 0xcef   : > { %16390 = vmatpush3.bf16.msra.mxu0 %v17839_v7 }
 0xcf0   : > { %16391 = vmatprep.subr.bf16.mxu0 %v17840_v63 }
 0xcf3   : > { %16392 = vmatpush3.bf16.msra.mxu0 %v17841_v25 }
 0xcf4   : > { %16393 = vmatprep.subr.bf16.mxu0 %v17842_v12 }
 0xcf7   : > { %16394 = vmatpush3.bf16.msra.mxu0 %v17843_v9 }
 0xcf8   : > { %16395 = vmatprep.subr.bf16.mxu0 %v17844_v40 }
 0xcfb   : > { %16396 = vmatpush3.bf16.msra.mxu0 %v17848_v11 }
 0xcfc   : > { %16397 = vmatprep.subr.bf16.mxu0 %v17849_v17 }
 0xcff   : > { %16398 = vmatpush3.bf16.msra.mxu0 %v17853_v59 }
 0xd00   : > { %16399 = vmatprep.subr.bf16.mxu0 %v17854_v19 }
 0xd03   : > { %16400 = vmatpush3.bf16.msra.mxu0 %v17858_v44 }
 0xd04   : > { %16401 = vmatprep.subr.bf16.mxu0 %v17859_v14 }
 0xd07   : > { %16402 = vmatpush3.bf16.msra.mxu0 %v17863_v15 }
 0xd08   : > { %16696 = vmatprep.subr.bf16.mxu0 %v22528_v51 }
 0xd0a   : > { %9705 = vmatmul.mubr.bf16.vlgmr.msra.gmra.mxu0 %v21188_v2  ;;  %v21312_v2 = vsub.s32 3, %v20951_v42 }
 0xd0b   : > { %16697 = vmatpush3.bf16.msra.mxu0 %v17867_v34  ;;  %16700 = vmatprep.mubr.msk.bf16.mxu0 %vm18738_vm12, %v22528_v51 }
 0xd0c   : > { %16698 = vmatprep.subr.bf16.mxu0 %v22528_v51  ;;  %22785 = vst [vmem:[#allocation112_spill] sm:$0xff] %v21312_v2  ;;  %v21336_v42 = vrot.slane %v22787_v16, %v21312_v2  ;;  %v21356_v21 = vrot.slane %v22788_v55, %v21312_v2 }
 0xd0f   : > { %16699 = vmatpush3.bf16.msra.mxu0 %v17871_v6 }
 0xd12   : > { %16701 = vmatmul.mubr.msk.bf16.vlgmr.msra.gmra.mxu0 %vm7771_vm11, %v21147_v46  ;;  %v8210_v46 = vrot.slane %v21044_v48, %v21304_v53  ;;  %v21340_v48 = vrot.slane %v22787_v16, %v21315_v28 }
 0xd3a   : > { %v8581_v52 = vpop.f32.mrf.mxu0 }
 0xd3b   : > { %v8540_v32 = vpop.f32.mrf.mxu1 }
 0xd3c   : > { %v8541_v27 = vadd.f32 %v8540_v32, %v8206_v60  ;;  %v8583_v4 = vpop.f32.mrf.mxu0 }
 0xd3d   : > { %v8542_v56 = vpop.f32.mrf.mxu1 }
 0xd3e   : > { %v8582_v5 = vadd.f32 %v8581_v52, %v8541_v27  ;;  %v8543_v30 = vadd.f32 %v8542_v56, %v8210_v46  ;;  %v8585_v18 = vpop.f32.mrf.mxu0 }
 0xd3f   : > { %v8544_v54 = vpop.f32.mrf.mxu1 }
 0xd40   : > { %v8584_v13 = vadd.f32 %v8583_v4, %v8543_v30  ;;  %v8586_v41 = vpop.f32.mrf.mxu0  ;;  %v9771_v36 = vmul.f32 %v21344_v57, %v8582_v5  ;;  %v9786_v3 = vmul.f32 %v21348_v31, %v8582_v5  ;;  %v9801_v7 = vmul.f32 %v21352_v23, %v8582_v5 }
 0xd41   : > { %v8545_v1 = vpop.f32.mrf.mxu1  ;;  %v9816_v63 = vmul.f32 %v21356_v21, %v8582_v5  ;;  %v9831_v29 = vmul.f32 %v21360_v38, %v8582_v5  ;;  %v9846_v25 = vmul.f32 %v21364_v50, %v8582_v5  ;;  %v9861_v26 = vmul.f32 %v21368_v10, %v8582_v5 }
 0xd42   : > { %v9772_v12 = vmul.f32 %v21324_v0, %v8584_v13  ;;  %v9787_v9 = vmul.f32 %v21328_v22, %v8584_v13  ;;  %v9802_v40 = vmul.f32 %v21332_v24, %v8584_v13  ;;  %v9817_v11 = vmul.f32 %v21336_v42, %v8584_v13 }
 0xd43   : > { %v9832_v17 = vmul.f32 %v21340_v48, %v8584_v13  ;;  %v9847_v59 = vmul.f32 %v21372_v61, %v8584_v13  ;;  %v9862_v19 = vmul.f32 %v21376_v58, %v8584_v13  ;;  %v9877_v44 = vmul.f32 %v21380_v43, %v8584_v13 }
 0xd44   : > { %v9883_v14 = vrot.slane %v9787_v9, 6  ;;  %v9892_v15 = vrot.slane %v9802_v40, 4  ;;  %v9901_v34 = vrot.slane %v9817_v11, 2  ;;  %v9876_v6 = vmul.f32 %v21384_v20, %v8582_v5 }
 0xd45   : > { %v9910_v60 = vrot.slane %v9847_v59, 6  ;;  %v9919_v52 = vrot.slane %v9862_v19, 4  ;;  %v9928_v46 = vrot.slane %v9877_v44, 2  ;;  %v9882_v16 = vrot.slane %v9786_v3, 6 }
 0xd46   : > { %v9934_v32 = vsel %vm7978_vm13, %v9772_v12, %v9883_v14  ;;  %v9891_v27 = vrot.slane %v9801_v7, 4  ;;  %v9900_v4 = vrot.slane %v9816_v63, 2  ;;  %v9909_v55 = vrot.slane %v9846_v25, 6  ;;  %v21429_v14 = vld [vmem:[%s19305_s30 + $0x10] sm:$0xff] }
 0xd47   : > { %v9938_v56 = vsel %vm9936_vm15, %v9934_v32, %v9892_v15  ;;  %v9945_v30 = vsel %vm7978_vm13, %v9832_v17, %v9910_v60  ;;  %v9918_v18 = vrot.slane %v9861_v26, 4  ;;  %v9927_v54 = vrot.slane %v9876_v6, 2 }
 0xd48   : > { %v9942_v13 = vsel %vm9940_vm0, %v9938_v56, %v9901_v34  ;;  %v9948_v41 = vsel %vm9936_vm15, %v9945_v30, %v9919_v52  ;;  %v9933_v5 = vsel %vm7978_vm13, %v9771_v36, %v9882_v16  ;;  %v9944_v1 = vsel %vm7978_vm13, %v9831_v29, %v9909_v55  ;;  %v21420_v36 = vpop.f32.mrf.mxu1 }
 0xd49   : > { %v9951_v3 = vsel %vm9940_vm0, %v9948_v41, %v9928_v46  ;;  %v9937_v7 = vsel %vm9936_vm15, %v9933_v5, %v9891_v27  ;;  %v9947_v63 = vsel %vm9936_vm15, %v9944_v1, %v9918_v18  ;;  %v8214_v15 = vrot.slane %v21429_v14, %v21304_v53  ;;  %v22789_v27 = vld [vmem:[#allocation64_spill] sm:$0xff] }
 0xd4a   : > { %v9954_v25 = vpack.c.bf16 %v9951_v3, %v9942_v13  ;;  %v21413_v12 = vsel %vm9940_vm0, %v9937_v7, %v9900_v4  ;;  %v21416_v26 = vsel %vm9940_vm0, %v9947_v63, %v9927_v54  ;;  %v21422_v29 = vpop.f32.mrf.mxu1  ;;  %v21435_v4 = vrot.slane %v22789_v27, %v21304_v53 }
 0xd4b   : > { %v9953_v9 = vpack.c.bf16 %v21416_v26, %v21413_v12  ;;  %v21439_v55 = vrot.slane %v22789_v27, %v21318_v8  ;;  %v8754_v18 = vrot.slane %v21429_v14, %v21309_v47  ;;  %v21445_v41 = vrot.slane %v22789_v27, %v21309_v47 }
 0xd4c   : > { %9994 = vmatprep.mubr.bf16.mxu0 %v9954_v25  ;;  %v21424_v11 = vpop.f32.mrf.mxu1  ;;  %v21449_v5 = vrot.slane %v22789_v27, %v21096_v37 }
 0xd4e   : > { %v21426_v44 = vpop.f32.mrf.mxu1 }
 0xd5a   : > { %v16353_v40 = vpop.f32.mrf.mxu0 }
 0xd5c   : > { %v16354_v17 = vpop.f32.mrf.mxu0 }
 0xd5d   : > { %v16355_v19 = vadd.f32 %v16354_v17, %v16353_v40  ;;  %v21455_v17 = vrot.slane %v22789_v27, %v21035_v62 }
 0xd5e   : > { %v16356_v59 = vpop.f32.mrf.mxu0 }
 0xd5f   : > { %v8623_v60 = vadd.f32 %v16355_v19, %v8214_v15  ;;  %v21459_v59 = vrot.slane %v22789_v27, %v21315_v28 }
 0xd60   : > { %v16357_v34 = vpop.f32.mrf.mxu0 }
 0xd62   : > { %v8662_v6 = vpop.f32.mrf.mxu0 }
 0xd63   : > { %v16378_v52 = vpop.f32.mrf.mxu1  ;;  %v8663_v16 = vadd.f32 %v8662_v6, %v8623_v60  ;;  %v21465_v6 = vrot.slane %v22789_v27, %v21312_v2  ;;  %v21469_v60 = vrot.slane %v22789_v27, %v21099_v35 }
 0xd64   : > { %v16686_v46 = vpop.f32.mrf.mxu0 }
 0xd65   : > { %v16379_v32 = vpop.f32.mrf.mxu1  ;;  %v9788_v3 = vmul.f32 %v21435_v4, %v8663_v16  ;;  %v9848_v7 = vmul.f32 %v21439_v55, %v8663_v16  ;;  %v9803_v37 = vmul.f32 %v21445_v41, %v8663_v16  ;;  %v9863_v15 = vmul.f32 %v21449_v5, %v8663_v16 }
 0xd66   : > { %v16380_v56 = vadd.f32 %v16379_v32, %v16378_v52  ;;  %v8665_v30 = vpop.f32.mrf.mxu0 }
 0xd67   : > { %v16381_v54 = vpop.f32.mrf.mxu1  ;;  %v9884_v52 = vrot.slane %v9788_v3, 6  ;;  %v9911_v46 = vrot.slane %v9848_v7, 6  ;;  %v9773_v30 = vmul.f32 %v21455_v17, %v8663_v16 }
 0xd68   : > { %v16687_v13 = vpop.f32.mrf.mxu0  ;;  %v9167_v25 = vadd.f32 %v16380_v56, %v8754_v18 }
 0xd69   : > { %v16382_v1 = vpop.f32.mrf.mxu1  ;;  %v9893_v13 = vrot.slane %v9803_v37, 4  ;;  %v9935_v45 = vsel %vm7978_vm13, %v9773_v30, %v9884_v52 }
 0xd6a   : > { %v16383_v63 = vadd.f32 %v16382_v1, %v16381_v54  ;;  %v9920_v1 = vrot.slane %v9863_v15, 4 }
 0xd6b   : > { %v9207_v40 = vpop.f32.mrf.mxu1 }
 0xd6c   : > { %v9170_v19 = vadd.f32 %v16383_v63, %v8754_v18  ;;  %v9208_v32 = vadd.f32 %v9207_v40, %v9167_v25  ;;  %v9833_v18 = vmul.f32 %v21459_v59, %v8663_v16  ;;  %v9818_v63 = vmul.f32 %v21465_v6, %v8663_v16 }
 0xd6d   : > { %v16694_v34 = vpop.f32.mrf.mxu1  ;;  %v9939_v25 = vsel %vm9936_vm15, %v9935_v45, %v9893_v13 }
 0xd6e   : > { %v9878_v34 = vmul.f32 %v21469_v60, %v8663_v16  ;;  %v9946_v35 = vsel %vm7978_vm13, %v9833_v18, %v9911_v46 }
 0xd6f   : > { %v9210_v56 = vpop.f32.mrf.mxu1  ;;  %v9949_v40 = vsel %vm9936_vm15, %v9946_v35, %v9920_v1 }
 0xd70   : > { %v9211_v54 = vadd.f32 %v9210_v56, %v9170_v19  ;;  %v9902_v19 = vrot.slane %v9818_v63, 2  ;;  %v9929_v37 = vrot.slane %v9878_v34, 2  ;;  %v21492_v56 = vld [vmem:[%s19305_s30] sm:$0xff] }
 0xd71   : > { %v16695_v27 = vpop.f32.mrf.mxu1  ;;  %v8746_v30 = vrot.slane %v21492_v56, %v21309_v47 }
 0xd72   : > { %v9758_v3 = vpack.c.bf16 %v9211_v54, %v9208_v32  ;;  %v9943_v16 = vsel %vm9940_vm0, %v9939_v25, %v9902_v19  ;;  %v9952_v15 = vsel %vm9940_vm0, %v9949_v40, %v9929_v37  ;;  %v21487_v32 = vld [vmem:[%s19305_s30 + $0x8] sm:$0xff] }
 0xd73   : > { %v9955_v52 = vpack.c.bf16 %v9952_v15, %v9943_v16  ;;  %v8750_v45 = vrot.slane %v21487_v32, %v21309_v47  ;;  %v9289_v16 = vrot.slane %v21492_v56, %v21312_v2 }
 0xd74   : > { %v9960_v7 = vsel %vm7771_vm11, %v9758_v3, 0 }
 0xd75   : > { %16705 = vmatpush3.bf16.xpose.msra.mxu1 %v9960_v7 }
 0xd76   : > { %16710 = vmatprep.subr.bf16.mxu1 %v22528_v51 }
 0xd7c   : > { %16707 = vmatmul.mubr.msk.bf16.vlgmr.msra.gmra.mxu1 %vm7771_vm11, %v9955_v52 }
 0xd7d   : > { %16712 = vmatprep.mubr.msk.bf16.mxu1 %vm18738_vm12, %v22528_v51 }
 0xda2   : > { %v9080_v46 = vpop.f32.mrf.mxu0 }
 0xda3   : > { %v9081_v63 = vadd.f32 %v9080_v46, %v8746_v30 }
 0xda4   : > { %v9082_v18 = vpop.f32.mrf.mxu0 }
 0xda5   : > { %v9083_v13 = vadd.f32 %v9082_v18, %v8750_v45  ;;  %v9124_v25 = vadd.f32 %v21420_v36, %v9081_v63 }
 0xda6   : > { %v9084_v54 = vpop.f32.mrf.mxu0 }
 0xda7   : > { %v9085_v1 = vadd.f32 %v9084_v54, %v8746_v30  ;;  %v9126_v3 = vadd.f32 %v21422_v29, %v9083_v13  ;;  %v9293_v29 = vrot.slane %v21487_v32, %v21312_v2 }
 0xda8   : > { %v9086_v34 = vpop.f32.mrf.mxu0 }
 0xda9   : > { %v9087_v35 = vadd.f32 %v9086_v34, %v8750_v45  ;;  %v9128_v27 = vadd.f32 %v21424_v11, %v9085_v1  ;;  %v22790_v11 = vmov 0  }
 0xdaa   : > { %v9663_v46 = vpop.f32.mrf.mxu0 }
 0xdab   : > { %v9130_v7 = vadd.f32 %v21426_v44, %v9087_v35  ;;  %v9756_v19 = vpack.c.bf16 %v9128_v27, %v9124_v25 }
 0xdac   : > { %v9620_v37 = vpop.f32.mrf.mxu1  ;;  %v9665_v54 = vpop.f32.mrf.mxu0 }
 0xdad   : > { %v9757_v40 = vpack.c.bf16 %v9130_v7, %v9126_v3  ;;  %v9621_v44 = vadd.f32 %v9620_v37, %v9289_v16 }
 0xdae   : > { %v9622_v15 = vpop.f32.mrf.mxu1 }
 0xdaf   : > { %9976 = vmatprep.subr.bf16.mxu0 %v9757_v40  ;;  %v9623_v52 = vadd.f32 %v9622_v15, %v9293_v29  ;;  %v21508_v18 = vadd.f32 %v9663_v46, %v9621_v44  ;;  %v9297_v15 = vrot.slane %v21429_v14, %v21312_v2 }
 0xdb0   : > { %9977 = vmatpush1.bf16.xpose.msra.mxu0 %v9756_v19  ;;  %v9624_v36 = vpop.f32.mrf.mxu1 }
 0xdb1   : > { %v9625_v45 = vadd.f32 %v9624_v36, %v9289_v16  ;;  %v21510_v26 = vadd.f32 %v9665_v54, %v9623_v52  ;;  %v10077_v63 = vmul.f32 %v21348_v31, %v21508_v18  ;;  %v21528_v52 = vmul.f32 %v21344_v57, %v21508_v18 }
 0xdb2   : > { %v9626_v30 = vpop.f32.mrf.mxu1 }
 0xdb3   : > { %v9627_v12 = vadd.f32 %v9626_v30, %v9293_v29  ;;  %v10078_v35 = vmul.f32 %v21328_v22, %v21510_v26  ;;  %v10069_v3 = vmul.f32 %v21324_v0, %v21510_v26 }
 0xdb7   : > { %9995 = vmatmul.mubr.bf16.vlgmr.msra.gmra.mxu0 %v9953_v9  ;;  %v9667_v9 = vpop.f32.mrf.mxu0 }
 0xdb8   : > { %10123 = vmatprep.mubr.bf16.mxu0 %v22790_v11  ;;  %v21512_v13 = vadd.f32 %v9667_v9, %v9625_v45  ;;  %v21543_v45 = vmul.f32 %v21352_v23, %v21508_v18 }
 0xdb9   : > { %v9669_v1 = vpop.f32.mrf.mxu0 }
 0xdba   : > { %v9670_v34 = vadd.f32 %v9669_v1, %v9627_v12  ;;  %v10080_v27 = vmul.f32 %v21348_v31, %v21512_v13  ;;  %v21547_v30 = vmul.f32 %v21352_v23, %v21512_v13  ;;  %v9755_v12 = vld [vmem:[%s22792_s5 + $0x8] sm:$0xff] }
 0xdbc   : > { %v10081_v7 = vmul.f32 %v21328_v22, %v9670_v34  ;;  %v10072_v25 = vmul.f32 %v21324_v0, %v9670_v34  ;;  %v10083_v40 = vpack.c.bf16 %v10080_v27, %v10077_v63  ;;  %v21532_v0 = vmul.f32 %v21344_v57, %v21512_v13  ;;  %v9754_v63 = vld [vmem:[%s22791_s16] sm:$0xff] }
 0xdbd   : > { %v21536_v22 = vmul.f32 %v21332_v24, %v21510_v26  ;;  %v21539_v14 = vmul.f32 %v21332_v24, %v9670_v34  ;;  %v21551_v57 = vmul.f32 %v21336_v42, %v21510_v26  ;;  %v21556_v9 = vmul.f32 %v21336_v42, %v9670_v34 }
 0xdbe   : > { %v10084_v19 = vpack.c.bf16 %v10081_v7, %v10078_v35  ;;  %v10075_v37 = vpack.c.bf16 %v10072_v25, %v10069_v3  ;;  %v21560_v24 = vmul.f32 %v21356_v21, %v21508_v18  ;;  %v21568_v35 = vmul.f32 %v21356_v21, %v21512_v13 }
 0xdbf   : > { %v21572_v27 = vmul.f32 %v21340_v48, %v21510_v26  ;;  %v21577_v25 = vmul.f32 %v21340_v48, %v9670_v34  ;;  %v21583_v21 = vmul.f32 %v21360_v38, %v21508_v18  ;;  %v21646_v48 = vmul.f32 %v21384_v20, %v21512_v13 }
 0xdc0   : > { %10105 = vmatprep.subr.bf16.mxu0 %v10084_v19 }
 0xdc1   : > { %10106 = vmatpush1.bf16.msra.mxu0 %v10083_v40 }
 0xdc2   : > { %10189 = vmatprep.subr.bf16.mxu0 %v10075_v37  ;;  %v21587_v37 = vmul.f32 %v21360_v38, %v21512_v13  ;;  %v21624_v38 = vmul.f32 %v21368_v10, %v21512_v13 }
 0xdca   : > { %v16403_v16 = vpop.f32.mrf.mxu0 }
 0xdcc   : > { %v16404_v29 = vpop.f32.mrf.mxu0 }
 0xdcd   : > { %v16405_v44 = vadd.f32 %v16404_v29, %v16403_v16  ;;  %v21591_v16 = vmul.f32 %v21372_v61, %v21510_v26  ;;  %v21597_v29 = vmul.f32 %v21372_v61, %v9670_v34 }
 0xdce   : > { %v16406_v31 = vpop.f32.mrf.mxu0 }
 0xdcf   : > { %v9707_v36 = vadd.f32 %v16405_v44, %v9297_v15  ;;  %v21601_v44 = vmul.f32 %v21364_v50, %v21508_v18 }
 0xdd0   : > { %v16407_v46 = vpop.f32.mrf.mxu0 }
 0xdd1   : > { %v16408_v54 = vadd.f32 %v16407_v46, %v16406_v31  ;;  %v21611_v46 = vmul.f32 %v21376_v58, %v21510_v26 }
 0xdd2   : > { %v9747_v1 = vpop.f32.mrf.mxu0 }
 0xdd3   : > { %v9748_v42 = vadd.f32 %v9747_v1, %v9707_v36  ;;  %v9710_v3 = vadd.f32 %v16408_v54, %v9297_v15  ;;  %v21607_v36 = vmul.f32 %v21364_v50, %v21512_v13  ;;  %v21614_v54 = vmul.f32 %v21376_v58, %v9670_v34 }
 0xdd4   : > { %v16702_v40 = vpop.f32.mrf.mxu0 }
 0xdd5   : > { %v10079_v15 = vmul.f32 %v21435_v4, %v9748_v42  ;;  %v21620_v40 = vmul.f32 %v21368_v10, %v21508_v18  ;;  %v21664_v13 = vmul.f32 %v21465_v6, %v9748_v42 }
 0xdd6   : > { %v9750_v31 = vpop.f32.mrf.mxu0 }
 0xdd7   : > { %v9751_v61 = vadd.f32 %v9750_v31, %v9710_v3  ;;  %v21632_v3 = vmul.f32 %v21380_v43, %v21510_v26  ;;  %v21635_v31 = vmul.f32 %v21380_v43, %v9670_v34  ;;  %v21658_v34 = vmul.f32 %v21445_v41, %v9748_v42 }
 0xdd8   : > { %v16703_v50 = vpop.f32.mrf.mxu0 }
 0xdd9   : > { %v10082_v1 = vmul.f32 %v21435_v4, %v9751_v61  ;;  %v21642_v50 = vmul.f32 %v21384_v20, %v21508_v18  ;;  %v21654_v4 = vmul.f32 %v21455_v17, %v9748_v42  ;;  %v10073_v18 = vmul.f32 %v21455_v17, %v9751_v61 }
 0xdda   : > { %v21661_v20 = vmul.f32 %v21445_v41, %v9751_v61  ;;  %v21679_v41 = vmul.f32 %v21439_v55, %v9748_v42  ;;  %v21682_v26 = vmul.f32 %v21439_v55, %v9751_v61  ;;  %v21700_v55 = vmul.f32 %v21469_v60, %v9751_v61 }
 0xddb   : > { %v10085_v58 = vpack.c.bf16 %v10082_v1, %v10079_v15  ;;  %v21667_v15 = vmul.f32 %v21465_v6, %v9751_v61  ;;  %v21670_v1 = vmul.f32 %v21459_v59, %v9748_v42  ;;  %v10076_v17 = vpack.c.bf16 %v10073_v18, %v21654_v4 }
 0xddc   : > { %v10264_v43 = vpack.c.bf16 %v21661_v20, %v21658_v34  ;;  %v21692_v4 = vmul.f32 %v21449_v5, %v9751_v61  ;;  %v21697_v34 = vmul.f32 %v21469_v60, %v9748_v42 }
 0xddd   : > { %16711 = vmatpush3.bf16.msra.mxu1 %v10085_v58  ;;  %v21673_v58 = vmul.f32 %v21459_v59, %v9751_v61  ;;  %v21689_v59 = vmul.f32 %v21449_v5, %v9748_v42 }
 0xdde   : > { %16716 = vmatprep.subr.bf16.mxu1 %v22528_v51 }
 0xe3c   : > { %v10037_v6 = vpop.f32.mrf.mxu1 }
 0xe3e   : > { %v16708_v19 = vpop.f32.mrf.mxu1 }
 0xe40   : > { %v10040_v7 = vpop.f32.mrf.mxu1 }
 0xe42   : > { %v16709_v5 = vpop.f32.mrf.mxu1 }
 0xe77   : > { %v9996_v51 = vpop.f32.mrf.mxu0 }
 0xe78   : > { %v9997_v23 = vadd.f32 %v9996_v51, %v9754_v63 }
 0xe79   : > { %v9998_v18 = vpop.f32.mrf.mxu0 }
 0xe7a   : > { %v10038_v42 = vadd.f32 %v10037_v6, %v9997_v23 }
 0xe7b   : > { %v9999_v8 = vpop.f32.mrf.mxu0 }
 0xe7c   : > { %v10000_v60 = vadd.f32 %v9999_v8, %v9755_v12  ;;  %v10045_v61 = vsel %vm10044_vm1, %v10038_v42, -inf }
 0xe7d   : > { %v10001_v2 = vpop.f32.mrf.mxu0  ;;  %10046 = vmax.xlane.f32.xlu1 %v10045_v61  ;;  %v17923_v61 = vld [vmem:[%s22810_s7] ss:$12 sps:$4 sm:$0xff]  }
 0xe7e   : > { %v10041_v20 = vadd.f32 %v10040_v7, %v10000_v60 }
 0xe80   : > { %v10048_v10 = vsel %vm10044_vm1, %v10041_v20, -inf }
 0xe81   : > { %10049 = vmax.xlane.f32.xlu1 %v10048_v10 }
 0xf06   : > { %v10047_v19 = vpop.xlane.xlu1 %10046 }
 0xf07   : > { %v10051_v47 = vsub.f32 %v10038_v42, %v10047_v19  ;;  %v17925_v19 = vld [vmem:[%s22810_s7 + $0x4] ss:$12 sps:$4 sm:$0xff]  }
 0xf09   : > { %v10053_v5 = vmul.f32 1.442695, %v10051_v47  ;;  %v22794_v47 = vpack.c.bf16 %v21539_v14, %v21536_v22  ;;  %v22798_v14 = vpack.c.bf16 %v21568_v35, %v21560_v24  ;;  %v22801_v24 = vpack.c.bf16 %v21587_v37, %v21583_v21 }
 0xf0a   : > { %v10050_v33 = vpop.xlane.xlu1 %10049  ;;  %v22802_v35 = vpack.c.bf16 %v21673_v58, %v21670_v1  ;;  %v22804_v21 = vpack.c.bf16 %v21607_v36, %v21601_v44  ;;  %v22805_v37 = vpack.c.bf16 %v21682_v26, %v21679_v41  ;;  %v22807_v44 = vpack.c.bf16 %v21624_v38, %v21620_v40  ;;  %v17907_v26 = vld [vmem:[%s22810_s7 + $0x94] ss:$12 sps:$4 sm:$0xff]   ;;  %v17913_v58 = vld [vmem:[%s22810_s7 + $0x64] ss:$12 sps:$4 sm:$0xff]   ;;  %v17916_v41 = vld [vmem:[%s22810_s7 + $0x4c] ss:$12 sps:$4 sm:$0xff]  }
 0xf0b   : > { %18246 = vpow2.f32 %v10053_v5  ;;  %v10052_v51 = vsub.f32 %v10041_v20, %v10050_v33  ;;  %v22793_v33 = vpack.c.bf16 %v21532_v0, %v21528_v52  ;;  %v22795_v20 = vmov 0.0   ;;  %v17911_v1 = vld [vmem:[%s22810_s7 + $0x60] ss:$12 sps:$4 sm:$0xff]   ;;  %v17926_v5 = vld [vmem:[%s22810_s7 + $0x168] ss:$12 sps:$4 sm:$0xff]  }
 0xf0c   : > { %v22796_v52 = vpack.c.bf16 %v21547_v30, %v21543_v45  ;;  %v22797_v0 = vpack.c.bf16 %v21556_v9, %v21551_v57  ;;  %v22799_v45 = vpack.c.bf16 %v21667_v15, %v21664_v13  ;;  %v22800_v30 = vpack.c.bf16 %v21577_v25, %v21572_v27  ;;  %v17908_v13 = vld [vmem:[%s22810_s7 + $0x78] ss:$12 sps:$4 sm:$0xff]   ;;  %v17910_v15 = vld [vmem:[%s22810_s7 + $0x7c] ss:$12 sps:$4 sm:$0xff]  }
 0xf0d   : > { %v10055_v63 = vmul.f32 1.442695, %v10052_v51  ;;  %v22803_v27 = vpack.c.bf16 %v21597_v29, %v21591_v16  ;;  %v22806_v16 = vpack.c.bf16 %v21614_v54, %v21611_v46  ;;  %v22808_v36 = vpack.c.bf16 %v21692_v4, %v21689_v59  ;;  %v17917_v59 = vld [vmem:[%s22810_s7 + $0x30] ss:$12 sps:$4 sm:$0xff]   ;;  %v17919_v4 = vld [vmem:[%s22810_s7 + $0x34] ss:$12 sps:$4 sm:$0xff]  }
 0xf0e   : > { %v22809_v46 = vpack.c.bf16 %v21635_v31, %v21632_v3  ;;  %v22811_v54 = vpack.c.bf16 %v21646_v48, %v21642_v50  ;;  %v22812_v40 = vpack.c.bf16 %v21700_v55, %v21697_v34  ;;  %v17902_v48 = vld [vmem:[%s22810_s7 + $0xa8] ss:$12 sps:$4 sm:$0xff]   ;;  %v17904_v31 = vld [vmem:[%s22810_s7 + $0xac] ss:$12 sps:$4 sm:$0xff]   ;;  %v17905_v50 = vld [vmem:[%s22810_s7 + $0x90] ss:$12 sps:$4 sm:$0xff]  }
 0xf0f   : > { %18248 = vpow2.f32 %v10055_v63  ;;  %v17920_v34 = vld [vmem:[%s22810_s7 + $0x18] ss:$12 sps:$4 sm:$0xff]   ;;  %v17922_v55 = vld [vmem:[%s22810_s7 + $0x1c] ss:$12 sps:$4 sm:$0xff]  }
 0xf10   : > { %v17928_v51 = vld [vmem:[%s22810_s7 + $0x16c] ss:$12 sps:$4 sm:$0xff]   ;;  %v17929_v63 = vld [vmem:[%s22810_s7 + $0x150] ss:$12 sps:$4 sm:$0xff]  }
 0xf18   : > { %v18247_v18 = vpop.eup %18246 }
 0xf19   : > { %v10057_v23 = vsel %vm10044_vm1, %v18247_v18, 0.0 }
 0xf1a   : > { %10058 = vadd.xlane.f32.xlu0 %v10057_v23  ;;  %v17932_v23 = vld [vmem:[%s22810_s7 + $0x138] ss:$12 sps:$4 sm:$0xff]  }
 0xf1c   : > { %v18249_v8 = vpop.eup %18248 }
 0xf1d   : > { %v10060_v2 = vsel %vm10044_vm1, %v18249_v8, 0.0 }
 0xf1e   : > { %10061 = vadd.xlane.f32.xlu1 %v10060_v2  ;;  %v17935_v2 = vld [vmem:[%s22810_s7 + $0x120] ss:$12 sps:$4 sm:$0xff]  }
 0xfa3   : > { %v10059_v12 = vpop.xlane.xlu0 %10058 }
 0xfa4   : > { %18250 = vrcp.f32 %v10059_v12  ;;  %v17937_v12 = vld [vmem:[%s22810_s7 + $0x124] ss:$12 sps:$4 sm:$0xff]  }
 0xfa7   : > { %v10062_v60 = vpop.xlane.xlu1 %10061 }
 0xfa8   : > { %18252 = vrcp.f32 %v10062_v60  ;;  %v17949_v60 = vld [vmem:[%s22810_s7 + $0xdc] ss:$12 sps:$4 sm:$0xff]  }
 0xfb1   : > { %v18251_v7 = vpop.eup %18250 }
 0xfb2   : > { %v10065_v10 = vmul.f32 %v18251_v7, %v18247_v18  ;;  %v17931_v18 = vld [vmem:[%s22810_s7 + $0x154] ss:$12 sps:$4 sm:$0xff]  }
 0xfb3   : > { %v17938_v7 = vld [vmem:[%s22810_s7 + $0x108] ss:$12 sps:$4 sm:$0xff]  }
 0xfb4   : > { %v10067_v6 = vpack.c.bf16 %v10065_v10, %v10065_v10  ;;  %v17940_v10 = vld [vmem:[%s22810_s7 + $0x10c] ss:$12 sps:$4 sm:$0xff]  }
 0xfb5   : > { %v18253_v9 = vpop.eup %18252 }
 0xfb6   : > { %v10087_v42 = vrot.slane %v10067_v6, 1  ;;  %v10265_v22 = vrot.slane %v10067_v6, 2  ;;  %v10362_v57 = vrot.slane %v10067_v6, 3  ;;  %v10066_v25 = vmul.f32 %v18253_v9, %v18249_v8  ;;  %v17934_v8 = vld [vmem:[%s22810_s7 + $0x13c] ss:$12 sps:$4 sm:$0xff]  }
 0xfb8   : > { %15734 = vmatmul.mubr.msk.bf16.vlgmr.msra.gmra.mxu0 %vm10044_vm1, %v10087_v42  ;;  %16713 = vmatmul.mubr.msk.bf16.vlgmr.msra.gmra.mxu1 %vm10044_vm1, %v10087_v42  ;;  %v17943_v42 = vld [vmem:[%s22810_s7 + $0xf4] ss:$12 sps:$4 sm:$0xff]  }
 0xfb9   : > { %10190 = vmatpush1.bf16.msra.mxu0 %v22793_v33  ;;  %16717 = vmatpush3.bf16.msra.mxu1 %v10076_v17  ;;  %v17914_v17 = vld [vmem:[%s22810_s7 + $0x48] ss:$12 sps:$4 sm:$0xff]   ;;  %v17944_v33 = vld [vmem:[%s22810_s7 + $0x198] ss:$12 sps:$4 sm:$0xff]  }
 0xfba   : > { %10283 = vmatprep.subr.bf16.mxu0 %v22794_v47  ;;  %10207 = vmatprep.mubr.bf16.mxu0 %v22790_v11  ;;  %v17946_v47 = vld [vmem:[%s22810_s7 + $0x19c] ss:$12 sps:$4 sm:$0xff]  }
 0xfbb   : > { %16718 = vmatprep.mubr.msk.bf16.mxu1 %vm18738_vm12, %v22795_v20  ;;  %16722 = vmatprep.subr.bf16.mxu1 %v22795_v20 }
 0xfc0   : > { %15736 = vmatmul.mubr.msk.bf16.vlgmr.msra.gmra.mxu0 %vm10044_vm1, %v10067_v6  ;;  %16719 = vmatmul.mubr.msk.bf16.vlgmr.msra.gmra.mxu1 %vm10044_vm1, %v10067_v6  ;;  %v17941_v6 = vld [vmem:[%s22810_s7 + $0xf0] ss:$12 sps:$4 sm:$0xff]  }
 0xfc1   : > { %10284 = vmatpush1.bf16.msra.mxu0 %v22796_v52  ;;  %16723 = vmatpush3.bf16.msra.mxu1 %v10264_v43  ;;  %v10450_v43 = vpack.c.bf16 %v10066_v25, %v10066_v25  ;;  %v17952_v52 = vld [vmem:[%s22810_s7 + $0x184] ss:$12 sps:$4 sm:$0xff]  }
 0xfc2   : > { %10380 = vmatprep.subr.bf16.mxu0 %v22797_v0  ;;  %10301 = vmatprep.mubr.bf16.mxu0 %v22790_v11  ;;  %v17947_v0 = vld [vmem:[%s22810_s7 + $0xd8] ss:$12 sps:$4 sm:$0xff]  }
 0xfc3   : > { %16724 = vmatprep.mubr.msk.bf16.mxu1 %vm18738_vm12, %v22795_v20  ;;  %16728 = vmatprep.subr.bf16.mxu1 %v22795_v20  ;;  %v10557_v29 = vrot.slane %v10450_v43, 1  ;;  %v10654_v38 = vrot.slane %v10450_v43, 2  ;;  %v10751_v3 = vrot.slane %v10450_v43, 3 }
 0xfc8   : > { %15738 = vmatmul.mubr.msk.bf16.vlgmr.msra.gmra.mxu0 %vm10044_vm1, %v10265_v22  ;;  %16725 = vmatmul.mubr.msk.bf16.vlgmr.msra.gmra.mxu1 %vm10044_vm1, %v10265_v22  ;;  %v17950_v22 = vld [vmem:[%s22810_s7 + $0x180] ss:$12 sps:$4 sm:$0xff]  }
 0xfc9   : > { %10381 = vmatpush1.bf16.msra.mxu0 %v22798_v14  ;;  %16729 = vmatpush3.bf16.msra.mxu1 %v22799_v45  ;;  %v17953_v14 = vld [vmem:[%s22810_s7 + $0xc0] ss:$12 sps:$4 sm:$0xff]   ;;  %v17955_v45 = vld [vmem:[%s22810_s7 + $0xc4] ss:$12 sps:$4 sm:$0xff]  }
 0xfca   : > { %10477 = vmatprep.subr.bf16.mxu0 %v22800_v30  ;;  %10398 = vmatprep.mubr.bf16.mxu0 %v22790_v11  ;;  %v17956_v30 = vld [vmem:[%s22810_s7 + $0x170] ss:$12 sps:$4 sm:$0xff]  }
 0xfcb   : > { %16730 = vmatprep.mubr.msk.bf16.mxu1 %vm18738_vm12, %v22795_v20  ;;  %16734 = vmatprep.subr.bf16.mxu1 %v22795_v20 }
 0xfd0   : > { %15740 = vmatmul.mubr.msk.bf16.vlgmr.msra.gmra.mxu0 %vm10044_vm1, %v10362_v57  ;;  %16731 = vmatmul.mubr.msk.bf16.vlgmr.msra.gmra.mxu1 %vm10044_vm1, %v10362_v57 }
 0xfd1   : > { %10478 = vmatpush1.bf16.msra.mxu0 %v22801_v24  ;;  %16735 = vmatpush3.bf16.msra.mxu1 %v22802_v35 }
 0xfd2   : > { %10575 = vmatprep.subr.bf16.mxu0 %v22803_v27  ;;  %10495 = vmatprep.mubr.bf16.mxu0 %v22790_v11 }
 0xfd3   : > { %16736 = vmatprep.mubr.msk.bf16.mxu1 %vm18738_vm12, %v22795_v20  ;;  %16740 = vmatprep.subr.bf16.mxu1 %v22795_v20 }
 0xfd8   : > { %15742 = vmatmul.mubr.msk.bf16.vlgmr.msra.gmra.mxu0 %vm10044_vm1, %v10450_v43  ;;  %16737 = vmatmul.mubr.msk.bf16.vlgmr.msra.gmra.mxu1 %vm10044_vm1, %v10450_v43 }
 0xfd9   : > { %10576 = vmatpush1.bf16.msra.mxu0 %v22804_v21  ;;  %16741 = vmatpush3.bf16.msra.mxu1 %v22805_v37 }
 0xfda   : > { %10672 = vmatprep.subr.bf16.mxu0 %v22806_v16  ;;  %10593 = vmatprep.mubr.bf16.mxu0 %v22790_v11 }
 0xfdb   : > { %16742 = vmatprep.mubr.msk.bf16.mxu1 %vm18738_vm12, %v22795_v20  ;;  %16746 = vmatprep.subr.bf16.mxu1 %v22795_v20 }
 0xfe0   : > { %15744 = vmatmul.mubr.msk.bf16.vlgmr.msra.gmra.mxu0 %vm10044_vm1, %v10557_v29  ;;  %16743 = vmatmul.mubr.msk.bf16.vlgmr.msra.gmra.mxu1 %vm10044_vm1, %v10557_v29 }
 0xfe1   : > { %10673 = vmatpush1.bf16.msra.mxu0 %v22807_v44  ;;  %16747 = vmatpush3.bf16.msra.mxu1 %v22808_v36 }
 0xfe2   : > { %10769 = vmatprep.subr.bf16.mxu0 %v22809_v46  ;;  %10690 = vmatprep.mubr.bf16.mxu0 %v22790_v11 }
 0xfe3   : > { %16748 = vmatprep.mubr.msk.bf16.mxu1 %vm18738_vm12, %v22795_v20  ;;  %16752 = vmatprep.subr.bf16.mxu1 %v22795_v20 }
 0xfe8   : > { %15746 = vmatmul.mubr.msk.bf16.vlgmr.msra.gmra.mxu0 %vm10044_vm1, %v10654_v38  ;;  %16749 = vmatmul.mubr.msk.bf16.vlgmr.msra.gmra.mxu1 %vm10044_vm1, %v10654_v38 }
 0xfe9   : > { %10770 = vmatpush1.bf16.msra.mxu0 %v22811_v54  ;;  %16753 = vmatpush3.bf16.msra.mxu1 %v22812_v40 }
 0xfea   : > { %10787 = vmatprep.mubr.bf16.mxu0 %v22790_v11  ;;  %16754 = vmatprep.mubr.msk.bf16.mxu1 %vm18738_vm12, %v22795_v20 }
 0xfeb   : > { %11217 = vmatprep.subr.bf16.mxu0 %v17904_v31  ;;  %11270 = vmatprep.subr.bf16.mxu1 %v17946_v47 }
 0xff0   : > { %15748 = vmatmul.mubr.msk.bf16.vlgmr.msra.gmra.mxu0 %vm10044_vm1, %v10751_v3  ;;  %16755 = vmatmul.mubr.msk.bf16.vlgmr.msra.gmra.mxu1 %vm10044_vm1, %v10751_v3 }
 0xff1   : > { %11290 = vmatprep.mubr.bf16.mxu1 %v22790_v11  ;;  %11218 = vmatpush1.bf16.msra.mxu0 %v17902_v48 }
 0xff2   : > { %11219 = vmatprep.subr.bf16.mxu0 %v17907_v26  ;;  %11271 = vmatpush1.bf16.msra.mxu1 %v17944_v33 }
 0xff3   : > { %11272 = vmatprep.subr.bf16.mxu1 %v17952_v52 }
 0xff5   : > { %11220 = vmatpush1.bf16.msra.mxu0 %v17905_v50 }
 0xff6   : > { %11221 = vmatprep.subr.bf16.mxu0 %v17910_v15  ;;  %11273 = vmatpush1.bf16.msra.mxu1 %v17950_v22 }
 0xff7   : > { %16430 = vmatprep.subr.bf16.mxu1 %v17956_v30 }
 0xff9   : > { %11222 = vmatpush1.bf16.msra.mxu0 %v17908_v13 }
 0xffa   : > { %11223 = vmatprep.subr.bf16.mxu0 %v17913_v58 }
 0xffd   : > { %11224 = vmatpush1.bf16.msra.mxu0 %v17911_v1 }
 0xffe   : > { %11225 = vmatprep.subr.bf16.mxu0 %v17916_v41 }
0x1001   : > { %11226 = vmatpush1.bf16.msra.mxu0 %v17914_v17 }
0x1002   : > { %11227 = vmatprep.subr.bf16.mxu0 %v17919_v4 }
0x1005   : > { %11228 = vmatpush1.bf16.msra.mxu0 %v17917_v59 }
0x1006   : > { %11229 = vmatprep.subr.bf16.mxu0 %v17922_v55 }
0x1009   : > { %11230 = vmatpush1.bf16.msra.mxu0 %v17920_v34 }
0x100a   : > { %11231 = vmatprep.subr.bf16.mxu0 %v17925_v19 }
0x100d   : > { %11232 = vmatpush1.bf16.msra.mxu0 %v17923_v61 }
0x100e   : > { %11233 = vmatprep.subr.bf16.mxu0 %v17928_v51 }
0x1011   : > { %11234 = vmatpush2.bf16.msra.mxu0 %v17926_v5 }
0x1012   : > { %11235 = vmatprep.subr.bf16.mxu0 %v17931_v18 }
0x1015   : > { %11236 = vmatpush2.bf16.msra.mxu0 %v17929_v63 }
0x1016   : > { %11237 = vmatprep.subr.bf16.mxu0 %v17934_v8 }
0x1019   : > { %11238 = vmatpush2.bf16.msra.mxu0 %v17932_v23 }
0x101a   : > { %11239 = vmatprep.subr.bf16.mxu0 %v17937_v12 }
0x101d   : > { %11240 = vmatpush2.bf16.msra.mxu0 %v17935_v2 }
0x101e   : > { %11241 = vmatprep.subr.bf16.mxu0 %v17940_v10 }
0x1021   : > { %11242 = vmatpush2.bf16.msra.mxu0 %v17938_v7 }
0x1022   : > { %11243 = vmatprep.subr.bf16.mxu0 %v17943_v42 }
0x1025   : > { %11244 = vmatpush2.bf16.msra.mxu0 %v17941_v6 }
0x1026   : > { %11245 = vmatprep.subr.bf16.mxu0 %v17949_v60 }
0x1029   : > { %11246 = vmatpush2.bf16.msra.mxu0 %v17947_v0 }
0x102a   : > { %11247 = vmatprep.subr.bf16.mxu0 %v17955_v45 }
0x102d   : > { %11248 = vmatpush2.bf16.msra.mxu0 %v17953_v14 }
0x1078   : > { %v10125_v57 = vpop.f32.mrf.mxu0  ;;  %v10166_v9 = vpop.f32.mrf.mxu1 }
0x107a   : > { %v10127_v24 = vpop.f32.mrf.mxu0  ;;  %v16714_v35 = vpop.f32.mrf.mxu1 }
0x107c   : > { %v10129_v27 = vpop.f32.mrf.mxu0  ;;  %v10169_v25 = vpop.f32.mrf.mxu1 }
0x107e   : > { %v10130_v43 = vpop.f32.mrf.mxu0  ;;  %v16715_v21 = vpop.f32.mrf.mxu1 }
0x1080   : > { %v10209_v37 = vpop.f32.mrf.mxu0  ;;  %v10250_v16 = vpop.f32.mrf.mxu1 }
0x1081   : > { %v10251_v33 = vadd.f32 %v10250_v16, %v10166_v9  ;;  %v10210_v47 = vadd.f32 %v10209_v37, %v10125_v57 }
0x1082   : > { %v10211_v29 = vpop.f32.mrf.mxu0  ;;  %v16720_v44 = vpop.f32.mrf.mxu1 }
0x1083   : > { %v10212_v0 = vadd.f32 %v10211_v29, %v10127_v24 }
0x1084   : > { %v10213_v36 = vpop.f32.mrf.mxu0  ;;  %v10253_v46 = vpop.f32.mrf.mxu1 }
0x1086   : > { %v10214_v38 = vpop.f32.mrf.mxu0  ;;  %v16721_v54 = vpop.f32.mrf.mxu1 }
0x1088   : > { %v10303_v40 = vpop.f32.mrf.mxu0  ;;  %v10344_v3 = vpop.f32.mrf.mxu1 }
0x1089   : > { %v10352_v22 = vadd.f32 %v10344_v3, %v10251_v33  ;;  %v10350_v14 = vadd.f32 %v10303_v40, %v10210_v47  ;;  %v17970_v33 = vld [vmem:[%s22810_s7 + $0xc8] ss:$12 sps:$4 sm:$0xff]  }
0x108a   : > { %v10305_v48 = vpop.f32.mrf.mxu0  ;;  %v16726_v31 = vpop.f32.mrf.mxu1  ;;  %v17971_v47 = vld [vmem:[%s22810_s7 + $0x8] ss:$12 sps:$4 sm:$0xff]  }
0x108b   : > { %v10351_v35 = vadd.f32 %v10305_v48, %v10212_v0  ;;  %v17974_v0 = vld [vmem:[%s19299_s27 + $0x118] ss:$20 sps:$4 sm:$0xff]  }
0x108c   : > { %v10307_v50 = vpop.f32.mrf.mxu0  ;;  %v10347_v26 = vpop.f32.mrf.mxu1 }
0x108e   : > { %v10308_v13 = vpop.f32.mrf.mxu0  ;;  %v16727_v15 = vpop.f32.mrf.mxu1 }
0x1090   : > { %v10400_v1 = vpop.f32.mrf.mxu0  ;;  %v10441_v58 = vpop.f32.mrf.mxu1 }
0x1091   : > { %v10449_v27 = vadd.f32 %v10441_v58, %v10352_v22  ;;  %v10447_v25 = vadd.f32 %v10400_v1, %v10350_v14  ;;  %v17957_v58 = vld [vmem:[%s22810_s7 + $0xb0] ss:$12 sps:$4 sm:$0xff]   ;;  %v17979_v14 = vld [vmem:[%s19299_s27 + $0xf4] ss:$20 sps:$4 sm:$0xff]  }
0x1092   : > { %v10402_v17 = vpop.f32.mrf.mxu0  ;;  %v16732_v41 = vpop.f32.mrf.mxu1  ;;  %v17976_v22 = vld [vmem:[%s19299_s27 + $0x11c] ss:$20 sps:$4 sm:$0xff]  }
0x1093   : > { %v10448_v44 = vadd.f32 %v10402_v17, %v10351_v35  ;;  %v17980_v35 = vld [vmem:[%s19299_s27 + $0xc8] ss:$20 sps:$4 sm:$0xff]  }
0x1094   : > { %v10404_v59 = vpop.f32.mrf.mxu0  ;;  %v10444_v4 = vpop.f32.mrf.mxu1 }
0x1096   : > { %v10405_v34 = vpop.f32.mrf.mxu0  ;;  %v16733_v55 = vpop.f32.mrf.mxu1 }
0x1097   : > { %v17958_v34 = vld [vmem:[%s22810_s7 + $0x158] ss:$12 sps:$4 sm:$0xff]  }
0x1098   : > { %v10497_v61 = vpop.f32.mrf.mxu0  ;;  %v10538_v19 = vpop.f32.mrf.mxu1 }
0x1099   : > { %v10546_v36 = vadd.f32 %v10538_v19, %v10449_v27  ;;  %v10544_v46 = vadd.f32 %v10497_v61, %v10447_v25  ;;  %v17985_v27 = vld [vmem:[%s19299_s27 + $0xa4] ss:$20 sps:$4 sm:$0xff]   ;;  %v17983_v25 = vld [vmem:[%s19299_s27 + $0xa0] ss:$20 sps:$4 sm:$0xff]  }
0x109a   : > { %v10499_v5 = vpop.f32.mrf.mxu0  ;;  %v16738_v51 = vpop.f32.mrf.mxu1 }
0x109b   : > { %v10545_v9 = vadd.f32 %v10499_v5, %v10448_v44  ;;  %v17959_v51 = vld [vmem:[%s22810_s7 + $0x98] ss:$12 sps:$4 sm:$0xff]   ;;  %v17991_v44 = vld [vmem:[%s19299_s27 + $0x54] ss:$20 sps:$4 sm:$0xff]  }
0x109c   : > { %v10501_v63 = vpop.f32.mrf.mxu0  ;;  %v10541_v18 = vpop.f32.mrf.mxu1 }
0x109d   : > { %v17960_v63 = vld [vmem:[%s22810_s7 + $0x140] ss:$12 sps:$4 sm:$0xff]  }
0x109e   : > { %v10502_v23 = vpop.f32.mrf.mxu0  ;;  %v16739_v8 = vpop.f32.mrf.mxu1  ;;  %v17961_v18 = vld [vmem:[%s22810_s7 + $0x80] ss:$12 sps:$4 sm:$0xff]  }
0x109f   : > { %v17962_v23 = vld [vmem:[%s22810_s7 + $0x128] ss:$12 sps:$4 sm:$0xff]  }
0x10a0   : > { %v10595_v2 = vpop.f32.mrf.mxu0  ;;  %v10636_v12 = vpop.f32.mrf.mxu1  ;;  %v17963_v8 = vld [vmem:[%s22810_s7 + $0x68] ss:$12 sps:$4 sm:$0xff]  }
0x10a1   : > { %v10644_v57 = vadd.f32 %v10636_v12, %v10546_v36  ;;  %v10642_v37 = vadd.f32 %v10595_v2, %v10544_v46  ;;  %v17964_v2 = vld [vmem:[%s22810_s7 + $0x110] ss:$12 sps:$4 sm:$0xff]   ;;  %v17994_v46 = vld [vmem:[%s19299_s27 + $0x2c] ss:$20 sps:$4 sm:$0xff]  }
0x10a2   : > { %v10597_v7 = vpop.f32.mrf.mxu0  ;;  %v16744_v10 = vpop.f32.mrf.mxu1  ;;  %v17965_v12 = vld [vmem:[%s22810_s7 + $0x50] ss:$12 sps:$4 sm:$0xff]  }
0x10a3   : > { %v10643_v29 = vadd.f32 %v10597_v7, %v10545_v9  ;;  %v17966_v7 = vld [vmem:[%s22810_s7 + $0xf8] ss:$12 sps:$4 sm:$0xff]  }
0x10a4   : > { %v10599_v6 = vpop.f32.mrf.mxu0  ;;  %v10639_v42 = vpop.f32.mrf.mxu1  ;;  %v17967_v10 = vld [vmem:[%s22810_s7 + $0x38] ss:$12 sps:$4 sm:$0xff]  }
0x10a5   : > { %v17968_v6 = vld [vmem:[%s22810_s7 + $0xe0] ss:$12 sps:$4 sm:$0xff]   ;;  %v17989_v36 = vld [vmem:[%s19299_s27 + $0x50] ss:$20 sps:$4 sm:$0xff]  }
0x10a6   : > { %v10600_v60 = vpop.f32.mrf.mxu0  ;;  %v16745_v52 = vpop.f32.mrf.mxu1  ;;  %v17969_v42 = vld [vmem:[%s22810_s7 + $0x20] ss:$12 sps:$4 sm:$0xff]  }
0x10a7   : > { %v17972_v60 = vld [vmem:[%s22810_s7 + $0x1a0] ss:$12 sps:$4 sm:$0xff]   ;;  %v17973_v52 = vld [vmem:[%s22810_s7 + $0x188] ss:$12 sps:$4 sm:$0xff]  }
0x10a8   : > { %v10692_v45 = vpop.f32.mrf.mxu0  ;;  %v10733_v30 = vpop.f32.mrf.mxu1 }
0x10a9   : > { %v10741_v40 = vadd.f32 %v10733_v30, %v10644_v57  ;;  %v10739_v3 = vadd.f32 %v10692_v45, %v10642_v37  ;;  %v17977_v45 = vld [vmem:[%s19299_s27 + $0xf0] ss:$20 sps:$4 sm:$0xff]   ;;  %v17982_v30 = vld [vmem:[%s19299_s27 + $0xcc] ss:$20 sps:$4 sm:$0xff]  }
0x10aa   : > { %v10694_v43 = vpop.f32.mrf.mxu0  ;;  %v16750_v21 = vpop.f32.mrf.mxu1 }
0x10ab   : > { %v10740_v50 = vadd.f32 %v10694_v43, %v10643_v29  ;;  %v17988_v43 = vld [vmem:[%s19299_s27 + $0x7c] ss:$20 sps:$4 sm:$0xff]   ;;  %v17986_v21 = vld [vmem:[%s19299_s27 + $0x78] ss:$20 sps:$4 sm:$0xff]  }
0x10ac   : > { %v10696_v38 = vpop.f32.mrf.mxu0  ;;  %v10736_v54 = vpop.f32.mrf.mxu1 }
0x10ad   : > { %v17992_v38 = vld [vmem:[%s19299_s27 + $0x28] ss:$20 sps:$4 sm:$0xff]  }
0x10ae   : > { %v10697_v16 = vpop.f32.mrf.mxu0  ;;  %v16751_v24 = vpop.f32.mrf.mxu1 }
0x10b0   : > { %v10789_v48 = vpop.f32.mrf.mxu0  ;;  %v10830_v31 = vpop.f32.mrf.mxu1 }
0x10b1   : > { %v10838_v26 = vadd.f32 %v10830_v31, %v10741_v40  ;;  %v10836_v13 = vadd.f32 %v10789_v48, %v10739_v3  ;;  %v10921_v3 = vrot.slane %v21487_v32, %v21315_v28  ;;  %v10917_v48 = vrot.slane %v21492_v56, %v21315_v28 }
0x10b2   : > { %v10791_v15 = vpop.f32.mrf.mxu0  ;;  %v16756_v1 = vpop.f32.mrf.mxu1 }
0x10b3   : > { %v10913_v17 = vpack.c.bf16 %v10838_v26, %v10838_v26  ;;  %v10837_v41 = vadd.f32 %v10791_v15, %v10740_v50  ;;  %v10911_v61 = vpack.c.bf16 %v10836_v13, %v10836_v13 }
0x10b4   : > { %v10793_v59 = vpop.f32.mrf.mxu0  ;;  %v10833_v4 = vpop.f32.mrf.mxu1 }
0x10b5   : > { %v10912_v55 = vpack.c.bf16 %v10837_v41, %v10837_v41  ;;  %15804 = vmatmul.mubr.msk.bf16.vlgmr.msra.gmra.mxu1 %vm7771_vm11, %v10913_v17 }
0x10b6   : > { %16431 = vmatpush3.bf16.msra.mxu1 %v17957_v58  ;;  %v10794_v19 = vpop.f32.mrf.mxu0  ;;  %v16757_v5 = vpop.f32.mrf.mxu1  ;;  %v18262_v58 = vld [vmem:[%s19305_s30 + $0x10] sm:$0xff] }
0x10b7   : > { %11249 = vmatprep.mubr.bf16.mxu0 %v10912_v55  ;;  %11331 = vmatprep.mubr.bf16.mxu1 %v10912_v55 }
0x10b8   : > { %11250 = vmatmul.mubr.bf16.vlgmr.msra.gmra.mxu0 %v10911_v61  ;;  %16432 = vmatprep.subr.bf16.mxu1 %v17958_v34 }
0x10b9   : > { %12249 = vmatprep.mubr.bf16.mxu0 %v22790_v11 }
0x10ba   : > { %16433 = vmatpush3.bf16.msra.mxu1 %v17959_v51 }
0x10bb   : > { %16434 = vmatprep.subr.bf16.mxu1 %v17960_v63 }
0x10be   : > { %16435 = vmatpush3.bf16.msra.mxu1 %v17961_v18 }
0x10bf   : > { %16436 = vmatprep.subr.bf16.mxu1 %v17962_v23 }
0x10c2   : > { %16437 = vmatpush3.bf16.msra.mxu1 %v17963_v8 }
0x10c3   : > { %16438 = vmatprep.subr.bf16.mxu1 %v17964_v2 }
0x10c6   : > { %16439 = vmatpush3.bf16.msra.mxu1 %v17965_v12 }
0x10c7   : > { %16440 = vmatprep.subr.bf16.mxu1 %v17966_v7 }
0x10ca   : > { %16441 = vmatpush3.bf16.msra.mxu1 %v17967_v10 }
0x10cb   : > { %16442 = vmatprep.subr.bf16.mxu1 %v17968_v6 }
0x10ce   : > { %16443 = vmatpush3.bf16.msra.mxu1 %v17969_v42 }
0x10cf   : > { %16444 = vmatprep.subr.bf16.mxu1 %v17970_v33 }
0x10d2   : > { %16445 = vmatpush3.bf16.msra.mxu1 %v17971_v47 }
0x10d3   : > { %16758 = vmatprep.subr.bf16.mxu1 %v22795_v20 }
0x10d5   : > { %11332 = vmatmul.mubr.bf16.vlgmr.msra.gmra.mxu1 %v10911_v61 }
0x10d6   : > { %16759 = vmatpush3.bf16.msra.mxu1 %v17972_v60  ;;  %16762 = vmatprep.mubr.msk.bf16.mxu1 %vm18738_vm12, %v22795_v20 }
0x10d7   : > { %16760 = vmatprep.subr.bf16.mxu1 %v22795_v20 }
0x10da   : > { %16761 = vmatpush3.bf16.msra.mxu1 %v17973_v52 }
0x10db   : > { %12176 = vmatprep.subr.bf16.mxu1 %v17976_v22 }
0x10dd   : > { %16763 = vmatmul.mubr.msk.bf16.vlgmr.msra.gmra.mxu1 %vm7771_vm11, %v10913_v17  ;;  %v10925_v17 = vrot.slane %v18262_v58, %v21315_v28  ;;  %v18033_v58 = vld [vmem:[%s19299_s27 + $0x2b4] ss:$20 sps:$4 sm:$0xff]  }
0x10de   : > { %12177 = vmatpush1.bf16.msra.mxu1 %v17974_v0 }
0x10df   : > { %12178 = vmatprep.subr.bf16.mxu1 %v17979_v14 }
0x10e2   : > { %12179 = vmatpush1.bf16.msra.mxu1 %v17977_v45 }
0x10e3   : > { %12180 = vmatprep.subr.bf16.mxu1 %v17982_v30 }
0x10e6   : > { %12181 = vmatpush1.bf16.msra.mxu1 %v17980_v35 }
0x10e7   : > { %12182 = vmatprep.subr.bf16.mxu1 %v17985_v27 }
0x10ea   : > { %12183 = vmatpush1.bf16.msra.mxu1 %v17983_v25  ;;  %v17997_v25 = vld [vmem:[%s19299_s27 + $0x4] ss:$20 sps:$4 sm:$0xff]  }
0x10eb   : > { %12184 = vmatprep.subr.bf16.mxu1 %v17988_v43  ;;  %v17995_v43 = vld [vmem:[%s19299_s27] ss:$20 sps:$4 sm:$0xff]  }
0x10ee   : > { %12185 = vmatpush1.bf16.msra.mxu1 %v17986_v21  ;;  %v18000_v21 = vld [vmem:[%s19299_s27 + $0x25c] ss:$20 sps:$4 sm:$0xff]  }
0x10ef   : > { %12186 = vmatprep.subr.bf16.mxu1 %v17991_v44  ;;  %v17998_v44 = vld [vmem:[%s19299_s27 + $0x258] ss:$20 sps:$4 sm:$0xff]  }
0x10f2   : > { %12187 = vmatpush1.bf16.msra.mxu1 %v17989_v36  ;;  %v18001_v36 = vld [vmem:[%s19299_s27 + $0x230] ss:$20 sps:$4 sm:$0xff]  }
0x10f3   : > { %12188 = vmatprep.subr.bf16.mxu1 %v17994_v46  ;;  %v18003_v46 = vld [vmem:[%s19299_s27 + $0x234] ss:$20 sps:$4 sm:$0xff]  }
0x10f6   : > { %12189 = vmatpush1.bf16.msra.mxu1 %v17992_v38  ;;  %v18006_v38 = vld [vmem:[%s19299_s27 + $0x20c] ss:$20 sps:$4 sm:$0xff]  }
0x10f7   : > { %12190 = vmatprep.subr.bf16.mxu1 %v17997_v25 }
0x10fa   : > { %12191 = vmatpush1.bf16.msra.mxu1 %v17995_v43 }
0x10fb   : > { %12192 = vmatprep.subr.bf16.mxu1 %v18000_v21  ;;  %v18028_v21 = vld [vmem:[%s19299_s27 + $0x120] ss:$20 sps:$4 sm:$0xff]  }
0x10fe   : > { %12193 = vmatpush2.bf16.msra.mxu1 %v17998_v44 }
0x10ff   : > { %12194 = vmatprep.subr.bf16.mxu1 %v18003_v46  ;;  %v18031_v46 = vld [vmem:[%s19299_s27 + $0x2b0] ss:$20 sps:$4 sm:$0xff]  }
0x1102   : > { %12195 = vmatpush2.bf16.msra.mxu1 %v18001_v36 }
0x1103   : > { %12196 = vmatprep.subr.bf16.mxu1 %v18006_v38 }
0x1175   : > { %v11292_v54 = vpop.f32.mrf.mxu1 }
0x1177   : > { %v11294_v9 = vpop.f32.mrf.mxu1 }
0x1178   : > { %v11251_v57 = vpop.f32.mrf.mxu0 }
0x1179   : > { %v11296_v37 = vpop.f32.mrf.mxu1  ;;  %v11252_v26 = vadd.f32 %v11251_v57, %v10917_v48  ;;  %v18018_v57 = vld [vmem:[%s19299_s27 + $0x2ac] ss:$20 sps:$4 sm:$0xff]  }
0x117a   : > { %v11253_v16 = vpop.f32.mrf.mxu0  ;;  %v18009_v37 = vld [vmem:[%s19299_s27 + $0x1e4] ss:$20 sps:$4 sm:$0xff]   ;;  %12229 = vmatprep.subr.bf16.mxu0 %v18018_v57 }
0x117b   : > { %v11297_v24 = vpop.f32.mrf.mxu1  ;;  %v11254_v31 = vadd.f32 %v11253_v16, %v10921_v3  ;;  %v11293_v59 = vadd.f32 %v11292_v54, %v11252_v26  ;;  %v18004_v54 = vld [vmem:[%s19299_s27 + $0x208] ss:$20 sps:$4 sm:$0xff]   ;;  %v18024_v16 = vld [vmem:[%s19299_s27 + $0x284] ss:$20 sps:$4 sm:$0xff]   ;;  %v18021_v26 = vld [vmem:[%s19299_s27 + $0x16c] ss:$20 sps:$4 sm:$0xff]  }
0x117c   : > { %v11255_v29 = vpop.f32.mrf.mxu0  ;;  %v18022_v24 = vld [vmem:[%s19299_s27 + $0x280] ss:$20 sps:$4 sm:$0xff]   ;;  %12197 = vmatpush2.bf16.msra.mxu1 %v18004_v54  ;;  %v18012_v3 = vld [vmem:[%s19299_s27 + $0x1bc] ss:$20 sps:$4 sm:$0xff]   ;;  %v18010_v48 = vld [vmem:[%s19299_s27 + $0x1b8] ss:$20 sps:$4 sm:$0xff]  }
0x117d   : > { %v11295_v15 = vadd.f32 %v11294_v9, %v11254_v31  ;;  %v18016_v9 = vld [vmem:[%s19299_s27 + $0x2a8] ss:$20 sps:$4 sm:$0xff]   ;;  %v18007_v29 = vld [vmem:[%s19299_s27 + $0x1e0] ss:$20 sps:$4 sm:$0xff]   ;;  %12198 = vmatprep.subr.bf16.mxu1 %v18009_v37  ;;  %v18034_v57 = vld [vmem:[%s19299_s27 + $0xf8] ss:$20 sps:$4 sm:$0xff]  }
0x117e   : > { %v11256_v40 = vpop.f32.mrf.mxu0  ;;  %12230 = vmatpush1.bf16.msra.mxu0 %v18016_v9  ;;  %v18015_v31 = vld [vmem:[%s19299_s27 + $0x194] ss:$20 sps:$4 sm:$0xff]   ;;  %v18036_v54 = vld [vmem:[%s19299_s27 + $0xfc] ss:$20 sps:$4 sm:$0xff]   ;;  %v18039_v9 = vld [vmem:[%s19299_s27 + $0x28c] ss:$20 sps:$4 sm:$0xff]  }
0x117f   : > { %v11382_v34 = vcombine.low %v11293_v59, %v11295_v15  ;;  %12231 = vmatprep.subr.bf16.mxu0 %v18024_v16  ;;  %v18030_v40 = vld [vmem:[%s19299_s27 + $0x124] ss:$20 sps:$4 sm:$0xff]   ;;  %v18037_v37 = vld [vmem:[%s19299_s27 + $0x288] ss:$20 sps:$4 sm:$0xff]  }
0x1180   : > { %12199 = vmatpush2.bf16.msra.mxu1 %v18007_v29  ;;  %v18027_v15 = vld [vmem:[%s19299_s27 + $0x144] ss:$20 sps:$4 sm:$0xff]   ;;  %v18042_v16 = vld [vmem:[%s19299_s27 + $0xd4] ss:$20 sps:$4 sm:$0xff]  }
0x1181   : > { %v11389_v5 = vrot.slane %v11382_v34, %v20959_v49  ;;  %12200 = vmatprep.subr.bf16.mxu1 %v18012_v3  ;;  %v18040_v29 = vld [vmem:[%s19299_s27 + $0xd0] ss:$20 sps:$4 sm:$0xff]   ;;  %v18047_v3 = vld [vmem:[%s19299_s27 + $0xac] ss:$20 sps:$4 sm:$0xff]  }
0x1182   : > { %12232 = vmatpush1.bf16.msra.mxu0 %v18022_v24  ;;  %v18043_v24 = vld [vmem:[%s19299_s27 + $0x268] ss:$20 sps:$4 sm:$0xff]  }
0x1183   : > { %12258 = vmatprep.subr.bf16.mxu0 %v18030_v40  ;;  %v18044_v40 = vld [vmem:[%s19299_s27 + $0x128] ss:$20 sps:$4 sm:$0xff]  }
0x1184   : > { %12201 = vmatpush2.bf16.msra.mxu1 %v18010_v48  ;;  %v18048_v48 = vld [vmem:[%s19299_s27 + $0x240] ss:$20 sps:$4 sm:$0xff]  }
0x1185   : > { %12202 = vmatprep.subr.bf16.mxu1 %v18015_v31  ;;  %v18045_v31 = vld [vmem:[%s19299_s27 + $0xa8] ss:$20 sps:$4 sm:$0xff]  }
0x1195   : > { %v16446_v50 = vpop.f32.mrf.mxu1 }
0x1197   : > { %v16447_v13 = vpop.f32.mrf.mxu1 }
0x1198   : > { %v16448_v1 = vadd.f32 %v16447_v13, %v16446_v50  ;;  %v18013_v50 = vld [vmem:[%s19299_s27 + $0x190] ss:$20 sps:$4 sm:$0xff]   ;;  %v18019_v13 = vld [vmem:[%s19299_s27 + $0x168] ss:$20 sps:$4 sm:$0xff]  }
0x1199   : > { %v16449_v41 = vpop.f32.mrf.mxu1  ;;  %12203 = vmatpush2.bf16.msra.mxu1 %v18013_v50  ;;  %v18049_v50 = vld [vmem:[%s19299_s27 + $0x100] ss:$20 sps:$4 sm:$0xff]  }
0x119a   : > { %v11334_v55 = vadd.f32 %v16448_v1, %v10925_v17  ;;  %12204 = vmatprep.subr.bf16.mxu1 %v18021_v26  ;;  %v18025_v1 = vld [vmem:[%s19299_s27 + $0x140] ss:$20 sps:$4 sm:$0xff]   ;;  %v18052_v26 = vld [vmem:[%s19299_s27 + $0x84] ss:$20 sps:$4 sm:$0xff]  }
0x119b   : > { %v16450_v4 = vpop.f32.mrf.mxu1 }
0x119d   : > { %v11373_v61 = vpop.f32.mrf.mxu1  ;;  %12205 = vmatpush2.bf16.msra.mxu1 %v18019_v13  ;;  %v18053_v13 = vld [vmem:[%s19299_s27 + $0x218] ss:$20 sps:$4 sm:$0xff]  }
0x119e   : > { %v11374_v19 = vadd.f32 %v11373_v61, %v11334_v55  ;;  %12206 = vmatprep.subr.bf16.mxu1 %v18027_v15  ;;  %v18050_v15 = vld [vmem:[%s19299_s27 + $0x80] ss:$20 sps:$4 sm:$0xff]  }
0x119f   : > { %v16764_v32 = vpop.f32.mrf.mxu1 }
0x11a0   : > { %v11396_v56 = vrot.slane %v11374_v19, %v20959_v49  ;;  %v21936_v19 = vld [vmem:[%s19305_s30 + $0x18] sm:$0xf]  ;;  %v21939_v32 = vld [vmem:[%s19305_s30 + $0x20] sm:$0xf] }
0x11a1   : > { %v11376_v51 = vpop.f32.mrf.mxu1  ;;  %12207 = vmatpush2.bf16.msra.mxu1 %v18025_v1  ;;  %v18054_v1 = vld [vmem:[%s19299_s27 + $0xd8] ss:$20 sps:$4 sm:$0xff]  }
0x11a2   : > { %v11397_v63 = vcombine.low %v11389_v5, %v11396_v56  ;;  %12311 = vmatprep.subr.bf16.mxu1 %v18033_v58  ;;  %v11484_v5 = vrot.slane %v21936_v19, %v21035_v62  ;;  %v11488_v56 = vrot.slane %v21939_v32, %v21035_v62  ;;  %v21946_v51 = vld [vmem:[%s19305_s30 + $0x28] sm:$0xf] }
0x11a3   : > { %v16765_v18 = vpop.f32.mrf.mxu1  ;;  %v18057_v58 = vld [vmem:[%s19299_s27 + $0x5c] ss:$20 sps:$4 sm:$0xff]  }
0x11a4   : > { %v21894_v23 = vadd.f32 %v11397_v63, %v21123_v39  ;;  %v11517_v63 = vrot.slane %v21936_v19, %v21304_v53  ;;  %v11521_v18 = vrot.slane %v21939_v32, %v21304_v53 }
0x11a6   : > { %v11401_v8 = vcombine.high %v21894_v23, %v21894_v23  ;;  %v11408_v2 = vrot.slane %v21894_v23, %v20959_v49  ;;  %v11428_v12 = vmul.f32 %v21894_v23, %v21894_v23 }
0x11a8   : > { %v11415_v7 = vrot.slane %v11401_v8, %v20959_v49  ;;  %v11416_v10 = vcombine.high %v11408_v2, %v11408_v2  ;;  %v11430_v6 = vcombine.high %v11428_v12, %v11428_v12  ;;  %v11437_v42 = vrot.slane %v11428_v12, %v20959_v49 }
0x11a9   : > { %v11420_v39 = vsel %vm7978_vm13, %v11408_v2, 0.0  ;;  %v11492_v8 = vrot.slane %v21946_v51, %v21035_v62  ;;  %v11496_v2 = vcombine.low %v11484_v5, %v11488_v56  ;;  %v11525_v12 = vrot.slane %v21946_v51, %v21304_v53  ;;  %v18067_v5 = vld [vmem:[%s19299_s27 + $0xc] ss:$20 sps:$4 sm:$0xff]  }
0x11aa   : > { %v11421_v33 = vsel %vm7978_vm13, %v11416_v10, 0.0  ;;  %v11444_v60 = vrot.slane %v11430_v6, %v20959_v49  ;;  %v11445_v52 = vcombine.high %v11437_v42, %v11437_v42  ;;  %v11423_v0 = vsel %vm7982_vm14, %v11415_v7, 0.0  ;;  %v22813_v10 = vld [vmem:[#allocation110_spill] sm:$0xff] }
0x11ab   : > { %v11422_v47 = vadd.f32 %v11421_v33, %v11420_v39  ;;  %v11449_v14 = vsel %vm7978_vm13, %v11437_v42, 0.0  ;;  %v11529_v7 = vcombine.low %v11517_v63, %v11521_v18  ;;  %v11503_v42 = vrot.slane %v11496_v2, %v20959_v49  ;;  %v18068_v56 = vld [vmem:[%s19299_s27 + $0x1a0] ss:$20 sps:$4 sm:$0xff]   ;;  %v18065_v63 = vld [vmem:[%s19299_s27 + $0x8] ss:$20 sps:$4 sm:$0xff]  }
0x11ac   : > { %v11450_v45 = vsel %vm7978_vm13, %v11445_v52, 0.0  ;;  %v11452_v35 = vsel %vm7982_vm14, %v11444_v60, 0.0  ;;  %v11510_v39 = vrot.slane %v11492_v8, %v20959_v49  ;;  %v18069_v18 = vld [vmem:[%s19299_s27 + $0x60] ss:$20 sps:$4 sm:$0xff]   ;;  %v18072_v8 = vld [vmem:[%s19299_s27 + $0x264] ss:$20 sps:$4 sm:$0xff]  }
0x11ad   : > { %v11424_v22 = vadd.f32 %v11423_v0, %v11422_v47  ;;  %v11451_v30 = vadd.f32 %v11450_v45, %v11449_v14  ;;  %v11536_v33 = vrot.slane %v11529_v7, %v20959_v49  ;;  %v11543_v47 = vrot.slane %v11525_v12, %v20959_v49  ;;  %v18073_v2 = vld [vmem:[%s19299_s27 + $0x178] ss:$20 sps:$4 sm:$0xff]   ;;  %v18070_v12 = vld [vmem:[%s19299_s27 + $0x260] ss:$20 sps:$4 sm:$0xff]  }
0x11ae   : > { %v18074_v7 = vld [vmem:[%s19299_s27 + $0x38] ss:$20 sps:$4 sm:$0xff]  }
0x11af   : > { %11425 = vadd.xlane.f32.xlu0 %v11424_v22  ;;  %v11453_v27 = vadd.f32 %v11452_v35, %v11451_v30  ;;  %v11511_v22 = vcombine.low %v11503_v42, %v11510_v39  ;;  %v11544_v45 = vcombine.low %v11536_v33, %v11543_v47  ;;  %v18078_v42 = vld [vmem:[%s19299_s27 + $0x150] ss:$20 sps:$4 sm:$0xff]   ;;  %v18075_v39 = vld [vmem:[%s19299_s27 + $0x238] ss:$20 sps:$4 sm:$0xff]   ;;  %v18082_v47 = vld [vmem:[%s19299_s27 + $0x214] ss:$20 sps:$4 sm:$0xff]  }
0x11b0   : > { %v18079_v33 = vld [vmem:[%s19299_s27 + $0x10] ss:$20 sps:$4 sm:$0xff]  }
0x11b1   : > { %11454 = vadd.xlane.f32.xlu1 %v11453_v27 }
0x1238   : > { %v11426_v17 = vpop.xlane.xlu0 %11425 }
0x1239   : > { %v11427_v41 = vmul.f32 0.0034722222, %v11426_v17  ;;  %v18058_v17 = vld [vmem:[%s19299_s27 + $0x1f0] ss:$20 sps:$4 sm:$0xff]  }
0x123a   : > { %v11455_v4 = vpop.xlane.xlu1 %11454 }
0x123b   : > { %v11457_v59 = vmul.f32 %v11427_v41, %v11427_v41  ;;  %v11456_v34 = vmul.f32 0.0034722222, %v11455_v4  ;;  %v11468_v6 = vrot.slane %v11427_v41, %v22813_v10  ;;  %v18055_v41 = vld [vmem:[%s19299_s27 + $0x58] ss:$20 sps:$4 sm:$0xff]   ;;  %v18062_v4 = vld [vmem:[%s19299_s27 + $0x34] ss:$20 sps:$4 sm:$0xff]  }
0x123d   : > { %v11458_v55 = vsub.f32 %v11456_v34, %v11457_v59  ;;  %v11470_v52 = vsub.f32 %v21894_v23, %v11468_v6  ;;  %v18059_v59 = vld [vmem:[%s19299_s27 + $0xb0] ss:$20 sps:$4 sm:$0xff]   ;;  %v18063_v34 = vld [vmem:[%s19299_s27 + $0x1c8] ss:$20 sps:$4 sm:$0xff]  }
0x123e   : > { %v18077_v6 = vld [vmem:[%s19299_s27 + $0x23c] ss:$20 sps:$4 sm:$0xff]  }
0x123f   : > { %v11459_v61 = vadd.f32 1e-05, %v11458_v55  ;;  %v18060_v55 = vld [vmem:[%s19299_s27 + $0x30] ss:$20 sps:$4 sm:$0xff]  }
0x1241   : > { %18254 = vrsqrt.f32 %v11459_v61  ;;  %v18064_v61 = vld [vmem:[%s19299_s27 + $0x88] ss:$20 sps:$4 sm:$0xff]  }
0x124e   : > { %v18255_v60 = vpop.eup %18254 }
0x124f   : > { %v11478_v0 = vrot.slane %v18255_v60, %v22813_v10  ;;  %v18080_v60 = vld [vmem:[%s19299_s27 + $0x210] ss:$20 sps:$4 sm:$0xff]  }
0x1251   : > { %v11480_v14 = vmul.f32 %v11478_v0, %v11470_v52  ;;  %v18085_v52 = vld [vmem:[%s19299_s27 + $0x1ec] ss:$20 sps:$4 sm:$0xff]   ;;  %v18083_v0 = vld [vmem:[%s19299_s27 + $0x1e8] ss:$20 sps:$4 sm:$0xff]  }
0x1253   : > { %v11513_v30 = vmul.f32 %v11511_v22, %v11480_v14  ;;  %v18088_v22 = vld [vmem:[%s19299_s27 + $0x1c4] ss:$20 sps:$4 sm:$0xff]   ;;  %v18086_v14 = vld [vmem:[%s19299_s27 + $0x1c0] ss:$20 sps:$4 sm:$0xff]  }
0x1255   : > { %v21963_v35 = vadd.f32 %v11544_v45, %v11513_v30  ;;  %v18091_v45 = vld [vmem:[%s19299_s27 + $0x19c] ss:$20 sps:$4 sm:$0xff]   ;;  %v18089_v30 = vld [vmem:[%s19299_s27 + $0x198] ss:$20 sps:$4 sm:$0xff]  }
0x1257   : > { %v11664_v27 = vrot.slane %v21963_v35, %v20959_v49  ;;  %v11657_v25 = vcombine.high %v21963_v35, %v21963_v35 }
0x1259   : > { %v11672_v43 = vcombine.high %v11664_v27, %v11664_v27  ;;  %v11671_v23 = vrot.slane %v11657_v25, %v20959_v49  ;;  %v21974_v38 = vpack.c.bf16 %v11664_v27, %v11664_v27  ;;  %v18094_v27 = vld [vmem:[%s19299_s27 + $0x174] ss:$20 sps:$4 sm:$0xff]   ;;  %v18092_v25 = vld [vmem:[%s19299_s27 + $0x170] ss:$20 sps:$4 sm:$0xff]  }
0x125b   : > { %v11677_v44 = vpack.c.bf16 %v11672_v43, %v11672_v43  ;;  %v21971_v36 = vpack.c.bf16 %v11671_v23, %v11671_v23  ;;  %v18097_v43 = vld [vmem:[%s19299_s27 + $0x14c] ss:$20 sps:$4 sm:$0xff]   ;;  %v18095_v23 = vld [vmem:[%s19299_s27 + $0x148] ss:$20 sps:$4 sm:$0xff]  }
0x125d   : > { %12208 = vmatprep.mubr.bf16.mxu1 %v11677_v44  ;;  %15896 = vmatmul.mubr.msk.bf16.vlgmr.msra.gmra.mxu0 %vm7771_vm11, %v21971_v36 }
0x125e   : > { %12259 = vmatpush1.bf16.msra.mxu0 %v18028_v21  ;;  %12209 = vmatmul.mubr.bf16.vlgmr.msra.gmra.mxu1 %v21974_v38  ;;  %v18098_v21 = vld [vmem:[%s19299_s27 + $0x2b8] ss:$20 sps:$4 sm:$0xff]  }
0x125f   : > { %12290 = vmatprep.mubr.bf16.mxu0 %v11677_v44  ;;  %12312 = vmatpush1.bf16.msra.mxu1 %v18031_v46  ;;  %v18102_v46 = vld [vmem:[%s19302_s22 + $0xac] ss:$12 sps:$4 sm:$0xff]  }
0x1260   : > { %12260 = vmatprep.subr.bf16.mxu0 %v18036_v54  ;;  %12313 = vmatprep.subr.bf16.mxu1 %v18039_v9  ;;  %v18100_v54 = vld [vmem:[%s19302_s22 + $0xa8] ss:$12 sps:$4 sm:$0xff]  }
0x1261   : > { %12331 = vmatprep.mubr.bf16.mxu1 %v22790_v11  ;;  %v18105_v9 = vld [vmem:[%s19302_s22 + $0x94] ss:$12 sps:$4 sm:$0xff]  }
0x1262   : > { %12261 = vmatpush1.bf16.msra.mxu0 %v18034_v57  ;;  %v18108_v57 = vld [vmem:[%s19302_s22 + $0x7c] ss:$12 sps:$4 sm:$0xff]  }
0x1263   : > { %12314 = vmatpush1.bf16.msra.mxu1 %v18037_v37  ;;  %12262 = vmatprep.subr.bf16.mxu0 %v18042_v16  ;;  %v18148_v37 = vld [vmem:[%s19302_s22 + $0x228] ss:$12 sps:$4 sm:$0xff]   ;;  %v18150_v16 = vld [vmem:[%s19302_s22 + $0x22c] ss:$12 sps:$4 sm:$0xff]  }
0x1264   : > { %16455 = vmatprep.subr.bf16.mxu1 %v18043_v24  ;;  %v18106_v24 = vld [vmem:[%s19302_s22 + $0x78] ss:$12 sps:$4 sm:$0xff]  }
0x1266   : > { %12263 = vmatpush1.bf16.msra.mxu0 %v18040_v29  ;;  %15897 = vmatmul.mubr.msk.bf16.vlgmr.msra.gmra.mxu1 %vm7771_vm11, %v21971_v36  ;;  %v18151_v29 = vld [vmem:[%s19302_s22 + $0x210] ss:$12 sps:$4 sm:$0xff]  }
0x1267   : > { %16456 = vmatpush3.bf16.msra.mxu1 %v18044_v40  ;;  %12372 = vmatprep.mubr.bf16.mxu1 %v11677_v44  ;;  %v18099_v44 = vld [vmem:[%s19299_s27 + $0x290] ss:$20 sps:$4 sm:$0xff]   ;;  %v18153_v40 = vld [vmem:[%s19302_s22 + $0x214] ss:$12 sps:$4 sm:$0xff]  }
0x1268   : > { %12264 = vmatprep.subr.bf16.mxu0 %v18047_v3  ;;  %16457 = vmatprep.subr.bf16.mxu1 %v18048_v48  ;;  %v18156_v3 = vld [vmem:[%s19302_s22 + $0x1fc] ss:$12 sps:$4 sm:$0xff]   ;;  %v18109_v48 = vld [vmem:[%s19302_s22 + $0x60] ss:$12 sps:$4 sm:$0xff]  }
0x126a   : > { %12265 = vmatpush1.bf16.msra.mxu0 %v18045_v31  ;;  %v18154_v31 = vld [vmem:[%s19302_s22 + $0x1f8] ss:$12 sps:$4 sm:$0xff]  }
0x126b   : > { %16458 = vmatpush3.bf16.msra.mxu1 %v18049_v50  ;;  %12266 = vmatprep.subr.bf16.mxu0 %v18052_v26  ;;  %v18114_v50 = vld [vmem:[%s19302_s22 + $0x4c] ss:$12 sps:$4 sm:$0xff]   ;;  %v18159_v26 = vld [vmem:[%s19302_s22 + $0x1e4] ss:$12 sps:$4 sm:$0xff]  }
0x126c   : > { %16459 = vmatprep.subr.bf16.mxu1 %v18053_v13  ;;  %v18112_v13 = vld [vmem:[%s19302_s22 + $0x48] ss:$12 sps:$4 sm:$0xff]  }
0x126e   : > { %12267 = vmatpush1.bf16.msra.mxu0 %v18050_v15  ;;  %v18157_v15 = vld [vmem:[%s19302_s22 + $0x1e0] ss:$12 sps:$4 sm:$0xff]  }
0x126f   : > { %16460 = vmatpush3.bf16.msra.mxu1 %v18054_v1  ;;  %12268 = vmatprep.subr.bf16.mxu0 %v18057_v58  ;;  %v18117_v1 = vld [vmem:[%s19302_s22 + $0x34] ss:$12 sps:$4 sm:$0xff]   ;;  %v18162_v58 = vld [vmem:[%s19302_s22 + $0x1cc] ss:$12 sps:$4 sm:$0xff]  }
0x1270   : > { %16461 = vmatprep.subr.bf16.mxu1 %v18058_v17  ;;  %v18115_v17 = vld [vmem:[%s19302_s22 + $0x30] ss:$12 sps:$4 sm:$0xff]  }
0x1272   : > { %12269 = vmatpush1.bf16.msra.mxu0 %v18055_v41  ;;  %v18160_v41 = vld [vmem:[%s19302_s22 + $0x1c8] ss:$12 sps:$4 sm:$0xff]  }
0x1273   : > { %16462 = vmatpush3.bf16.msra.mxu1 %v18059_v59  ;;  %12270 = vmatprep.subr.bf16.mxu0 %v18062_v4  ;;  %v18120_v59 = vld [vmem:[%s19302_s22 + $0x1c] ss:$12 sps:$4 sm:$0xff]   ;;  %v18165_v4 = vld [vmem:[%s19302_s22 + $0x1b4] ss:$12 sps:$4 sm:$0xff]  }
0x1274   : > { %16463 = vmatprep.subr.bf16.mxu1 %v18063_v34  ;;  %v18118_v34 = vld [vmem:[%s19302_s22 + $0x18] ss:$12 sps:$4 sm:$0xff]  }
0x1276   : > { %12271 = vmatpush1.bf16.msra.mxu0 %v18060_v55  ;;  %v18163_v55 = vld [vmem:[%s19302_s22 + $0x1b0] ss:$12 sps:$4 sm:$0xff]  }
0x1277   : > { %16464 = vmatpush3.bf16.msra.mxu1 %v18064_v61  ;;  %12272 = vmatprep.subr.bf16.mxu0 %v18067_v5  ;;  %v18123_v61 = vld [vmem:[%s19302_s22 + $0x4] ss:$12 sps:$4 sm:$0xff]   ;;  %v18168_v5 = vld [vmem:[%s19302_s22 + $0x19c] ss:$12 sps:$4 sm:$0xff]  }
0x1278   : > { %16465 = vmatprep.subr.bf16.mxu1 %v18068_v56  ;;  %v18121_v56 = vld [vmem:[%s19302_s22] ss:$12 sps:$4 sm:$0xff]  }
0x127a   : > { %12273 = vmatpush1.bf16.msra.mxu0 %v18065_v63  ;;  %v18166_v63 = vld [vmem:[%s19302_s22 + $0x198] ss:$12 sps:$4 sm:$0xff]  }
0x127b   : > { %16466 = vmatpush3.bf16.msra.mxu1 %v18069_v18  ;;  %12274 = vmatprep.subr.bf16.mxu0 %v18072_v8  ;;  %v18126_v18 = vld [vmem:[%s19302_s22 + $0x16c] ss:$12 sps:$4 sm:$0xff]   ;;  %v18171_v8 = vld [vmem:[%s19302_s22 + $0x184] ss:$12 sps:$4 sm:$0xff]  }
0x127c   : > { %16467 = vmatprep.subr.bf16.mxu1 %v18073_v2  ;;  %v18124_v2 = vld [vmem:[%s19302_s22 + $0x168] ss:$12 sps:$4 sm:$0xff]  }
0x127e   : > { %12275 = vmatpush2.bf16.msra.mxu0 %v18070_v12  ;;  %v18169_v12 = vld [vmem:[%s19302_s22 + $0x180] ss:$12 sps:$4 sm:$0xff]  }
0x127f   : > { %16468 = vmatpush3.bf16.msra.mxu1 %v18074_v7  ;;  %12276 = vmatprep.subr.bf16.mxu0 %v18077_v6  ;;  %v18129_v7 = vld [vmem:[%s19302_s22 + $0x154] ss:$12 sps:$4 sm:$0xff]   ;;  %v18127_v6 = vld [vmem:[%s19302_s22 + $0x150] ss:$12 sps:$4 sm:$0xff]  }
0x1280   : > { %16469 = vmatprep.subr.bf16.mxu1 %v18078_v42  ;;  %v18132_v42 = vld [vmem:[%s19302_s22 + $0x13c] ss:$12 sps:$4 sm:$0xff]  }
0x1282   : > { %12277 = vmatpush2.bf16.msra.mxu0 %v18075_v39  ;;  %v18174_v39 = vld [vmem:[%s19302_s22 + $0x2ec] ss:$12 sps:$4 sm:$0xff]  }
0x1283   : > { %16470 = vmatpush3.bf16.msra.mxu1 %v18079_v33  ;;  %12278 = vmatprep.subr.bf16.mxu0 %v18082_v47  ;;  %v18172_v33 = vld [vmem:[%s19302_s22 + $0x2e8] ss:$12 sps:$4 sm:$0xff]   ;;  %v18130_v47 = vld [vmem:[%s19302_s22 + $0x138] ss:$12 sps:$4 sm:$0xff]  }
0x1284   : > { %13207 = vmatprep.subr.bf16.mxu1 %v18150_v16  ;;  %v18145_v16 = vld [vmem:[%s19302_s22 + $0xc0] ss:$12 sps:$4 sm:$0xff]  }
0x1286   : > { %12279 = vmatpush2.bf16.msra.mxu0 %v18080_v60  ;;  %12373 = vmatmul.mubr.bf16.vlgmr.msra.gmra.mxu1 %v21974_v38  ;;  %v18135_v60 = vld [vmem:[%s19302_s22 + $0x124] ss:$12 sps:$4 sm:$0xff]  }
0x1287   : > { %12280 = vmatprep.subr.bf16.mxu0 %v18085_v52  ;;  %13208 = vmatpush1.bf16.msra.mxu1 %v18148_v37  ;;  %v18177_v52 = vld [vmem:[%s19302_s22 + $0x2d4] ss:$12 sps:$4 sm:$0xff]   ;;  %v18147_v37 = vld [vmem:[%s19302_s22 + $0xc4] ss:$12 sps:$4 sm:$0xff]  }
0x1288   : > { %13209 = vmatprep.subr.bf16.mxu1 %v18153_v40  ;;  %v18196_v40 = vld [vmem:[%s19302_s22 + $0x258] ss:$12 sps:$4 sm:$0xff]  }
0x128a   : > { %12281 = vmatpush2.bf16.msra.mxu0 %v18083_v0  ;;  %v18175_v0 = vld [vmem:[%s19302_s22 + $0x2d0] ss:$12 sps:$4 sm:$0xff]  }
0x128b   : > { %12282 = vmatprep.subr.bf16.mxu0 %v18088_v22  ;;  %13210 = vmatpush1.bf16.msra.mxu1 %v18151_v29  ;;  %v18180_v22 = vld [vmem:[%s19302_s22 + $0x2bc] ss:$12 sps:$4 sm:$0xff]  }
0x128c   : > { %13211 = vmatprep.subr.bf16.mxu1 %v18156_v3  ;;  %v18198_v29 = vld [vmem:[%s19302_s22 + $0x25c] ss:$12 sps:$4 sm:$0xff]   ;;  %v18202_v3 = vld [vmem:[%s19302_s22 + $0x240] ss:$12 sps:$4 sm:$0xff]  }
0x128e   : > { %12283 = vmatpush2.bf16.msra.mxu0 %v18086_v14  ;;  %v18133_v14 = vld [vmem:[%s19302_s22 + $0x120] ss:$12 sps:$4 sm:$0xff]  }
0x128f   : > { %12284 = vmatprep.subr.bf16.mxu0 %v18091_v45  ;;  %13212 = vmatpush1.bf16.msra.mxu1 %v18154_v31  ;;  %v18178_v45 = vld [vmem:[%s19302_s22 + $0x2b8] ss:$12 sps:$4 sm:$0xff]  }
0x1290   : > { %13213 = vmatprep.subr.bf16.mxu1 %v18159_v26  ;;  %v11655_v31 = vld [vmem:[%s19296_s28] sm:$0x1f] }
0x1292   : > { %12285 = vmatpush2.bf16.msra.mxu0 %v18089_v30  ;;  %v18138_v30 = vld [vmem:[%s19302_s22 + $0x10c] ss:$12 sps:$4 sm:$0xff]  }
0x1293   : > { %12286 = vmatprep.subr.bf16.mxu0 %v18094_v27  ;;  %13214 = vmatpush1.bf16.msra.mxu1 %v18157_v15  ;;  %v18183_v27 = vld [vmem:[%s19302_s22 + $0x2a4] ss:$12 sps:$4 sm:$0xff]  }
0x1294   : > { %13215 = vmatprep.subr.bf16.mxu1 %v18162_v58 }
0x1296   : > { %12287 = vmatpush2.bf16.msra.mxu0 %v18092_v25  ;;  %v18136_v25 = vld [vmem:[%s19302_s22 + $0x108] ss:$12 sps:$4 sm:$0xff]  }
0x1297   : > { %12288 = vmatprep.subr.bf16.mxu0 %v18097_v43  ;;  %13216 = vmatpush1.bf16.msra.mxu1 %v18160_v41  ;;  %v18181_v43 = vld [vmem:[%s19302_s22 + $0x2a0] ss:$12 sps:$4 sm:$0xff]  }
0x1298   : > { %13217 = vmatprep.subr.bf16.mxu1 %v18165_v4 }
0x129a   : > { %12289 = vmatpush2.bf16.msra.mxu0 %v18095_v23  ;;  %v18141_v23 = vld [vmem:[%s19302_s22 + $0xf4] ss:$12 sps:$4 sm:$0xff]  }
0x129b   : > { %16766 = vmatprep.subr.bf16.mxu0 %v22795_v20  ;;  %13218 = vmatpush1.bf16.msra.mxu1 %v18163_v55 }
0x129c   : > { %13219 = vmatprep.subr.bf16.mxu1 %v18168_v5 }
0x129d   : > { %12291 = vmatmul.mubr.bf16.vlgmr.msra.gmra.mxu0 %v21974_v38  ;;  %v18103_v38 = vld [vmem:[%s19302_s22 + $0x90] ss:$12 sps:$4 sm:$0xff]  }
0x129e   : > { %16767 = vmatpush3.bf16.msra.mxu0 %v18098_v21  ;;  %16770 = vmatprep.mubr.msk.bf16.mxu0 %vm18738_vm12, %v22795_v20  ;;  %v18186_v21 = vld [vmem:[%s19302_s22 + $0x28c] ss:$12 sps:$4 sm:$0xff]  }
0x129f   : > { %16768 = vmatprep.subr.bf16.mxu0 %v22795_v20  ;;  %13220 = vmatpush1.bf16.msra.mxu1 %v18166_v63 }
0x12a0   : > { %13221 = vmatprep.subr.bf16.mxu1 %v18171_v8 }
0x12a2   : > { %16769 = vmatpush3.bf16.msra.mxu0 %v18099_v44  ;;  %v18139_v44 = vld [vmem:[%s19302_s22 + $0xf0] ss:$12 sps:$4 sm:$0xff]  }
0x12a3   : > { %13166 = vmatprep.subr.bf16.mxu0 %v18102_v46  ;;  %13222 = vmatpush1.bf16.msra.mxu1 %v18169_v12  ;;  %v18184_v46 = vld [vmem:[%s19302_s22 + $0x288] ss:$12 sps:$4 sm:$0xff]  }
0x12a4   : > { %13223 = vmatprep.subr.bf16.mxu1 %v18174_v39  ;;  %v18195_v12 = vld [vmem:[%s19302_s22 + $0x334] ss:$12 sps:$4 sm:$0xff]   ;;  %v18201_v39 = vld [vmem:[%s19302_s22 + $0x31c] ss:$12 sps:$4 sm:$0xff]  }
0x12a5   : > { %16771 = vmatmul.mubr.msk.bf16.vlgmr.msra.gmra.mxu0 %vm7771_vm11, %v21971_v36  ;;  %v18111_v36 = vld [vmem:[%s19302_s22 + $0x64] ss:$12 sps:$4 sm:$0xff]  }
0x12a6   : > { %13167 = vmatpush1.bf16.msra.mxu0 %v18100_v54  ;;  %v18144_v54 = vld [vmem:[%s19302_s22 + $0xdc] ss:$12 sps:$4 sm:$0xff]  }
0x12a7   : > { %13168 = vmatprep.subr.bf16.mxu0 %v18105_v9  ;;  %13224 = vmatpush2.bf16.msra.mxu1 %v18172_v33  ;;  %v18192_v9 = vld [vmem:[%s19302_s22 + $0x274] ss:$12 sps:$4 sm:$0xff]   ;;  %v18199_v33 = vld [vmem:[%s19302_s22 + $0x318] ss:$12 sps:$4 sm:$0xff]  }
0x12a8   : > { %13225 = vmatprep.subr.bf16.mxu1 %v18177_v52  ;;  %v18210_v52 = vld [vmem:[%s19302_s22 + $0x2f0] ss:$12 sps:$4 sm:$0xff]  }
0x12aa   : > { %13169 = vmatpush1.bf16.msra.mxu0 %v18103_v38  ;;  %v18142_v38 = vld [vmem:[%s19302_s22 + $0xd8] ss:$12 sps:$4 sm:$0xff]  }
0x12ab   : > { %13170 = vmatprep.subr.bf16.mxu0 %v18108_v57  ;;  %13226 = vmatpush2.bf16.msra.mxu1 %v18175_v0  ;;  %v18190_v57 = vld [vmem:[%s19302_s22 + $0x270] ss:$12 sps:$4 sm:$0xff]  }
0x12ac   : > { %13227 = vmatprep.subr.bf16.mxu1 %v18180_v22 }
0x12ae   : > { %13171 = vmatpush1.bf16.msra.mxu0 %v18106_v24  ;;  %v18189_v24 = vld [vmem:[%s19302_s22 + $0x34c] ss:$12 sps:$4 sm:$0xff]  }
0x12af   : > { %13172 = vmatprep.subr.bf16.mxu0 %v18111_v36  ;;  %13228 = vmatpush2.bf16.msra.mxu1 %v18178_v45  ;;  %v18204_v36 = vld [vmem:[%s19302_s22 + $0x244] ss:$12 sps:$4 sm:$0xff]  }
0x12b0   : > { %13229 = vmatprep.subr.bf16.mxu1 %v18183_v27 }
0x12b2   : > { %13173 = vmatpush1.bf16.msra.mxu0 %v18109_v48  ;;  %v18208_v48 = vld [vmem:[%s19302_s22 + $0x170] ss:$12 sps:$4 sm:$0xff]  }
0x12b3   : > { %13174 = vmatprep.subr.bf16.mxu0 %v18114_v50  ;;  %13230 = vmatpush2.bf16.msra.mxu1 %v18181_v43  ;;  %v11683_v50 = vrot.slane %v11655_v31, %v21035_v62 }
0x12b4   : > { %13231 = vmatprep.subr.bf16.mxu1 %v18186_v21 }
0x12b6   : > { %13175 = vmatpush1.bf16.msra.mxu0 %v18112_v13  ;;  %v11687_v13 = vrot.slane %v11655_v31, %v21304_v53 }
0x12b7   : > { %13176 = vmatprep.subr.bf16.mxu0 %v18117_v1  ;;  %13232 = vmatpush2.bf16.msra.mxu1 %v18184_v46 }
0x12b8   : > { %13233 = vmatprep.subr.bf16.mxu1 %v18192_v9  ;;  %v11699_v9 = vrot.slane %v11655_v31, %v21315_v28 }
0x12ba   : > { %13177 = vmatpush1.bf16.msra.mxu0 %v18115_v17 }
0x12bb   : > { %13178 = vmatprep.subr.bf16.mxu0 %v18120_v59  ;;  %13234 = vmatpush2.bf16.msra.mxu1 %v18190_v57 }
0x12bc   : > { %13235 = vmatprep.subr.bf16.mxu1 %v18198_v29 }
0x12be   : > { %13179 = vmatpush1.bf16.msra.mxu0 %v18118_v34 }
0x12bf   : > { %13180 = vmatprep.subr.bf16.mxu0 %v18123_v61  ;;  %13236 = vmatpush2.bf16.msra.mxu1 %v18196_v40 }
0x12c0   : > { %13237 = vmatprep.subr.bf16.mxu1 %v18204_v36 }
0x12c2   : > { %13181 = vmatpush1.bf16.msra.mxu0 %v18121_v56 }
0x12c3   : > { %13182 = vmatprep.subr.bf16.mxu0 %v18126_v18  ;;  %13238 = vmatpush2.bf16.msra.mxu1 %v18202_v3  ;;  %v18187_v18 = vld [vmem:[%s19302_s22 + $0x348] ss:$12 sps:$4 sm:$0xff]  }
0x12c4   : > { %16480 = vmatprep.subr.bf16.mxu1 %v18208_v48  ;;  %v18209_v48 = vld [vmem:[%s19302_s22 + $0xb0] ss:$12 sps:$4 sm:$0xff]  }
0x12c6   : > { %13183 = vmatpush2.bf16.msra.mxu0 %v18124_v2 }
0x12c7   : > { %13184 = vmatprep.subr.bf16.mxu0 %v18129_v7 }
0x12ca   : > { %13185 = vmatpush2.bf16.msra.mxu0 %v18127_v6  ;;  %v18193_v6 = vld [vmem:[%s19302_s22 + $0x330] ss:$12 sps:$4 sm:$0xff]  }
0x12cb   : > { %13186 = vmatprep.subr.bf16.mxu0 %v18132_v42 }
0x12ce   : > { %13187 = vmatpush2.bf16.msra.mxu0 %v18130_v47  ;;  %v18207_v47 = vld [vmem:[%s19302_s22 + $0x304] ss:$12 sps:$4 sm:$0xff]  }
0x12cf   : > { %13188 = vmatprep.subr.bf16.mxu0 %v18135_v60  ;;  %v18205_v60 = vld [vmem:[%s19302_s22 + $0x300] ss:$12 sps:$4 sm:$0xff]  }
0x12d2   : > { %13189 = vmatpush2.bf16.msra.mxu0 %v18133_v14 }
0x12d3   : > { %13190 = vmatprep.subr.bf16.mxu0 %v18138_v30  ;;  %v22814_v30 = vld [vmem:[#allocation111_spill] sm:$0xff] }
0x12d4   : > { %v11691_v27 = vrot.slane %v11655_v31, %v22814_v30 }
0x12d6   : > { %13191 = vmatpush2.bf16.msra.mxu0 %v18136_v25 }
0x12d7   : > { %13192 = vmatprep.subr.bf16.mxu0 %v18141_v23 }
0x12da   : > { %13193 = vmatpush2.bf16.msra.mxu0 %v18139_v44 }
0x12db   : > { %13194 = vmatprep.subr.bf16.mxu0 %v18144_v54 }
0x12de   : > { %13195 = vmatpush2.bf16.msra.mxu0 %v18142_v38 }
0x12df   : > { %13196 = vmatprep.subr.bf16.mxu0 %v18147_v37 }
0x12e2   : > { %13197 = vmatpush2.bf16.msra.mxu0 %v18145_v16 }
0x12e3   : > { %13256 = vmatprep.subr.bf16.mxu0 %v18189_v24 }
0x131d   : > { %v12251_v26 = vpop.f32.mrf.mxu0 }
0x131e   : > { %v12210_v15 = vpop.f32.mrf.mxu1 }
0x131f   : > { %v12211_v1 = vadd.f32 %v12210_v15, %v11683_v50  ;;  %v12253_v58 = vpop.f32.mrf.mxu0 }
0x1320   : > { %v12212_v17 = vpop.f32.mrf.mxu1 }
0x1321   : > { %v12252_v41 = vadd.f32 %v12251_v26, %v12211_v1  ;;  %v12213_v59 = vadd.f32 %v12212_v17, %v11687_v13  ;;  %v12255_v4 = vpop.f32.mrf.mxu0  ;;  %v18211_v13 = vld [vmem:[%s19302_s22 + $0x158] ss:$12 sps:$4 sm:$0xff]  }
0x1322   : > { %v12214_v34 = vpop.f32.mrf.mxu1  ;;  %v18214_v17 = vld [vmem:[%s19302_s22 + $0x2d8] ss:$12 sps:$4 sm:$0xff]  }
0x1323   : > { %v12254_v55 = vadd.f32 %v12253_v58, %v12213_v59  ;;  %v12256_v61 = vpop.f32.mrf.mxu0  ;;  %v12420_v5 = vmax.f32 %v12252_v41, 0.0  ;;  %v18213_v58 = vld [vmem:[%s19302_s22 + $0x98] ss:$12 sps:$4 sm:$0xff]   ;;  %v18215_v59 = vld [vmem:[%s19302_s22 + $0x140] ss:$12 sps:$4 sm:$0xff]  }
0x1324   : > { %v12215_v56 = vpop.f32.mrf.mxu1  ;;  %v18216_v4 = vld [vmem:[%s19302_s22 + $0x218] ss:$12 sps:$4 sm:$0xff]   ;;  %v18217_v34 = vld [vmem:[%s19302_s22 + $0x80] ss:$12 sps:$4 sm:$0xff]   ;;  %v18219_v61 = vld [vmem:[%s19302_s22 + $0x128] ss:$12 sps:$4 sm:$0xff]  }
0x1325   : > { %v12421_v62 = vmax.f32 %v12254_v55, 0.0  ;;  %v22110_v8 = vpack.c.bf16 %v12420_v5, %v12420_v5  ;;  %v18218_v55 = vld [vmem:[%s19302_s22 + $0x2c0] ss:$12 sps:$4 sm:$0xff]   ;;  %v18221_v56 = vld [vmem:[%s19302_s22 + $0x68] ss:$12 sps:$4 sm:$0xff]  }
0x1326   : > { %v12333_v63 = vpop.f32.mrf.mxu1  ;;  %v18220_v5 = vld [vmem:[%s19302_s22 + $0x200] ss:$12 sps:$4 sm:$0xff]  }
0x1327   : > { %v12570_v53 = vpack.c.bf16 %v12421_v62, %v12421_v62  ;;  %v18222_v62 = vld [vmem:[%s19302_s22 + $0x2a8] ss:$12 sps:$4 sm:$0xff]  }
0x1328   : > { %v12335_v2 = vpop.f32.mrf.mxu1 }
0x1329   : > { %13198 = vmatprep.mubr.bf16.mxu0 %v12570_v53 }
0x132a   : > { %v12337_v7 = vpop.f32.mrf.mxu1  ;;  %13199 = vmatmul.mubr.bf16.vlgmr.msra.gmra.mxu0 %v22110_v8 }
0x132b   : > { %13257 = vmatpush1.bf16.msra.mxu0 %v18187_v18  ;;  %13280 = vmatprep.mubr.bf16.mxu0 %v22790_v11  ;;  %v22815_v11 = vld [vmem:[#allocation112_spill] sm:$0xff]  ;;  %v18225_v18 = vld [vmem:[%s19302_s22 + $0x50] ss:$12 sps:$4 sm:$0xff]  }
0x132c   : > { %v12338_v42 = vpop.f32.mrf.mxu1  ;;  %13258 = vmatprep.subr.bf16.mxu0 %v18195_v12  ;;  %v11695_v25 = vrot.slane %v11655_v31, %v22815_v11  ;;  %v18212_v31 = vld [vmem:[%s19302_s22 + $0x230] ss:$12 sps:$4 sm:$0xff]   ;;  %v18227_v12 = vld [vmem:[%s19302_s22 + $0xf8] ss:$12 sps:$4 sm:$0xff]  }
0x132d   : > { %v18228_v7 = vld [vmem:[%s19302_s22 + $0x1d0] ss:$12 sps:$4 sm:$0xff]   ;;  %v18230_v42 = vld [vmem:[%s19302_s22 + $0x278] ss:$12 sps:$4 sm:$0xff]  }
0x132f   : > { %13259 = vmatpush1.bf16.msra.mxu0 %v18193_v6  ;;  %v18229_v6 = vld [vmem:[%s19302_s22 + $0x38] ss:$12 sps:$4 sm:$0xff]  }
0x1330   : > { %13260 = vmatprep.subr.bf16.mxu0 %v18201_v39  ;;  %v18231_v39 = vld [vmem:[%s19302_s22 + $0xe0] ss:$12 sps:$4 sm:$0xff]  }
0x1333   : > { %13261 = vmatpush1.bf16.msra.mxu0 %v18199_v33  ;;  %v18232_v33 = vld [vmem:[%s19302_s22 + $0x1b8] ss:$12 sps:$4 sm:$0xff]  }
0x1334   : > { %13262 = vmatprep.subr.bf16.mxu0 %v18207_v47  ;;  %v18233_v47 = vld [vmem:[%s19302_s22 + $0x20] ss:$12 sps:$4 sm:$0xff]  }
0x1337   : > { %13263 = vmatpush1.bf16.msra.mxu0 %v18205_v60  ;;  %v18234_v60 = vld [vmem:[%s19302_s22 + $0x260] ss:$12 sps:$4 sm:$0xff]  }
0x1338   : > { %16502 = vmatprep.subr.bf16.mxu0 %v18210_v52  ;;  %v18235_v52 = vld [vmem:[%s19302_s22 + $0xc8] ss:$12 sps:$4 sm:$0xff]  }
0x1346   : > { %v16471_v0 = vpop.f32.mrf.mxu1 }
0x1348   : > { %v16472_v22 = vpop.f32.mrf.mxu1 }
0x1349   : > { %v16473_v44 = vadd.f32 %v16472_v22, %v16471_v0  ;;  %v18236_v0 = vld [vmem:[%s19302_s22 + $0x1a0] ss:$12 sps:$4 sm:$0xff]   ;;  %v18237_v22 = vld [vmem:[%s19302_s22 + $0x8] ss:$12 sps:$4 sm:$0xff]  }
0x134a   : > { %v16474_v14 = vpop.f32.mrf.mxu1 }
0x134b   : > { %v12375_v29 = vadd.f32 %v16473_v44, %v11699_v9  ;;  %v18238_v14 = vld [vmem:[%s19302_s22 + $0x248] ss:$12 sps:$4 sm:$0xff]  }
0x134c   : > { %v16475_v45 = vpop.f32.mrf.mxu1  ;;  %v22816_v9 = vld [vmem:[#allocation113_spill] sm:$0xff] }
0x134d   : > { %v18239_v45 = vld [vmem:[%s19302_s22 + $0x188] ss:$12 sps:$4 sm:$0xff]  }
0x135d   : > { %v12292_v43 = vpop.f32.mrf.mxu0 }
0x135e   : > { %v12293_v23 = vadd.f32 %v12292_v43, %v11691_v27  ;;  %v18240_v27 = vld [vmem:[%s19302_s22 + $0x350] ss:$12 sps:$4 sm:$0xff]   ;;  %v18242_v43 = vld [vmem:[%s19302_s22 + $0x320] ss:$12 sps:$4 sm:$0xff]  }
0x135f   : > { %v12294_v21 = vpop.f32.mrf.mxu0 }
0x1360   : > { %v12334_v46 = vadd.f32 %v12333_v63, %v12293_v23  ;;  %v12295_v54 = vadd.f32 %v12294_v21, %v11695_v25  ;;  %v18223_v63 = vld [vmem:[%s19302_s22 + $0x110] ss:$12 sps:$4 sm:$0xff]   ;;  %v18241_v25 = vld [vmem:[%s19302_s22 + $0x338] ss:$12 sps:$4 sm:$0xff]   ;;  %v18243_v23 = vld [vmem:[%s19302_s22 + $0x308] ss:$12 sps:$4 sm:$0xff]  }
0x1361   : > { %v12296_v38 = vpop.f32.mrf.mxu0 }
0x1362   : > { %v12336_v57 = vadd.f32 %v12335_v2, %v12295_v54  ;;  %v12422_v37 = vmax.f32 %v12334_v46, 0.0  ;;  %v18226_v2 = vld [vmem:[%s19302_s22 + $0x290] ss:$12 sps:$4 sm:$0xff]  }
0x1363   : > { %v12297_v16 = vpop.f32.mrf.mxu0  ;;  %v18263_v54 = vld [vmem:[%s19305_s30] sm:$0xff] }
0x1364   : > { %v12423_v24 = vmax.f32 %v12336_v57, 0.0  ;;  %v22125_v50 = vpack.c.bf16 %v12422_v37, %v12422_v37  ;;  %v12577_v38 = vrot.slane %v18263_v54, %v22816_v9  ;;  %v18264_v57 = vld [vmem:[%s19305_s30 + $0x8] sm:$0xff] }
0x1365   : > { %v12414_v40 = vpop.f32.mrf.mxu0  ;;  %v12581_v37 = vrot.slane %v18264_v57, %v22816_v9 }
0x1366   : > { %v12572_v36 = vpack.c.bf16 %v12423_v24, %v12423_v24  ;;  %v12415_v3 = vadd.f32 %v12414_v40, %v12375_v29 }
0x1367   : > { %v16772_v26 = vpop.f32.mrf.mxu0 }
0x1368   : > { %v12424_v15 = vmax.f32 %v12415_v3, 0.0  ;;  %13239 = vmatprep.mubr.bf16.mxu1 %v12572_v36 }
0x1369   : > { %v12417_v28 = vpop.f32.mrf.mxu0  ;;  %13240 = vmatmul.mubr.bf16.vlgmr.msra.gmra.mxu1 %v22125_v50 }
0x136a   : > { %v22130_v1 = vpack.c.bf16 %v12424_v15, %v12424_v15  ;;  %16481 = vmatpush3.bf16.msra.mxu1 %v18209_v48  ;;  %13321 = vmatprep.mubr.bf16.mxu1 %v12570_v53  ;;  %v18224_v53 = vld [vmem:[%s19302_s22 + $0x1e8] ss:$12 sps:$4 sm:$0xff]  }
0x136b   : > { %v16773_v41 = vpop.f32.mrf.mxu0  ;;  %16482 = vmatprep.subr.bf16.mxu1 %v18211_v13 }
0x136c   : > { %16007 = vmatmul.mubr.msk.bf16.vlgmr.msra.gmra.mxu0 %vm13162_vm2, %v22130_v1 }
0x136d   : > { %16503 = vmatpush3.bf16.msra.mxu0 %v18212_v31  ;;  %13361 = vmatprep.mubr.bf16.mxu0 %v12572_v36 }
0x136e   : > { %16483 = vmatpush3.bf16.msra.mxu1 %v18213_v58  ;;  %16504 = vmatprep.subr.bf16.mxu0 %v18214_v17 }
0x136f   : > { %16484 = vmatprep.subr.bf16.mxu1 %v18215_v59 }
0x1371   : > { %16505 = vmatpush3.bf16.msra.mxu0 %v18216_v4 }
0x1372   : > { %16485 = vmatpush3.bf16.msra.mxu1 %v18217_v34  ;;  %16506 = vmatprep.subr.bf16.mxu0 %v18218_v55  ;;  %v18265_v55 = vld [vmem:[%s19305_s30 + $0x10] sm:$0xff] }
0x1373   : > { %16486 = vmatprep.subr.bf16.mxu1 %v18219_v61  ;;  %v12585_v61 = vrot.slane %v18265_v55, %v22816_v9 }
0x1375   : > { %16507 = vmatpush3.bf16.msra.mxu0 %v18220_v5 }
0x1376   : > { %16487 = vmatpush3.bf16.msra.mxu1 %v18221_v56  ;;  %16508 = vmatprep.subr.bf16.mxu0 %v18222_v62 }
0x1377   : > { %16488 = vmatprep.subr.bf16.mxu1 %v18223_v63 }
0x1379   : > { %16509 = vmatpush3.bf16.msra.mxu0 %v18224_v53 }
0x137a   : > { %16489 = vmatpush3.bf16.msra.mxu1 %v18225_v18  ;;  %16510 = vmatprep.subr.bf16.mxu0 %v18226_v2 }
0x137b   : > { %16490 = vmatprep.subr.bf16.mxu1 %v18227_v12 }
0x137d   : > { %16511 = vmatpush3.bf16.msra.mxu0 %v18228_v7 }
0x137e   : > { %16491 = vmatpush3.bf16.msra.mxu1 %v18229_v6  ;;  %16512 = vmatprep.subr.bf16.mxu0 %v18230_v42 }
0x137f   : > { %16492 = vmatprep.subr.bf16.mxu1 %v18231_v39 }
0x1381   : > { %16513 = vmatpush3.bf16.msra.mxu0 %v18232_v33 }
0x1382   : > { %16493 = vmatpush3.bf16.msra.mxu1 %v18233_v47  ;;  %16514 = vmatprep.subr.bf16.mxu0 %v18234_v60 }
0x1383   : > { %16494 = vmatprep.subr.bf16.mxu1 %v18235_v52 }
0x1385   : > { %16515 = vmatpush3.bf16.msra.mxu0 %v18236_v0 }
0x1386   : > { %16495 = vmatpush3.bf16.msra.mxu1 %v18237_v22  ;;  %16516 = vmatprep.subr.bf16.mxu0 %v18238_v14 }
0x1387   : > { %16774 = vmatprep.subr.bf16.mxu1 %v22795_v20 }
0x1389   : > { %13322 = vmatmul.mubr.bf16.vlgmr.msra.gmra.mxu1 %v22110_v8  ;;  %16517 = vmatpush3.bf16.msra.mxu0 %v18239_v45 }
0x138a   : > { %16775 = vmatpush3.bf16.msra.mxu1 %v18240_v27  ;;  %16782 = vmatprep.mubr.msk.bf16.mxu1 %vm18738_vm12, %v22795_v20 }
0x138b   : > { %16776 = vmatprep.subr.bf16.mxu1 %v22795_v20 }
0x138c   : > { %13362 = vmatmul.mubr.bf16.vlgmr.msra.gmra.mxu0 %v22125_v50 }
0x138e   : > { %16777 = vmatpush3.bf16.msra.mxu1 %v18241_v25 }
0x138f   : > { %16778 = vmatprep.subr.bf16.mxu1 %v22795_v20 }
0x1392   : > { %16779 = vmatpush3.bf16.msra.mxu1 %v18242_v43 }
0x1393   : > { %16780 = vmatprep.subr.bf16.mxu1 %v22795_v20 }
0x1396   : > { %16781 = vmatpush3.bf16.msra.mxu1 %v18243_v23 }
0x1399   : > { %16783 = vmatmul.mubr.msk.bf16.vlgmr.msra.gmra.mxu1 %vm13162_vm2, %v22130_v1 }
0x13ea   : > { %v13200_v8 = vpop.f32.mrf.mxu0 }
0x13eb   : > { %v13201_v16 = vadd.f32 %v13200_v8, %v12577_v38 }
0x13ec   : > { %v13202_v21 = vpop.f32.mrf.mxu0 }
0x13ed   : > { %v13203_v29 = vadd.f32 %v13202_v21, %v12581_v37 }
0x13ee   : > { %v13204_v44 = vpop.f32.mrf.mxu0 }
0x13f0   : > { %v13205_v46 = vpop.f32.mrf.mxu0 }
0x1429   : > { %v13241_v24 = vpop.f32.mrf.mxu1 }
0x142a   : > { %v13242_v40 = vadd.f32 %v13241_v24, %v13201_v16  ;;  %v13514_v16 = vrot.slane %v21936_v19, %v22814_v30  ;;  %v13518_v24 = vrot.slane %v21939_v32, %v22814_v30 }
0x142b   : > { %v13243_v36 = vpop.f32.mrf.mxu1 }
0x142c   : > { %v13244_v20 = vadd.f32 %v13243_v36, %v13203_v29  ;;  %v13282_v3 = vpop.f32.mrf.mxu0  ;;  %v13522_v29 = vrot.slane %v21946_v51, %v22814_v30  ;;  %v13551_v36 = vrot.slane %v21939_v32, %v22815_v11 }
0x142d   : > { %v13245_v48 = vpop.f32.mrf.mxu1  ;;  %v13283_v26 = vadd.f32 %v13282_v3, %v13242_v40  ;;  %v13547_v40 = vrot.slane %v21936_v19, %v22815_v11  ;;  %v13526_v3 = vcombine.low %v13514_v16, %v13518_v24 }
0x142e   : > { %v13284_v50 = vpop.f32.mrf.mxu0  ;;  %v13540_v48 = vrot.slane %v13522_v29, %v20959_v49 }
0x142f   : > { %v13285_v13 = vadd.f32 %v13284_v50, %v13244_v20  ;;  %v13246_v15 = vpop.f32.mrf.mxu1  ;;  %v13555_v20 = vrot.slane %v21946_v51, %v22815_v11  ;;  %v13559_v50 = vcombine.low %v13547_v40, %v13551_v36 }
0x1430   : > { %v13286_v28 = vpop.f32.mrf.mxu0 }
0x1431   : > { %v13412_v31 = vcombine.low %v13283_v26, %v13285_v13  ;;  %v13573_v26 = vrot.slane %v13555_v20, %v20959_v49  ;;  %v13533_v13 = vrot.slane %v13526_v3, %v20959_v49  ;;  %v13566_v15 = vrot.slane %v13559_v50, %v20959_v49 }
0x1432   : > { %v13287_v1 = vpop.f32.mrf.mxu0 }
0x1433   : > { %v13419_v6 = vrot.slane %v13412_v31, %v20959_v49  ;;  %v13541_v30 = vcombine.low %v13533_v13, %v13540_v48  ;;  %v13574_v28 = vcombine.low %v13566_v15, %v13573_v26 }
0x1449   : > { %v16496_v58 = vpop.f32.mrf.mxu1 }
0x144b   : > { %v16497_v17 = vpop.f32.mrf.mxu1 }
0x144c   : > { %v16518_v41 = vpop.f32.mrf.mxu0  ;;  %v16498_v5 = vadd.f32 %v16497_v17, %v16496_v58 }
0x144d   : > { %v16499_v59 = vpop.f32.mrf.mxu1 }
0x144e   : > { %v16519_v4 = vpop.f32.mrf.mxu0  ;;  %v13324_v63 = vadd.f32 %v16498_v5, %v12585_v61 }
0x144f   : > { %v16500_v34 = vpop.f32.mrf.mxu1  ;;  %v16520_v53 = vadd.f32 %v16519_v4, %v16518_v41 }
0x1450   : > { %v16521_v56 = vpop.f32.mrf.mxu0 }
0x1451   : > { %v13364_v18 = vadd.f32 %v16520_v53, %v13324_v63 }
0x1452   : > { %v16522_v62 = vpop.f32.mrf.mxu0 }
0x1459   : > { %v13403_v2 = vpop.f32.mrf.mxu1 }
0x145a   : > { %v13404_v12 = vadd.f32 %v13403_v2, %v13364_v18 }
0x145b   : > { %v16784_v7 = vpop.f32.mrf.mxu1 }
0x145c   : > { %v13426_v42 = vrot.slane %v13404_v12, %v20959_v49 }
0x145d   : > { %v13406_v39 = vpop.f32.mrf.mxu1 }
0x145e   : > { %v13427_v33 = vcombine.low %v13419_v6, %v13426_v42 }
0x145f   : > { %v16785_v47 = vpop.f32.mrf.mxu1 }
0x1460   : > { %v13429_v60 = vadd.f32 %v13427_v33, %v21963_v35 }
0x1462   : > { %v13431_v52 = vcombine.high %v13429_v60, %v13429_v60  ;;  %v13438_v0 = vrot.slane %v13429_v60, %v20959_v49  ;;  %v13458_v22 = vmul.f32 %v13429_v60, %v13429_v60 }
0x1464   : > { %v13445_v14 = vrot.slane %v13431_v52, %v20959_v49  ;;  %v13446_v45 = vcombine.high %v13438_v0, %v13438_v0  ;;  %v13460_v27 = vcombine.high %v13458_v22, %v13458_v22  ;;  %v13467_v25 = vrot.slane %v13458_v22, %v20959_v49 }
0x1465   : > { %v13450_v43 = vsel %vm7978_vm13, %v13438_v0, 0.0 }
0x1466   : > { %v13451_v23 = vsel %vm7978_vm13, %v13446_v45, 0.0  ;;  %v13474_v21 = vrot.slane %v13460_v27, %v20959_v49  ;;  %v13475_v44 = vcombine.high %v13467_v25, %v13467_v25  ;;  %v13453_v35 = vsel %vm7982_vm14, %v13445_v14, 0.0 }
0x1467   : > { %v13452_v8 = vadd.f32 %v13451_v23, %v13450_v43  ;;  %v13479_v54 = vsel %vm7978_vm13, %v13467_v25, 0.0 }
0x1468   : > { %v13480_v9 = vsel %vm7978_vm13, %v13475_v44, 0.0  ;;  %v13482_v57 = vsel %vm7982_vm14, %v13474_v21, 0.0 }
0x1469   : > { %v13454_v46 = vadd.f32 %v13453_v35, %v13452_v8  ;;  %v13481_v38 = vadd.f32 %v13480_v9, %v13479_v54 }
0x146b   : > { %13455 = vadd.xlane.f32.xlu0 %v13454_v46  ;;  %v13483_v37 = vadd.f32 %v13482_v57, %v13481_v38 }
0x146d   : > { %13484 = vadd.xlane.f32.xlu1 %v13483_v37 }
0x14f4   : > { %v13456_v31 = vpop.xlane.xlu0 %13455 }
0x14f5   : > { %v13457_v19 = vmul.f32 0.0034722222, %v13456_v31 }
0x14f6   : > { %v13485_v58 = vpop.xlane.xlu1 %13484 }
0x14f7   : > { %v13487_v1 = vmul.f32 %v13457_v19, %v13457_v19  ;;  %v13486_v32 = vmul.f32 0.0034722222, %v13485_v58  ;;  %v13498_v51 = vrot.slane %v13457_v19, %v22813_v10 }
0x14f9   : > { %v13488_v17 = vsub.f32 %v13486_v32, %v13487_v1  ;;  %v13500_v59 = vsub.f32 %v13429_v60, %v13498_v51 }
0x14fb   : > { %v13489_v41 = vadd.f32 1e-05, %v13488_v17 }
0x14fd   : > { %18256 = vrsqrt.f32 %v13489_v41 }
0x150a   : > { %v18257_v11 = vpop.eup %18256 }
0x150b   : > { %v13508_v4 = vrot.slane %v18257_v11, %v22813_v10 }
0x150d   : > { %v13510_v49 = vmul.f32 %v13508_v4, %v13500_v59 }
0x150f   : > { %v13543_v34 = vmul.f32 %v13541_v30, %v13510_v49 }
0x1511   : > { %v13576_v55 = vadd.f32 %v13574_v28, %v13543_v34 }
0x1513   : > { %13581 = vst.msk [vmem:[#allocation3] sm:$0x3f] %vm13580_vm6, %v13576_v55 }
0x1514 PF: > { %p16009_p12 = scmp.ne.s32.totalorder %s19066_s24, 11 }
0x1515   : > { %s22817_s14 = sld [smem:[#allocation47_spill]] (!%p16009_p12) }
0x1516   : > { %13585 = sbr.rel (%p16009_p12) target bundleno = 6013 (0x177d), region = 184  ;;  %s22818_s25 = sld [smem:[#allocation49_spill]] (!%p16009_p12) }
0x1517   : > { %s22819_s3 = sld [smem:[#allocation42_spill]] (!%p16009_p12) }
0x1518   : > { %s22820_s6 = sld [smem:[#allocation41_spill]] (!%p16009_p12) }
0x1519   : > { %s22821_s20 = sld [smem:[#allocation46_spill]] (!%p16009_p12) }
0x151a   : > { %s22822_s9 = sld [smem:[#allocation48_spill]] (!%p16009_p12) }
0x151b   : > { %v22214_v61 = vld [vmem:[#allocation3] sm:$0x3f]  ;;  %v13594_v5 = vlaneseq  ;;  %v18740_v10 = vmov 1983009808   ;;  %v18267_v62 = vld [vmem:[%s22817_s14 + $0xac] ss:$12 sps:$4 sm:$0xff]  }
0x151c   : > { %v13592_v56 = vunpack.c.l.s4 %v18740_v10  ;;  %v18269_v53 = vld [vmem:[%s22817_s14 + $0xa8] ss:$12 sps:$4 sm:$0xff]   ;;  %v13590_v18 = vcombine.high %v22214_v61, %v22214_v61  ;;  %v13620_v12 = vmul.f32 %v22214_v61, %v22214_v61  ;;  %14139 = vmatprep.subr.bf16.mxu0 %v18267_v62  ;;  %v18272_v6 = vld [vmem:[%s22817_s14 + $0x90] ss:$12 sps:$4 sm:$0xff]   ;;  %vm13609_vm7 = vcmask 1041408  }
0x151d   : > { %v22217_v63 = vshrl.u32 %v13594_v5, 7  ;;  %v18270_v7 = vld [vmem:[%s22817_s14 + $0x94] ss:$12 sps:$4 sm:$0xff]   ;;  %14140 = vmatpush1.bf16.msra.mxu0 %v18269_v53  ;;  %v18273_v33 = vld [vmem:[%s22817_s14 + $0x7c] ss:$12 sps:$4 sm:$0xff]   ;;  %vm13613_vm8 = vcmask 254976  }
0x151e   : > { %v13593_v2 = vunpack.c.0.s8 %v13592_v56  ;;  %v13622_v39 = vcombine.high %v13620_v12, %v13620_v12  ;;  %14141 = vmatprep.subr.bf16.mxu0 %v18270_v7  ;;  %v18275_v0 = vld [vmem:[%s22817_s14 + $0x78] ss:$12 sps:$4 sm:$0xff]   ;;  %v18278_v8 = vld [vmem:[%s22817_s14 + $0x60] ss:$12 sps:$4 sm:$0xff]   ;;  %v18281_v57 = vld [vmem:[%s22817_s14 + $0x48] ss:$12 sps:$4 sm:$0xff]  }
0x151f   : > { %v18276_v25 = vld [vmem:[%s22817_s14 + $0x64] ss:$12 sps:$4 sm:$0xff]   ;;  %v18279_v35 = vld [vmem:[%s22817_s14 + $0x4c] ss:$12 sps:$4 sm:$0xff]   ;;  %v18282_v37 = vld [vmem:[%s22817_s14 + $0x34] ss:$12 sps:$4 sm:$0xff]  }
0x1520   : > { %v22227_v42 = vsub.s32 %v13593_v2, %v22217_v63  ;;  %v18284_v24 = vld [vmem:[%s22817_s14 + $0x30] ss:$12 sps:$4 sm:$0xff]   ;;  %v18287_v40 = vld [vmem:[%s22817_s14 + $0x18] ss:$12 sps:$4 sm:$0xff]   ;;  %v18290_v20 = vld [vmem:[%s22817_s14] ss:$12 sps:$4 sm:$0xff]  }
0x1521   : > { %14142 = vmatpush1.bf16.msra.mxu0 %v18272_v6  ;;  %v18285_v29 = vld [vmem:[%s22817_s14 + $0x1c] ss:$12 sps:$4 sm:$0xff]   ;;  %v18288_v36 = vld [vmem:[%s22817_s14 + $0x4] ss:$12 sps:$4 sm:$0xff]   ;;  %v18291_v3 = vld [vmem:[%s22817_s14 + $0x16c] ss:$12 sps:$4 sm:$0xff]  }
0x1522   : > { %v13597_v47 = vrot.slane %v22214_v61, %v22227_v42  ;;  %v13604_v60 = vrot.slane %v13590_v18, %v22227_v42  ;;  %v13629_v52 = vrot.slane %v13620_v12, %v22227_v42  ;;  %v13636_v45 = vrot.slane %v13622_v39, %v22227_v42  ;;  %14143 = vmatprep.subr.bf16.mxu0 %v18273_v33  ;;  %v18294_v48 = vld [vmem:[%s22817_s14 + $0x170] ss:$12 sps:$4 sm:$0xff]   ;;  %v18293_v50 = vld [vmem:[%s22817_s14 + $0x168] ss:$12 sps:$4 sm:$0xff]   ;;  %v18299_v15 = vld [vmem:[%s22817_s14 + $0x158] ss:$12 sps:$4 sm:$0xff]  }
0x1523   : > { %v18295_v26 = vld [vmem:[%s22817_s14 + $0xb0] ss:$12 sps:$4 sm:$0xff]   ;;  %16529 = vmatprep.subr.bf16.mxu1 %v18294_v48  ;;  %v18296_v13 = vld [vmem:[%s22817_s14 + $0x154] ss:$12 sps:$4 sm:$0xff]   ;;  %v18300_v28 = vld [vmem:[%s22817_s14 + $0x98] ss:$12 sps:$4 sm:$0xff]  }
0x1524   : > { %v13605_v22 = vcombine.high %v13597_v47, %v13597_v47  ;;  %v13610_v14 = vsel %vm13609_vm7, %v13597_v47, 0.0  ;;  %v13637_v27 = vcombine.high %v13629_v52, %v13629_v52  ;;  %v13614_v43 = vsel %vm13613_vm8, %v13604_v60, 0.0  ;;  %16530 = vmatpush3.bf16.msra.mxu1 %v18295_v26  ;;  %v18298_v30 = vld [vmem:[%s22817_s14 + $0x150] ss:$12 sps:$4 sm:$0xff]   ;;  %v18304_v19 = vld [vmem:[%s22817_s14 + $0x140] ss:$12 sps:$4 sm:$0xff]  }
0x1525   : > { %v13641_v23 = vsel %vm13609_vm7, %v13629_v52, 0.0  ;;  %14144 = vmatpush1.bf16.msra.mxu0 %v18275_v0  ;;  %v13644_v9 = vsel %vm13613_vm8, %v13636_v45, 0.0  ;;  %16531 = vmatprep.subr.bf16.mxu1 %v18299_v15  ;;  %v18301_v31 = vld [vmem:[%s22817_s14 + $0x13c] ss:$12 sps:$4 sm:$0xff]   ;;  %v18305_v1 = vld [vmem:[%s22817_s14 + $0x80] ss:$12 sps:$4 sm:$0xff]  }
0x1526   : > { %v13611_v21 = vsel %vm13609_vm7, %v13605_v22, 0.0  ;;  %v13642_v44 = vsel %vm13609_vm7, %v13637_v27, 0.0  ;;  %14145 = vmatprep.subr.bf16.mxu0 %v18276_v25  ;;  %v18309_v58 = vld [vmem:[%s22817_s14 + $0x128] ss:$12 sps:$4 sm:$0xff]   ;;  %v18303_v32 = vld [vmem:[%s22817_s14 + $0x138] ss:$12 sps:$4 sm:$0xff]  }
0x1527   : > { %v13612_v46 = vadd.f32 %v13611_v21, %v13610_v14  ;;  %v13643_v54 = vadd.f32 %v13642_v44, %v13641_v23  ;;  %v18306_v17 = vld [vmem:[%s22817_s14 + $0x124] ss:$12 sps:$4 sm:$0xff]   ;;  %v18310_v41 = vld [vmem:[%s22817_s14 + $0x68] ss:$12 sps:$4 sm:$0xff]   ;;  %v18308_v11 = vld [vmem:[%s22817_s14 + $0x120] ss:$12 sps:$4 sm:$0xff]  }
0x1528   : > { %16532 = vmatpush3.bf16.msra.mxu1 %v18300_v28  ;;  %v18314_v51 = vld [vmem:[%s22817_s14 + $0x110] ss:$12 sps:$4 sm:$0xff]   ;;  %v18311_v59 = vld [vmem:[%s22817_s14 + $0x10c] ss:$12 sps:$4 sm:$0xff]   ;;  %v18313_v34 = vld [vmem:[%s22817_s14 + $0x108] ss:$12 sps:$4 sm:$0xff]  }
0x1529   : > { %v13615_v38 = vadd.f32 %v13614_v43, %v13612_v46  ;;  %v13645_v16 = vadd.f32 %v13644_v9, %v13643_v54  ;;  %14146 = vmatpush1.bf16.msra.mxu0 %v18278_v8  ;;  %16533 = vmatprep.subr.bf16.mxu1 %v18304_v19  ;;  %v18315_v4 = vld [vmem:[%s22817_s14 + $0x50] ss:$12 sps:$4 sm:$0xff]   ;;  %v18319_v49 = vld [vmem:[%s22817_s14 + $0xf8] ss:$12 sps:$4 sm:$0xff]   ;;  %v18316_v55 = vld [vmem:[%s22817_s14 + $0xf4] ss:$12 sps:$4 sm:$0xff]  }
0x152a   : > { %14147 = vmatprep.subr.bf16.mxu0 %v18279_v35  ;;  %v18320_v5 = vld [vmem:[%s22817_s14 + $0x38] ss:$12 sps:$4 sm:$0xff]   ;;  %v18324_v10 = vld [vmem:[%s22817_s14 + $0xe0] ss:$12 sps:$4 sm:$0xff]   ;;  %v18318_v56 = vld [vmem:[%s22817_s14 + $0xf0] ss:$12 sps:$4 sm:$0xff]  }
0x152b   : > { %13616 = vadd.xlane.f32.xlu0 %v13615_v38  ;;  %v18321_v62 = vld [vmem:[%s22817_s14 + $0xdc] ss:$12 sps:$4 sm:$0xff]   ;;  %v18325_v53 = vld [vmem:[%s22817_s14 + $0x20] ss:$12 sps:$4 sm:$0xff]   ;;  %v18323_v2 = vld [vmem:[%s22817_s14 + $0xd8] ss:$12 sps:$4 sm:$0xff]  }
0x152c   : > { %16534 = vmatpush3.bf16.msra.mxu1 %v18305_v1  ;;  %v18329_v18 = vld [vmem:[%s22817_s14 + $0xc8] ss:$12 sps:$4 sm:$0xff]   ;;  %v18326_v12 = vld [vmem:[%s22817_s14 + $0xc4] ss:$12 sps:$4 sm:$0xff]   ;;  %v18328_v6 = vld [vmem:[%s22817_s14 + $0xc0] ss:$12 sps:$4 sm:$0xff]  }
0x152d   : > { %14148 = vmatpush1.bf16.msra.mxu0 %v18281_v57  ;;  %16535 = vmatprep.subr.bf16.mxu1 %v18309_v58  ;;  %v18330_v7 = vld [vmem:[%s22817_s14 + $0x8] ss:$12 sps:$4 sm:$0xff]   ;;  %v18741_v45 = vmov 269488144   ;;  %v22287_v43 = vsub.s32 0, %v22217_v63  ;;  %v22290_v23 = vsub.s32 1, %v22217_v63 }
0x152e   : > { %14149 = vmatprep.subr.bf16.mxu0 %v18282_v37  ;;  %v18333_v39 = vld [vmem:[%s22817_s14 + $0x19c] ss:$12 sps:$4 sm:$0xff]   ;;  %v13655_v27 = vunpack.c.l.s4 %v18741_v45  ;;  %v13587_v8 = vld [vmem:[%s22819_s3] sm:$0x7]  ;;  %v22297_v54 = vsub.s32 2, %v22217_v63  ;;  %vm14135_vm9 = vcmask 261120  }
0x152f   : > { %13646 = vadd.xlane.f32.xlu0 %v13645_v16  ;;  %v18341_v33 = vld [vmem:[%s22818_s25 + $0x74] ss:$8 sps:$4 sm:$0xff]   ;;  %v13588_v21 = vld [vmem:[%s22820_s6] sm:$0x7]  ;;  %v13677_v35 = vrot.slane %v13587_v8, %v22287_v43  ;;  %v13681_v46 = vrot.slane %v13587_v8, %v22290_v23  ;;  %vm18744_vm10 = vmmov 0   ;;  %vm14631_vm11 = vcmask 125954  }
0x1530   : > { %16536 = vmatpush3.bf16.msra.mxu1 %v18310_v41  ;;  %v13656_v44 = vunpack.c.0.s8 %v13655_v27  ;;  %v13708_v9 = vrot.slane %v13588_v21, %v22287_v43  ;;  %v13712_v38 = vrot.slane %v13588_v21, %v22290_v23  ;;  %v13685_v37 = vrot.slane %v13587_v8, %v22297_v54  ;;  %v18366_v45 = vld [vmem:[%s22818_s25 + $0xe0] ss:$8 sps:$4 sm:$0xff]   ;;  %v18371_v27 = vld [vmem:[%s22818_s25 + $0xd4] ss:$8 sps:$4 sm:$0xff]   ;;  %v18374_v8 = vld [vmem:[%s22818_s25 + $0xc4] ss:$8 sps:$4 sm:$0xff]  }
0x1531   : > { %14150 = vmatpush1.bf16.msra.mxu0 %v18284_v24  ;;  %16537 = vmatprep.subr.bf16.mxu1 %v18314_v51  ;;  %v13686_v16 = vcombine.low %v13677_v35, %v13681_v46  ;;  %v13716_v24 = vrot.slane %v13588_v21, %v22297_v54  ;;  %v18336_v51 = vld [vmem:[%s22817_s14 + $0x184] ss:$12 sps:$4 sm:$0xff]   ;;  %v18372_v21 = vld [vmem:[%s22818_s25 + $0xc0] ss:$8 sps:$4 sm:$0xff]   ;;  %vm14632_vm12 = vmor %vm14631_vm11, %vm13609_vm7 }
0x1532   : > { %14151 = vmatprep.subr.bf16.mxu0 %v18285_v29  ;;  %v13659_v57 = vsub.s32 %v13656_v44, %v22217_v63  ;;  %v13717_v29 = vcombine.low %v13708_v9, %v13712_v38  ;;  %v18377_v44 = vld [vmem:[%s22818_s25 + $0xb4] ss:$8 sps:$4 sm:$0xff]   ;;  %v18375_v35 = vld [vmem:[%s22818_s25 + $0xb0] ss:$8 sps:$4 sm:$0xff]   ;;  %v18380_v46 = vld [vmem:[%s22818_s25 + $0xa4] ss:$8 sps:$4 sm:$0xff]  }
0x1533   : > { %v13731_v48 = vrot.slane %v13716_v24, %v22227_v42  ;;  %v18378_v9 = vld [vmem:[%s22818_s25 + $0xa0] ss:$8 sps:$4 sm:$0xff]   ;;  %v18383_v38 = vld [vmem:[%s22818_s25 + $0x94] ss:$8 sps:$4 sm:$0xff]  }
0x1534   : > { %16538 = vmatpush3.bf16.msra.mxu1 %v18315_v4  ;;  %v18742_v4 = vmov 0   ;;  %v18389_v24 = vld [vmem:[%s22818_s25 + $0x114] ss:$8 sps:$4 sm:$0xff]  }
0x1535   : > { %14152 = vmatpush1.bf16.msra.mxu0 %v18287_v40  ;;  %16539 = vmatprep.subr.bf16.mxu1 %v18319_v49 }
0x1536   : > { %14153 = vmatprep.subr.bf16.mxu0 %v18288_v36  ;;  %v13693_v36 = vrot.slane %v13686_v16, %v22227_v42  ;;  %v18384_v16 = vld [vmem:[%s22818_s25 + $0x80] ss:$8 sps:$4 sm:$0xff]  }
0x1538   : > { %16540 = vmatpush3.bf16.msra.mxu1 %v18320_v5  ;;  %v18337_v5 = vld [vmem:[%s22817_s14 + $0x1a0] ss:$12 sps:$4 sm:$0xff]  }
0x1539   : > { %14154 = vmatpush1.bf16.msra.mxu0 %v18290_v20  ;;  %16541 = vmatprep.subr.bf16.mxu1 %v18324_v10  ;;  %v13700_v20 = vrot.slane %v13685_v37, %v22227_v42  ;;  %v18386_v37 = vld [vmem:[%s22818_s25 + $0x84] ss:$8 sps:$4 sm:$0xff]  }
0x153a   : > { %14155 = vmatprep.subr.bf16.mxu0 %v18291_v3  ;;  %v13724_v3 = vrot.slane %v13717_v29, %v22227_v42  ;;  %v18387_v29 = vld [vmem:[%s22818_s25 + $0x110] ss:$8 sps:$4 sm:$0xff]  }
0x153c   : > { %16542 = vmatpush3.bf16.msra.mxu1 %v18325_v53  ;;  %v18350_v53 = vld [vmem:[%s22818_s25 + $0x44] ss:$8 sps:$4 sm:$0xff]  }
0x153d   : > { %14156 = vmatpush2.bf16.msra.mxu0 %v18293_v50  ;;  %16543 = vmatprep.subr.bf16.mxu1 %v18329_v18  ;;  %v18338_v18 = vld [vmem:[%s22817_s14 + $0x188] ss:$12 sps:$4 sm:$0xff]  }
0x153e   : > { %14157 = vmatprep.subr.bf16.mxu0 %v18296_v13  ;;  %v13701_v13 = vcombine.low %v13693_v36, %v13700_v20  ;;  %v18390_v36 = vld [vmem:[%s22818_s25 + $0x100] ss:$8 sps:$4 sm:$0xff]  }
0x153f   : > { %v13807_v20 = vld [vmem:[%s22821_s20] sm:$0x7] }
0x1540   : > { %16544 = vmatpush3.bf16.msra.mxu1 %v18330_v7  ;;  %v18351_v7 = vld [vmem:[%s22818_s25 + $0x30] ss:$8 sps:$4 sm:$0xff]  }
0x1541   : > { %14158 = vmatpush2.bf16.msra.mxu0 %v18298_v30  ;;  %14538 = vmatprep.subr.bf16.mxu1 %v18341_v33  ;;  %v13732_v30 = vcombine.low %v13724_v3, %v13731_v48  ;;  %v18359_v33 = vld [vmem:[%s22818_s25 + $0x14] ss:$8 sps:$4 sm:$0xff]  }
0x1542   : > { %14159 = vmatprep.subr.bf16.mxu0 %v18301_v31 }
0x1545   : > { %14160 = vmatpush2.bf16.msra.mxu0 %v18303_v32  ;;  %v18331_v32 = vld [vmem:[%s22817_s14 + $0x198] ss:$12 sps:$4 sm:$0xff]  }
0x1546   : > { %14161 = vmatprep.subr.bf16.mxu0 %v18306_v17 }
0x1549   : > { %14162 = vmatpush2.bf16.msra.mxu0 %v18308_v11  ;;  %v18339_v11 = vld [vmem:[%s22818_s25 + $0x70] ss:$8 sps:$4 sm:$0xff]  }
0x154a   : > { %14163 = vmatprep.subr.bf16.mxu0 %v18311_v59  ;;  %v18334_v59 = vld [vmem:[%s22817_s14 + $0x180] ss:$12 sps:$4 sm:$0xff]  }
0x154d   : > { %14164 = vmatpush2.bf16.msra.mxu0 %v18313_v34  ;;  %v18342_v34 = vld [vmem:[%s22818_s25 + $0x60] ss:$8 sps:$4 sm:$0xff]  }
0x154e   : > { %14165 = vmatprep.subr.bf16.mxu0 %v18316_v55  ;;  %v18347_v55 = vld [vmem:[%s22818_s25 + $0x54] ss:$8 sps:$4 sm:$0xff]  }
0x1551   : > { %14166 = vmatpush2.bf16.msra.mxu0 %v18318_v56  ;;  %v18743_v56 = vmov 0.0  }
0x1552   : > { %14167 = vmatprep.subr.bf16.mxu0 %v18321_v62  ;;  %v18345_v62 = vld [vmem:[%s22818_s25 + $0x50] ss:$8 sps:$4 sm:$0xff]  }
0x1555   : > { %14168 = vmatpush2.bf16.msra.mxu0 %v18323_v2  ;;  %v18348_v2 = vld [vmem:[%s22818_s25 + $0x40] ss:$8 sps:$4 sm:$0xff]  }
0x1556   : > { %14169 = vmatprep.subr.bf16.mxu0 %v18326_v12  ;;  %v18353_v12 = vld [vmem:[%s22818_s25 + $0x34] ss:$8 sps:$4 sm:$0xff]  }
0x1559   : > { %14170 = vmatpush2.bf16.msra.mxu0 %v18328_v6  ;;  %v18356_v6 = vld [vmem:[%s22818_s25 + $0x24] ss:$8 sps:$4 sm:$0xff]  }
0x155a   : > { %14192 = vmatprep.subr.bf16.mxu0 %v18333_v39  ;;  %v18354_v39 = vld [vmem:[%s22818_s25 + $0x20] ss:$8 sps:$4 sm:$0xff]  }
0x15b4   : > { %v13617_v47 = vpop.xlane.xlu0 %13616 }
0x15b5   : > { %v13619_v60 = vmul.f32 0.0034722222, %v13617_v47  ;;  %v18357_v47 = vld [vmem:[%s22818_s25 + $0x10] ss:$8 sps:$4 sm:$0xff]  }
0x15b7   : > { %v13649_v0 = vmul.f32 %v13619_v60, %v13619_v60  ;;  %v13660_v40 = vrot.slane %v13619_v60, %v13659_v57  ;;  %v18362_v60 = vld [vmem:[%s22818_s25 + $0x4] ss:$8 sps:$4 sm:$0xff]  }
0x15b8   : > { %v13647_v52 = vpop.xlane.xlu0 %13646 }
0x15b9   : > { %v13648_v22 = vmul.f32 0.0034722222, %v13647_v52  ;;  %v13662_v63 = vsub.f32 %v22214_v61, %v13660_v40  ;;  %v18344_v61 = vld [vmem:[%s22818_s25 + $0x64] ss:$8 sps:$4 sm:$0xff]   ;;  %v18360_v52 = vld [vmem:[%s22818_s25] ss:$8 sps:$4 sm:$0xff]  }
0x15ba   : > { %v18392_v40 = vld [vmem:[%s22818_s25 + $0x104] ss:$8 sps:$4 sm:$0xff]  }
0x15bb   : > { %v13650_v14 = vsub.f32 %v13648_v22, %v13649_v0  ;;  %v18365_v0 = vld [vmem:[%s22818_s25 + $0xf4] ss:$8 sps:$4 sm:$0xff]   ;;  %v18363_v22 = vld [vmem:[%s22818_s25 + $0xf0] ss:$8 sps:$4 sm:$0xff]  }
0x15bd   : > { %v13651_v25 = vadd.f32 1e-05, %v13650_v14  ;;  %v18368_v14 = vld [vmem:[%s22818_s25 + $0xe4] ss:$8 sps:$4 sm:$0xff]  }
0x15bf   : > { %18393 = vrsqrt.f32 %v13651_v25  ;;  %v18369_v25 = vld [vmem:[%s22818_s25 + $0xd0] ss:$8 sps:$4 sm:$0xff]  }
0x15cc   : > { %v18394_v50 = vpop.eup %18393 }
0x15cd   : > { %v13670_v26 = vrot.slane %v18394_v50, %v13659_v57  ;;  %v18381_v57 = vld [vmem:[%s22818_s25 + $0x90] ss:$8 sps:$4 sm:$0xff]  }
0x15cf   : > { %v13672_v15 = vmul.f32 %v13670_v26, %v13662_v63  ;;  %v13835_v26 = vrot.slane %v13807_v20, %v22287_v43 }
0x15d1   : > { %v13703_v28 = vmul.f32 %v13701_v13, %v13672_v15 }
0x15d3   : > { %v13734_v31 = vadd.f32 %v13732_v30, %v13703_v28  ;;  %v13839_v30 = vrot.slane %v13807_v20, %v22290_v23 }
0x15d5   : > { %v13816_v19 = vrot.slane %v13734_v31, %v22227_v42  ;;  %v13809_v17 = vcombine.high %v13734_v31, %v13734_v31 }
0x15d7   : > { %v13824_v1 = vcombine.high %v13816_v19, %v13816_v19  ;;  %v13828_v41 = vpack.c.bf16 %v13816_v19, %v13816_v19  ;;  %v13823_v49 = vrot.slane %v13809_v17, %v22227_v42 }
0x15d9   : > { %v13829_v58 = vpack.c.bf16 %v13824_v1, %v13824_v1  ;;  %v13830_v10 = vpack.c.bf16 %v13823_v49, %v13823_v49 }
0x15db   : > { %14171 = vmatprep.mubr.bf16.mxu0 %v13829_v58  ;;  %14253 = vmatprep.mubr.bf16.mxu1 %v13829_v58 }
0x15dc   : > { %14172 = vmatmul.mubr.bf16.vlgmr.msra.gmra.mxu0 %v13828_v41  ;;  %14254 = vmatmul.mubr.bf16.vlgmr.msra.gmra.mxu1 %v13828_v41 }
0x15dd   : > { %14193 = vmatpush1.bf16.msra.mxu0 %v18331_v32  ;;  %14212 = vmatprep.mubr.bf16.mxu0 %v18742_v4 }
0x15de   : > { %14194 = vmatprep.subr.bf16.mxu0 %v18336_v51  ;;  %14539 = vmatpush1.bf16.msra.mxu1 %v18339_v11  ;;  %v13843_v11 = vrot.slane %v13807_v20, %v22297_v54  ;;  %v14340_v54 = vld [vmem:[%s22822_s9] sm:$0x3] }
0x15df   : > { %14540 = vmatprep.subr.bf16.mxu1 %v18344_v61 }
0x15e1   : > { %14195 = vmatpush1.bf16.msra.mxu0 %v18334_v59 }
0x15e2   : > { %16786 = vmatprep.subr.bf16.mxu0 %v18743_v56  ;;  %14541 = vmatpush1.bf16.msra.mxu1 %v18342_v34 }
0x15e3   : > { %14542 = vmatprep.subr.bf16.mxu1 %v18347_v55 }
0x15e4   : > { %16064 = vmatmul.mubr.msk.bf16.vlgmr.msra.gmra.mxu0 %vm14135_vm9, %v13830_v10 }
0x15e5   : > { %16787 = vmatpush3.bf16.msra.mxu0 %v18337_v5  ;;  %16790 = vmatprep.mubr.msk.bf16.mxu0 %vm18744_vm10, %v18743_v56 }
0x15e6   : > { %16788 = vmatprep.subr.bf16.mxu0 %v18743_v56  ;;  %14543 = vmatpush1.bf16.msra.mxu1 %v18345_v62 }
0x15e7   : > { %14544 = vmatprep.subr.bf16.mxu1 %v18350_v53 }
0x15e9   : > { %16789 = vmatpush3.bf16.msra.mxu0 %v18338_v18 }
0x15ea   : > { %14545 = vmatpush1.bf16.msra.mxu1 %v18348_v2  ;;  %14591 = vmatprep.subr.bf16.mxu0 %v18389_v24 }
0x15eb   : > { %14546 = vmatprep.subr.bf16.mxu1 %v18353_v12 }
0x15ec   : > { %16791 = vmatmul.mubr.msk.bf16.vlgmr.msra.gmra.mxu0 %vm14135_vm9, %v13830_v10 }
0x15ed   : > { %14611 = vmatprep.mubr.bf16.mxu0 %v18742_v4  ;;  %14592 = vmatpush1.bf16.msra.mxu0 %v18387_v29 }
0x15ee   : > { %14547 = vmatpush1.bf16.msra.mxu1 %v18351_v7  ;;  %14593 = vmatprep.subr.bf16.mxu0 %v18392_v40 }
0x15ef   : > { %14548 = vmatprep.subr.bf16.mxu1 %v18356_v6  ;;  %v14348_v6 = vrot.slane %v14340_v54, %v22287_v43 }
0x15f1   : > { %14594 = vmatpush1.bf16.msra.mxu0 %v18390_v36 }
0x15f2   : > { %14549 = vmatpush1.bf16.msra.mxu1 %v18354_v39  ;;  %v14352_v39 = vrot.slane %v14340_v54, %v22290_v23 }
0x15f3   : > { %14550 = vmatprep.subr.bf16.mxu1 %v18359_v33 }
0x15f6   : > { %14551 = vmatpush1.bf16.msra.mxu1 %v18357_v47 }
0x15f7   : > { %14552 = vmatprep.subr.bf16.mxu1 %v18362_v60 }
0x15fa   : > { %14553 = vmatpush1.bf16.msra.mxu1 %v18360_v52 }
0x15fb   : > { %14554 = vmatprep.subr.bf16.mxu1 %v18365_v0 }
0x15fe   : > { %14555 = vmatpush2.bf16.msra.mxu1 %v18363_v22 }
0x15ff   : > { %14556 = vmatprep.subr.bf16.mxu1 %v18368_v14 }
0x1602   : > { %14557 = vmatpush2.bf16.msra.mxu1 %v18366_v45 }
0x1603   : > { %14558 = vmatprep.subr.bf16.mxu1 %v18371_v27 }
0x1606   : > { %14559 = vmatpush2.bf16.msra.mxu1 %v18369_v25 }
0x1607   : > { %14560 = vmatprep.subr.bf16.mxu1 %v18374_v8 }
0x160a   : > { %14561 = vmatpush2.bf16.msra.mxu1 %v18372_v21 }
0x160b   : > { %14562 = vmatprep.subr.bf16.mxu1 %v18377_v44 }
0x160e   : > { %14563 = vmatpush2.bf16.msra.mxu1 %v18375_v35 }
0x160f   : > { %14564 = vmatprep.subr.bf16.mxu1 %v18380_v46 }
0x1612   : > { %14565 = vmatpush2.bf16.msra.mxu1 %v18378_v9 }
0x1613   : > { %14566 = vmatprep.subr.bf16.mxu1 %v18383_v38 }
0x1616   : > { %14567 = vmatpush2.bf16.msra.mxu1 %v18381_v57 }
0x1617   : > { %14568 = vmatprep.subr.bf16.mxu1 %v18386_v37 }
0x161a   : > { %14569 = vmatpush2.bf16.msra.mxu1 %v18384_v16 }
0x169c   : > { %v14173_v3 = vpop.f32.mrf.mxu0  ;;  %v16545_v48 = vpop.f32.mrf.mxu1 }
0x169d   : > { %v14174_v19 = vadd.f32 %v14173_v3, %v13835_v26 }
0x169e   : > { %v14175_v50 = vpop.f32.mrf.mxu0  ;;  %v16546_v63 = vpop.f32.mrf.mxu1 }
0x169f   : > { %v14176_v58 = vadd.f32 %v14175_v50, %v13839_v30  ;;  %v16547_v41 = vadd.f32 %v16546_v63, %v16545_v48 }
0x16a0   : > { %v14177_v13 = vpop.f32.mrf.mxu0  ;;  %v16548_v15 = vpop.f32.mrf.mxu1 }
0x16a1   : > { %v14256_v55 = vadd.f32 %v16547_v41, %v13843_v11 }
0x16a2   : > { %v14178_v28 = vpop.f32.mrf.mxu0  ;;  %v16549_v31 = vpop.f32.mrf.mxu1 }
0x16a4   : > { %v14214_v1 = vpop.f32.mrf.mxu0 }
0x16a5   : > { %v14215_v32 = vadd.f32 %v14214_v1, %v14174_v19 }
0x16a6   : > { %v14216_v17 = vpop.f32.mrf.mxu0 }
0x16a7   : > { %v14217_v51 = vadd.f32 %v14216_v17, %v14176_v58  ;;  %v14301_v61 = vmax.f32 %v14215_v32, 0.0 }
0x16a8   : > { %v14218_v59 = vpop.f32.mrf.mxu0 }
0x16a9   : > { %v14302_v4 = vmax.f32 %v14217_v51, 0.0  ;;  %v14341_v5 = vpack.c.bf16 %v14301_v61, %v14301_v61 }
0x16aa   : > { %v14219_v49 = vpop.f32.mrf.mxu0 }
0x16ab   : > { %v14342_v34 = vpack.c.bf16 %v14302_v4, %v14302_v4 }
0x16ac   : > { %v14295_v10 = vpop.f32.mrf.mxu0 }
0x16ad   : > { %v14296_v56 = vadd.f32 %v14295_v10, %v14256_v55  ;;  %14570 = vmatprep.mubr.bf16.mxu1 %v14342_v34 }
0x16ae   : > { %v16792_v62 = vpop.f32.mrf.mxu0  ;;  %14571 = vmatmul.mubr.bf16.vlgmr.msra.gmra.mxu1 %v14341_v5 }
0x16af   : > { %v14303_v53 = vmax.f32 %v14296_v56, 0.0 }
0x16b0   : > { %v14298_v18 = vpop.f32.mrf.mxu0 }
0x16b1   : > { %v14343_v2 = vpack.c.bf16 %v14303_v53, %v14303_v53 }
0x16b2   : > { %v16793_v12 = vpop.f32.mrf.mxu0 }
0x16b3   : > { %16102 = vmatmul.mubr.msk.bf16.vlgmr.msra.gmra.mxu0 %vm14135_vm9, %v14343_v2 }
0x176e   : > { %v14572_v7 = vpop.f32.mrf.mxu1 }
0x176f   : > { %v14573_v52 = vadd.f32 %v14572_v7, %v14348_v6 }
0x1770   : > { %v14574_v33 = vpop.f32.mrf.mxu1 }
0x1771   : > { %v14575_v0 = vadd.f32 %v14574_v33, %v14352_v39 }
0x1772   : > { %v14576_v47 = vpop.f32.mrf.mxu1 }
0x1773   : > { %v14613_v60 = vpop.f32.mrf.mxu0 }
0x1774   : > { %v14577_v22 = vpop.f32.mrf.mxu1  ;;  %v14614_v45 = vadd.f32 %v14613_v60, %v14573_v52 }
0x1775   : > { %v14615_v14 = vpop.f32.mrf.mxu0 }
0x1776   : > { %v14616_v27 = vadd.f32 %v14615_v14, %v14575_v0 }
0x1777   : > { %v14617_v25 = vpop.f32.mrf.mxu0 }
0x1778   : > { %v14622_v8 = vcombine.low %v14614_v45, %v14616_v27 }
0x1779   : > { %v14618_v21 = vpop.f32.mrf.mxu0 }
0x177a   : > { %v14629_v44 = vrot.slane %v14622_v8, %v22227_v42 }
0x177c   : > { %14633 = vst.msk [vmem:[#allocation16] sm:$0xf] %vm14632_vm12, %v14629_v44 }
0x177d PF: > { %p16861_p8 = scmp.eq.s32.totalorder %s19066_s24, 11  ;;  %s18745_s17 = smov [#allocation16]  }
0x177e   : > { %s14641_s0 = sshll.u32 %s18745_s17, 4  ;;  %s14642_s0 = int_to_ptr.vmem [resolvable:$true] %s14641_s0 }
0x177f   : > { %s18591_s18 = scalar_lea.vmem %s14642_s0, 64  ;;  %p18598_p3 = scmp.lt.s32.totalorder %s14642_s0, %s14642_s0 }
0x1780   : > { %p18592_p0 = scmp.ne.s32.totalorder %s14642_s0, %s18591_s18  ;;  %p18599_p7 = scmp.lt.s32.totalorder %s18591_s18, %s18591_s18 }
0x1782   : > { %p18593_p2 = pnand %p18592_p0, %p16861_p8  ;;  %p18600_p11 = por %p18599_p7, %p18598_p3 }
0x1784   : > { %p18594_p9 = pneg %p18593_p2 }
0x1786   : > { %p18601_p6 = pnand %p18600_p11, %p18594_p9 }
0x1788   : > { %18604 = shalt.err (!%p18601_p6)
}
0x1789   : > { %s22823_s15 = sld [smem:[#allocation51_spill]] }
0x178f   : > { %16835 = dma.vmem_to_hbm [thread:$0]  (%p16861_p8), %s14642_s0, 64, %s22823_s15, [#allocation6]  }
0x1790   : > { %18660 = dma.done.wait (%p16861_p8), [#allocation6], 64  }
0x1791   : > { %18662 = vsyncadd (%p16861_p8), [#allocation6], 4294967232 }
0x1792 PF: > { %s22824_s18 = sld [smem:[#allocation56_spill]] }
0x1793   : > { %s22825_s7 = sld [smem:[#allocation52_spill]] }
0x1794   : > { %s22826_s10 = sld [smem:[#allocation53_spill]] }
0x1795   : > { %s22827_s11 = sld [smem:[#allocation58_spill]] }
0x1796   : > { %s22828_s15 = sld [smem:[#allocation54_spill]] }
0x1797   : > { %s22829_s16 = sld [smem:[#allocation55_spill]] }
0x1798   : > { %s22830_s0 = sld [smem:[#allocation57_spill]]  ;;  %p79_p13 = scmp.ge.s32.totalorder %s22824_s18, 14  }
0x179a   :  { %81 = sbr.rel (!%p79_p13) target bundleno = 79 (0x4f), region = 324 }
0x179f   :  { %14654 = vsyncpa [#allocation5], 1 }
0x17a0   :  { %14656 = vsyncpa [#allocation5 + $0x1], 1 }
0x17a1   :  { %14657 = vsyncpa [#allocation8], 1 }
0x17a2   :  { %14659 = vsyncpa [#allocation8 + $0x1], 1 }
0x17a3   :  { %14660 = vsyncpa [#allocation11], 1 }
0x17a4   :  { %14662 = vsyncpa [#allocation11 + $0x1], 1 }
0x17a5   :  { %14663 = vsyncpa [#allocation14], 1 }
0x17a6   :  { %14665 = vsyncpa [#allocation14 + $0x1], 1 }
0x17a7   :  { %14666 = vsyncpa [#allocation6], 1 }
0x17a8   :  { %14668 = vsyncpa [#allocation6 + $0x1], 1 }

</bundles_post_ra>
